<compile_context>
chip_gen: v6e
topology: v6e:2x2x1
jax: 0.10.0
libtpu: 0.0.40
codegen_flags: <defaults>
</compile_context>

<pallas_src>
import numpy as np
import jax
import jax.numpy as jnp
from jax import lax
from jax.experimental import pallas as pl
from jax.experimental.pallas import tpu as pltpu


# ----------------------------------------------------------------------------
# Init-time (host) weight preparation
# ----------------------------------------------------------------------------
def _banded_conv_mats(w, scale, W):
    """w: (Cout, Cin, 3, 3); returns (3, W*Cin, W*Cout) f32 banded matrices.

    M[kh][(w+kw-1)*Cin + ci, w*Cout + co] = w[co, ci, kh, kw] * scale[co]
    (taps with w+kw-1 outside [0, W) are omitted -> 'same' zero padding in W).
    """
    Cout, Cin = w.shape[0], w.shape[1]
    M = np.zeros((3, W * Cin, W * Cout), np.float32)
    ci = np.arange(Cin)
    co = np.arange(Cout)
    for kh in range(3):
        for kw in range(3):
            blk = (w[:, :, kh, kw] * scale[:, None]).T          # (Cin, Cout)
            wout = np.arange(W)
            win = wout + kw - 1
            ok = (win >= 0) & (win < W)
            wo, wi = wout[ok], win[ok]
            rows = wi[:, None, None] * Cin + ci[None, :, None]   # (V, Cin, 1)
            cols = wo[:, None, None] * Cout + co[None, None, :]  # (V, 1, Cout)
            M[kh, rows, cols] = blk[None, :, :]
    return M


def _fused_pool_mats(H, W, C, G):
    """Fused 2x2 max-pool selection matrices for G row-stacked images.

    R: (G*H, G*(H+2)-2)  row selectors; image g's conv output starts at row
                         g*(H+2).  Top G*H/2 output rows pick even conv rows,
                         bottom half pick odd conv rows (junk seam rows of the
                         stacked conv output are never selected).
    S: (W*C, W*C)        column selectors; left (W/2)*C columns pick even-w
                         input columns, right half pick odd-w columns.
    """
    Mout = G * (H + 2) - 2
    Hh = H // 2
    R = np.zeros((G * H, Mout), np.float32)
    j = np.arange(Hh)
    for g in range(G):
        R[g * Hh + j, g * (H + 2) + 2 * j] = 1.0
        R[G * Hh + g * Hh + j, g * (H + 2) + 2 * j + 1] = 1.0
    half = (W // 2) * C
    S = np.zeros((W * C, W * C), np.float32)
    jj = np.repeat(np.arange(W // 2), C)
    cc = np.tile(np.arange(C), W // 2)
    S[2 * jj * C + cc, jj * C + cc] = 1.0
    S[(2 * jj + 1) * C + cc, half + jj * C + cc] = 1.0
    return R, S


def init_raw_params(key, in_chans, num_filters, dense_size, num_classes):
    """Deterministic synthetic parameters in PyTorch-like form."""
    c1, c2 = num_filters, num_filters * 2
    ks = jax.random.split(key, 20)

    def conv_p(i, cin, cout):
        return dict(
            w=0.05 * jax.random.normal(ks[i], (cout, cin, 3, 3), jnp.float32),
            b=0.01 * jax.random.normal(ks[i + 1], (cout,), jnp.float32),
            g=1.0 + 0.1 * jax.random.normal(ks[i + 2], (cout,), jnp.float32),
            beta=0.05 * jax.random.normal(ks[i + 3], (cout,), jnp.float32),
            mu=0.02 * jax.random.normal(ks[i + 4], (cout,), jnp.float32),
            var=1.0 + 0.1 * jax.random.uniform(ks[i + 5], (cout,), jnp.float32))

    raw = {'conv1': conv_p(0, in_chans, c1), 'conv2': conv_p(6, c1, c2)}
    conv_out = c2 * (64 // 4) ** 2   # module hard-codes 64 in conv_out_size
    raw['wf1'] = (1.0 / np.sqrt(conv_out)) * jax.random.normal(
        ks[12], (conv_out, dense_size), jnp.float32)
    raw['bf1'] = 0.01 * jax.random.normal(ks[13], (dense_size,), jnp.float32)
    raw['wf2'] = (1.0 / np.sqrt(dense_size)) * jax.random.normal(
        ks[14], (dense_size, dense_size), jnp.float32)
    raw['bf2'] = 0.01 * jax.random.normal(ks[15], (dense_size,), jnp.float32)
    raw['wf3'] = (1.0 / np.sqrt(dense_size)) * jax.random.normal(
        ks[16], (dense_size, num_classes), jnp.float32)
    raw['bf3'] = 0.01 * jax.random.normal(ks[17], (num_classes,), jnp.float32)
    return raw


def prepare_params(raw, num_filters, dense_size, num_classes, H, W,
                   images_per_step=2):
    """Fold BN, build banded conv mats / fused pool mats, permute & pad FC."""
    eps = 1e-5
    assert H == 64 and W == 64, \
        "SkippdModel hard-codes 64x64 spatial in conv_out_size"
    c1, c2 = num_filters, num_filters * 2
    H2, W2, H3, W3 = H // 2, W // 2, H // 4, W // 4
    G = images_per_step
    P = {}

    def fold(cp):
        w = np.asarray(cp['w']); b = np.asarray(cp['b'])
        g = np.asarray(cp['g']); be = np.asarray(cp['beta'])
        mu = np.asarray(cp['mu']); var = np.asarray(cp['var'])
        scale = g / np.sqrt(var + eps)
        shift = scale * (b - mu) + be
        return w, scale, shift

    w1, s1, sh1 = fold(raw['conv1'])
    w2, s2, sh2 = fold(raw['conv2'])

    P['M1'] = jnp.asarray(_banded_conv_mats(w1, s1, W), jnp.bfloat16)
    P['sh1'] = jnp.asarray(np.tile(sh1, W)[None, :], jnp.float32)
    R1, S1 = _fused_pool_mats(H, W, c1, G)
    P['R1'] = jnp.asarray(R1, jnp.bfloat16)   # exact 0/1 values
    P['S1'] = jnp.asarray(S1, jnp.bfloat16)

    P['M2'] = jnp.asarray(_banded_conv_mats(w2, s2, W2), jnp.bfloat16)
    P['sh2'] = jnp.asarray(np.tile(sh2, W2)[None, :], jnp.float32)
    R2, S2 = _fused_pool_mats(H2, W2, c2, G)
    P['R2'] = jnp.asarray(R2, jnp.bfloat16)
    P['S2'] = jnp.asarray(S2, jnp.bfloat16)

    # Fold the NCHW flatten permutation into wf1 so the kernel can accumulate
    # FC1 directly from its (h, w*C + c) pooled rows (no flatten/transpose).
    conv_out = c2 * H3 * W3
    idx_pt = np.arange(conv_out).reshape(c2, H3, W3)
    perm = np.transpose(idx_pt, (1, 2, 0)).reshape(-1)        # mine -> pytorch
    P['wf1'] = jnp.asarray(np.asarray(raw['wf1'])[perm, :], jnp.bfloat16)
    P['b1'] = jnp.asarray(np.asarray(raw['bf1'])[None, :], jnp.float32)
    P['wf2'] = jnp.asarray(np.asarray(raw['wf2']), jnp.bfloat16)
    P['b2'] = jnp.asarray(np.asarray(raw['bf2'])[None, :], jnp.float32)

    ncp = ((num_classes + 127) // 128) * 128                  # lane-pad output
    wf3 = np.zeros((dense_size, ncp), np.float32)
    wf3[:, :num_classes] = np.asarray(raw['wf3'])
    b3 = np.zeros((1, ncp), np.float32)
    b3[0, :num_classes] = np.asarray(raw['bf3'])
    P['wf3'] = jnp.asarray(wf3, jnp.bfloat16)
    P['b3'] = jnp.asarray(b3, jnp.float32)
    return P


# ----------------------------------------------------------------------------
# Fused kernel
# ----------------------------------------------------------------------------
def _conv_stage(xp_ref, m_ref, sh_ref, r_ref, s_ref, G, Himg):
    """xp_ref: (G*(Himg+2), W*Cin) bf16 padded rows (per-image zero halos).
    Returns stacked pooled activations (G*Himg/2, (W/2)*Cout) f32."""
    f32, bf16 = jnp.float32, jnp.bfloat16
    Mout = G * (Himg + 2) - 2

    # 3x3 'same' conv (+ folded BN scale) = 3 row-shifted MXU matmuls against
    # banded (W*Cin, W*Cout) matrices, f32 accumulation.
    acc = jnp.dot(xp_ref[0:Mout, :], m_ref[0], preferred_element_type=f32)
    for kh in (1, 2):
        acc = acc + jnp.dot(xp_ref[kh:kh + Mout, :], m_ref[kh],
                            preferred_element_type=f32)

    # Folded BN shift + ReLU (f32 VPU), single cast to bf16 for the pool.
    y = jnp.maximum(acc + sh_ref[...], 0.0).astype(bf16)

    # 2x2 max-pool: one fused row-selection matmul (even rows -> top half,
    # odd rows -> bottom half), max the halves; then one fused column-selection
    # matmul (even-w -> left lane half, odd-w -> right), max the halves.
    yr = jnp.dot(r_ref[...], y, preferred_element_type=f32)
    gh = r_ref.shape[0] // 2
    mr = jnp.maximum(yr[:gh, :], yr[gh:, :]).astype(bf16)   # exact bf16 values
    ys = jnp.dot(mr, s_ref[...], preferred_element_type=f32)
    half = s_ref.shape[1] // 2
    return jnp.maximum(ys[:, :half], ys[:, half:])


def _skippd_kernel(x_ref, m1_ref, sh1_ref, r1_ref, s1_ref,
                   m2_ref, sh2_ref, r2_ref, s2_ref,
                   wf1_ref, b1_ref, wf2_ref, b2_ref, wf3_ref, b3_ref,
                   o_ref, xp1_ref, xp2_ref):
    f32, bf16 = jnp.float32, jnp.bfloat16
    G, H, WC1 = x_ref.shape
    H2 = H // 2
    WC2in = xp2_ref.shape[1]

    # ---- stage 1: conv1 + BN + ReLU + maxpool on G row-stacked images -------
    # Per-image zero halo rows are rewritten every grid step (each core has its
    # own scratch, so do NOT gate this on program_id == 0).
    z1 = jnp.zeros((1, WC1), bf16)
    for g in range(G):
        base = g * (H + 2)
        xp1_ref[base:base + 1, :] = z1
        xp1_ref[base + H + 1:base + H + 2, :] = z1
        xp1_ref[base + 1:base + H + 1, :] = x_ref[g]
    p1 = _conv_stage(xp1_ref, m1_ref, sh1_ref, r1_ref, s1_ref, G, H)

    # ---- stage 2: conv2 + BN + ReLU + maxpool --------------------------------
    z2 = jnp.zeros((1, WC2in), bf16)
    p1b = p1.astype(bf16)              # exact: pooled entries are bf16 values
    for g in range(G):
        base = g * (H2 + 2)
        xp2_ref[base:base + 1, :] = z2
        xp2_ref[base + H2 + 1:base + H2 + 2, :] = z2
        xp2_ref[base + 1:base + H2 + 1, :] = p1b[g * H2:(g + 1) * H2, :]
    p2 = _conv_stage(xp2_ref, m2_ref, sh2_ref, r2_ref, s2_ref, G, H2)

    # ---- FC head: flatten folded into an unrolled K-accumulation over the ----
    # pooled rows (wf1 is already permuted to NCHW flatten order at init).
    GH3, WCf = p2.shape
    H3 = GH3 // G
    dense = wf1_ref.shape[1]
    acc1 = jnp.zeros((G, dense), f32)
    for h in range(H3):
        rows = jnp.concatenate(
            [p2[g * H3 + h:g * H3 + h + 1, :] for g in range(G)], axis=0)
        acc1 = acc1 + jnp.dot(rows.astype(bf16),
                              wf1_ref[h * WCf:(h + 1) * WCf, :],
                              preferred_element_type=f32)
    h1 = jnp.maximum(acc1 + b1_ref[...], 0.0)
    h2 = jnp.maximum(jnp.dot(h1.astype(bf16), wf2_ref[...],
                             preferred_element_type=f32) + b2_ref[...], 0.0)
    out = jnp.dot(h2.astype(bf16), wf3_ref[...],
                  preferred_element_type=f32) + b3_ref[...]
    o_ref[0] = out.astype(o_ref.dtype)     # Dropout = identity at inference


def skippd_forward(x_nchw, P, num_classes):
    B, Cin, H, W = x_nchw.shape
    G = P['R1'].shape[0] // H            # images per grid step (baked into R)
    assert B % G == 0, "batch must be divisible by images_per_step"
    H2 = H // 2
    ncp = P['b3'].shape[-1]
    wc2_in = P['M2'].shape[1]            # (W/2) * num_filters

    # NCHW -> (B, H, W*Cin) lane-dense bf16 rows (single XLA copy, half DMA).
    xr = jnp.transpose(x_nchw, (0, 2, 3, 1)).reshape(B, H, W * Cin)
    xr = xr.astype(jnp.bfloat16)

    weights = [P['M1'], P['sh1'], P['R1'], P['S1'],
               P['M2'], P['sh2'], P['R2'], P['S2'],
               P['wf1'], P['b1'], P['wf2'], P['b2'], P['wf3'], P['b3']]
    # Grid-invariant weights: whole-array VMEM operands -> single-buffered,
    # fetched once (no per-step double-buffer VMEM).
    vmem_spec = pl.BlockSpec(memory_space=pltpu.MemorySpace.VMEM)
    in_specs = [pl.BlockSpec((G, H, W * Cin), lambda b: (b, 0, 0))]
    in_specs += [vmem_spec] * len(weights)

    out = pl.pallas_call(
        _skippd_kernel,
        out_shape=jax.ShapeDtypeStruct((B // G, G, ncp), jnp.float32),
        grid=(B // G,),
        in_specs=in_specs,
        out_specs=pl.BlockSpec((1, G, ncp), lambda b: (b, 0, 0)),
        scratch_shapes=[
            pltpu.VMEM((G * (H + 2), W * Cin), jnp.bfloat16),   # conv1 halo rows
            pltpu.VMEM((G * (H2 + 2), wc2_in), jnp.bfloat16),   # conv2 halo rows
        ],
        compiler_params=pltpu.CompilerParams(
            dimension_semantics=("parallel",),
            vmem_limit_bytes=32 * 1024 * 1024),
    )(xr, *weights)
    return out.reshape(B, ncp)[:, :num_classes]
    # TODO(synk): for the full-size config (in_chans=48, dense=1024) the banded
    # conv matrices + wf1 (~70 MiB) still need K/N tiling to fit v7x's 64 MiB
    # VMEM even single-buffered; also pick images_per_step so B/G >= 2 per
    # TensorCore on v7x to keep both cores busy.


# ----------------------------------------------------------------------------
# Pure-JAX reference (PyTorch semantics, eval mode) for a correctness check
# ----------------------------------------------------------------------------
def ref_forward(x_nchw, raw):
    eps = 1e-5
    x = x_nchw.astype(jnp.float32)

    def block(x, cp):
        y = lax.conv_general_dilated(
            x, cp['w'], (1, 1), 'SAME',
            dimension_numbers=('NCHW', 'OIHW', 'NCHW'),
            precision=lax.Precision.HIGHEST)
        y = y + cp['b'][None, :, None, None]
        scale = cp['g'] / jnp.sqrt(cp['var'] + eps)
        y = (scale[None, :, None, None] * (y - cp['mu'][None, :, None, None])
             + cp['beta'][None, :, None, None])
        y = jnp.maximum(y, 0.0)
        return lax.reduce_window(y, -jnp.inf, lax.max,
                                 (1, 1, 2, 2), (1, 1, 2, 2), 'VALID')

    x = block(x, raw['conv1'])
    x = block(x, raw['conv2'])
    x = x.reshape(x.shape[0], -1)                    # NCHW flatten
    hp = lax.Precision.HIGHEST
    h = jnp.maximum(jnp.dot(x, raw['wf1'], precision=hp) + raw['bf1'], 0.0)
    h = jnp.maximum(jnp.dot(h, raw['wf2'], precision=hp) + raw['bf2'], 0.0)
    return jnp.dot(h, raw['wf3'], precision=hp) + raw['bf3']


if __name__ == "__main__":
    # Spatial must be 64x64 (the module hard-codes 64 in conv_out_size);
    # channels / dense size shrunk for a small test.
    B, in_chans, num_filters, dense_size, num_classes = 2, 8, 8, 128, 1
    H = W = 64
    images_per_step = 2 if B % 2 == 0 else 1

    key = jax.random.PRNGKey(0)
    kx, kp = jax.random.split(key)
    x = jax.random.normal(kx, (B, in_chans, H, W), jnp.float32)  # NCHW input
    raw = init_raw_params(kp, in_chans, num_filters, dense_size, num_classes)
    P = prepare_params(raw, num_filters, dense_size, num_classes, H, W,
                       images_per_step=images_per_step)

    fwd = jax.jit(lambda xx, pp: skippd_forward(xx, pp, num_classes))
    out = jax.block_until_ready(fwd(x, P))
    assert out.shape == (B, num_classes), out.shape

    # bf16 matmul operands vs. f32 HIGHEST reference -> loose tolerance (intended).
    ref = jax.block_until_ready(ref_forward(x, raw))
    np.testing.assert_allclose(np.asarray(out), np.asarray(ref),
                               rtol=5e-2, atol=5e-2)
    print("KERNEL_OK")
</pallas_src>

<mosaic_0001>
module attributes {stable_mosaic.version = 11 : i64} {
  func.func @_skippd_kernel(%arg0: i32, %arg1: memref<2x64x512xbf16, #tpu.memory_space<vmem>>, %arg2: memref<3x512x512xbf16, #tpu.memory_space<vmem>>, %arg3: memref<1x512xf32, #tpu.memory_space<vmem>>, %arg4: memref<128x130xbf16, #tpu.memory_space<vmem>>, %arg5: memref<512x512xbf16, #tpu.memory_space<vmem>>, %arg6: memref<3x256x512xbf16, #tpu.memory_space<vmem>>, %arg7: memref<1x512xf32, #tpu.memory_space<vmem>>, %arg8: memref<64x66xbf16, #tpu.memory_space<vmem>>, %arg9: memref<512x512xbf16, #tpu.memory_space<vmem>>, %arg10: memref<4096x128xbf16, #tpu.memory_space<vmem>>, %arg11: memref<1x128xf32, #tpu.memory_space<vmem>>, %arg12: memref<128x128xbf16, #tpu.memory_space<vmem>>, %arg13: memref<1x128xf32, #tpu.memory_space<vmem>>, %arg14: memref<128x128xbf16, #tpu.memory_space<vmem>>, %arg15: memref<1x128xf32, #tpu.memory_space<vmem>>, %arg16: memref<1x2x128xf32, #tpu.memory_space<vmem>>, %arg17: memref<132x512xbf16, #tpu.memory_space<vmem>>, %arg18: memref<68x256xbf16, #tpu.memory_space<vmem>>) attributes {dimension_semantics = [#tpu.dimension_semantics<parallel>], iteration_bounds = array<i64: 1>, scalar_prefetch = 0 : i64, scratch_operands = 2 : i64, tpu.core_type = #tpu.core_type<tc>, window_params = [{transform_indices = @transform_0, window_bounds = array<i64: 2, 64, 512>}, {pipeline_mode = #tpu.pipeline_mode<synchronous>, transform_indices = @transform_1, window_bounds = array<i64: 3, 512, 512>}, {pipeline_mode = #tpu.pipeline_mode<synchronous>, transform_indices = @transform_2, window_bounds = array<i64: 1, 512>}, {pipeline_mode = #tpu.pipeline_mode<synchronous>, transform_indices = @transform_3, window_bounds = array<i64: 128, 130>}, {pipeline_mode = #tpu.pipeline_mode<synchronous>, transform_indices = @transform_4, window_bounds = array<i64: 512, 512>}, {pipeline_mode = #tpu.pipeline_mode<synchronous>, transform_indices = @transform_5, window_bounds = array<i64: 3, 256, 512>}, {pipeline_mode = #tpu.pipeline_mode<synchronous>, transform_indices = @transform_6, window_bounds = array<i64: 1, 512>}, {pipeline_mode = #tpu.pipeline_mode<synchronous>, transform_indices = @transform_7, window_bounds = array<i64: 64, 66>}, {pipeline_mode = #tpu.pipeline_mode<synchronous>, transform_indices = @transform_8, window_bounds = array<i64: 512, 512>}, {pipeline_mode = #tpu.pipeline_mode<synchronous>, transform_indices = @transform_9, window_bounds = array<i64: 4096, 128>}, {pipeline_mode = #tpu.pipeline_mode<synchronous>, transform_indices = @transform_10, window_bounds = array<i64: 1, 128>}, {pipeline_mode = #tpu.pipeline_mode<synchronous>, transform_indices = @transform_11, window_bounds = array<i64: 128, 128>}, {pipeline_mode = #tpu.pipeline_mode<synchronous>, transform_indices = @transform_12, window_bounds = array<i64: 1, 128>}, {pipeline_mode = #tpu.pipeline_mode<synchronous>, transform_indices = @transform_13, window_bounds = array<i64: 128, 128>}, {pipeline_mode = #tpu.pipeline_mode<synchronous>, transform_indices = @transform_14, window_bounds = array<i64: 1, 128>}, {transform_indices = @transform_15, window_bounds = array<i64: 1, 2, 128>}]} {
    %cst = arith.constant 0.000000e+00 : bf16
    %0 = vector.broadcast %cst : bf16 to vector<1x512xbf16>
    %c0 = arith.constant 0 : index
    %c0_0 = arith.constant 0 : index
    %1 = vector.load %arg17[%c0, %c0_0] : memref<132x512xbf16, #tpu.memory_space<vmem>>, vector<1x512xbf16>
    tpu.vector_store %arg17[%c0, %c0_0], %0 {strides = array<i32>} : memref<132x512xbf16, #tpu.memory_space<vmem>>, vector<1x512xbf16>,
    %c65 = arith.constant 65 : index
    %c0_1 = arith.constant 0 : index
    %2 = vector.load %arg17[%c65, %c0_1] : memref<132x512xbf16, #tpu.memory_space<vmem>>, vector<1x512xbf16>
    tpu.vector_store %arg17[%c65, %c0_1], %0 {strides = array<i32>} : memref<132x512xbf16, #tpu.memory_space<vmem>>, vector<1x512xbf16>,
    %c0_2 = arith.constant 0 : index
    %c0_3 = arith.constant 0 : index
    %c0_4 = arith.constant 0 : index
    %3 = vector.load %arg1[%c0_2, %c0_3, %c0_4] : memref<2x64x512xbf16, #tpu.memory_space<vmem>>, vector<1x64x512xbf16>
    %4 = vector.shape_cast %3 : vector<1x64x512xbf16> to vector<64x512xbf16>
    %c1 = arith.constant 1 : index
    %c0_5 = arith.constant 0 : index
    %5 = vector.load %arg17[%c1, %c0_5] : memref<132x512xbf16, #tpu.memory_space<vmem>>, vector<64x512xbf16>
    tpu.vector_store %arg17[%c1, %c0_5], %4 {strides = array<i32>} : memref<132x512xbf16, #tpu.memory_space<vmem>>, vector<64x512xbf16>,
    %c66 = arith.constant 66 : index
    %c0_6 = arith.constant 0 : index
    %6 = vector.load %arg17[%c66, %c0_6] : memref<132x512xbf16, #tpu.memory_space<vmem>>, vector<1x512xbf16>
    tpu.vector_store %arg17[%c66, %c0_6], %0 {strides = array<i32>} : memref<132x512xbf16, #tpu.memory_space<vmem>>, vector<1x512xbf16>,
    %c131 = arith.constant 131 : index
    %c0_7 = arith.constant 0 : index
    %7 = vector.load %arg17[%c131, %c0_7] : memref<132x512xbf16, #tpu.memory_space<vmem>>, vector<1x512xbf16>
    tpu.vector_store %arg17[%c131, %c0_7], %0 {strides = array<i32>} : memref<132x512xbf16, #tpu.memory_space<vmem>>, vector<1x512xbf16>,
    %c1_8 = arith.constant 1 : index
    %c0_9 = arith.constant 0 : index
    %c0_10 = arith.constant 0 : index
    %8 = vector.load %arg1[%c1_8, %c0_9, %c0_10] : memref<2x64x512xbf16, #tpu.memory_space<vmem>>, vector<1x64x512xbf16>
    %9 = vector.shape_cast %8 : vector<1x64x512xbf16> to vector<64x512xbf16>
    %c67 = arith.constant 67 : index
    %c0_11 = arith.constant 0 : index
    %10 = vector.load %arg17[%c67, %c0_11] : memref<132x512xbf16, #tpu.memory_space<vmem>>, vector<64x512xbf16>
    tpu.vector_store %arg17[%c67, %c0_11], %9 {strides = array<i32>} : memref<132x512xbf16, #tpu.memory_space<vmem>>, vector<64x512xbf16>,
    %c0_12 = arith.constant 0 : index
    %c0_13 = arith.constant 0 : index
    %11 = vector.load %arg17[%c0_12, %c0_13] : memref<132x512xbf16, #tpu.memory_space<vmem>>, vector<130x512xbf16>
    %c0_14 = arith.constant 0 : index
    %c0_15 = arith.constant 0 : index
    %c0_16 = arith.constant 0 : index
    %12 = vector.load %arg2[%c0_14, %c0_15, %c0_16] : memref<3x512x512xbf16, #tpu.memory_space<vmem>>, vector<1x512x512xbf16>
    %13 = vector.shape_cast %12 : vector<1x512x512xbf16> to vector<512x512xbf16>
    %cst_17 = arith.constant dense<0.000000e+00> : vector<130x512xf32>
    %14 = tpu.matmul %11, %13, %cst_17 {dimension_numbers = #tpu.dot_dimension_numbers<[1], [0], [0], [1], [0, 0, 1, 1], [], []>} : vector<130x512xbf16>, vector<512x512xbf16>, vector<130x512xf32> -> vector<130x512xf32>
    %c1_18 = arith.constant 1 : index
    %c0_19 = arith.constant 0 : index
    %15 = vector.load %arg17[%c1_18, %c0_19] : memref<132x512xbf16, #tpu.memory_space<vmem>>, vector<130x512xbf16>
    %c1_20 = arith.constant 1 : index
    %c0_21 = arith.constant 0 : index
    %c0_22 = arith.constant 0 : index
    %16 = vector.load %arg2[%c1_20, %c0_21, %c0_22] : memref<3x512x512xbf16, #tpu.memory_space<vmem>>, vector<1x512x512xbf16>
    %17 = vector.shape_cast %16 : vector<1x512x512xbf16> to vector<512x512xbf16>
    %cst_23 = arith.constant dense<0.000000e+00> : vector<130x512xf32>
    %18 = tpu.matmul %15, %17, %cst_23 {dimension_numbers = #tpu.dot_dimension_numbers<[1], [0], [0], [1], [0, 0, 1, 1], [], []>} : vector<130x512xbf16>, vector<512x512xbf16>, vector<130x512xf32> -> vector<130x512xf32>
    %19 = arith.addf %14, %18 : vector<130x512xf32>
    %c2 = arith.constant 2 : index
    %c0_24 = arith.constant 0 : index
    %20 = vector.load %arg17[%c2, %c0_24] : memref<132x512xbf16, #tpu.memory_space<vmem>>, vector<130x512xbf16>
    %c2_25 = arith.constant 2 : index
    %c0_26 = arith.constant 0 : index
    %c0_27 = arith.constant 0 : index
    %21 = vector.load %arg2[%c2_25, %c0_26, %c0_27] : memref<3x512x512xbf16, #tpu.memory_space<vmem>>, vector<1x512x512xbf16>
    %22 = vector.shape_cast %21 : vector<1x512x512xbf16> to vector<512x512xbf16>
    %cst_28 = arith.constant dense<0.000000e+00> : vector<130x512xf32>
    %23 = tpu.matmul %20, %22, %cst_28 {dimension_numbers = #tpu.dot_dimension_numbers<[1], [0], [0], [1], [0, 0, 1, 1], [], []>} : vector<130x512xbf16>, vector<512x512xbf16>, vector<130x512xf32> -> vector<130x512xf32>
    %24 = arith.addf %19, %23 : vector<130x512xf32>
    %c0_29 = arith.constant 0 : index
    %c0_30 = arith.constant 0 : index
    %25 = vector.load %arg3[%c0_29, %c0_30] : memref<1x512xf32, #tpu.memory_space<vmem>>, vector<1x512xf32>
    %26 = vector.broadcast %25 : vector<1x512xf32> to vector<130x512xf32>
    %27 = arith.addf %24, %26 : vector<130x512xf32>
    %cst_31 = arith.constant 0.000000e+00 : f32
    %28 = vector.broadcast %cst_31 : f32 to vector<130x512xf32>
    %29 = arith.maximumf %27, %28 : vector<130x512xf32>
    %30 = arith.truncf %29 : vector<130x512xf32> to vector<130x512xbf16>
    %c0_32 = arith.constant 0 : index
    %c0_33 = arith.constant 0 : index
    %31 = vector.load %arg4[%c0_32, %c0_33] : memref<128x130xbf16, #tpu.memory_space<vmem>>, vector<128x130xbf16>
    %cst_34 = arith.constant dense<0.000000e+00> : vector<128x512xf32>
    %32 = tpu.matmul %31, %30, %cst_34 {dimension_numbers = #tpu.dot_dimension_numbers<[1], [0], [0], [1], [0, 0, 1, 1], [], []>} : vector<128x130xbf16>, vector<130x512xbf16>, vector<128x512xf32> -> vector<128x512xf32>
    %33 = vector.extract_strided_slice %32 {offsets = [0, 0], sizes = [64, 512], strides = [1, 1]} : vector<128x512xf32> to vector<64x512xf32>
    %34 = vector.extract_strided_slice %32 {offsets = [64, 0], sizes = [64, 512], strides = [1, 1]} : vector<128x512xf32> to vector<64x512xf32>
    %35 = arith.maximumf %33, %34 : vector<64x512xf32>
    %36 = arith.truncf %35 : vector<64x512xf32> to vector<64x512xbf16>
    %c0_35 = arith.constant 0 : index
    %c0_36 = arith.constant 0 : index
    %37 = vector.load %arg5[%c0_35, %c0_36] : memref<512x512xbf16, #tpu.memory_space<vmem>>, vector<512x512xbf16>
    %cst_37 = arith.constant dense<0.000000e+00> : vector<64x512xf32>
    %38 = tpu.matmul %36, %37, %cst_37 {dimension_numbers = #tpu.dot_dimension_numbers<[1], [0], [0], [1], [0, 0, 1, 1], [], []>} : vector<64x512xbf16>, vector<512x512xbf16>, vector<64x512xf32> -> vector<64x512xf32>
    %39 = vector.extract_strided_slice %38 {offsets = [0, 0], sizes = [64, 256], strides = [1, 1]} : vector<64x512xf32> to vector<64x256xf32>
    %40 = vector.extract_strided_slice %38 {offsets = [0, 256], sizes = [64, 256], strides = [1, 1]} : vector<64x512xf32> to vector<64x256xf32>
    %41 = arith.maximumf %39, %40 : vector<64x256xf32>
    %cst_38 = arith.constant 0.000000e+00 : bf16
    %42 = vector.broadcast %cst_38 : bf16 to vector<1x256xbf16>
    %43 = arith.truncf %41 : vector<64x256xf32> to vector<64x256xbf16>
    %c0_39 = arith.constant 0 : index
    %c0_40 = arith.constant 0 : index
    %44 = vector.load %arg18[%c0_39, %c0_40] : memref<68x256xbf16, #tpu.memory_space<vmem>>, vector<1x256xbf16>
    tpu.vector_store %arg18[%c0_39, %c0_40], %42 {strides = array<i32>} : memref<68x256xbf16, #tpu.memory_space<vmem>>, vector<1x256xbf16>,
    %c33 = arith.constant 33 : index
    %c0_41 = arith.constant 0 : index
    %45 = vector.load %arg18[%c33, %c0_41] : memref<68x256xbf16, #tpu.memory_space<vmem>>, vector<1x256xbf16>
    tpu.vector_store %arg18[%c33, %c0_41], %42 {strides = array<i32>} : memref<68x256xbf16, #tpu.memory_space<vmem>>, vector<1x256xbf16>,
    %46 = vector.extract_strided_slice %43 {offsets = [0, 0], sizes = [32, 256], strides = [1, 1]} : vector<64x256xbf16> to vector<32x256xbf16>
    %c1_42 = arith.constant 1 : index
    %c0_43 = arith.constant 0 : index
    %47 = vector.load %arg18[%c1_42, %c0_43] : memref<68x256xbf16, #tpu.memory_space<vmem>>, vector<32x256xbf16>
    tpu.vector_store %arg18[%c1_42, %c0_43], %46 {strides = array<i32>} : memref<68x256xbf16, #tpu.memory_space<vmem>>, vector<32x256xbf16>,
    %c34 = arith.constant 34 : index
    %c0_44 = arith.constant 0 : index
    %48 = vector.load %arg18[%c34, %c0_44] : memref<68x256xbf16, #tpu.memory_space<vmem>>, vector<1x256xbf16>
    tpu.vector_store %arg18[%c34, %c0_44], %42 {strides = array<i32>} : memref<68x256xbf16, #tpu.memory_space<vmem>>, vector<1x256xbf16>,
    %c67_45 = arith.constant 67 : index
    %c0_46 = arith.constant 0 : index
    %49 = vector.load %arg18[%c67_45, %c0_46] : memref<68x256xbf16, #tpu.memory_space<vmem>>, vector<1x256xbf16>
    tpu.vector_store %arg18[%c67_45, %c0_46], %42 {strides = array<i32>} : memref<68x256xbf16, #tpu.memory_space<vmem>>, vector<1x256xbf16>,
    %50 = vector.extract_strided_slice %43 {offsets = [32, 0], sizes = [32, 256], strides = [1, 1]} : vector<64x256xbf16> to vector<32x256xbf16>
    %c35 = arith.constant 35 : index
    %c0_47 = arith.constant 0 : index
    %51 = vector.load %arg18[%c35, %c0_47] : memref<68x256xbf16, #tpu.memory_space<vmem>>, vector<32x256xbf16>
    tpu.vector_store %arg18[%c35, %c0_47], %50 {strides = array<i32>} : memref<68x256xbf16, #tpu.memory_space<vmem>>, vector<32x256xbf16>,
    %c0_48 = arith.constant 0 : index
    %c0_49 = arith.constant 0 : index
    %52 = vector.load %arg18[%c0_48, %c0_49] : memref<68x256xbf16, #tpu.memory_space<vmem>>, vector<66x256xbf16>
    %c0_50 = arith.constant 0 : index
    %c0_51 = arith.constant 0 : index
    %c0_52 = arith.constant 0 : index
    %53 = vector.load %arg6[%c0_50, %c0_51, %c0_52] : memref<3x256x512xbf16, #tpu.memory_space<vmem>>, vector<1x256x512xbf16>
    %54 = vector.shape_cast %53 : vector<1x256x512xbf16> to vector<256x512xbf16>
    %cst_53 = arith.constant dense<0.000000e+00> : vector<66x512xf32>
    %55 = tpu.matmul %52, %54, %cst_53 {dimension_numbers = #tpu.dot_dimension_numbers<[1], [0], [0], [1], [0, 0, 1, 1], [], []>} : vector<66x256xbf16>, vector<256x512xbf16>, vector<66x512xf32> -> vector<66x512xf32>
    %c1_54 = arith.constant 1 : index
    %c0_55 = arith.constant 0 : index
    %56 = vector.load %arg18[%c1_54, %c0_55] : memref<68x256xbf16, #tpu.memory_space<vmem>>, vector<66x256xbf16>
    %c1_56 = arith.constant 1 : index
    %c0_57 = arith.constant 0 : index
    %c0_58 = arith.constant 0 : index
    %57 = vector.load %arg6[%c1_56, %c0_57, %c0_58] : memref<3x256x512xbf16, #tpu.memory_space<vmem>>, vector<1x256x512xbf16>
    %58 = vector.shape_cast %57 : vector<1x256x512xbf16> to vector<256x512xbf16>
    %cst_59 = arith.constant dense<0.000000e+00> : vector<66x512xf32>
    %59 = tpu.matmul %56, %58, %cst_59 {dimension_numbers = #tpu.dot_dimension_numbers<[1], [0], [0], [1], [0, 0, 1, 1], [], []>} : vector<66x256xbf16>, vector<256x512xbf16>, vector<66x512xf32> -> vector<66x512xf32>
    %60 = arith.addf %55, %59 : vector<66x512xf32>
    %c2_60 = arith.constant 2 : index
    %c0_61 = arith.constant 0 : index
    %61 = vector.load %arg18[%c2_60, %c0_61] : memref<68x256xbf16, #tpu.memory_space<vmem>>, vector<66x256xbf16>
    %c2_62 = arith.constant 2 : index
    %c0_63 = arith.constant 0 : index
    %c0_64 = arith.constant 0 : index
    %62 = vector.load %arg6[%c2_62, %c0_63, %c0_64] : memref<3x256x512xbf16, #tpu.memory_space<vmem>>, vector<1x256x512xbf16>
    %63 = vector.shape_cast %62 : vector<1x256x512xbf16> to vector<256x512xbf16>
    %cst_65 = arith.constant dense<0.000000e+00> : vector<66x512xf32>
    %64 = tpu.matmul %61, %63, %cst_65 {dimension_numbers = #tpu.dot_dimension_numbers<[1], [0], [0], [1], [0, 0, 1, 1], [], []>} : vector<66x256xbf16>, vector<256x512xbf16>, vector<66x512xf32> -> vector<66x512xf32>
    %65 = arith.addf %60, %64 : vector<66x512xf32>
    %c0_66 = arith.constant 0 : index
    %c0_67 = arith.constant 0 : index
    %66 = vector.load %arg7[%c0_66, %c0_67] : memref<1x512xf32, #tpu.memory_space<vmem>>, vector<1x512xf32>
    %67 = vector.broadcast %66 : vector<1x512xf32> to vector<66x512xf32>
    %68 = arith.addf %65, %67 : vector<66x512xf32>
    %cst_68 = arith.constant 0.000000e+00 : f32
    %69 = vector.broadcast %cst_68 : f32 to vector<66x512xf32>
    %70 = arith.maximumf %68, %69 : vector<66x512xf32>
    %71 = arith.truncf %70 : vector<66x512xf32> to vector<66x512xbf16>
    %c0_69 = arith.constant 0 : index
    %c0_70 = arith.constant 0 : index
    %72 = vector.load %arg8[%c0_69, %c0_70] : memref<64x66xbf16, #tpu.memory_space<vmem>>, vector<64x66xbf16>
    %cst_71 = arith.constant dense<0.000000e+00> : vector<64x512xf32>
    %73 = tpu.matmul %72, %71, %cst_71 {dimension_numbers = #tpu.dot_dimension_numbers<[1], [0], [0], [1], [0, 0, 1, 1], [], []>} : vector<64x66xbf16>, vector<66x512xbf16>, vector<64x512xf32> -> vector<64x512xf32>
    %74 = vector.extract_strided_slice %73 {offsets = [0, 0], sizes = [32, 512], strides = [1, 1]} : vector<64x512xf32> to vector<32x512xf32>
    %75 = vector.extract_strided_slice %73 {offsets = [32, 0], sizes = [32, 512], strides = [1, 1]} : vector<64x512xf32> to vector<32x512xf32>
    %76 = arith.maximumf %74, %75 : vector<32x512xf32>
    %77 = arith.truncf %76 : vector<32x512xf32> to vector<32x512xbf16>
    %c0_72 = arith.constant 0 : index
    %c0_73 = arith.constant 0 : index
    %78 = vector.load %arg9[%c0_72, %c0_73] : memref<512x512xbf16, #tpu.memory_space<vmem>>, vector<512x512xbf16>
    %cst_74 = arith.constant dense<0.000000e+00> : vector<32x512xf32>
    %79 = tpu.matmul %77, %78, %cst_74 {dimension_numbers = #tpu.dot_dimension_numbers<[1], [0], [0], [1], [0, 0, 1, 1], [], []>} : vector<32x512xbf16>, vector<512x512xbf16>, vector<32x512xf32> -> vector<32x512xf32>
    %80 = vector.extract_strided_slice %79 {offsets = [0, 0], sizes = [32, 256], strides = [1, 1]} : vector<32x512xf32> to vector<32x256xf32>
    %81 = vector.extract_strided_slice %79 {offsets = [0, 256], sizes = [32, 256], strides = [1, 1]} : vector<32x512xf32> to vector<32x256xf32>
    %82 = arith.maximumf %80, %81 : vector<32x256xf32>
    %cst_75 = arith.constant 0.000000e+00 : f32
    %83 = vector.broadcast %cst_75 : f32 to vector<2x128xf32>
    %84 = vector.extract_strided_slice %82 {offsets = [0, 0], sizes = [1, 256], strides = [1, 1]} : vector<32x256xf32> to vector<1x256xf32>
    %85 = vector.extract_strided_slice %82 {offsets = [16, 0], sizes = [1, 256], strides = [1, 1]} : vector<32x256xf32> to vector<1x256xf32>
    %86 = tpu.concatenate %84, %85 in 0 : vector<1x256xf32>, vector<1x256xf32> -> vector<2x256xf32>
    %87 = arith.truncf %86 : vector<2x256xf32> to vector<2x256xbf16>
    %c0_76 = arith.constant 0 : index
    %c0_77 = arith.constant 0 : index
    %88 = vector.load %arg10[%c0_76, %c0_77] : memref<4096x128xbf16, #tpu.memory_space<vmem>>, vector<256x128xbf16>
    %cst_78 = arith.constant dense<0.000000e+00> : vector<2x128xf32>
    %89 = tpu.matmul %87, %88, %cst_78 {dimension_numbers = #tpu.dot_dimension_numbers<[1], [0], [0], [1], [0, 0, 1, 1], [], []>} : vector<2x256xbf16>, vector<256x128xbf16>, vector<2x128xf32> -> vector<2x128xf32>
    %90 = arith.addf %83, %89 : vector<2x128xf32>
    %91 = vector.extract_strided_slice %82 {offsets = [1, 0], sizes = [1, 256], strides = [1, 1]} : vector<32x256xf32> to vector<1x256xf32>
    %92 = vector.extract_strided_slice %82 {offsets = [17, 0], sizes = [1, 256], strides = [1, 1]} : vector<32x256xf32> to vector<1x256xf32>
    %93 = tpu.concatenate %91, %92 in 0 : vector<1x256xf32>, vector<1x256xf32> -> vector<2x256xf32>
    %94 = arith.truncf %93 : vector<2x256xf32> to vector<2x256xbf16>
    %c256 = arith.constant 256 : index
    %c0_79 = arith.constant 0 : index
    %95 = vector.load %arg10[%c256, %c0_79] : memref<4096x128xbf16, #tpu.memory_space<vmem>>, vector<256x128xbf16>
    %cst_80 = arith.constant dense<0.000000e+00> : vector<2x128xf32>
    %96 = tpu.matmul %94, %95, %cst_80 {dimension_numbers = #tpu.dot_dimension_numbers<[1], [0], [0], [1], [0, 0, 1, 1], [], []>} : vector<2x256xbf16>, vector<256x128xbf16>, vector<2x128xf32> -> vector<2x128xf32>
    %97 = arith.addf %90, %96 : vector<2x128xf32>
    %98 = vector.extract_strided_slice %82 {offsets = [2, 0], sizes = [1, 256], strides = [1, 1]} : vector<32x256xf32> to vector<1x256xf32>
    %99 = vector.extract_strided_slice %82 {offsets = [18, 0], sizes = [1, 256], strides = [1, 1]} : vector<32x256xf32> to vector<1x256xf32>
    %100 = tpu.concatenate %98, %99 in 0 : vector<1x256xf32>, vector<1x256xf32> -> vector<2x256xf32>
    %101 = arith.truncf %100 : vector<2x256xf32> to vector<2x256xbf16>
    %c512 = arith.constant 512 : index
    %c0_81 = arith.constant 0 : index
    %102 = vector.load %arg10[%c512, %c0_81] : memref<4096x128xbf16, #tpu.memory_space<vmem>>, vector<256x128xbf16>
    %cst_82 = arith.constant dense<0.000000e+00> : vector<2x128xf32>
    %103 = tpu.matmul %101, %102, %cst_82 {dimension_numbers = #tpu.dot_dimension_numbers<[1], [0], [0], [1], [0, 0, 1, 1], [], []>} : vector<2x256xbf16>, vector<256x128xbf16>, vector<2x128xf32> -> vector<2x128xf32>
    %104 = arith.addf %97, %103 : vector<2x128xf32>
    %105 = vector.extract_strided_slice %82 {offsets = [3, 0], sizes = [1, 256], strides = [1, 1]} : vector<32x256xf32> to vector<1x256xf32>
    %106 = vector.extract_strided_slice %82 {offsets = [19, 0], sizes = [1, 256], strides = [1, 1]} : vector<32x256xf32> to vector<1x256xf32>
    %107 = tpu.concatenate %105, %106 in 0 : vector<1x256xf32>, vector<1x256xf32> -> vector<2x256xf32>
    %108 = arith.truncf %107 : vector<2x256xf32> to vector<2x256xbf16>
    %c768 = arith.constant 768 : index
    %c0_83 = arith.constant 0 : index
    %109 = vector.load %arg10[%c768, %c0_83] : memref<4096x128xbf16, #tpu.memory_space<vmem>>, vector<256x128xbf16>
    %cst_84 = arith.constant dense<0.000000e+00> : vector<2x128xf32>
    %110 = tpu.matmul %108, %109, %cst_84 {dimension_numbers = #tpu.dot_dimension_numbers<[1], [0], [0], [1], [0, 0, 1, 1], [], []>} : vector<2x256xbf16>, vector<256x128xbf16>, vector<2x128xf32> -> vector<2x128xf32>
    %111 = arith.addf %104, %110 : vector<2x128xf32>
    %112 = vector.extract_strided_slice %82 {offsets = [4, 0], sizes = [1, 256], strides = [1, 1]} : vector<32x256xf32> to vector<1x256xf32>
    %113 = vector.extract_strided_slice %82 {offsets = [20, 0], sizes = [1, 256], strides = [1, 1]} : vector<32x256xf32> to vector<1x256xf32>
    %114 = tpu.concatenate %112, %113 in 0 : vector<1x256xf32>, vector<1x256xf32> -> vector<2x256xf32>
    %115 = arith.truncf %114 : vector<2x256xf32> to vector<2x256xbf16>
    %c1024 = arith.constant 1024 : index
    %c0_85 = arith.constant 0 : index
    %116 = vector.load %arg10[%c1024, %c0_85] : memref<4096x128xbf16, #tpu.memory_space<vmem>>, vector<256x128xbf16>
    %cst_86 = arith.constant dense<0.000000e+00> : vector<2x128xf32>
    %117 = tpu.matmul %115, %116, %cst_86 {dimension_numbers = #tpu.dot_dimension_numbers<[1], [0], [0], [1], [0, 0, 1, 1], [], []>} : vector<2x256xbf16>, vector<256x128xbf16>, vector<2x128xf32> -> vector<2x128xf32>
    %118 = arith.addf %111, %117 : vector<2x128xf32>
    %119 = vector.extract_strided_slice %82 {offsets = [5, 0], sizes = [1, 256], strides = [1, 1]} : vector<32x256xf32> to vector<1x256xf32>
    %120 = vector.extract_strided_slice %82 {offsets = [21, 0], sizes = [1, 256], strides = [1, 1]} : vector<32x256xf32> to vector<1x256xf32>
    %121 = tpu.concatenate %119, %120 in 0 : vector<1x256xf32>, vector<1x256xf32> -> vector<2x256xf32>
    %122 = arith.truncf %121 : vector<2x256xf32> to vector<2x256xbf16>
    %c1280 = arith.constant 1280 : index
    %c0_87 = arith.constant 0 : index
    %123 = vector.load %arg10[%c1280, %c0_87] : memref<4096x128xbf16, #tpu.memory_space<vmem>>, vector<256x128xbf16>
    %cst_88 = arith.constant dense<0.000000e+00> : vector<2x128xf32>
    %124 = tpu.matmul %122, %123, %cst_88 {dimension_numbers = #tpu.dot_dimension_numbers<[1], [0], [0], [1], [0, 0, 1, 1], [], []>} : vector<2x256xbf16>, vector<256x128xbf16>, vector<2x128xf32> -> vector<2x128xf32>
    %125 = arith.addf %118, %124 : vector<2x128xf32>
    %126 = vector.extract_strided_slice %82 {offsets = [6, 0], sizes = [1, 256], strides = [1, 1]} : vector<32x256xf32> to vector<1x256xf32>
    %127 = vector.extract_strided_slice %82 {offsets = [22, 0], sizes = [1, 256], strides = [1, 1]} : vector<32x256xf32> to vector<1x256xf32>
    %128 = tpu.concatenate %126, %127 in 0 : vector<1x256xf32>, vector<1x256xf32> -> vector<2x256xf32>
    %129 = arith.truncf %128 : vector<2x256xf32> to vector<2x256xbf16>
    %c1536 = arith.constant 1536 : index
    %c0_89 = arith.constant 0 : index
    %130 = vector.load %arg10[%c1536, %c0_89] : memref<4096x128xbf16, #tpu.memory_space<vmem>>, vector<256x128xbf16>
    %cst_90 = arith.constant dense<0.000000e+00> : vector<2x128xf32>
    %131 = tpu.matmul %129, %130, %cst_90 {dimension_numbers = #tpu.dot_dimension_numbers<[1], [0], [0], [1], [0, 0, 1, 1], [], []>} : vector<2x256xbf16>, vector<256x128xbf16>, vector<2x128xf32> -> vector<2x128xf32>
    %132 = arith.addf %125, %131 : vector<2x128xf32>
    %133 = vector.extract_strided_slice %82 {offsets = [7, 0], sizes = [1, 256], strides = [1, 1]} : vector<32x256xf32> to vector<1x256xf32>
    %134 = vector.extract_strided_slice %82 {offsets = [23, 0], sizes = [1, 256], strides = [1, 1]} : vector<32x256xf32> to vector<1x256xf32>
    %135 = tpu.concatenate %133, %134 in 0 : vector<1x256xf32>, vector<1x256xf32> -> vector<2x256xf32>
    %136 = arith.truncf %135 : vector<2x256xf32> to vector<2x256xbf16>
    %c1792 = arith.constant 1792 : index
    %c0_91 = arith.constant 0 : index
    %137 = vector.load %arg10[%c1792, %c0_91] : memref<4096x128xbf16, #tpu.memory_space<vmem>>, vector<256x128xbf16>
    %cst_92 = arith.constant dense<0.000000e+00> : vector<2x128xf32>
    %138 = tpu.matmul %136, %137, %cst_92 {dimension_numbers = #tpu.dot_dimension_numbers<[1], [0], [0], [1], [0, 0, 1, 1], [], []>} : vector<2x256xbf16>, vector<256x128xbf16>, vector<2x128xf32> -> vector<2x128xf32>
    %139 = arith.addf %132, %138 : vector<2x128xf32>
    %140 = vector.extract_strided_slice %82 {offsets = [8, 0], sizes = [1, 256], strides = [1, 1]} : vector<32x256xf32> to vector<1x256xf32>
    %141 = vector.extract_strided_slice %82 {offsets = [24, 0], sizes = [1, 256], strides = [1, 1]} : vector<32x256xf32> to vector<1x256xf32>
    %142 = tpu.concatenate %140, %141 in 0 : vector<1x256xf32>, vector<1x256xf32> -> vector<2x256xf32>
    %143 = arith.truncf %142 : vector<2x256xf32> to vector<2x256xbf16>
    %c2048 = arith.constant 2048 : index
    %c0_93 = arith.constant 0 : index
    %144 = vector.load %arg10[%c2048, %c0_93] : memref<4096x128xbf16, #tpu.memory_space<vmem>>, vector<256x128xbf16>
    %cst_94 = arith.constant dense<0.000000e+00> : vector<2x128xf32>
    %145 = tpu.matmul %143, %144, %cst_94 {dimension_numbers = #tpu.dot_dimension_numbers<[1], [0], [0], [1], [0, 0, 1, 1], [], []>} : vector<2x256xbf16>, vector<256x128xbf16>, vector<2x128xf32> -> vector<2x128xf32>
    %146 = arith.addf %139, %145 : vector<2x128xf32>
    %147 = vector.extract_strided_slice %82 {offsets = [9, 0], sizes = [1, 256], strides = [1, 1]} : vector<32x256xf32> to vector<1x256xf32>
    %148 = vector.extract_strided_slice %82 {offsets = [25, 0], sizes = [1, 256], strides = [1, 1]} : vector<32x256xf32> to vector<1x256xf32>
    %149 = tpu.concatenate %147, %148 in 0 : vector<1x256xf32>, vector<1x256xf32> -> vector<2x256xf32>
    %150 = arith.truncf %149 : vector<2x256xf32> to vector<2x256xbf16>
    %c2304 = arith.constant 2304 : index
    %c0_95 = arith.constant 0 : index
    %151 = vector.load %arg10[%c2304, %c0_95] : memref<4096x128xbf16, #tpu.memory_space<vmem>>, vector<256x128xbf16>
    %cst_96 = arith.constant dense<0.000000e+00> : vector<2x128xf32>
    %152 = tpu.matmul %150, %151, %cst_96 {dimension_numbers = #tpu.dot_dimension_numbers<[1], [0], [0], [1], [0, 0, 1, 1], [], []>} : vector<2x256xbf16>, vector<256x128xbf16>, vector<2x128xf32> -> vector<2x128xf32>
    %153 = arith.addf %146, %152 : vector<2x128xf32>
    %154 = vector.extract_strided_slice %82 {offsets = [10, 0], sizes = [1, 256], strides = [1, 1]} : vector<32x256xf32> to vector<1x256xf32>
    %155 = vector.extract_strided_slice %82 {offsets = [26, 0], sizes = [1, 256], strides = [1, 1]} : vector<32x256xf32> to vector<1x256xf32>
    %156 = tpu.concatenate %154, %155 in 0 : vector<1x256xf32>, vector<1x256xf32> -> vector<2x256xf32>
    %157 = arith.truncf %156 : vector<2x256xf32> to vector<2x256xbf16>
    %c2560 = arith.constant 2560 : index
    %c0_97 = arith.constant 0 : index
    %158 = vector.load %arg10[%c2560, %c0_97] : memref<4096x128xbf16, #tpu.memory_space<vmem>>, vector<256x128xbf16>
    %cst_98 = arith.constant dense<0.000000e+00> : vector<2x128xf32>
    %159 = tpu.matmul %157, %158, %cst_98 {dimension_numbers = #tpu.dot_dimension_numbers<[1], [0], [0], [1], [0, 0, 1, 1], [], []>} : vector<2x256xbf16>, vector<256x128xbf16>, vector<2x128xf32> -> vector<2x128xf32>
    %160 = arith.addf %153, %159 : vector<2x128xf32>
    %161 = vector.extract_strided_slice %82 {offsets = [11, 0], sizes = [1, 256], strides = [1, 1]} : vector<32x256xf32> to vector<1x256xf32>
    %162 = vector.extract_strided_slice %82 {offsets = [27, 0], sizes = [1, 256], strides = [1, 1]} : vector<32x256xf32> to vector<1x256xf32>
    %163 = tpu.concatenate %161, %162 in 0 : vector<1x256xf32>, vector<1x256xf32> -> vector<2x256xf32>
    %164 = arith.truncf %163 : vector<2x256xf32> to vector<2x256xbf16>
    %c2816 = arith.constant 2816 : index
    %c0_99 = arith.constant 0 : index
    %165 = vector.load %arg10[%c2816, %c0_99] : memref<4096x128xbf16, #tpu.memory_space<vmem>>, vector<256x128xbf16>
    %cst_100 = arith.constant dense<0.000000e+00> : vector<2x128xf32>
    %166 = tpu.matmul %164, %165, %cst_100 {dimension_numbers = #tpu.dot_dimension_numbers<[1], [0], [0], [1], [0, 0, 1, 1], [], []>} : vector<2x256xbf16>, vector<256x128xbf16>, vector<2x128xf32> -> vector<2x128xf32>
    %167 = arith.addf %160, %166 : vector<2x128xf32>
    %168 = vector.extract_strided_slice %82 {offsets = [12, 0], sizes = [1, 256], strides = [1, 1]} : vector<32x256xf32> to vector<1x256xf32>
    %169 = vector.extract_strided_slice %82 {offsets = [28, 0], sizes = [1, 256], strides = [1, 1]} : vector<32x256xf32> to vector<1x256xf32>
    %170 = tpu.concatenate %168, %169 in 0 : vector<1x256xf32>, vector<1x256xf32> -> vector<2x256xf32>
    %171 = arith.truncf %170 : vector<2x256xf32> to vector<2x256xbf16>
    %c3072 = arith.constant 3072 : index
    %c0_101 = arith.constant 0 : index
    %172 = vector.load %arg10[%c3072, %c0_101] : memref<4096x128xbf16, #tpu.memory_space<vmem>>, vector<256x128xbf16>
    %cst_102 = arith.constant dense<0.000000e+00> : vector<2x128xf32>
    %173 = tpu.matmul %171, %172, %cst_102 {dimension_numbers = #tpu.dot_dimension_numbers<[1], [0], [0], [1], [0, 0, 1, 1], [], []>} : vector<2x256xbf16>, vector<256x128xbf16>, vector<2x128xf32> -> vector<2x128xf32>
    %174 = arith.addf %167, %173 : vector<2x128xf32>
    %175 = vector.extract_strided_slice %82 {offsets = [13, 0], sizes = [1, 256], strides = [1, 1]} : vector<32x256xf32> to vector<1x256xf32>
    %176 = vector.extract_strided_slice %82 {offsets = [29, 0], sizes = [1, 256], strides = [1, 1]} : vector<32x256xf32> to vector<1x256xf32>
    %177 = tpu.concatenate %175, %176 in 0 : vector<1x256xf32>, vector<1x256xf32> -> vector<2x256xf32>
    %178 = arith.truncf %177 : vector<2x256xf32> to vector<2x256xbf16>
    %c3328 = arith.constant 3328 : index
    %c0_103 = arith.constant 0 : index
    %179 = vector.load %arg10[%c3328, %c0_103] : memref<4096x128xbf16, #tpu.memory_space<vmem>>, vector<256x128xbf16>
    %cst_104 = arith.constant dense<0.000000e+00> : vector<2x128xf32>
    %180 = tpu.matmul %178, %179, %cst_104 {dimension_numbers = #tpu.dot_dimension_numbers<[1], [0], [0], [1], [0, 0, 1, 1], [], []>} : vector<2x256xbf16>, vector<256x128xbf16>, vector<2x128xf32> -> vector<2x128xf32>
    %181 = arith.addf %174, %180 : vector<2x128xf32>
    %182 = vector.extract_strided_slice %82 {offsets = [14, 0], sizes = [1, 256], strides = [1, 1]} : vector<32x256xf32> to vector<1x256xf32>
    %183 = vector.extract_strided_slice %82 {offsets = [30, 0], sizes = [1, 256], strides = [1, 1]} : vector<32x256xf32> to vector<1x256xf32>
    %184 = tpu.concatenate %182, %183 in 0 : vector<1x256xf32>, vector<1x256xf32> -> vector<2x256xf32>
    %185 = arith.truncf %184 : vector<2x256xf32> to vector<2x256xbf16>
    %c3584 = arith.constant 3584 : index
    %c0_105 = arith.constant 0 : index
    %186 = vector.load %arg10[%c3584, %c0_105] : memref<4096x128xbf16, #tpu.memory_space<vmem>>, vector<256x128xbf16>
    %cst_106 = arith.constant dense<0.000000e+00> : vector<2x128xf32>
    %187 = tpu.matmul %185, %186, %cst_106 {dimension_numbers = #tpu.dot_dimension_numbers<[1], [0], [0], [1], [0, 0, 1, 1], [], []>} : vector<2x256xbf16>, vector<256x128xbf16>, vector<2x128xf32> -> vector<2x128xf32>
    %188 = arith.addf %181, %187 : vector<2x128xf32>
    %189 = vector.extract_strided_slice %82 {offsets = [15, 0], sizes = [1, 256], strides = [1, 1]} : vector<32x256xf32> to vector<1x256xf32>
    %190 = vector.extract_strided_slice %82 {offsets = [31, 0], sizes = [1, 256], strides = [1, 1]} : vector<32x256xf32> to vector<1x256xf32>
    %191 = tpu.concatenate %189, %190 in 0 : vector<1x256xf32>, vector<1x256xf32> -> vector<2x256xf32>
    %192 = arith.truncf %191 : vector<2x256xf32> to vector<2x256xbf16>
    %c3840 = arith.constant 3840 : index
    %c0_107 = arith.constant 0 : index
    %193 = vector.load %arg10[%c3840, %c0_107] : memref<4096x128xbf16, #tpu.memory_space<vmem>>, vector<256x128xbf16>
    %cst_108 = arith.constant dense<0.000000e+00> : vector<2x128xf32>
    %194 = tpu.matmul %192, %193, %cst_108 {dimension_numbers = #tpu.dot_dimension_numbers<[1], [0], [0], [1], [0, 0, 1, 1], [], []>} : vector<2x256xbf16>, vector<256x128xbf16>, vector<2x128xf32> -> vector<2x128xf32>
    %195 = arith.addf %188, %194 : vector<2x128xf32>
    %c0_109 = arith.constant 0 : index
    %c0_110 = arith.constant 0 : index
    %196 = vector.load %arg11[%c0_109, %c0_110] : memref<1x128xf32, #tpu.memory_space<vmem>>, vector<1x128xf32>
    %197 = vector.broadcast %196 : vector<1x128xf32> to vector<2x128xf32>
    %198 = arith.addf %195, %197 : vector<2x128xf32>
    %cst_111 = arith.constant 0.000000e+00 : f32
    %199 = vector.broadcast %cst_111 : f32 to vector<2x128xf32>
    %200 = arith.maximumf %198, %199 : vector<2x128xf32>
    %201 = arith.truncf %200 : vector<2x128xf32> to vector<2x128xbf16>
    %c0_112 = arith.constant 0 : index
    %c0_113 = arith.constant 0 : index
    %202 = vector.load %arg12[%c0_112, %c0_113] : memref<128x128xbf16, #tpu.memory_space<vmem>>, vector<128x128xbf16>
    %cst_114 = arith.constant dense<0.000000e+00> : vector<2x128xf32>
    %203 = tpu.matmul %201, %202, %cst_114 {dimension_numbers = #tpu.dot_dimension_numbers<[1], [0], [0], [1], [0, 0, 1, 1], [], []>} : vector<2x128xbf16>, vector<128x128xbf16>, vector<2x128xf32> -> vector<2x128xf32>
    %c0_115 = arith.constant 0 : index
    %c0_116 = arith.constant 0 : index
    %204 = vector.load %arg13[%c0_115, %c0_116] : memref<1x128xf32, #tpu.memory_space<vmem>>, vector<1x128xf32>
    %205 = vector.broadcast %204 : vector<1x128xf32> to vector<2x128xf32>
    %206 = arith.addf %203, %205 : vector<2x128xf32>
    %cst_117 = arith.constant 0.000000e+00 : f32
    %207 = vector.broadcast %cst_117 : f32 to vector<2x128xf32>
    %208 = arith.maximumf %206, %207 : vector<2x128xf32>
    %209 = arith.truncf %208 : vector<2x128xf32> to vector<2x128xbf16>
    %c0_118 = arith.constant 0 : index
    %c0_119 = arith.constant 0 : index
    %210 = vector.load %arg14[%c0_118, %c0_119] : memref<128x128xbf16, #tpu.memory_space<vmem>>, vector<128x128xbf16>
    %cst_120 = arith.constant dense<0.000000e+00> : vector<2x128xf32>
    %211 = tpu.matmul %209, %210, %cst_120 {dimension_numbers = #tpu.dot_dimension_numbers<[1], [0], [0], [1], [0, 0, 1, 1], [], []>} : vector<2x128xbf16>, vector<128x128xbf16>, vector<2x128xf32> -> vector<2x128xf32>
    %c0_121 = arith.constant 0 : index
    %c0_122 = arith.constant 0 : index
    %212 = vector.load %arg15[%c0_121, %c0_122] : memref<1x128xf32, #tpu.memory_space<vmem>>, vector<1x128xf32>
    %213 = vector.broadcast %212 : vector<1x128xf32> to vector<2x128xf32>
    %214 = arith.addf %211, %213 : vector<2x128xf32>
    %c0_123 = arith.constant 0 : index
    %c0_124 = arith.constant 0 : index
    %c0_125 = arith.constant 0 : index
    %215 = vector.load %arg16[%c0_123, %c0_124, %c0_125] : memref<1x2x128xf32, #tpu.memory_space<vmem>>, vector<1x2x128xf32>
    %216 = vector.shape_cast %215 : vector<1x2x128xf32> to vector<2x128xf32>
    %217 = vector.shape_cast %214 : vector<2x128xf32> to vector<1x2x128xf32>
    tpu.vector_store %arg16[%c0_123, %c0_124, %c0_125], %217 {strides = array<i32>} : memref<1x2x128xf32, #tpu.memory_space<vmem>>, vector<1x2x128xf32>,
    return
  }
  func.func @transform_0(%arg0: i32) -> (i32, i32, i32) {
    %c0_i32 = arith.constant 0 : i32
    %c0_i32_0 = arith.constant 0 : i32
    %c0_i32_1 = arith.constant 0 : i32
    return %arg0, %c0_i32, %c0_i32_0 : i32, i32, i32
  }
  func.func @transform_1(%arg0: i32) -> (i32, i32, i32) {
    %c0_i32 = arith.constant 0 : i32
    %c0_i32_0 = arith.constant 0 : i32
    %c0_i32_1 = arith.constant 0 : i32
    %c0_i32_2 = arith.constant 0 : i32
    return %c0_i32, %c0_i32_0, %c0_i32_1 : i32, i32, i32
  }
  func.func @transform_2(%arg0: i32) -> (i32, i32) {
    %c0_i32 = arith.constant 0 : i32
    %c0_i32_0 = arith.constant 0 : i32
    %c0_i32_1 = arith.constant 0 : i32
    return %c0_i32, %c0_i32_0 : i32, i32
  }
  func.func @transform_3(%arg0: i32) -> (i32, i32) {
    %c0_i32 = arith.constant 0 : i32
    %c0_i32_0 = arith.constant 0 : i32
    %c0_i32_1 = arith.constant 0 : i32
    return %c0_i32, %c0_i32_0 : i32, i32
  }
  func.func @transform_4(%arg0: i32) -> (i32, i32) {
    %c0_i32 = arith.constant 0 : i32
    %c0_i32_0 = arith.constant 0 : i32
    %c0_i32_1 = arith.constant 0 : i32
    return %c0_i32, %c0_i32_0 : i32, i32
  }
  func.func @transform_5(%arg0: i32) -> (i32, i32, i32) {
    %c0_i32 = arith.constant 0 : i32
    %c0_i32_0 = arith.constant 0 : i32
    %c0_i32_1 = arith.constant 0 : i32
    %c0_i32_2 = arith.constant 0 : i32
    return %c0_i32, %c0_i32_0, %c0_i32_1 : i32, i32, i32
  }
  func.func @transform_6(%arg0: i32) -> (i32, i32) {
    %c0_i32 = arith.constant 0 : i32
    %c0_i32_0 = arith.constant 0 : i32
    %c0_i32_1 = arith.constant 0 : i32
    return %c0_i32, %c0_i32_0 : i32, i32
  }
  func.func @transform_7(%arg0: i32) -> (i32, i32) {
    %c0_i32 = arith.constant 0 : i32
    %c0_i32_0 = arith.constant 0 : i32
    %c0_i32_1 = arith.constant 0 : i32
    return %c0_i32, %c0_i32_0 : i32, i32
  }
  func.func @transform_8(%arg0: i32) -> (i32, i32) {
    %c0_i32 = arith.constant 0 : i32
    %c0_i32_0 = arith.constant 0 : i32
    %c0_i32_1 = arith.constant 0 : i32
    return %c0_i32, %c0_i32_0 : i32, i32
  }
  func.func @transform_9(%arg0: i32) -> (i32, i32) {
    %c0_i32 = arith.constant 0 : i32
    %c0_i32_0 = arith.constant 0 : i32
    %c0_i32_1 = arith.constant 0 : i32
    return %c0_i32, %c0_i32_0 : i32, i32
  }
  func.func @transform_10(%arg0: i32) -> (i32, i32) {
    %c0_i32 = arith.constant 0 : i32
    %c0_i32_0 = arith.constant 0 : i32
    %c0_i32_1 = arith.constant 0 : i32
    return %c0_i32, %c0_i32_0 : i32, i32
  }
  func.func @transform_11(%arg0: i32) -> (i32, i32) {
    %c0_i32 = arith.constant 0 : i32
    %c0_i32_0 = arith.constant 0 : i32
    %c0_i32_1 = arith.constant 0 : i32
    return %c0_i32, %c0_i32_0 : i32, i32
  }
  func.func @transform_12(%arg0: i32) -> (i32, i32) {
    %c0_i32 = arith.constant 0 : i32
    %c0_i32_0 = arith.constant 0 : i32
    %c0_i32_1 = arith.constant 0 : i32
    return %c0_i32, %c0_i32_0 : i32, i32
  }
  func.func @transform_13(%arg0: i32) -> (i32, i32) {
    %c0_i32 = arith.constant 0 : i32
    %c0_i32_0 = arith.constant 0 : i32
    %c0_i32_1 = arith.constant 0 : i32
    return %c0_i32, %c0_i32_0 : i32, i32
  }
  func.func @transform_14(%arg0: i32) -> (i32, i32) {
    %c0_i32 = arith.constant 0 : i32
    %c0_i32_0 = arith.constant 0 : i32
    %c0_i32_1 = arith.constant 0 : i32
    return %c0_i32, %c0_i32_0 : i32, i32
  }
  func.func @transform_15(%arg0: i32) -> (i32, i32, i32) {
    %c0_i32 = arith.constant 0 : i32
    %c0_i32_0 = arith.constant 0 : i32
    %c0_i32_1 = arith.constant 0 : i32
    return %arg0, %c0_i32, %c0_i32_0 : i32, i32, i32
  }
}

</mosaic_0001>

<bundles_post_ra>
// kernel: _lambda_.1
= control target key start
LH: loop header
LB: loop body
LE: loop exit
PB: predicated region body
PF: predicated region fallthrough
CT: control target
= control target key end

     0   :  { %20 = vsyncpa [#allocation5], 0  ;;  %s20733_s0 = inlined_call_operand.vmem [shape: bf16[2,64,512], index: 0, kind: input, shape index: {}]   ;;  %s20734_s1 = inlined_call_operand.vmem [shape: bf16[3,512,512], index: 1, kind: input, shape index: {}]   ;;  %s20735_s2 = inlined_call_operand.vmem [shape: f32[1,512], index: 2, kind: input, shape index: {}]   ;;  %s20736_s3 = inlined_call_operand.vmem [shape: bf16[128,130], index: 3, kind: input, shape index: {}]   ;;  %s20737_s4 = inlined_call_operand.hbm [shape: bf16[512,512], index: 4, kind: input, shape index: {}]   ;;  %s20738_s5 = inlined_call_operand.hbm [shape: bf16[3,256,512], index: 5, kind: input, shape index: {}]   ;;  %s20739_s6 = inlined_call_operand.vmem [shape: f32[1,512], index: 6, kind: input, shape index: {}]   ;;  %s20740_s7 = inlined_call_operand.vmem [shape: bf16[64,66], index: 7, kind: input, shape index: {}]   ;;  %s20741_s8 = inlined_call_operand.hbm [shape: bf16[512,512], index: 8, kind: input, shape index: {}]   ;;  %s20742_s9 = inlined_call_operand.hbm [shape: bf16[4096,128], index: 9, kind: input, shape index: {}]   ;;  %s20743_s10 = inlined_call_operand.vmem [shape: f32[1,128], index: 10, kind: input, shape index: {}]   ;;  %s20744_s11 = inlined_call_operand.vmem [shape: bf16[128,128], index: 11, kind: input, shape index: {}]   ;;  %s20745_s12 = inlined_call_operand.vmem [shape: f32[1,128], index: 12, kind: input, shape index: {}]   ;;  %s20746_s13 = inlined_call_operand.vmem [shape: bf16[128,128], index: 13, kind: input, shape index: {}]   ;;  %s20747_s14 = inlined_call_operand.vmem [shape: f32[1,128], index: 14, kind: input, shape index: {}]   ;;  %s20748_s15 = inlined_call_operand.vmem [shape: f32[1,2,128], index: 15, kind: output, shape index: {}]  }
   0x1   :  { %21 = vsyncpa [#allocation7], 0 }
   0x2   :  { %22 = vsyncpa [#allocation10], 0  ;;  %s16785_s18 = smov [#allocation6]   ;;  %s16786_s20 = smov [#allocation4]  }
   0x3   :  { %s48_s19 = sshll.u32 %s16785_s18, 4  ;;  %s36_s21 = sshll.u32 %s16786_s20, 4  ;;  %s49_s19 = int_to_ptr.vmem [resolvable:$true] %s48_s19  ;;  %s37_s21 = int_to_ptr.vmem [resolvable:$true] %s36_s21 }
   0x4   :  { %s16707_s22 = scalar_lea.vmem %s49_s19, 24576  ;;  %p16712_p1 = scmp.lt.s32.totalorder %s49_s19, %s49_s19 }
   0x5   :  { %p16708_p0 = scmp.ne.s32.totalorder %s49_s19, %s16707_s22  ;;  %p16713_p2 = scmp.lt.s32.totalorder %s16707_s22, %s16707_s22 }
   0x7   :  { %p16714_p3 = por %p16713_p2, %p16712_p1 }
   0x9   :  { %p16715_p4 = pnand %p16714_p3, %p16708_p0 }
   0xb   :  { %16718 = shalt.err (!%p16715_p4)
}
   0xc   :  { %s16787_s23 = smov 256   ;;  %s16788_s24 = smov 16  }
   0xd   :  { %54 = dma.hbm_to_vmem [thread:$0]  %s20738_s5, 24576, %s49_s19, [#allocation7], %s16787_s23, %s16787_s23, %s16788_s24  }
   0xe   :  { %s16727_s27 = scalar_lea.vmem %s37_s21, 16384  ;;  %p16732_p6 = scmp.lt.s32.totalorder %s37_s21, %s37_s21 }
   0xf   :  { %p16728_p5 = scmp.ne.s32.totalorder %s37_s21, %s16727_s27  ;;  %p16733_p7 = scmp.lt.s32.totalorder %s16727_s27, %s16727_s27 }
  0x11   :  { %p16734_p8 = por %p16733_p7, %p16732_p6 }
  0x13   :  { %p16735_p9 = pnand %p16734_p8, %p16728_p5 }
  0x15   :  { %16738 = shalt.err (!%p16735_p9)
}
  0x16   :  { %42 = dma.hbm_to_vmem [thread:$0]  %s20737_s4, 16384, %s37_s21, [#allocation5], %s16787_s23, %s16787_s23, %s16788_s24  }
  0x17   :  { %s16789_s30 = smov [#allocation8]   ;;  %s16790_s17 = smov [#allocation9]  }
  0x18   :  { %s64_s16 = sshll.u32 %s16789_s30, 4  ;;  %s76_s18 = sshll.u32 %s16790_s17, 4  ;;  %s65_s16 = int_to_ptr.vmem [resolvable:$true] %s64_s16  ;;  %s77_s18 = int_to_ptr.vmem [resolvable:$true] %s76_s18 }
  0x19   :  { %s16747_s20 = scalar_lea.vmem %s65_s16, 16384  ;;  %p16752_p11 = scmp.lt.s32.totalorder %s65_s16, %s65_s16 }
  0x1a   :  { %p16748_p10 = scmp.ne.s32.totalorder %s65_s16, %s16747_s20  ;;  %p16753_p12 = scmp.lt.s32.totalorder %s16747_s20, %s16747_s20 }
  0x1c   :  { %p16754_p13 = por %p16753_p12, %p16752_p11 }
  0x1e   :  { %p16755_p0 = pnand %p16754_p13, %p16748_p10 }
  0x20   :  { %16758 = shalt.err (!%p16755_p0)
}
  0x21   :  { %70 = dma.hbm_to_vmem [thread:$0]  %s20741_s8, 16384, %s65_s16, [#allocation7], %s16787_s23, %s16787_s23, %s16788_s24  }
  0x22   :  { %s16767_s22 = scalar_lea.vmem %s77_s18, 32768  ;;  %p16772_p2 = scmp.lt.s32.totalorder %s77_s18, %s77_s18 }
  0x23   :  { %p16768_p1 = scmp.ne.s32.totalorder %s77_s18, %s16767_s22  ;;  %p16773_p3 = scmp.lt.s32.totalorder %s16767_s22, %s16767_s22 }
  0x25   :  { %p16774_p4 = por %p16773_p3, %p16772_p2 }
  0x27   :  { %p16775_p5 = pnand %p16774_p4, %p16768_p1 }
  0x29   :  { %16778 = shalt.err (!%p16775_p5)
}
  0x2a   :  { %s16791_s4 = smov 64   ;;  %s16792_s21 = smov 4  }
  0x2b   :  { %82 = dma.hbm_to_vmem [thread:$0]  %s20742_s9, 32768, %s77_s18, [#allocation10], %s16791_s4, %s16791_s4, %s16792_s21  }
  0x2c   :  { %16779 = dma.done.wait [#allocation5], 16384  }
  0x2d   :  { %16780 = vsyncadd [#allocation5], 4294950912 }
  0x2e   :  { %16781 = dma.done.wait [#allocation7], 40960  }
  0x2f   :  { %16782 = vsyncadd [#allocation7], 4294926336 }
  0x30   :  { %16783 = dma.done.wait [#allocation10], 32768  }
  0x31   :  { %16784 = vsyncadd [#allocation10], 4294934528  ;;  %v15137_v0 = vld [vmem:[%s20734_s1 + $0x4e4] ss:$16 sps:$4 sm:$0xff]   ;;  %v15141_v2 = vld [vmem:[%s20734_s1 + $0x4e0] ss:$16 sps:$4 sm:$0xff]  }
  0x32   :  { %v15139_v1 = vld [vmem:[%s20734_s1 + $0x6e4] ss:$16 sps:$4 sm:$0xff]   ;;  %1986 = vmatprep.subr.bf16.mxu0 %v15137_v0  ;;  %v15142_v3 = vld [vmem:[%s20734_s1 + $0x6e0] ss:$16 sps:$4 sm:$0xff]   ;;  %vm107_vm0 = vsmask.f32 256 }
  0x33   :  { %2107 = vmatprep.subr.bf16.mxu1 %v15139_v1  ;;  %v15143_v4 = vld [vmem:[%s20734_s1 + $0x4c4] ss:$16 sps:$4 sm:$0xff]   ;;  %1987 = vmatpush1.bf16.msra.mxu0 %v15141_v2  ;;  %v15147_v6 = vld [vmem:[%s20734_s1 + $0x4c0] ss:$16 sps:$4 sm:$0xff]   ;;  %vm20749_vm1 = vcmask 1040384   ;;  %vm109_vm2 = vcmask 1044484  }
  0x34   :  { %2108 = vmatpush1.bf16.msra.mxu1 %v15142_v3  ;;  %v15145_v5 = vld [vmem:[%s20734_s1 + $0x6c4] ss:$16 sps:$4 sm:$0xff]   ;;  %1988 = vmatprep.subr.bf16.mxu0 %v15143_v4  ;;  %v15148_v7 = vld [vmem:[%s20734_s1 + $0x6c0] ss:$16 sps:$4 sm:$0xff]   ;;  %vm16998_vm3 = vmand %vm20749_vm1, %vm107_vm0  ;;  %vm110_vm4 = vsmask.f32 4352 }
  0x35   :  { %2109 = vmatprep.subr.bf16.mxu1 %v15145_v5  ;;  %v15149_v8 = vld [vmem:[%s20734_s1 + $0x4a4] ss:$16 sps:$4 sm:$0xff]   ;;  %v15153_v10 = vld [vmem:[%s20734_s1 + $0x4a0] ss:$16 sps:$4 sm:$0xff]   ;;  %vm111_vm5 = vmand %vm109_vm2, %vm110_vm4  ;;  %vm119_vm6 = vsmask.f32 7938 }
  0x36   :  { %v15151_v9 = vld [vmem:[%s20734_s1 + $0x6a4] ss:$16 sps:$4 sm:$0xff]   ;;  %v15154_v11 = vld [vmem:[%s20734_s1 + $0x6a0] ss:$16 sps:$4 sm:$0xff]   ;;  %vm17029_vm7 = vmor %vm111_vm5, %vm16998_vm3  ;;  %v20810_v45 = vmov 0  ;;  %vm308_vm10 = vcmask 1043456  }
  0x37   :  { %1989 = vmatpush1.bf16.msra.mxu0 %v15147_v6  ;;  %v15155_v12 = vld [vmem:[%s20734_s1 + $0x484] ss:$16 sps:$4 sm:$0xff]   ;;  %v15159_v14 = vld [vmem:[%s20734_s1 + $0x480] ss:$16 sps:$4 sm:$0xff]   ;;  %v20811_v45 = vsel %vm17029_vm7, 4294967295, %v20810_v45  ;;  %vm310_vm11 = vcmask 1047556   ;;  %vm17070_vm12 = vmand %vm308_vm10, %vm119_vm6 }
  0x38   :  { %2110 = vmatpush1.bf16.msra.mxu1 %v15148_v7  ;;  %1990 = vmatprep.subr.bf16.mxu0 %v15149_v8  ;;  %v15157_v13 = vld [vmem:[%s20734_s1 + $0x684] ss:$16 sps:$4 sm:$0xff]   ;;  %v15160_v15 = vld [vmem:[%s20734_s1 + $0x680] ss:$16 sps:$4 sm:$0xff]   ;;  %20812 = vst [vmem:[#allocation14_spill] sm:$0xff] %v20811_v45  ;;  %v131_v62 = vld [vmem:[%s20733_s0 + $0x8] sm:$0xff] }
  0x39   :  { %2111 = vmatprep.subr.bf16.mxu1 %v15151_v9  ;;  %v15161_v16 = vld [vmem:[%s20734_s1 + $0x464] ss:$16 sps:$4 sm:$0xff]   ;;  %v15165_v18 = vld [vmem:[%s20734_s1 + $0x460] ss:$16 sps:$4 sm:$0xff]   ;;  %vm121_vm8 = vsmask.f32 7954  ;;  %vm17308_vm10 = vmand %vm20749_vm1, %vm119_vm6 }
  0x3a   :  { %v15163_v17 = vld [vmem:[%s20734_s1 + $0x664] ss:$16 sps:$4 sm:$0xff]   ;;  %v15166_v19 = vld [vmem:[%s20734_s1 + $0x660] ss:$16 sps:$4 sm:$0xff]   ;;  %vm146_vm9 = vsmask.f32 4368  ;;  %vm17082_vm13 = vmand %vm310_vm11, %vm121_vm8 }
  0x3b   :  { %1991 = vmatpush1.bf16.msra.mxu0 %v15153_v10  ;;  %v15167_v20 = vld [vmem:[%s20734_s1 + $0x444] ss:$16 sps:$4 sm:$0xff]   ;;  %v15171_v22 = vld [vmem:[%s20734_s1 + $0x440] ss:$16 sps:$4 sm:$0xff]   ;;  %vm17093_vm14 = vmor %vm107_vm0, %vm146_vm9  ;;  %vm1025_vm0 = vsmask.f32 7424 }
  0x3c   :  { %2112 = vmatpush1.bf16.msra.mxu1 %v15154_v11  ;;  %1992 = vmatprep.subr.bf16.mxu0 %v15155_v12  ;;  %v15169_v21 = vld [vmem:[%s20734_s1 + $0x644] ss:$16 sps:$4 sm:$0xff]   ;;  %v15172_v23 = vld [vmem:[%s20734_s1 + $0x640] ss:$16 sps:$4 sm:$0xff]   ;;  %v133_v11 = vld [vmem:[%s20733_s0 + $0x18] sm:$0xff]  ;;  %v156_v12 = vshrl.u32 %v131_v62, 16 }
  0x3d   :  { %2113 = vmatprep.subr.bf16.mxu1 %v15157_v13  ;;  %v15173_v24 = vld [vmem:[%s20734_s1 + $0x424] ss:$16 sps:$4 sm:$0xff]   ;;  %v15177_v26 = vld [vmem:[%s20734_s1 + $0x420] ss:$16 sps:$4 sm:$0xff]   ;;  %v20817_v13 = vmov 0  ;;  %vm17113_vm15 = vmor %vm17082_vm13, %vm17070_vm12  ;;  %vm20750_vm3 = vcmask 1041409  }
  0x3e   :  { %v15175_v25 = vld [vmem:[%s20734_s1 + $0x624] ss:$16 sps:$4 sm:$0xff]   ;;  %v15178_v27 = vld [vmem:[%s20734_s1 + $0x620] ss:$16 sps:$4 sm:$0xff]   ;;  %v20818_v13 = vsel %vm17093_vm14, 4294967295, %v20817_v13  ;;  %vm342_vm5 = vcmask 1045509   ;;  %vm17322_vm6 = vmand %vm109_vm2, %vm121_vm8 }
  0x3f   :  { %1993 = vmatpush1.bf16.msra.mxu0 %v15159_v14  ;;  %v15179_v28 = vld [vmem:[%s20734_s1 + $0x404] ss:$16 sps:$4 sm:$0xff]   ;;  %v15183_v30 = vld [vmem:[%s20734_s1 + $0x400] ss:$16 sps:$4 sm:$0xff]   ;;  %20819 = vst [vmem:[#allocation15_spill] sm:$0xff] %v20818_v13  ;;  %vm558_vm12 = vcmask 1043457  }
  0x40   :  { %2114 = vmatpush1.bf16.msra.mxu1 %v15160_v15  ;;  %1994 = vmatprep.subr.bf16.mxu0 %v15161_v16  ;;  %v15181_v29 = vld [vmem:[%s20734_s1 + $0x604] ss:$16 sps:$4 sm:$0xff]   ;;  %v15184_v31 = vld [vmem:[%s20734_s1 + $0x600] ss:$16 sps:$4 sm:$0xff]   ;;  %v135_v16 = vld [vmem:[%s20733_s0 + $0x28] sm:$0xff]  ;;  %vm560_vm8 = vcmask 1047557  }
  0x41   :  { %2115 = vmatprep.subr.bf16.mxu1 %v15163_v17  ;;  %v15185_v32 = vld [vmem:[%s20734_s1 + $0x5e4] ss:$16 sps:$4 sm:$0xff]   ;;  %v15189_v34 = vld [vmem:[%s20734_s1 + $0x5e0] ss:$16 sps:$4 sm:$0xff]   ;;  %v159_v17 = vshll.u32 %v131_v62, 16 }
  0x42   :  { %v15187_v33 = vld [vmem:[%s20734_s1 + $0x7e4] ss:$16 sps:$4 sm:$0xff]   ;;  %v15190_v35 = vld [vmem:[%s20734_s1 + $0x7e0] ss:$16 sps:$4 sm:$0xff]   ;;  %vm340_vm4 = vsmask.f32 1280 }
  0x43   :  { %1995 = vmatpush1.bf16.msra.mxu0 %v15165_v18  ;;  %v15191_v37 = vld [vmem:[%s20734_s1 + $0x5c4] ss:$16 sps:$4 sm:$0xff]   ;;  %v15195_v39 = vld [vmem:[%s20734_s1 + $0x5c0] ss:$16 sps:$4 sm:$0xff]   ;;  %v173_v18 = vshrl.u32 %v133_v11, 16  ;;  %vm17376_vm13 = vmand %vm20750_vm3, %vm340_vm4 }
  0x44   :  { %2116 = vmatpush1.bf16.msra.mxu1 %v15166_v19  ;;  %1996 = vmatprep.subr.bf16.mxu0 %v15167_v20  ;;  %v15193_v38 = vld [vmem:[%s20734_s1 + $0x7c4] ss:$16 sps:$4 sm:$0xff]   ;;  %v15196_v40 = vld [vmem:[%s20734_s1 + $0x7c0] ss:$16 sps:$4 sm:$0xff]   ;;  %vm20751_vm9 = vsmask.f32 5376  ;;  %vm17395_vm3 = vmor %vm17322_vm6, %vm17308_vm10 }
  0x45   :  { %2117 = vmatprep.subr.bf16.mxu1 %v15169_v21  ;;  %v15197_v41 = vld [vmem:[%s20734_s1 + $0x5a4] ss:$16 sps:$4 sm:$0xff]   ;;  %v15201_v43 = vld [vmem:[%s20734_s1 + $0x5a0] ss:$16 sps:$4 sm:$0xff]   ;;  %vm352_vm11 = vsmask.f32 7942  ;;  %vm17384_vm1 = vmand %vm342_vm5, %vm20751_vm9 }
  0x46   :  { %v15199_v42 = vld [vmem:[%s20734_s1 + $0x7a4] ss:$16 sps:$4 sm:$0xff]   ;;  %v15202_v44 = vld [vmem:[%s20734_s1 + $0x7a0] ss:$16 sps:$4 sm:$0xff]   ;;  %vm354_vm2 = vsmask.f32 7958  ;;  %vm17428_vm10 = vmor %vm17384_vm1, %vm17376_vm13 }
  0x47   :  { %1997 = vmatpush1.bf16.msra.mxu0 %v15171_v22  ;;  %v15203_v46 = vld [vmem:[%s20734_s1 + $0x584] ss:$16 sps:$4 sm:$0xff]   ;;  %v15207_v48 = vld [vmem:[%s20734_s1 + $0x580] ss:$16 sps:$4 sm:$0xff]   ;;  %vm380_vm9 = vsmask.f32 5392  ;;  %vm17467_vm1 = vmand %vm558_vm12, %vm352_vm11 }
  0x48   :  { %2118 = vmatpush1.bf16.msra.mxu1 %v15172_v23  ;;  %1998 = vmatprep.subr.bf16.mxu0 %v15173_v24  ;;  %v15205_v47 = vld [vmem:[%s20734_s1 + $0x784] ss:$16 sps:$4 sm:$0xff]   ;;  %v15208_v49 = vld [vmem:[%s20734_s1 + $0x780] ss:$16 sps:$4 sm:$0xff]   ;;  %vm17499_vm6 = vmand %vm560_vm8, %vm354_vm2  ;;  %vm20863_vm8 = vcmask 1041409  }
  0x49   :  { %2119 = vmatprep.subr.bf16.mxu1 %v15175_v25  ;;  %v113_v50 = vld [vmem:[#allocation2 + $0xa0] sm:$0x11]  ;;  %v132_v55 = vld [vmem:[%s20733_s0 + $0x10] sm:$0xff]  ;;  %vm17534_vm12 = vmor %vm340_vm4, %vm380_vm9 }
  0x4a   :  { %v15209_v51 = vld [vmem:[%s20734_s1 + $0x564] ss:$16 sps:$4 sm:$0xff]   ;;  %v114_v53 = vsel %vm17029_vm7, 0, %v113_v50  ;;  %v164_v60 = vshrl.u32 %v132_v55, 16  ;;  %v167_v61 = vshll.u32 %v132_v55, 16  ;;  %vm17551_vm9 = vmor %vm17499_vm6, %vm17467_vm1 }
  0x4b   :  { %1999 = vmatpush1.bf16.msra.mxu0 %v15177_v26  ;;  %v15211_v52 = vld [vmem:[%s20734_s1 + $0x764] ss:$16 sps:$4 sm:$0xff]   ;;  %115 = vst [vmem:[#allocation2 + $0xa0] sm:$0x11] %v114_v53  ;;  %v15213_v5 = vld [vmem:[%s20734_s1 + $0x560] ss:$16 sps:$4 sm:$0xff]   ;;  %vm17864_vm13 = vmand %vm20863_vm8, %vm352_vm11 }
  0x4c   :  { %2120 = vmatpush1.bf16.msra.mxu1 %v15178_v27  ;;  %2000 = vmatprep.subr.bf16.mxu0 %v15179_v28  ;;  %v130_v54 = vld [vmem:[%s20733_s0] sm:$0xff]  ;;  %v136_v57 = vld [vmem:[%s20733_s0 + $0x30] sm:$0xff]  ;;  %v166_v8 = vrot.slane %v164_v60, 7  ;;  %v20820_v28 = vmov 0  ;;  %vm17871_vm1 = vmand %vm342_vm5, %vm354_vm2  ;;  %vm583_vm11 = vcmask 1041408   ;;  %vm585_vm2 = vcmask 1045508  }
  0x4d   :  { %2121 = vmatprep.subr.bf16.mxu1 %v15181_v29  ;;  %v134_v56 = vld [vmem:[%s20733_s0 + $0x20] sm:$0xff]  ;;  %v149_v58 = vshrl.u32 %v130_v54, 16  ;;  %v152_v59 = vshll.u32 %v130_v54, 16  ;;  %v200_v1 = vshrl.u32 %v136_v57, 16  ;;  %v203_v2 = vshll.u32 %v136_v57, 16  ;;  %v13221_v13 = vld [vmem:[%s20733_s0 + $0xb0] sm:$0xff]  ;;  %vm17900_vm5 = vmor %vm17871_vm1, %vm17864_vm13 }
  0x4e   :  { %v182_v63 = vshrl.u32 %v134_v56, 16  ;;  %v185_v0 = vshll.u32 %v134_v56, 16  ;;  %v116_v4 = vld [vmem:[#allocation2 + $0xc0] sm:$0x11]  ;;  %v169_v23 = vor.u32 %v167_v61, %v166_v8  ;;  %v180_v24 = vrot.slane %v166_v8, 4  ;;  %vm584_vm6 = vmand %vm583_vm11, %vm340_vm4 }
  0x4f   :  { %2001 = vmatpush1.bf16.msra.mxu0 %v15183_v30  ;;  %v15214_v6 = vld [vmem:[%s20734_s1 + $0x760] ss:$16 sps:$4 sm:$0xff]   ;;  %v151_v7 = vrot.slane %v149_v58, 7  ;;  %v117_v10 = vsel %vm17029_vm7, 0, %v116_v4  ;;  %v17097_v15 = vrot.slane %v200_v1, 7  ;;  %v20821_v28 = vsel %vm17113_vm15, 4294967295, %v20820_v28 }
  0x50   :  { %2122 = vmatpush1.bf16.msra.mxu1 %v15184_v31  ;;  %2002 = vmatprep.subr.bf16.mxu0 %v15185_v32  ;;  %v184_v14 = vrot.slane %v182_v63, 7  ;;  %118 = vst [vmem:[#allocation2 + $0xc0] sm:$0x11] %v117_v10  ;;  %v15215_v19 = vld [vmem:[%s20734_s1 + $0x544] ss:$16 sps:$4 sm:$0xff]   ;;  %20822 = vst [vmem:[#allocation16_spill] sm:$0xff] %v20821_v28 }
  0x51   :  { %2123 = vmatprep.subr.bf16.mxu1 %v15187_v33  ;;  %v15217_v20 = vld [vmem:[%s20734_s1 + $0x744] ss:$16 sps:$4 sm:$0xff]   ;;  %v154_v21 = vor.u32 %v152_v59, %v151_v7  ;;  %v162_v22 = vrot.slane %v151_v7, 4  ;;  %v205_v27 = vor.u32 %v203_v2, %v17097_v15  ;;  %v158_v29 = vrot.slane %v156_v12, 7  ;;  %v15219_v30 = vld [vmem:[%s20734_s1 + $0x540] ss:$16 sps:$4 sm:$0xff]  }
  0x52   :  { %v187_v25 = vor.u32 %v185_v0, %v184_v14  ;;  %v198_v26 = vrot.slane %v184_v14, 4  ;;  %v137_v32 = vld [vmem:[%s20733_s0 + $0x38] sm:$0xff]  ;;  %v175_v33 = vrot.slane %v173_v18, 7  ;;  %v15220_v36 = vld [vmem:[%s20734_s1 + $0x740] ss:$16 sps:$4 sm:$0xff]   ;;  %vm3781_vm1 = vcmask 1046528  }
  0x53   :  { %2003 = vmatpush2.bf16.msra.mxu0 %v15189_v34  ;;  %v170_v31 = vsel %vm17093_vm14, %v162_v22, %v169_v23  ;;  %v176_v34 = vshll.u32 %v133_v11, 16  ;;  %v212_v55 = vshll.u32 %v137_v32, 16  ;;  %v15225_v58 = vld [vmem:[%s20734_s1 + $0x520] ss:$16 sps:$4 sm:$0xff]   ;;  %v15227_v0 = vld [vmem:[%s20734_s1 + $0x504] ss:$16 sps:$4 sm:$0xff]  }
  0x54   :  { %2124 = vmatpush2.bf16.msra.mxu1 %v15190_v35  ;;  %2004 = vmatprep.subr.bf16.mxu0 %v15191_v37  ;;  %v191_v35 = vshrl.u32 %v135_v16, 16  ;;  %v188_v37 = vsel %vm17093_vm14, %v180_v24, %v187_v25  ;;  %319 = vst [vmem:[#allocation2 + $0xf8] sm:$0xff] %v170_v31  ;;  %v15226_v63 = vld [vmem:[%s20734_s1 + $0x720] ss:$16 sps:$4 sm:$0xff]   ;;  %v216_v22 = vrot.slane %v17097_v15, 4  ;;  %vm5360_vm11 = vcmask 15360  }
  0x55   :  { %2125 = vmatprep.subr.bf16.mxu1 %v15193_v38  ;;  %v206_v38 = vsel %vm17093_vm14, %v198_v26, %v205_v27  ;;  %v15231_v10 = vld [vmem:[%s20734_s1 + $0x500] ss:$16 sps:$4 sm:$0xff]   ;;  %vm20872_vm8 = vsmask.f32 5376 }
  0x56   :  { %v193_v50 = vrot.slane %v191_v35, 7  ;;  %v17166_v4 = vcombine.low %v188_v37, %v206_v38  ;;  %v15232_v11 = vld [vmem:[%s20734_s1 + $0x700] ss:$16 sps:$4 sm:$0xff]   ;;  %vm586_vm13 = vmand %vm585_vm2, %vm20872_vm8  ;;  %vm21066_vm2 = vcmask 1040384  }
  0x57   :  { %2005 = vmatpush2.bf16.msra.mxu0 %v15195_v39  ;;  %v313_v39 = vld [vmem:[#allocation2 + $0xa0] sm:$0xff]  ;;  %v140_v27 = vld [vmem:[%s20733_s0 + $0x50] sm:$0xff]  ;;  %vm17950_vm4 = vmor %vm586_vm13, %vm584_vm6 }
  0x58   :  { %2126 = vmatpush2.bf16.msra.mxu1 %v15196_v40  ;;  %2006 = vmatprep.subr.bf16.mxu0 %v15197_v41  ;;  %v161_v40 = vor.u32 %v159_v17, %v158_v29  ;;  %v171_v41 = vrot.slane %v158_v29, 4  ;;  %v316_v56 = vld [vmem:[#allocation2 + $0xc0] sm:$0xff]  ;;  %v207_v62 = vrot.slane %v193_v50, 4  ;;  %vm21067_vm6 = vmmov %vm21066_vm2 }
  0x59   :  { %2127 = vmatprep.subr.bf16.mxu1 %v15199_v42  ;;  %v15221_v42 = vld [vmem:[%s20734_s1 + $0x524] ss:$16 sps:$4 sm:$0xff]   ;;  %vm21094_vm8 = vmmov %vm21066_vm2 }
  0x5a   :  { %v317_v3 = vsel %vm17113_vm15, %v161_v40, %v316_v56  ;;  %v138_v18 = vld [vmem:[%s20733_s0 + $0x40] sm:$0xff]  ;;  %vm21095_vm13 = vmmov %vm21066_vm2 }
  0x5b   :  { %2007 = vmatpush2.bf16.msra.mxu0 %v15201_v43  ;;  %v314_v43 = vsel %vm17113_vm15, %v154_v21, %v313_v39  ;;  %318 = vst [vmem:[#allocation2 + $0xc0] sm:$0xff] %v317_v3 }
  0x5c   :  { %2128 = vmatpush2.bf16.msra.mxu1 %v15202_v44  ;;  %2008 = vmatprep.subr.bf16.mxu0 %v15203_v46  ;;  %v17137_v44 = vcombine.high %v188_v37, %v206_v38  ;;  %v178_v46 = vor.u32 %v176_v34, %v175_v33  ;;  %315 = vst [vmem:[#allocation2 + $0xa0] sm:$0xff] %v314_v43  ;;  %v221_v37 = vshll.u32 %v138_v18, 16 }
  0x5d   :  { %2129 = vmatprep.subr.bf16.mxu1 %v15205_v47  ;;  %v189_v47 = vrot.slane %v175_v33, 4  ;;  %v17147_v57 = vcombine.low %v314_v43, %v170_v31  ;;  %v15238_v33 = vld [vmem:[%s20734_s1 + $0x6ec] ss:$16 sps:$4 sm:$0xff]  }
  0x5e   :  { %v1046_v53 = vshll.u32 %v17137_v44, 16  ;;  %v179_v54 = vsel %vm17093_vm14, %v171_v41, %v178_v46  ;;  %v236_v41 = vshrl.u32 %v140_v27, 16 }
  0x5f   :  { %2009 = vmatpush2.bf16.msra.mxu0 %v15207_v48  ;;  %v15223_v48 = vld [vmem:[%s20734_s1 + $0x724] ss:$16 sps:$4 sm:$0xff]   ;;  %320 = vst [vmem:[#allocation2 + $0x58] sm:$0xff] %v179_v54  ;;  %v17173_v8 = vcombine.high %v317_v3, %v179_v54  ;;  %v1027_v9 = vshrl.u32 %v17147_v57, 16  ;;  %v1029_v14 = vshll.u32 %v17147_v57, 16  ;;  %v17185_v17 = vcombine.low %v317_v3, %v179_v54  ;;  %v141_v54 = vld [vmem:[%s20733_s0 + $0x58] sm:$0xff] }
  0x60   :  { %2130 = vmatpush2.bf16.msra.mxu1 %v15208_v49  ;;  %2010 = vmatprep.subr.bf16.mxu0 %v15209_v51  ;;  %v17142_v49 = vcombine.high %v314_v43, %v170_v31  ;;  %v194_v51 = vshll.u32 %v135_v16, 16  ;;  %v17160_v1 = vrot.slane %v1046_v53, 1  ;;  %v1034_v16 = vshll.u32 %v17166_v4, 16  ;;  %v15239_v3 = vld [vmem:[%s20734_s1 + $0x4c8] ss:$16 sps:$4 sm:$0xff]  }
  0x61   :  { %2131 = vmatprep.subr.bf16.mxu1 %v15211_v52  ;;  %v209_v52 = vshrl.u32 %v137_v32, 16  ;;  %v1065_v21 = vshll.u32 %v17173_v8, 16  ;;  %v1031_v24 = vrot.slane %v1029_v14, 1  ;;  %v1051_v26 = vshrl.u32 %v17185_v17, 16  ;;  %v15235_v32 = vld [vmem:[%s20734_s1 + $0x4ec] ss:$16 sps:$4 sm:$0xff]  }
  0x62   :  { %v1039_v59 = vshrl.u32 %v17142_v49, 16  ;;  %v1041_v60 = vshll.u32 %v17142_v49, 16  ;;  %v196_v61 = vor.u32 %v194_v51, %v193_v50  ;;  %v17195_v25 = vrot.slane %v1034_v16, 1  ;;  %v15233_v50 = vld [vmem:[%s20734_s1 + $0x4e8] ss:$16 sps:$4 sm:$0xff]  }
  0x63   :  { %2011 = vmatpush2.bf16.msra.mxu0 %v15213_v5  ;;  %v17162_v2 = vrot.slane %v209_v52, 7  ;;  %v15229_v5 = vld [vmem:[%s20734_s1 + $0x704] ss:$16 sps:$4 sm:$0xff]   ;;  %v1032_v34 = vor.u32 %v1031_v24, %v1027_v9  ;;  %v1053_v35 = vshll.u32 %v17185_v17, 16  ;;  %v17233_v53 = vrot.slane %v236_v41, 7 }
  0x64   :  { %2132 = vmatpush2.bf16.msra.mxu1 %v15214_v6  ;;  %2012 = vmatprep.subr.bf16.mxu0 %v15215_v19  ;;  %v1043_v6 = vrot.slane %v1041_v60, 1  ;;  %v197_v7 = vsel %vm17093_vm14, %v189_v47, %v196_v61  ;;  %v239_v47 = vshll.u32 %v140_v27, 16  ;;  %v15236_v60 = vld [vmem:[%s20734_s1 + $0x6e8] ss:$16 sps:$4 sm:$0xff]   ;;  %v1074_v24 = vshrl.u32 %v17166_v4, 16 }
  0x65   :  { %2133 = vmatprep.subr.bf16.mxu1 %v15217_v20  ;;  %v214_v12 = vor.u32 %v212_v55, %v17162_v2  ;;  %v1063_v20 = vshrl.u32 %v17173_v8, 16  ;;  %v1055_v43 = vrot.slane %v1053_v35, 1  ;;  %v15241_v55 = vld [vmem:[%s20734_s1 + $0x4cc] ss:$16 sps:$4 sm:$0xff]   ;;  %v225_v16 = vrot.slane %v17162_v2, 4  ;;  %v17289_v2 = vld [vmem:[%s20733_s0 + $0x70] sm:$0xff] }
  0x66   :  { %v1044_v19 = vor.u32 %v1043_v6, %v1039_v59  ;;  %v252_v41 = vrot.slane %v17233_v53, 4 }
  0x67   :  { %2013 = vmatpush2.bf16.msra.mxu0 %v15219_v30  ;;  %v215_v23 = vsel %vm17093_vm14, %v207_v62, %v214_v12  ;;  %v1067_v30 = vrot.slane %v1065_v21, 1  ;;  %v1056_v56 = vor.u32 %v1055_v43, %v1051_v26  ;;  %v241_v62 = vor.u32 %v239_v47, %v17233_v53  ;;  %v17270_v12 = vld [vmem:[%s20733_s0 + $0x60] sm:$0xff] }
  0x68   :  { %2134 = vmatpush2.bf16.msra.mxu1 %v15220_v36  ;;  %2014 = vmatprep.subr.bf16.mxu0 %v15221_v42  ;;  %v17203_v29 = vsel %vm1025_vm0, %v1044_v19, %v17160_v1  ;;  %v17205_v15 = vcombine.high %v197_v7, %v215_v23  ;;  %v17207_v31 = vcombine.low %v197_v7, %v215_v23  ;;  %v218_v36 = vshrl.u32 %v138_v18, 16 }
  0x69   :  { %2135 = vmatprep.subr.bf16.mxu1 %v15223_v48  ;;  %2018 = vmatprep.mubr.bf16.mxu0 %v17203_v29  ;;  %v1068_v38 = vor.u32 %v1067_v30, %v1063_v20  ;;  %v17221_v42 = vsel %vm1025_vm0, %v1032_v34, %v17195_v25  ;;  %v139_v48 = vld [vmem:[%s20733_s0 + $0x48] sm:$0xff]  ;;  %v248_v19 = vshll.u32 %v141_v54, 16  ;;  %v254_v43 = vshrl.u32 %v17270_v12, 16 }
  0x6a   :  { %v1070_v39 = vshll.u32 %v17205_v15, 16  ;;  %v1058_v40 = vshll.u32 %v17207_v31, 16  ;;  %v220_v46 = vrot.slane %v218_v36, 7  ;;  %v230_v9 = vshll.u32 %v139_v48, 16  ;;  %v15247_v20 = vld [vmem:[%s20734_s1 + $0x4ac] ss:$16 sps:$4 sm:$0xff]  }
  0x6b   :  { %2015 = vmatpush2.bf16.msra.mxu0 %v15225_v58  ;;  %v1076_v36 = vor.u32 %v1074_v24, %v17195_v25  ;;  %v257_v53 = vshll.u32 %v17270_v12, 16 }
  0x6c   :  { %2136 = vmatpush2.bf16.msra.mxu1 %v15226_v63  ;;  %2016 = vmatprep.subr.bf16.mxu0 %v15227_v0  ;;  %v17229_v51 = vrot.slane %v1070_v39, 1  ;;  %v17231_v52 = vrot.slane %v1058_v40, 1  ;;  %v223_v58 = vor.u32 %v221_v37, %v220_v46  ;;  %v234_v59 = vrot.slane %v220_v46, 4  ;;  %v15253_v46 = vld [vmem:[%s20734_s1 + $0x48c] ss:$16 sps:$4 sm:$0xff]  }
  0x6d   :  { %2137 = vmatprep.subr.bf16.mxu1 %v15229_v5  ;;  %v1082_v63 = vshrl.u32 %v17137_v44, 16  ;;  %v227_v0 = vshrl.u32 %v139_v48, 16  ;;  %v15244_v5 = vld [vmem:[%s20734_s1 + $0x6cc] ss:$16 sps:$4 sm:$0xff]   ;;  %v1090_v40 = vshrl.u32 %v17207_v31, 16 }
  0x6e   :  { %v17246_v61 = vsel %vm1025_vm0, %v1068_v38, %v17229_v51  ;;  %v17260_v6 = vsel %vm1025_vm0, %v1056_v56, %v17231_v52  ;;  %v224_v7 = vsel %vm17093_vm14, %v216_v22, %v223_v58  ;;  %v242_v14 = vsel %vm17093_vm14, %v234_v59, %v241_v62  ;;  %v15248_v38 = vld [vmem:[%s20734_s1 + $0x6a8] ss:$16 sps:$4 sm:$0xff]  }
  0x6f   :  { %2017 = vmatpush2.bf16.msra.mxu0 %v15231_v10  ;;  %2139 = vmatprep.mubr.bf16.mxu1 %v17246_v61  ;;  %v245_v10 = vshrl.u32 %v141_v54, 16  ;;  %v229_v18 = vrot.slane %v227_v0, 7  ;;  %v17279_v21 = vcombine.high %v224_v7, %v242_v14  ;;  %v17283_v23 = vcombine.low %v224_v7, %v242_v14  ;;  %v143_v62 = vld [vmem:[%s20733_s0 + $0x68] sm:$0xff]  ;;  %v145_v14 = vld [vmem:[%s20733_s0 + $0x78] sm:$0xff] }
  0x70   :  { %2138 = vmatpush2.bf16.msra.mxu1 %v15232_v11  ;;  %2228 = vmatprep.subr.bf16.mxu0 %v15235_v32  ;;  %v15242_v11 = vld [vmem:[%s20734_s1 + $0x6c8] ss:$16 sps:$4 sm:$0xff]   ;;  %v1084_v26 = vor.u32 %v1082_v63, %v17160_v1  ;;  %v1098_v32 = vshrl.u32 %v17205_v15, 16  ;;  %v256_v59 = vrot.slane %v254_v43, 7  ;;  %v15256_v63 = vld [vmem:[%s20734_s1 + $0x68c] ss:$16 sps:$4 sm:$0xff]  }
  0x71   :  { %2349 = vmatprep.subr.bf16.mxu1 %v15238_v33  ;;  %v17281_v22 = vrot.slane %v245_v10, 7  ;;  %20823 = vst [vmem:[#allocation17_spill] sm:$0xff] %v17283_v23  ;;  %v232_v27 = vor.u32 %v230_v9, %v229_v18  ;;  %v243_v30 = vrot.slane %v229_v18, 4  ;;  %v15250_v33 = vld [vmem:[%s20734_s1 + $0x6ac] ss:$16 sps:$4 sm:$0xff]   ;;  %v1086_v34 = vshll.u32 %v17279_v21, 16 }
  0x72   :  { %2019 = vmatmul.mubr.bf16.vlgmr.msra.gmra.mxu0 %v17221_v42  ;;  %v1078_v37 = vshll.u32 %v17283_v23, 16  ;;  %v15245_v1 = vld [vmem:[%s20734_s1 + $0x4a8] ss:$16 sps:$4 sm:$0xff]   ;;  %v275_v7 = vshll.u32 %v17289_v2, 16  ;;  %v270_v18 = vrot.slane %v256_v59, 4 }
  0x73   :  { %2229 = vmatpush1.bf16.msra.mxu0 %v15233_v50  ;;  %2140 = vmatmul.mubr.bf16.vlgmr.msra.gmra.mxu1 %v17260_v6  ;;  %v250_v35 = vor.u32 %v248_v19, %v17281_v22  ;;  %v233_v25 = vsel %vm17093_vm14, %v225_v16, %v232_v27  ;;  %v17326_v48 = vrot.slane %v1086_v34, 1  ;;  %v15254_v9 = vld [vmem:[%s20734_s1 + $0x688] ss:$16 sps:$4 sm:$0xff]   ;;  %v15259_v16 = vld [vmem:[%s20734_s1 + $0x46c] ss:$16 sps:$4 sm:$0xff]   ;;  %v20833_v34 = vmov 0 }
  0x74   :  { %2230 = vmatprep.subr.bf16.mxu0 %v15241_v55  ;;  %2350 = vmatpush1.bf16.msra.mxu1 %v15236_v60  ;;  %v17330_v54 = vrot.slane %v1078_v37, 1  ;;  %v15251_v55 = vld [vmem:[%s20734_s1 + $0x488] ss:$16 sps:$4 sm:$0xff]   ;;  %v272_v60 = vshrl.u32 %v17289_v2, 16  ;;  %v20834_v34 = vsel %vm17395_vm3, 4294967295, %v20833_v34 }
  0x75   :  { %2351 = vmatprep.subr.bf16.mxu1 %v15244_v5  ;;  %v251_v50 = vsel %vm17093_vm14, %v243_v30, %v250_v35  ;;  %v17349_v0 = vsel %vm1025_vm0, %v1084_v26, %v17326_v48  ;;  %v266_v30 = vshll.u32 %v143_v62, 16  ;;  %20835 = vst [vmem:[#allocation19_spill] sm:$0xff] %v20834_v34  ;;  %v440_v34 = vshrl.u32 %v13221_v13, 16 }
  0x76   :  { %v17336_v56 = vcombine.high %v233_v25, %v251_v50  ;;  %v17338_v58 = vcombine.low %v233_v25, %v251_v50  ;;  %v17354_v5 = vsel %vm1025_vm0, %v1076_v36, %v17330_v54  ;;  %2028 = vmatprep.mubr.bf16.mxu0 %v17349_v0  ;;  %v17371_v19 = vrot.slane %v272_v60, 7  ;;  %v15257_v25 = vld [vmem:[%s20734_s1 + $0x468] ss:$16 sps:$4 sm:$0xff]   ;;  %v346_v60 = vld [vmem:[#allocation2 + $0x80] sm:$0x22] }
  0x77   :  { %2231 = vmatpush1.bf16.msra.mxu0 %v15239_v3  ;;  %v1100_v3 = vor.u32 %v1098_v32, %v17229_v51  ;;  %v259_v51 = vor.u32 %v257_v53, %v256_v59  ;;  %v261_v36 = vrot.slane %v17281_v22, 4  ;;  %v17414_v22 = vld [vmem:[%s20733_s0 + $0x80] sm:$0xff]  ;;  %v20836_v59 = vmov 0 }
  0x78   :  { %2232 = vmatprep.subr.bf16.mxu0 %v15247_v20  ;;  %2352 = vmatpush1.bf16.msra.mxu1 %v15242_v11  ;;  %20828 = vst [vmem:[#allocation18_spill] sm:$0xff] %v17338_v58  ;;  %v1102_v10 = vshll.u32 %v17336_v56, 16  ;;  %v1092_v11 = vor.u32 %v1090_v40, %v17231_v52  ;;  %v1094_v12 = vshll.u32 %v17338_v58, 16  ;;  %v1114_v52 = vshrl.u32 %v17279_v21, 16 }
  0x79   :  { %2353 = vmatprep.subr.bf16.mxu1 %v15250_v33  ;;  %v263_v20 = vshrl.u32 %v143_v62, 16  ;;  %v260_v27 = vsel %vm17093_vm14, %v252_v41, %v259_v51  ;;  %v15262_v33 = vld [vmem:[%s20734_s1 + $0x66c] ss:$16 sps:$4 sm:$0xff]   ;;  %v277_v35 = vor.u32 %v275_v7, %v17371_v19  ;;  %v284_v41 = vshll.u32 %v145_v14, 16  ;;  %v15260_v62 = vld [vmem:[%s20734_s1 + $0x668] ss:$16 sps:$4 sm:$0xff]  }
  0x7a   :  { %2029 = vmatmul.mubr.bf16.gmra.mxu0 %v17354_v5  ;;  %v1104_v2 = vrot.slane %v1102_v10, 1  ;;  %v1096_v26 = vrot.slane %v1094_v12, 1  ;;  %v1130_v43 = vshrl.u32 %v17336_v56, 16  ;;  %v20837_v59 = vsel %vm17428_vm10, 4294967295, %v20836_v59  ;;  %v13217_v10 = vld [vmem:[%s20733_s0 + $0x90] sm:$0xff] }
  0x7b   :  { %2233 = vmatpush1.bf16.msra.mxu0 %v15245_v1  ;;  %v265_v37 = vrot.slane %v263_v20, 7  ;;  %v281_v1 = vshrl.u32 %v145_v14, 16  ;;  %v278_v47 = vsel %vm17093_vm14, %v270_v18, %v277_v35  ;;  %20838 = vst [vmem:[#allocation20_spill] sm:$0xff] %v20837_v59  ;;  %v15268_v12 = vld [vmem:[%s20734_s1 + $0x64c] ss:$16 sps:$4 sm:$0xff]   ;;  %v383_v35 = vshrl.u32 %v17414_v22, 16 }
  0x7c   :  { %2234 = vmatprep.subr.bf16.mxu0 %v15253_v46  ;;  %2354 = vmatpush1.bf16.msra.mxu1 %v15248_v38  ;;  %v124_v38 = vld [vmem:[#allocation2 + $0x80] sm:$0x11]  ;;  %v17405_v39 = vsel %vm1025_vm0, %v1100_v3, %v1104_v2  ;;  %v17408_v40 = vsel %vm1025_vm0, %v1092_v11, %v1096_v26  ;;  %v15265_v46 = vld [vmem:[%s20734_s1 + $0x44c] ss:$16 sps:$4 sm:$0xff]   ;;  %v1116_v3 = vor.u32 %v1114_v52, %v17326_v48  ;;  %v15263_v11 = vld [vmem:[%s20734_s1 + $0x448] ss:$16 sps:$4 sm:$0xff]  }
  0x7d   :  { %2355 = vmatprep.subr.bf16.mxu1 %v15256_v63  ;;  %2149 = vmatprep.mubr.bf16.mxu1 %v17405_v39  ;;  %v268_v50 = vor.u32 %v266_v30, %v265_v37  ;;  %v279_v53 = vrot.slane %v265_v37, 4  ;;  %v17436_v63 = vcombine.high %v260_v27, %v278_v47  ;;  %v17439_v7 = vcombine.low %v260_v27, %v278_v47  ;;  %v15266_v18 = vld [vmem:[%s20734_s1 + $0x648] ss:$16 sps:$4 sm:$0xff]   ;;  %v15271_v30 = vld [vmem:[%s20734_s1 + $0x42c] ss:$16 sps:$4 sm:$0xff]  }
  0x7e   :  { %2150 = vmatmul.mubr.bf16.gmra.mxu1 %v17408_v40  ;;  %v17454_v14 = vor.u32 %v1130_v43, %v1104_v2  ;;  %v125_v27 = vsel %vm17395_vm3, 0, %v124_v38  ;;  %v349_v37 = vld [vmem:[#allocation2 + $0x38] sm:$0x22]  ;;  %v13216_v43 = vld [vmem:[%s20733_s0 + $0x88] sm:$0xff]  ;;  %v385_v47 = vrot.slane %v383_v35, 6 }
  0x7f   :  { %2235 = vmatpush1.bf16.msra.mxu0 %v15251_v55  ;;  %v17422_v55 = vrot.slane %v281_v1, 7  ;;  %20839 = vst [vmem:[#allocation21_spill] sm:$0xff] %v17436_v63  ;;  %20840 = vst [vmem:[#allocation22_spill] sm:$0xff] %v17439_v7  ;;  %v269_v48 = vsel %vm17093_vm14, %v261_v36, %v268_v50  ;;  %v1118_v52 = vshll.u32 %v17436_v63, 16  ;;  %v1110_v24 = vshll.u32 %v17439_v7, 16 }
  0x80   :  { %2236 = vmatprep.subr.bf16.mxu0 %v15259_v16  ;;  %2356 = vmatpush1.bf16.msra.mxu1 %v15254_v9  ;;  %v1106_v9 = vshrl.u32 %v17283_v23, 16  ;;  %v1122_v16 = vshrl.u32 %v17338_v58, 16  ;;  %126 = vst [vmem:[#allocation2 + $0x80] sm:$0x11] %v125_v27  ;;  %v127_v36 = vld [vmem:[#allocation2 + $0x38] sm:$0x11] }
  0x81   :  { %2357 = vmatprep.subr.bf16.mxu1 %v15262_v33  ;;  %v286_v51 = vor.u32 %v284_v41, %v17422_v55  ;;  %v347_v33 = vsel %vm17428_vm10, 0, %v346_v60  ;;  %v15269_v1 = vld [vmem:[%s20734_s1 + $0x428] ss:$16 sps:$4 sm:$0xff]   ;;  %v17482_v38 = vrot.slane %v1118_v52, 1  ;;  %v17486_v41 = vrot.slane %v1110_v24, 1 }
  0x82   :  { %v1108_v20 = vor.u32 %v1106_v9, %v17330_v54  ;;  %v1124_v54 = vor.u32 %v1122_v16, %v1096_v26  ;;  %348 = vst [vmem:[#allocation2 + $0x80] sm:$0x22] %v347_v33  ;;  %v386_v50 = vshll.u32 %v17414_v22, 16  ;;  %v403_v60 = vshll.u32 %v13217_v10, 16  ;;  %v15272_v9 = vld [vmem:[%s20734_s1 + $0x628] ss:$16 sps:$4 sm:$0xff]  }
  0x83   :  { %2237 = vmatpush1.bf16.msra.mxu0 %v15257_v25  ;;  %v287_v32 = vsel %vm17093_vm14, %v279_v53, %v286_v51  ;;  %v400_v53 = vshrl.u32 %v13217_v10, 16  ;;  %v15277_v51 = vld [vmem:[%s20734_s1 + $0x40c] ss:$16 sps:$4 sm:$0xff]   ;;  %v15278_v2 = vld [vmem:[%s20734_s1 + $0x608] ss:$16 sps:$4 sm:$0xff]  }
  0x84   :  { %2238 = vmatprep.subr.bf16.mxu0 %v15265_v46  ;;  %2358 = vmatpush1.bf16.msra.mxu1 %v15260_v62  ;;  %v17484_v25 = vcombine.high %v269_v48, %v287_v32  ;;  %v17488_v26 = vcombine.low %v269_v48, %v287_v32  ;;  %v15274_v46 = vld [vmem:[%s20734_s1 + $0x62c] ss:$16 sps:$4 sm:$0xff]   ;;  %v17513_v22 = vsel %vm1025_vm0, %v1108_v20, %v17486_v41  ;;  %v388_v16 = vrot.slane %v386_v50, 7  ;;  %v15275_v20 = vld [vmem:[%s20734_s1 + $0x408] ss:$16 sps:$4 sm:$0xff]  }
  0x85   :  { %2359 = vmatprep.subr.bf16.mxu1 %v15268_v12  ;;  %v17508_v12 = vsel %vm1025_vm0, %v1116_v3, %v17482_v38  ;;  %v288_v3 = vrot.slane %v17371_v19, 4  ;;  %v402_v52 = vrot.slane %v400_v53, 6  ;;  %v405_v24 = vrot.slane %v403_v60, 7  ;;  %v15280_v33 = vld [vmem:[%s20734_s1 + $0x60c] ss:$16 sps:$4 sm:$0xff]  }
  0x86   :  { %20843 = vst [vmem:[#allocation23_spill] sm:$0xff] %v17484_v25  ;;  %20844 = vst [vmem:[#allocation24_spill] sm:$0xff] %v17488_v26  ;;  %v1134_v48 = vshll.u32 %v17484_v25, 16  ;;  %v1126_v10 = vshll.u32 %v17488_v26, 16  ;;  %2038 = vmatprep.mubr.bf16.mxu0 %v17508_v12  ;;  %v20847_v19 = vmov 0  ;;  %v128_v32 = vsel %vm17395_vm3, 0, %v127_v36 }
  0x87   :  { %2239 = vmatpush1.bf16.msra.mxu0 %v15263_v11  ;;  %v13218_v11 = vld [vmem:[%s20733_s0 + $0x98] sm:$0xff]  ;;  %v20848_v19 = vsel %vm17534_vm12, 4294967295, %v20847_v19  ;;  %v389_v35 = vor.u32 %v388_v16, %v385_v47  ;;  %v17545_v50 = vor.u32 %v405_v24, %v402_v52  ;;  %v20850_v53 = vmov 0  ;;  %129 = vst [vmem:[#allocation2 + $0x38] sm:$0x11] %v128_v32 }
  0x88   :  { %2240 = vmatprep.subr.bf16.mxu0 %v15271_v30  ;;  %2360 = vmatpush1.bf16.msra.mxu1 %v15266_v18  ;;  %v17527_v27 = vrot.slane %v1134_v48, 1  ;;  %v17530_v30 = vrot.slane %v1126_v10, 1  ;;  %20849 = vst [vmem:[#allocation25_spill] sm:$0xff] %v20848_v19  ;;  %v350_v18 = vsel %vm17428_vm10, 0, %v349_v37  ;;  %v20851_v53 = vsel %vm17551_vm9, 4294967295, %v20850_v53 }
  0x89   :  { %2039 = vmatmul.mubr.bf16.gmra.mxu0 %v17513_v22  ;;  %2361 = vmatprep.subr.bf16.mxu1 %v15274_v46  ;;  %20852 = vst [vmem:[#allocation26_spill] sm:$0xff] %v20851_v53  ;;  %v1146_v36 = vshrl.u32 %v17436_v63, 16  ;;  %351 = vst [vmem:[#allocation2 + $0x38] sm:$0x22] %v350_v18  ;;  %v391_v37 = vshrl.u32 %v13216_v43, 16  ;;  %v13219_v46 = vld [vmem:[%s20733_s0 + $0xa0] sm:$0xff] }
  0x8a   :  { %v15283_v47 = vld [vmem:[%s20734_s1 + $0x5ec] ss:$16 sps:$4 sm:$0xff]   ;;  %v17568_v60 = vsel %vm1025_vm0, %v17454_v14, %v17527_v27  ;;  %v17572_v62 = vsel %vm1025_vm0, %v1124_v54, %v17530_v30  ;;  %v333_v48 = vld [vmem:[#allocation2 + $0x80] sm:$0x11]  ;;  %v394_v10 = vshll.u32 %v13216_v43, 16  ;;  %v398_v52 = vrot.slane %v389_v35, 4 }
  0x8b   :  { %2241 = vmatpush1.bf16.msra.mxu0 %v15269_v1  ;;  %v410_v1 = vshrl.u32 %v13218_v11, 16  ;;  %2159 = vmatprep.mubr.bf16.mxu1 %v17568_v60  ;;  %v334_v16 = vsel %vm17029_vm7, %v288_v3, %v333_v48  ;;  %v563_v24 = vld [vmem:[#allocation2 + $0x80] sm:$0xee]  ;;  %v393_v32 = vrot.slane %v391_v37, 6  ;;  %v413_v18 = vshll.u32 %v13218_v11, 16  ;;  %v13220_v48 = vld [vmem:[%s20733_s0 + $0xa8] sm:$0xff] }
  0x8c   :  { %2242 = vmatprep.subr.bf16.mxu0 %v15277_v51  ;;  %2362 = vmatpush1.bf16.msra.mxu1 %v15272_v9  ;;  %335 = vst [vmem:[#allocation2 + $0x80] sm:$0x11] %v334_v16  ;;  %v564_v14 = vsel %vm17551_vm9, %v389_v35, %v563_v24  ;;  %v396_v54 = vrot.slane %v394_v10, 7  ;;  %v1162_v51 = vshrl.u32 %v17484_v25, 16  ;;  %v15286_v11 = vld [vmem:[%s20734_s1 + $0x7ec] ss:$16 sps:$4 sm:$0xff]   ;;  %v407_v3 = vsel %vm17534_vm12, %v398_v52, %v17545_v50 }
  0x8d   :  { %2160 = vmatmul.mubr.bf16.gmra.mxu1 %v17572_v62  ;;  %v412_v43 = vrot.slane %v410_v1, 6  ;;  %2363 = vmatprep.subr.bf16.mxu1 %v15280_v33  ;;  %v289_v9 = vrot.slane %v17422_v55, 4  ;;  %565 = vst [vmem:[#allocation2 + $0x80] sm:$0xee] %v564_v14  ;;  %v415_v35 = vrot.slane %v413_v18, 7  ;;  %v1138_v37 = vshrl.u32 %v17439_v7, 16 }
  0x8e   :  { %v15281_v33 = vld [vmem:[%s20734_s1 + $0x5e8] ss:$16 sps:$4 sm:$0xff]   ;;  %v397_v10 = vor.u32 %v396_v54, %v393_v32  ;;  %v1154_v55 = vshrl.u32 %v17488_v26, 16  ;;  %v420_v1 = vshrl.u32 %v13219_v46, 16  ;;  %v15289_v52 = vld [vmem:[%s20734_s1 + $0x5cc] ss:$16 sps:$4 sm:$0xff]   ;;  %v17606_v24 = vor.u32 %v1146_v36, %v17482_v38 }
  0x8f   :  { %2243 = vmatpush1.bf16.msra.mxu0 %v15275_v20  ;;  %v15284_v16 = vld [vmem:[%s20734_s1 + $0x7e8] ss:$16 sps:$4 sm:$0xff]   ;;  %v17608_v20 = vor.u32 %v415_v35, %v412_v43  ;;  %v418_v18 = vrot.slane %v17545_v50, 4  ;;  %v423_v32 = vshll.u32 %v13219_v46, 16  ;;  %v15292_v54 = vld [vmem:[%s20734_s1 + $0x7cc] ss:$16 sps:$4 sm:$0xff]   ;;  %v17621_v35 = vor.u32 %v1162_v51, %v17527_v27 }
  0x90   :  { %2244 = vmatprep.subr.bf16.mxu0 %v15283_v47  ;;  %v13222_v47 = vld [vmem:[%s20733_s0 + $0xb8] sm:$0xff]  ;;  %2364 = vmatpush1.bf16.msra.mxu1 %v15278_v2  ;;  %v408_v36 = vrot.slane %v397_v10, 4  ;;  %v17624_v50 = vor.u32 %v1138_v37, %v17486_v41  ;;  %v422_v46 = vrot.slane %v420_v1, 6  ;;  %v17637_v27 = vor.u32 %v1154_v55, %v17530_v30  ;;  %v360_v23 = vld [vmem:[#allocation2 + $0x28] sm:$0x22] }
  0x91   :  { %v15287_v14 = vld [vmem:[%s20734_s1 + $0x5c8] ss:$16 sps:$4 sm:$0xff]   ;;  %2365 = vmatprep.subr.bf16.mxu1 %v15286_v11  ;;  %v425_v59 = vrot.slane %v423_v32, 7  ;;  %v443_v51 = vshll.u32 %v13221_v13, 16  ;;  %v430_v11 = vshrl.u32 %v13220_v48, 16  ;;  %v433_v1 = vshll.u32 %v13220_v48, 16 }
  0x92   :  { %v336_v38 = vld [vmem:[#allocation2 + $0x38] sm:$0x11]  ;;  %v566_v43 = vld [vmem:[#allocation2 + $0x38] sm:$0xee]  ;;  %v417_v41 = vsel %vm17534_vm12, %v408_v36, %v17608_v20  ;;  %v450_v32 = vshrl.u32 %v13222_v47, 16  ;;  %v428_v55 = vrot.slane %v17608_v20, 4 }
  0x93   :  { %v337_v2 = vsel %vm17029_vm7, %v289_v9, %v336_v38  ;;  %v567_v28 = vsel %vm17551_vm9, %v397_v10, %v566_v43  ;;  %2245 = vmatpush2.bf16.msra.mxu0 %v15281_v33  ;;  %v15290_v26 = vld [vmem:[%s20734_s1 + $0x7c8] ss:$16 sps:$4 sm:$0xff]   ;;  %v17642_v9 = vld [vmem:[%s20733_s0 + $0xc0] sm:$0xff]  ;;  %v15295_v37 = vld [vmem:[%s20734_s1 + $0x5ac] ss:$16 sps:$4 sm:$0xff]   ;;  %v426_v33 = vor.u32 %v425_v59, %v422_v46  ;;  %v442_v10 = vrot.slane %v440_v34, 6 }
  0x94   :  { %338 = vst [vmem:[#allocation2 + $0x38] sm:$0x11] %v337_v2  ;;  %568 = vst [vmem:[#allocation2 + $0x38] sm:$0xee] %v567_v28  ;;  %2246 = vmatprep.subr.bf16.mxu0 %v15289_v52  ;;  %2366 = vmatpush2.bf16.msra.mxu1 %v15284_v16  ;;  %v15298_v13 = vld [vmem:[%s20734_s1 + $0x7ac] ss:$16 sps:$4 sm:$0xff]  }
  0x95   :  { %v610_v28 = vld [vmem:[#allocation2 + $0x80] sm:$0xff]  ;;  %v445_v30 = vrot.slane %v443_v51, 7  ;;  %v432_v38 = vrot.slane %v430_v11, 6  ;;  %v453_v36 = vshll.u32 %v13222_v47, 16  ;;  %2367 = vmatprep.subr.bf16.mxu1 %v15292_v54  ;;  %v427_v34 = vsel %vm17534_vm12, %v418_v18, %v426_v33  ;;  %v15293_v48 = vld [vmem:[%s20734_s1 + $0x5a8] ss:$16 sps:$4 sm:$0xff]  }
  0x96   :  { %v17651_v52 = vcombine.high %v610_v28, %v407_v3  ;;  %v17653_v43 = vcombine.low %v610_v28, %v407_v3  ;;  %v438_v59 = vrot.slane %v426_v33, 4  ;;  %v435_v46 = vrot.slane %v433_v1, 7  ;;  %v15301_v3 = vld [vmem:[%s20734_s1 + $0x58c] ss:$16 sps:$4 sm:$0xff]   ;;  %v15296_v51 = vld [vmem:[%s20734_s1 + $0x7a8] ss:$16 sps:$4 sm:$0xff]  }
  0x97   :  { %2247 = vmatpush2.bf16.msra.mxu0 %v15287_v14  ;;  %v17660_v16 = vor.u32 %v445_v30, %v442_v10  ;;  %v452_v20 = vrot.slane %v450_v32, 6  ;;  %v455_v2 = vrot.slane %v453_v36, 7  ;;  %v460_v54 = vshrl.u32 %v17642_v9, 16  ;;  %v15304_v1 = vld [vmem:[%s20734_s1 + $0x78c] ss:$16 sps:$4 sm:$0xff]  }
  0x98   :  { %20853 = vst [vmem:[#allocation27_spill] sm:$0xff] %v17651_v52  ;;  %20854 = vst [vmem:[#allocation28_spill] sm:$0xff] %v17653_v43  ;;  %2248 = vmatprep.subr.bf16.mxu0 %v15295_v37  ;;  %v1150_v47 = vshll.u32 %v17651_v52, 16  ;;  %v1142_v18 = vshll.u32 %v17653_v43, 16  ;;  %v1178_v14 = vshrl.u32 %v17651_v52, 16  ;;  %2368 = vmatpush2.bf16.msra.mxu1 %v15290_v26  ;;  %v436_v37 = vor.u32 %v435_v46, %v432_v38 }
  0x99   :  { %v447_v11 = vsel %vm17534_vm12, %v438_v59, %v17660_v16  ;;  %v17675_v33 = vor.u32 %v455_v2, %v452_v20  ;;  %v1170_v10 = vshrl.u32 %v17653_v43, 16  ;;  %2369 = vmatprep.subr.bf16.mxu1 %v15298_v13  ;;  %v15299_v46 = vld [vmem:[%s20734_s1 + $0x588] ss:$16 sps:$4 sm:$0xff]   ;;  %v15311_v2 = vld [vmem:[%s20734_s1 + $0x56c] ss:$16 sps:$4 sm:$0xff]  }
  0x9a   :  { %v1152_v32 = vrot.slane %v1150_v47, 1  ;;  %v1144_v28 = vrot.slane %v1142_v18, 1  ;;  %v17681_v30 = vcombine.high %v427_v34, %v447_v11  ;;  %v17683_v36 = vcombine.low %v427_v34, %v447_v11  ;;  %v15302_v20 = vld [vmem:[%s20734_s1 + $0x788] ss:$16 sps:$4 sm:$0xff]  }
  0x9b   :  { %v611_v26 = vld [vmem:[#allocation2 + $0x38] sm:$0xff]  ;;  %2249 = vmatpush2.bf16.msra.mxu0 %v15293_v48  ;;  %v437_v59 = vsel %vm17534_vm12, %v428_v55, %v436_v37  ;;  %v448_v13 = vrot.slane %v436_v37, 4  ;;  %v468_v58 = vrot.slane %v17675_v33, 4 }
  0x9c   :  { %20855 = vst [vmem:[#allocation29_spill] sm:$0xff] %v17681_v30  ;;  %20856 = vst [vmem:[#allocation30_spill] sm:$0xff] %v17683_v36  ;;  %v17685_v53 = vcombine.high %v611_v26, %v417_v41  ;;  %v17687_v38 = vcombine.low %v611_v26, %v417_v41  ;;  %2250 = vmatprep.subr.bf16.mxu0 %v15301_v3  ;;  %v17699_v34 = vsel %vm1025_vm0, %v17606_v24, %v1152_v32  ;;  %v15309_v18 = vld [vmem:[%s20734_s1 + $0x568] ss:$16 sps:$4 sm:$0xff]  }
  0x9d   :  { %v17703_v41 = vsel %vm1025_vm0, %v17624_v50, %v1144_v28  ;;  %v1180_v48 = vor.u32 %v1178_v14, %v1152_v32  ;;  %v1182_v55 = vshll.u32 %v17681_v30, 16  ;;  %2370 = vmatpush2.bf16.msra.mxu1 %v15296_v51  ;;  %2048 = vmatprep.mubr.bf16.mxu0 %v17699_v34  ;;  %v457_v24 = vsel %vm17534_vm12, %v448_v13, %v17675_v33  ;;  %v13225_v32 = vld [vmem:[%s20733_s0 + $0xd0] sm:$0xff] }
  0x9e   :  { %20857 = vst [vmem:[#allocation31_spill] sm:$0xff] %v17685_v53  ;;  %20858 = vst [vmem:[#allocation32_spill] sm:$0xff] %v17687_v38  ;;  %v1166_v3 = vshll.u32 %v17685_v53, 16  ;;  %v1158_v47 = vshll.u32 %v17687_v38, 16  ;;  %v1194_v50 = vshrl.u32 %v17685_v53, 16  ;;  %2371 = vmatprep.subr.bf16.mxu1 %v15304_v1  ;;  %2049 = vmatmul.mubr.bf16.gmra.mxu0 %v17703_v41  ;;  %v17722_v51 = vcombine.high %v437_v59, %v457_v24 }
  0x9f   :  { %v17720_v14 = vrot.slane %v1182_v55, 1  ;;  %v1172_v11 = vor.u32 %v1170_v10, %v1144_v28  ;;  %v1174_v37 = vshll.u32 %v17683_v36, 16  ;;  %v15314_v1 = vld [vmem:[%s20734_s1 + $0x76c] ss:$16 sps:$4 sm:$0xff]   ;;  %v17731_v45 = vcombine.low %v437_v59, %v457_v24  ;;  %2251 = vmatpush2.bf16.msra.mxu0 %v15299_v46  ;;  %v15312_v28 = vld [vmem:[%s20734_s1 + $0x768] ss:$16 sps:$4 sm:$0xff]  }
  0xa0   :  { %20859 = vst [vmem:[#allocation33_spill] sm:$0xff] %v17722_v51  ;;  %v1168_v26 = vrot.slane %v1166_v3, 1  ;;  %v1160_v13 = vrot.slane %v1158_v47, 1  ;;  %v1186_v55 = vshrl.u32 %v17687_v38, 16  ;;  %v13224_v10 = vld [vmem:[%s20733_s0 + $0xc8] sm:$0xff]  ;;  %v1198_v3 = vshll.u32 %v17722_v51, 16  ;;  %2252 = vmatprep.subr.bf16.mxu0 %v15311_v2 }
  0xa1   :  { %20860 = vst [vmem:[#allocation34_spill] sm:$0xff] %v17731_v45  ;;  %v17742_v43 = vsel %vm1025_vm0, %v1180_v48, %v17720_v14  ;;  %v17745_v47 = vrot.slane %v1174_v37, 1  ;;  %v458_v59 = vrot.slane %v17660_v16, 4  ;;  %2372 = vmatpush2.bf16.msra.mxu1 %v15302_v20  ;;  %v15317_v46 = vld [vmem:[%s20734_s1 + $0x54c] ss:$16 sps:$4 sm:$0xff]   ;;  %v462_v38 = vrot.slane %v460_v54, 6 }
  0xa2   :  { %v17753_v24 = vsel %vm1025_vm0, %v17621_v35, %v1168_v26  ;;  %v17757_v48 = vsel %vm1025_vm0, %v17637_v27, %v1160_v13  ;;  %2058 = vmatprep.mubr.bf16.mxu0 %v17742_v43  ;;  %v1196_v37 = vor.u32 %v1194_v50, %v1168_v26  ;;  %v15315_v16 = vld [vmem:[%s20734_s1 + $0x548] ss:$16 sps:$4 sm:$0xff]   ;;  %v15320_v20 = vld [vmem:[%s20734_s1 + $0x74c] ss:$16 sps:$4 sm:$0xff]   ;;  %v1200_v35 = vrot.slane %v1198_v3, 1  ;;  %2373 = vmatprep.subr.bf16.mxu1 %v15314_v1 }
  0xa3   :  { %2169 = vmatprep.mubr.bf16.mxu1 %v17753_v24  ;;  %v1188_v2 = vor.u32 %v1186_v55, %v1160_v13  ;;  %v1190_v53 = vshll.u32 %v17731_v45, 16  ;;  %v463_v27 = vshll.u32 %v17642_v9, 16  ;;  %v15318_v54 = vld [vmem:[%s20734_s1 + $0x748] ss:$16 sps:$4 sm:$0xff]   ;;  %v15323_v50 = vld [vmem:[%s20734_s1 + $0x52c] ss:$16 sps:$4 sm:$0xff]   ;;  %v17778_v26 = vsel %vm1025_vm0, %v1172_v11, %v17745_v47  ;;  %2253 = vmatpush2.bf16.msra.mxu0 %v15309_v18 }
  0xa4   :  { %2170 = vmatmul.mubr.bf16.gmra.mxu1 %v17757_v48  ;;  %v480_v13 = vshrl.u32 %v13225_v32, 16  ;;  %v483_v55 = vshll.u32 %v13225_v32, 16  ;;  %v1210_v3 = vshrl.u32 %v17681_v30, 16  ;;  %v13226_v9 = vld [vmem:[%s20733_s0 + $0xd8] sm:$0xff]  ;;  %v17785_v1 = vsel %vm1025_vm0, %v1196_v37, %v1200_v35  ;;  %2254 = vmatprep.subr.bf16.mxu0 %v15317_v46 }
  0xa5   :  { %v17787_v52 = vrot.slane %v1190_v53, 1  ;;  %v465_v7 = vrot.slane %v463_v27, 7  ;;  %v470_v25 = vshrl.u32 %v13224_v10, 16  ;;  %2374 = vmatpush2.bf16.msra.mxu1 %v15312_v28  ;;  %v15326_v11 = vld [vmem:[%s20734_s1 + $0x72c] ss:$16 sps:$4 sm:$0xff]   ;;  %2179 = vmatprep.mubr.bf16.mxu1 %v17785_v1  ;;  %v473_v18 = vshll.u32 %v13224_v10, 16 }
  0xa6   :  { %v482_v32 = vrot.slane %v480_v13, 6  ;;  %v485_v30 = vrot.slane %v483_v55, 7  ;;  %2375 = vmatprep.subr.bf16.mxu1 %v15320_v20  ;;  %2059 = vmatmul.mubr.bf16.gmra.mxu0 %v17778_v26  ;;  %v490_v37 = vshrl.u32 %v13226_v9, 16  ;;  %v13227_v27 = vld [vmem:[%s20733_s0 + $0xe0] sm:$0xff]  ;;  %v15321_v13 = vld [vmem:[%s20734_s1 + $0x528] ss:$16 sps:$4 sm:$0xff]  }
  0xa7   :  { %v17797_v53 = vsel %vm1025_vm0, %v1188_v2, %v17787_v52  ;;  %v466_v28 = vor.u32 %v465_v7, %v462_v38  ;;  %v472_v46 = vrot.slane %v470_v25, 6  ;;  %v475_v10 = vrot.slane %v473_v18, 7  ;;  %2255 = vmatpush2.bf16.msra.mxu0 %v15315_v16  ;;  %v15324_v7 = vld [vmem:[%s20734_s1 + $0x728] ss:$16 sps:$4 sm:$0xff]   ;;  %v15329_v16 = vld [vmem:[%s20734_s1 + $0x50c] ss:$16 sps:$4 sm:$0xff]  }
  0xa8   :  { %v17805_v33 = vor.u32 %v485_v30, %v482_v32  ;;  %v493_v20 = vshll.u32 %v13226_v9, 16  ;;  %v1226_v55 = vshrl.u32 %v17722_v51, 16  ;;  %v492_v2 = vrot.slane %v490_v37, 6  ;;  %v13229_v30 = vld [vmem:[%s20733_s0 + $0xf0] sm:$0xff]  ;;  %2256 = vmatprep.subr.bf16.mxu0 %v15323_v50 }
  0xa9   :  { %v467_v25 = vsel %vm17534_vm12, %v458_v59, %v466_v28  ;;  %v478_v38 = vrot.slane %v466_v28, 4  ;;  %v1202_v63 = vshrl.u32 %v17683_v36, 16  ;;  %2376 = vmatpush2.bf16.msra.mxu1 %v15318_v54  ;;  %v1212_v9 = vor.u32 %v1210_v3, %v17720_v14  ;;  %v15332_v59 = vld [vmem:[%s20734_s1 + $0x70c] ss:$16 sps:$4 sm:$0xff]   ;;  %v15327_v14 = vld [vmem:[%s20734_s1 + $0x508] ss:$16 sps:$4 sm:$0xff]  }
  0xaa   :  { %v476_v32 = vor.u32 %v475_v10, %v472_v46  ;;  %v495_v18 = vrot.slane %v493_v20, 7  ;;  %v17821_v51 = vor.u32 %v1226_v55, %v1200_v35  ;;  %2377 = vmatprep.subr.bf16.mxu1 %v15326_v11  ;;  %v1218_v28 = vshrl.u32 %v17731_v45, 16 }
  0xab   :  { %v487_v54 = vsel %vm17534_vm12, %v478_v38, %v17805_v33  ;;  %v1204_v50 = vor.u32 %v1202_v63, %v17745_v47  ;;  %v500_v37 = vshrl.u32 %v13227_v27, 16  ;;  %2257 = vmatpush2.bf16.msra.mxu0 %v15321_v13  ;;  %v15330_v63 = vld [vmem:[%s20734_s1 + $0x708] ss:$16 sps:$4 sm:$0xff]   ;;  %v15335_v47 = vld [vmem:[%s20734_s1 + $0xe4] ss:$16 sps:$4 sm:$0xff]   ;;  %v498_v20 = vrot.slane %v17805_v33, 4 }
  0xac   :  { %2180 = vmatmul.mubr.bf16.gmra.mxu1 %v17797_v53  ;;  %v17835_v35 = vcombine.high %v467_v25, %v487_v54  ;;  %v477_v3 = vsel %vm17534_vm12, %v468_v58, %v476_v32  ;;  %v488_v11 = vrot.slane %v476_v32, 4  ;;  %v17839_v46 = vor.u32 %v495_v18, %v492_v2  ;;  %2258 = vmatprep.subr.bf16.mxu0 %v15329_v16  ;;  %v15338_v58 = vld [vmem:[%s20734_s1 + $0x2e4] ss:$16 sps:$4 sm:$0xff]  }
  0xad   :  { %v17847_v10 = vcombine.low %v467_v25, %v487_v54  ;;  %v502_v55 = vrot.slane %v500_v37, 6  ;;  %v503_v38 = vshll.u32 %v13227_v27, 16  ;;  %2378 = vmatpush2.bf16.msra.mxu1 %v15324_v7  ;;  %v520_v32 = vshrl.u32 %v13229_v30, 16 }
  0xae   :  { %20861 = vst [vmem:[#allocation35_spill] sm:$0xff] %v17835_v35  ;;  %v1214_v13 = vshll.u32 %v17835_v35, 16  ;;  %v497_v2 = vsel %vm17534_vm12, %v488_v11, %v17839_v46  ;;  %v523_v18 = vshll.u32 %v13229_v30, 16  ;;  %2379 = vmatprep.subr.bf16.mxu1 %v15332_v59  ;;  %v1220_v37 = vor.u32 %v1218_v28, %v17787_v52  ;;  %v13230_v52 = vld [vmem:[%s20733_s0 + $0xf8] sm:$0xff] }
  0xaf   :  { %v17857_v25 = vcombine.high %v477_v3, %v497_v2  ;;  %v1206_v33 = vshll.u32 %v17847_v10, 16  ;;  %v17860_v27 = vcombine.low %v477_v3, %v497_v2  ;;  %v505_v7 = vrot.slane %v503_v38, 7  ;;  %2259 = vmatpush2.bf16.msra.mxu0 %v15327_v14 }
  0xb0   :  { %v1216_v54 = vrot.slane %v1214_v13, 1  ;;  %v522_v11 = vrot.slane %v520_v32, 6  ;;  %v525_v45 = vrot.slane %v523_v18, 7  ;;  %v13228_v13 = vld [vmem:[%s20733_s0 + $0xe8] sm:$0xff]  ;;  %3156 = vmatprep.subr.bf16.mxu0 %v15335_v47  ;;  %v1242_v32 = vshrl.u32 %v17835_v35, 16 }
  0xb1   :  { %20862 = vst [vmem:[#allocation36_spill] sm:$0xff] %v17860_v27  ;;  %v1230_v59 = vshll.u32 %v17857_v25, 16  ;;  %v1208_v3 = vrot.slane %v1206_v33, 1  ;;  %v1222_v38 = vshll.u32 %v17860_v27, 16  ;;  %v506_v2 = vor.u32 %v505_v7, %v502_v55  ;;  %2380 = vmatpush2.bf16.msra.mxu1 %v15330_v63 }
  0xb2   :  { %v17884_v28 = vsel %vm1025_vm0, %v1212_v9, %v1216_v54  ;;  %v17886_v14 = vor.u32 %v525_v45, %v522_v11  ;;  %3277 = vmatprep.subr.bf16.mxu1 %v15338_v58  ;;  %v510_v9 = vshrl.u32 %v13228_v13, 16  ;;  %v513_v47 = vshll.u32 %v13228_v13, 16 }
  0xb3   :  { %2068 = vmatprep.mubr.bf16.mxu0 %v17884_v28  ;;  %v1232_v55 = vrot.slane %v1230_v59, 1  ;;  %v17891_v18 = vsel %vm1025_vm0, %v1204_v50, %v1208_v3  ;;  %v1224_v33 = vrot.slane %v1222_v38, 1  ;;  %v507_v7 = vsel %vm17534_vm12, %v498_v20, %v506_v2  ;;  %v357_v38 = vld [vmem:[#allocation2 + $0x50] sm:$0x22] }
  0xb4   :  { %2069 = vmatmul.mubr.bf16.gmra.mxu0 %v17891_v18  ;;  %v518_v63 = vrot.slane %v506_v2, 4  ;;  %v530_v45 = vshrl.u32 %v13230_v52, 16  ;;  %v20868_v58 = vmov 0  ;;  %v508_v11 = vrot.slane %v17839_v46, 4 }
  0xb5   :  { %v20869_v58 = vsel %vm17900_vm5, 4294967295, %v20868_v58  ;;  %v17906_v50 = vsel %vm1025_vm0, %v17821_v51, %v1232_v55  ;;  %v17909_v20 = vsel %vm1025_vm0, %v1220_v37, %v1224_v33  ;;  %v533_v59 = vshll.u32 %v13230_v52, 16 }
  0xb6   :  { %20870 = vst [vmem:[#allocation37_spill] sm:$0xff] %v20869_v58  ;;  %2189 = vmatprep.mubr.bf16.mxu1 %v17906_v50  ;;  %v527_v16 = vsel %vm17534_vm12, %v518_v63, %v17886_v14  ;;  %v512_v30 = vrot.slane %v510_v9, 6  ;;  %v515_v2 = vrot.slane %v513_v47, 7  ;;  %v532_v13 = vrot.slane %v530_v45, 6 }
  0xb7   :  { %2190 = vmatmul.mubr.bf16.gmra.mxu1 %v17909_v20  ;;  %v17917_v51 = vcombine.high %v507_v7, %v527_v16  ;;  %v535_v35 = vrot.slane %v533_v59, 7  ;;  %v17919_v37 = vcombine.low %v507_v7, %v527_v16  ;;  %v1234_v52 = vshrl.u32 %v17847_v10, 16 }
  0xb8   :  { %v516_v46 = vor.u32 %v515_v2, %v512_v30  ;;  %v358_v36 = vsel %vm17900_vm5, 0, %v357_v38  ;;  %v1244_v63 = vor.u32 %v1242_v32, %v1216_v54  ;;  %v1258_v47 = vshrl.u32 %v17857_v25, 16 }
  0xb9   :  { %20871 = vst [vmem:[#allocation38_spill] sm:$0xff] %v17919_v37  ;;  %v1246_v9 = vshll.u32 %v17917_v51, 16  ;;  %v1238_v45 = vshll.u32 %v17919_v37, 16  ;;  %359 = vst [vmem:[#allocation2 + $0x50] sm:$0x22] %v358_v36  ;;  %v536_v16 = vor.u32 %v535_v35, %v532_v13  ;;  %v1236_v30 = vor.u32 %v1234_v52, %v1208_v3 }
  0xba   :  { %v517_v7 = vsel %vm17534_vm12, %v508_v11, %v516_v46  ;;  %v528_v59 = vrot.slane %v516_v46, 4  ;;  %v1250_v54 = vshrl.u32 %v17860_v27, 16  ;;  %v361_v32 = vsel %vm17900_vm5, 0, %v360_v23 }
  0xbb   :  { %v1248_v38 = vrot.slane %v1246_v9, 1  ;;  %v1240_v2 = vrot.slane %v1238_v45, 1  ;;  %v538_v11 = vrot.slane %v17886_v14, 4  ;;  %362 = vst [vmem:[#allocation2 + $0x28] sm:$0x22] %v361_v32  ;;  %v20875_v23 = vmov 0 }
  0xbc   :  { %v537_v36 = vsel %vm17534_vm12, %v528_v59, %v536_v16  ;;  %v20876_v23 = vsel %vm17950_vm4, 4294967295, %v20875_v23  ;;  %v1260_v52 = vor.u32 %v1258_v47, %v1232_v55  ;;  %v539_v59 = vrot.slane %v536_v16, 4 }
  0xbd   :  { %v17940_v35 = vsel %vm1025_vm0, %v1244_v63, %v1248_v38  ;;  %v17942_v3 = vcombine.high %v517_v7, %v537_v36  ;;  %v17945_v13 = vsel %vm1025_vm0, %v1236_v30, %v1240_v2  ;;  %v17947_v46 = vcombine.low %v517_v7, %v537_v36  ;;  %20877 = vst [vmem:[#allocation41_spill] sm:$0xff] %v20876_v23 }
  0xbe   :  { %2078 = vmatprep.mubr.bf16.mxu0 %v17940_v35  ;;  %v1252_v63 = vor.u32 %v1250_v54, %v1224_v33  ;;  %v1274_v16 = vshrl.u32 %v17917_v51, 16  ;;  %v1266_v54 = vshrl.u32 %v17919_v37, 16 }
  0xbf   :  { %20873 = vst [vmem:[#allocation39_spill] sm:$0xff] %v17942_v3  ;;  %20874 = vst [vmem:[#allocation40_spill] sm:$0xff] %v17947_v46  ;;  %v1262_v14 = vshll.u32 %v17942_v3, 16  ;;  %2079 = vmatmul.mubr.bf16.gmra.mxu0 %v17945_v13  ;;  %v1254_v9 = vshll.u32 %v17947_v46, 16 }
  0xc0   :  { %v588_v45 = vld [vmem:[#allocation2 + $0x50] sm:$0x33] }
  0xc1   :  { %v1264_v30 = vrot.slane %v1262_v14, 1  ;;  %v1256_v32 = vrot.slane %v1254_v9, 1  ;;  %v589_v7 = vsel %vm17950_vm4, %v538_v11, %v588_v45  ;;  %v1276_v9 = vor.u32 %v1274_v16, %v1248_v38 }
  0xc2   :  { %590 = vst [vmem:[#allocation2 + $0x50] sm:$0x33] %v589_v7  ;;  %v591_v47 = vld [vmem:[#allocation2 + $0x28] sm:$0x33]  ;;  %v1282_v45 = vshrl.u32 %v17947_v46, 16 }
  0xc3   :  { %v17960_v36 = vsel %vm1025_vm0, %v1260_v52, %v1264_v30  ;;  %v17963_v55 = vsel %vm1025_vm0, %v1252_v63, %v1256_v32  ;;  %v592_v33 = vsel %vm17950_vm4, %v539_v59, %v591_v47  ;;  %v1290_v52 = vshrl.u32 %v17942_v3, 16 }
  0xc4   :  { %2199 = vmatprep.mubr.bf16.mxu1 %v17960_v36  ;;  %593 = vst [vmem:[#allocation2 + $0x28] sm:$0x33] %v592_v33  ;;  %v1268_v47 = vor.u32 %v1266_v54, %v1240_v2  ;;  %v1284_v38 = vor.u32 %v1282_v45, %v1256_v32 }
  0xc5   :  { %2200 = vmatmul.mubr.bf16.gmra.mxu1 %v17963_v55  ;;  %v1292_v27 = vor.u32 %v1290_v52, %v1264_v30 }
  0xc9   :  { %v756_v11 = vld [vmem:[#allocation2 + $0x50] sm:$0x33] }
  0xca   :  { %v17971_v14 = vcombine.high %v756_v11, %v756_v11  ;;  %v17974_v63 = vcombine.low %v756_v11, %v756_v11 }
  0xcb   :  { %v757_v59 = vld [vmem:[#allocation2 + $0x28] sm:$0x33] }
  0xcc   :  { %20878 = vst [vmem:[#allocation42_spill] sm:$0xff] %v17971_v14  ;;  %v1278_v7 = vshll.u32 %v17971_v14, 16  ;;  %v1270_v33 = vshll.u32 %v17974_v63, 16  ;;  %v1301_v23 = vshrl.u32 %v17971_v14, 16  ;;  %v17980_v19 = vcombine.high %v757_v59, %v757_v59 }
  0xcd   :  { %v17982_v58 = vcombine.low %v757_v59, %v757_v59  ;;  %v1298_v32 = vshrl.u32 %v17974_v63, 16 }
  0xce   :  { %v1280_v37 = vrot.slane %v1278_v7, 1  ;;  %v1272_v3 = vrot.slane %v1270_v33, 1  ;;  %v1294_v11 = vshll.u32 %v17980_v19, 16  ;;  %v1307_v46 = vshrl.u32 %v17980_v19, 16  ;;  %v15345_v33 = vld [vmem:[%s20734_s1 + $0xa0] ss:$16 sps:$4 sm:$0xff]  }
  0xcf   :  { %v1286_v16 = vshll.u32 %v17982_v58, 16 }
  0xd0   :  { %v17988_v2 = vsel %vm1025_vm0, %v1276_v9, %v1280_v37  ;;  %v17991_v54 = vsel %vm1025_vm0, %v1268_v47, %v1272_v3  ;;  %v17993_v14 = vor.u32 %v1301_v23, %v1280_v37  ;;  %v1296_v7 = vrot.slane %v1294_v11, 1  ;;  %v15347_v47 = vld [vmem:[%s20734_s1 + $0xa4] ss:$16 sps:$4 sm:$0xff]  }
  0xd1   :  { %2088 = vmatprep.mubr.bf16.mxu0 %v17988_v2  ;;  %v1288_v30 = vrot.slane %v1286_v16, 1  ;;  %v1304_v37 = vshrl.u32 %v17982_v58, 16  ;;  %v18011_v23 = vor.u32 %v1298_v32, %v1272_v3  ;;  %v15336_v3 = vld [vmem:[%s20734_s1 + $0x2e0] ss:$16 sps:$4 sm:$0xff]   ;;  %v15356_v11 = vld [vmem:[%s20734_s1 + $0x284] ss:$16 sps:$4 sm:$0xff]  }
  0xd2   :  { %2089 = vmatmul.mubr.bf16.gmra.mxu0 %v17991_v54  ;;  %v17999_v52 = vsel %vm1025_vm0, %v1292_v27, %v1296_v7  ;;  %v18005_v9 = vor.u32 %v1307_v46, %v1296_v7  ;;  %v15333_v27 = vld [vmem:[%s20734_s1 + $0xe0] ss:$16 sps:$4 sm:$0xff]   ;;  %v15341_v46 = vld [vmem:[%s20734_s1 + $0xc4] ss:$16 sps:$4 sm:$0xff]  }
  0xd3   :  { %v18002_v45 = vsel %vm1025_vm0, %v1284_v38, %v1288_v30  ;;  %2098 = vmatprep.mubr.bf16.mxu0 %v17993_v14  ;;  %2209 = vmatprep.mubr.bf16.mxu1 %v17999_v52  ;;  %v18013_v59 = vor.u32 %v1304_v37, %v1288_v30  ;;  %v15351_v38 = vld [vmem:[%s20734_s1 + $0x80] ss:$16 sps:$4 sm:$0xff]   ;;  %v15362_v16 = vld [vmem:[%s20734_s1 + $0x264] ss:$16 sps:$4 sm:$0xff]  }
  0xd4   :  { %2210 = vmatmul.mubr.bf16.gmra.mxu1 %v18002_v45  ;;  %v15360_v7 = vld [vmem:[%s20734_s1 + $0x260] ss:$16 sps:$4 sm:$0xff]   ;;  %v15368_v30 = vld [vmem:[%s20734_s1 + $0x244] ss:$16 sps:$4 sm:$0xff]  }
  0xd5   :  { %2219 = vmatprep.mubr.bf16.mxu1 %v18005_v9  ;;  %v15363_v32 = vld [vmem:[%s20734_s1 + $0x40] ss:$16 sps:$4 sm:$0xff]   ;;  %v15374_v37 = vld [vmem:[%s20734_s1 + $0x224] ss:$16 sps:$4 sm:$0xff]  }
  0xda   :  { %2099 = vmatmul.mubr.bf16.gmra.mxu0 %v18011_v23 }
  0xdb   :  { %2260 = vmatprep.mubr.bf16.mxu0 %v17203_v29  ;;  %v15339_v29 = vld [vmem:[%s20734_s1 + $0xc0] ss:$16 sps:$4 sm:$0xff]  }
  0xdc   :  { %2220 = vmatmul.mubr.bf16.gmra.mxu1 %v18013_v59 }
  0xdd   :  { %2381 = vmatprep.mubr.bf16.mxu1 %v17246_v61  ;;  %v15344_v61 = vld [vmem:[%s20734_s1 + $0x2c4] ss:$16 sps:$4 sm:$0xff]  }
  0xe2   :  { %2261 = vmatmul.mubr.bf16.vlgmr.msra.gmra.mxu0 %v17221_v42  ;;  %v15342_v42 = vld [vmem:[%s20734_s1 + $0x2c0] ss:$16 sps:$4 sm:$0xff]  }
  0xe3   :  { %2270 = vmatprep.mubr.bf16.mxu0 %v17349_v0  ;;  %3157 = vmatpush1.bf16.msra.mxu0 %v15333_v27  ;;  %v15350_v0 = vld [vmem:[%s20734_s1 + $0x2a4] ss:$16 sps:$4 sm:$0xff]   ;;  %v15372_v27 = vld [vmem:[%s20734_s1 + $0x220] ss:$16 sps:$4 sm:$0xff]  }
  0xe4   :  { %3158 = vmatprep.subr.bf16.mxu0 %v15341_v46  ;;  %2382 = vmatmul.mubr.bf16.vlgmr.msra.gmra.mxu1 %v17260_v6  ;;  %v15353_v6 = vld [vmem:[%s20734_s1 + $0x84] ss:$16 sps:$4 sm:$0xff]  }
  0xe5   :  { %2391 = vmatprep.mubr.bf16.mxu1 %v17405_v39  ;;  %3278 = vmatpush1.bf16.msra.mxu1 %v15336_v3  ;;  %v15348_v39 = vld [vmem:[%s20734_s1 + $0x2a0] ss:$16 sps:$4 sm:$0xff]   ;;  %v15380_v46 = vld [vmem:[%s20734_s1 + $0x204] ss:$16 sps:$4 sm:$0xff]  }
  0xe6   :  { %3279 = vmatprep.subr.bf16.mxu1 %v15344_v61  ;;  %v15375_v3 = vld [vmem:[%s20734_s1] ss:$16 sps:$4 sm:$0xff]  }
  0xe7   :  { %3159 = vmatpush1.bf16.msra.mxu0 %v15339_v29  ;;  %v15386_v29 = vld [vmem:[%s20734_s1 + $0x3e4] ss:$16 sps:$4 sm:$0xff]   ;;  %v15384_v61 = vld [vmem:[%s20734_s1 + $0x3e0] ss:$16 sps:$4 sm:$0xff]  }
  0xe8   :  { %3160 = vmatprep.subr.bf16.mxu0 %v15347_v47  ;;  %v15392_v47 = vld [vmem:[%s20734_s1 + $0x3c4] ss:$16 sps:$4 sm:$0xff]  }
  0xe9   :  { %3280 = vmatpush1.bf16.msra.mxu1 %v15342_v42  ;;  %v15387_v42 = vld [vmem:[%s20734_s1 + $0x1c0] ss:$16 sps:$4 sm:$0xff]  }
  0xea   :  { %2271 = vmatmul.mubr.bf16.gmra.mxu0 %v17354_v5  ;;  %3281 = vmatprep.subr.bf16.mxu1 %v15350_v0  ;;  %v15359_v5 = vld [vmem:[%s20734_s1 + $0x64] ss:$16 sps:$4 sm:$0xff]  }
  0xeb   :  { %2280 = vmatprep.mubr.bf16.mxu0 %v17508_v12  ;;  %3161 = vmatpush1.bf16.msra.mxu0 %v15345_v33  ;;  %v15354_v12 = vld [vmem:[%s20734_s1 + $0x280] ss:$16 sps:$4 sm:$0xff]   ;;  %v15398_v0 = vld [vmem:[%s20734_s1 + $0x3a4] ss:$16 sps:$4 sm:$0xff]  }
  0xec   :  { %2392 = vmatmul.mubr.bf16.gmra.mxu1 %v17408_v40  ;;  %3162 = vmatprep.subr.bf16.mxu0 %v15353_v6  ;;  %v15357_v40 = vld [vmem:[%s20734_s1 + $0x60] ss:$16 sps:$4 sm:$0xff]   ;;  %v15404_v6 = vld [vmem:[%s20734_s1 + $0x384] ss:$16 sps:$4 sm:$0xff]  }
  0xed   :  { %2401 = vmatprep.mubr.bf16.mxu1 %v17568_v60  ;;  %3282 = vmatpush1.bf16.msra.mxu1 %v15348_v39  ;;  %v15365_v60 = vld [vmem:[%s20734_s1 + $0x44] ss:$16 sps:$4 sm:$0xff]   ;;  %v15396_v33 = vld [vmem:[%s20734_s1 + $0x3a0] ss:$16 sps:$4 sm:$0xff]  }
  0xee   :  { %3283 = vmatprep.subr.bf16.mxu1 %v15356_v11  ;;  %v15399_v39 = vld [vmem:[%s20734_s1 + $0x180] ss:$16 sps:$4 sm:$0xff]   ;;  %v15410_v11 = vld [vmem:[%s20734_s1 + $0x364] ss:$16 sps:$4 sm:$0xff]  }
  0xef   :  { %3163 = vmatpush1.bf16.msra.mxu0 %v15351_v38  ;;  %v15408_v38 = vld [vmem:[%s20734_s1 + $0x360] ss:$16 sps:$4 sm:$0xff]  }
  0xf0   :  { %3164 = vmatprep.subr.bf16.mxu0 %v15359_v5  ;;  %v15416_v5 = vld [vmem:[%s20734_s1 + $0x344] ss:$16 sps:$4 sm:$0xff]  }
  0xf1   :  { %3284 = vmatpush1.bf16.msra.mxu1 %v15354_v12  ;;  %v15411_v12 = vld [vmem:[%s20734_s1 + $0x140] ss:$16 sps:$4 sm:$0xff]  }
  0xf2   :  { %2281 = vmatmul.mubr.bf16.gmra.mxu0 %v17513_v22  ;;  %3285 = vmatprep.subr.bf16.mxu1 %v15362_v16  ;;  %v15371_v22 = vld [vmem:[%s20734_s1 + $0x24] ss:$16 sps:$4 sm:$0xff]   ;;  %v15417_v16 = vld [vmem:[%s20734_s1 + $0x120] ss:$16 sps:$4 sm:$0xff]  }
  0xf3   :  { %2290 = vmatprep.mubr.bf16.mxu0 %v17699_v34  ;;  %3165 = vmatpush1.bf16.msra.mxu0 %v15357_v40  ;;  %v15366_v34 = vld [vmem:[%s20734_s1 + $0x240] ss:$16 sps:$4 sm:$0xff]   ;;  %v15422_v40 = vld [vmem:[%s20734_s1 + $0x324] ss:$16 sps:$4 sm:$0xff]  }
  0xf4   :  { %2402 = vmatmul.mubr.bf16.gmra.mxu1 %v17572_v62  ;;  %3166 = vmatprep.subr.bf16.mxu0 %v15365_v60  ;;  %v15369_v62 = vld [vmem:[%s20734_s1 + $0x20] ss:$16 sps:$4 sm:$0xff]   ;;  %v15425_v60 = vld [vmem:[%s20734_s1 + $0x104] ss:$16 sps:$4 sm:$0xff]  }
  0xf5   :  { %2411 = vmatprep.mubr.bf16.mxu1 %v17753_v24  ;;  %3286 = vmatpush1.bf16.msra.mxu1 %v15360_v7  ;;  %v15377_v24 = vld [vmem:[%s20734_s1 + $0x4] ss:$16 sps:$4 sm:$0xff]  }
  0xf6   :  { %3287 = vmatprep.subr.bf16.mxu1 %v15368_v30  ;;  %v15428_v7 = vld [vmem:[%s20734_s1 + $0x304] ss:$16 sps:$4 sm:$0xff]   ;;  %v15426_v30 = vld [vmem:[%s20734_s1 + $0x300] ss:$16 sps:$4 sm:$0xff]  }
  0xf7   :  { %3167 = vmatpush1.bf16.msra.mxu0 %v15363_v32  ;;  %v15440_v32 = vld [vmem:[%s20734_s1 + $0x2cc] ss:$16 sps:$4 sm:$0xff]  }
  0xf8   :  { %3168 = vmatprep.subr.bf16.mxu0 %v15371_v22  ;;  %v15438_v22 = vld [vmem:[%s20734_s1 + $0x2c8] ss:$16 sps:$4 sm:$0xff]  }
  0xf9   :  { %3288 = vmatpush1.bf16.msra.mxu1 %v15366_v34  ;;  %v15443_v34 = vld [vmem:[%s20734_s1 + $0xac] ss:$16 sps:$4 sm:$0xff]  }
  0xfa   :  { %2291 = vmatmul.mubr.bf16.gmra.mxu0 %v17703_v41  ;;  %3289 = vmatprep.subr.bf16.mxu1 %v15374_v37  ;;  %v15383_v41 = vld [vmem:[%s20734_s1 + $0x1e4] ss:$16 sps:$4 sm:$0xff]   ;;  %v15441_v37 = vld [vmem:[%s20734_s1 + $0xa8] ss:$16 sps:$4 sm:$0xff]  }
  0xfb   :  { %2300 = vmatprep.mubr.bf16.mxu0 %v17742_v43  ;;  %3169 = vmatpush1.bf16.msra.mxu0 %v15369_v62  ;;  %v15378_v43 = vld [vmem:[%s20734_s1 + $0x200] ss:$16 sps:$4 sm:$0xff]   ;;  %v15446_v62 = vld [vmem:[%s20734_s1 + $0x2ac] ss:$16 sps:$4 sm:$0xff]  }
  0xfc   :  { %2412 = vmatmul.mubr.bf16.gmra.mxu1 %v17757_v48  ;;  %3170 = vmatprep.subr.bf16.mxu0 %v15377_v24  ;;  %v15381_v48 = vld [vmem:[%s20734_s1 + $0x1e0] ss:$16 sps:$4 sm:$0xff]   ;;  %v15444_v24 = vld [vmem:[%s20734_s1 + $0x2a8] ss:$16 sps:$4 sm:$0xff]  }
  0xfd   :  { %2421 = vmatprep.mubr.bf16.mxu1 %v17785_v1  ;;  %3290 = vmatpush1.bf16.msra.mxu1 %v15372_v27  ;;  %v15389_v1 = vld [vmem:[%s20734_s1 + $0x1c4] ss:$16 sps:$4 sm:$0xff]   ;;  %v15449_v27 = vld [vmem:[%s20734_s1 + $0x8c] ss:$16 sps:$4 sm:$0xff]  }
  0xfe   :  { %3291 = vmatprep.subr.bf16.mxu1 %v15380_v46 }
  0xff   :  { %3171 = vmatpush1.bf16.msra.mxu0 %v15375_v3  ;;  %v15452_v3 = vld [vmem:[%s20734_s1 + $0x28c] ss:$16 sps:$4 sm:$0xff]  }
 0x100   :  { %3172 = vmatprep.subr.bf16.mxu0 %v15383_v41  ;;  %v15447_v41 = vld [vmem:[%s20734_s1 + $0x88] ss:$16 sps:$4 sm:$0xff]  }
 0x101   :  { %3292 = vmatpush1.bf16.msra.mxu1 %v15378_v43  ;;  %v15455_v43 = vld [vmem:[%s20734_s1 + $0x6c] ss:$16 sps:$4 sm:$0xff]  }
 0x102   :  { %2301 = vmatmul.mubr.bf16.gmra.mxu0 %v17778_v26  ;;  %3293 = vmatprep.subr.bf16.mxu1 %v15386_v29  ;;  %v15395_v26 = vld [vmem:[%s20734_s1 + $0x1a4] ss:$16 sps:$4 sm:$0xff]  }
 0x103   :  { %2310 = vmatprep.mubr.bf16.mxu0 %v17884_v28  ;;  %3173 = vmatpush2.bf16.msra.mxu0 %v15381_v48  ;;  %v15390_v28 = vld [vmem:[%s20734_s1 + $0x3c0] ss:$16 sps:$4 sm:$0xff]  }
 0x104   :  { %2422 = vmatmul.mubr.bf16.gmra.mxu1 %v17797_v53  ;;  %3174 = vmatprep.subr.bf16.mxu0 %v15389_v1  ;;  %v15393_v53 = vld [vmem:[%s20734_s1 + $0x1a0] ss:$16 sps:$4 sm:$0xff]  }
 0x105   :  { %2431 = vmatprep.mubr.bf16.mxu1 %v17906_v50  ;;  %3294 = vmatpush2.bf16.msra.mxu1 %v15384_v61  ;;  %v15401_v50 = vld [vmem:[%s20734_s1 + $0x184] ss:$16 sps:$4 sm:$0xff]   ;;  %v15450_v61 = vld [vmem:[%s20734_s1 + $0x288] ss:$16 sps:$4 sm:$0xff]  }
 0x106   :  { %3295 = vmatprep.subr.bf16.mxu1 %v15392_v47 }
 0x107   :  { %3175 = vmatpush2.bf16.msra.mxu0 %v15387_v42 }
 0x108   :  { %3176 = vmatprep.subr.bf16.mxu0 %v15395_v26  ;;  %v15453_v26 = vld [vmem:[%s20734_s1 + $0x68] ss:$16 sps:$4 sm:$0xff]  }
 0x109   :  { %3296 = vmatpush2.bf16.msra.mxu1 %v15390_v28  ;;  %v15458_v28 = vld [vmem:[%s20734_s1 + $0x26c] ss:$16 sps:$4 sm:$0xff]  }
 0x10a   :  { %2311 = vmatmul.mubr.bf16.gmra.mxu0 %v17891_v18  ;;  %3297 = vmatprep.subr.bf16.mxu1 %v15398_v0  ;;  %v15407_v18 = vld [vmem:[%s20734_s1 + $0x164] ss:$16 sps:$4 sm:$0xff]  }
 0x10b   :  { %2320 = vmatprep.mubr.bf16.mxu0 %v17940_v35  ;;  %3177 = vmatpush2.bf16.msra.mxu0 %v15393_v53  ;;  %v15402_v35 = vld [vmem:[%s20734_s1 + $0x380] ss:$16 sps:$4 sm:$0xff]   ;;  %v15456_v53 = vld [vmem:[%s20734_s1 + $0x268] ss:$16 sps:$4 sm:$0xff]  }
 0x10c   :  { %2432 = vmatmul.mubr.bf16.gmra.mxu1 %v17909_v20  ;;  %3178 = vmatprep.subr.bf16.mxu0 %v15401_v50  ;;  %v15405_v20 = vld [vmem:[%s20734_s1 + $0x160] ss:$16 sps:$4 sm:$0xff]   ;;  %v15461_v50 = vld [vmem:[%s20734_s1 + $0x4c] ss:$16 sps:$4 sm:$0xff]  }
 0x10d   :  { %2441 = vmatprep.mubr.bf16.mxu1 %v17960_v36  ;;  %3298 = vmatpush2.bf16.msra.mxu1 %v15396_v33  ;;  %v15413_v36 = vld [vmem:[%s20734_s1 + $0x144] ss:$16 sps:$4 sm:$0xff]  }
 0x10e   :  { %3299 = vmatprep.subr.bf16.mxu1 %v15404_v6 }
 0x10f   :  { %3179 = vmatpush2.bf16.msra.mxu0 %v15399_v39 }
 0x110   :  { %3180 = vmatprep.subr.bf16.mxu0 %v15407_v18  ;;  %v20879_v18 = vld [vmem:[#allocation17_spill] sm:$0xff] }
 0x111   :  { %3300 = vmatpush2.bf16.msra.mxu1 %v15402_v35  ;;  %v15459_v35 = vld [vmem:[%s20734_s1 + $0x48] ss:$16 sps:$4 sm:$0xff]  }
 0x112   :  { %2321 = vmatmul.mubr.bf16.gmra.mxu0 %v17945_v13  ;;  %3301 = vmatprep.subr.bf16.mxu1 %v15410_v11  ;;  %v15414_v13 = vld [vmem:[%s20734_s1 + $0x340] ss:$16 sps:$4 sm:$0xff]   ;;  %v15464_v11 = vld [vmem:[%s20734_s1 + $0x24c] ss:$16 sps:$4 sm:$0xff]  }
 0x113   :  { %2330 = vmatprep.mubr.bf16.mxu0 %v17988_v2  ;;  %3181 = vmatpush2.bf16.msra.mxu0 %v15405_v20  ;;  %v15419_v2 = vld [vmem:[%s20734_s1 + $0x124] ss:$16 sps:$4 sm:$0xff]  }
 0x114   :  { %2442 = vmatmul.mubr.bf16.gmra.mxu1 %v17963_v55  ;;  %3182 = vmatprep.subr.bf16.mxu0 %v15413_v36  ;;  %v15420_v55 = vld [vmem:[%s20734_s1 + $0x320] ss:$16 sps:$4 sm:$0xff]   ;;  %v15467_v36 = vld [vmem:[%s20734_s1 + $0x2c] ss:$16 sps:$4 sm:$0xff]  }
 0x115   :  { %2451 = vmatprep.mubr.bf16.mxu1 %v17999_v52  ;;  %3302 = vmatpush2.bf16.msra.mxu1 %v15408_v38  ;;  %v15423_v52 = vld [vmem:[%s20734_s1 + $0x100] ss:$16 sps:$4 sm:$0xff]   ;;  %v15462_v38 = vld [vmem:[%s20734_s1 + $0x248] ss:$16 sps:$4 sm:$0xff]  }
 0x116   :  { %3303 = vmatprep.subr.bf16.mxu1 %v15416_v5  ;;  %v20880_v20 = vld [vmem:[#allocation21_spill] sm:$0xff]  ;;  %v20881_v5 = vld [vmem:[#allocation18_spill] sm:$0xff] }
 0x117   :  { %3183 = vmatpush2.bf16.msra.mxu0 %v15411_v12  ;;  %v15470_v12 = vld [vmem:[%s20734_s1 + $0x22c] ss:$16 sps:$4 sm:$0xff]  }
 0x118   :  { %3184 = vmatprep.subr.bf16.mxu0 %v15419_v2  ;;  %v20882_v2 = vld [vmem:[#allocation23_spill] sm:$0xff] }
 0x119   :  { %3304 = vmatpush2.bf16.msra.mxu1 %v15414_v13 }
 0x11a   :  { %2331 = vmatmul.mubr.bf16.gmra.mxu0 %v17991_v54  ;;  %3305 = vmatprep.subr.bf16.mxu1 %v15422_v40  ;;  %v15431_v54 = vld [vmem:[%s20734_s1 + $0xec] ss:$16 sps:$4 sm:$0xff]  }
 0x11b   :  { %2340 = vmatprep.mubr.bf16.mxu0 %v17993_v14  ;;  %3185 = vmatpush2.bf16.msra.mxu0 %v15417_v16  ;;  %v15434_v14 = vld [vmem:[%s20734_s1 + $0x2ec] ss:$16 sps:$4 sm:$0xff]   ;;  %v15465_v16 = vld [vmem:[%s20734_s1 + $0x28] ss:$16 sps:$4 sm:$0xff]  }
 0x11c   :  { %2452 = vmatmul.mubr.bf16.gmra.mxu1 %v18002_v45  ;;  %3186 = vmatprep.subr.bf16.mxu0 %v15425_v60  ;;  %v15429_v45 = vld [vmem:[%s20734_s1 + $0xe8] ss:$16 sps:$4 sm:$0xff]  }
 0x11d   :  { %2461 = vmatprep.mubr.bf16.mxu1 %v18005_v9  ;;  %3306 = vmatpush2.bf16.msra.mxu1 %v15420_v55  ;;  %v15432_v9 = vld [vmem:[%s20734_s1 + $0x2e8] ss:$16 sps:$4 sm:$0xff]   ;;  %v15473_v55 = vld [vmem:[%s20734_s1 + $0xc] ss:$16 sps:$4 sm:$0xff]  }
 0x11e   :  { %3307 = vmatprep.subr.bf16.mxu1 %v15428_v7  ;;  %v20883_v7 = vld [vmem:[#allocation22_spill] sm:$0xff] }
 0x11f   :  { %3187 = vmatpush2.bf16.msra.mxu0 %v15423_v52  ;;  %v15468_v52 = vld [vmem:[%s20734_s1 + $0x228] ss:$16 sps:$4 sm:$0xff]  }
 0x120   :  { %3398 = vmatprep.subr.bf16.mxu0 %v15431_v54 }
 0x121   :  { %3308 = vmatpush2.bf16.msra.mxu1 %v15426_v30 }
 0x122   :  { %2341 = vmatmul.mubr.bf16.gmra.mxu0 %v18011_v23  ;;  %3519 = vmatprep.subr.bf16.mxu1 %v15434_v14  ;;  %v15437_v23 = vld [vmem:[%s20734_s1 + $0xcc] ss:$16 sps:$4 sm:$0xff]   ;;  %v20884_v14 = vld [vmem:[#allocation27_spill] sm:$0xff] }
 0x123   :  { %3188 = vmatprep.mubr.bf16.mxu0 %v17142_v49 }
 0x124   :  { %2462 = vmatmul.mubr.bf16.gmra.mxu1 %v18013_v59  ;;  %v15435_v59 = vld [vmem:[%s20734_s1 + $0xc8] ss:$16 sps:$4 sm:$0xff]  }
 0x125   :  { %3309 = vmatprep.mubr.bf16.mxu1 %v17173_v8 }
 0x12a   :  { %3189 = vmatmul.mubr.bf16.vlgmr.msra.gmra.mxu0 %v17147_v57 }
 0x12b   :  { %3198 = vmatprep.mubr.bf16.mxu0 %v17137_v44  ;;  %3399 = vmatpush1.bf16.msra.mxu0 %v15429_v45  ;;  %v15471_v45 = vld [vmem:[%s20734_s1 + $0x8] ss:$16 sps:$4 sm:$0xff]  }
 0x12c   :  { %3400 = vmatprep.subr.bf16.mxu0 %v15437_v23  ;;  %3310 = vmatmul.mubr.bf16.vlgmr.msra.gmra.mxu1 %v17185_v17 }
 0x12d   :  { %3319 = vmatprep.mubr.bf16.mxu1 %v17205_v15  ;;  %3520 = vmatpush1.bf16.msra.mxu1 %v15432_v9  ;;  %v15476_v9 = vld [vmem:[%s20734_s1 + $0x20c] ss:$16 sps:$4 sm:$0xff]  }
 0x12e   :  { %3521 = vmatprep.subr.bf16.mxu1 %v15440_v32  ;;  %v15479_v32 = vld [vmem:[%s20734_s1 + $0x1ec] ss:$16 sps:$4 sm:$0xff]  }
 0x12f   :  { %3401 = vmatpush1.bf16.msra.mxu0 %v15435_v59  ;;  %v15474_v59 = vld [vmem:[%s20734_s1 + $0x208] ss:$16 sps:$4 sm:$0xff]  }
 0x130   :  { %3402 = vmatprep.subr.bf16.mxu0 %v15443_v34  ;;  %v20885_v34 = vld [vmem:[#allocation24_spill] sm:$0xff] }
 0x131   :  { %3522 = vmatpush1.bf16.msra.mxu1 %v15438_v22 }
 0x132   :  { %3199 = vmatmul.mubr.bf16.gmra.mxu0 %v17166_v4  ;;  %v2020_v46 = vpop.f32.mrf.mxu0  ;;  %3523 = vmatprep.subr.bf16.mxu1 %v15446_v62  ;;  %v20887_v62 = vld [vmem:[#allocation31_spill] sm:$0xff] }
 0x133   :  { %3208 = vmatprep.mubr.bf16.mxu0 %v17279_v21  ;;  %3403 = vmatpush1.bf16.msra.mxu0 %v15441_v37  ;;  %v2141_v29 = vpop.f32.mrf.mxu1 }
 0x134   :  { %v2022_v48 = vpop.f32.mrf.mxu0  ;;  %3320 = vmatmul.mubr.bf16.gmra.mxu1 %v17207_v31  ;;  %3404 = vmatprep.subr.bf16.mxu0 %v15449_v27  ;;  %v18296_v1 = vadd.f32 %v2141_v29, %v2020_v46  ;;  %v15477_v46 = vld [vmem:[%s20734_s1 + $0x1e8] ss:$16 sps:$4 sm:$0xff]   ;;  %v15485_v29 = vld [vmem:[%s20734_s1 + $0x1cc] ss:$16 sps:$4 sm:$0xff]  }
 0x135   :  { %3329 = vmatprep.mubr.bf16.mxu1 %v17336_v56  ;;  %3524 = vmatpush1.bf16.msra.mxu1 %v15444_v24  ;;  %v2143_v47 = vpop.f32.mrf.mxu1 }
 0x136   :  { %v2024_v42 = vpop.f32.mrf.mxu0  ;;  %3525 = vmatprep.subr.bf16.mxu1 %v15452_v3  ;;  %v18308_v0 = vadd.f32 %v2143_v47, %v2022_v48  ;;  %v15482_v3 = vld [vmem:[%s20734_s1 + $0x3ec] ss:$16 sps:$4 sm:$0xff]  }
 0x137   :  { %3405 = vmatpush1.bf16.msra.mxu0 %v15447_v41  ;;  %v2145_v33 = vpop.f32.mrf.mxu1  ;;  %v20890_v47 = vld [vmem:[#allocation28_spill] sm:$0xff] }
 0x138   :  { %3406 = vmatprep.subr.bf16.mxu0 %v15455_v43  ;;  %v18316_v6 = vadd.f32 %v2145_v33, %v2024_v42  ;;  %v18318_v39 = vpop.f32.mrf.mxu0  ;;  %v15480_v43 = vld [vmem:[%s20734_s1 + $0x3e8] ss:$16 sps:$4 sm:$0xff]   ;;  %v15491_v33 = vld [vmem:[%s20734_s1 + $0x1ac] ss:$16 sps:$4 sm:$0xff]  }
 0x139   :  { %3526 = vmatpush1.bf16.msra.mxu1 %v15450_v61  ;;  %v18342_v40 = vpop.f32.mrf.mxu1 }
 0x13a   :  { %3209 = vmatmul.mubr.bf16.gmra.mxu0 %v20879_v18  ;;  %3527 = vmatprep.subr.bf16.mxu1 %v15458_v28  ;;  %v2030_v13 = vpop.f32.mrf.mxu0  ;;  %v15483_v28 = vld [vmem:[%s20734_s1 + $0x1c8] ss:$16 sps:$4 sm:$0xff]  }
 0x13b   :  { %3218 = vmatprep.mubr.bf16.mxu0 %v20880_v20  ;;  %3407 = vmatpush1.bf16.msra.mxu0 %v15453_v26  ;;  %v20891_v26 = vld [vmem:[#allocation29_spill] sm:$0xff] }
 0x13c   :  { %3330 = vmatmul.mubr.bf16.gmra.mxu1 %v20881_v5  ;;  %3408 = vmatprep.subr.bf16.mxu0 %v15461_v50  ;;  %v2032_v60 = vpop.f32.mrf.mxu0  ;;  %v15486_v50 = vld [vmem:[%s20734_s1 + $0x3c8] ss:$16 sps:$4 sm:$0xff]  }
 0x13d   :  { %3339 = vmatprep.mubr.bf16.mxu1 %v20882_v2  ;;  %3528 = vmatpush1.bf16.msra.mxu1 %v15456_v53  ;;  %v15488_v53 = vld [vmem:[%s20734_s1 + $0x3cc] ss:$16 sps:$4 sm:$0xff]  }
 0x13e   :  { %3529 = vmatprep.subr.bf16.mxu1 %v15464_v11  ;;  %v2151_v30 = vpop.f32.mrf.mxu1  ;;  %v2034_v54 = vpop.f32.mrf.mxu0  ;;  %v20892_v11 = vld [vmem:[#allocation32_spill] sm:$0xff] }
 0x13f   :  { %3409 = vmatpush1.bf16.msra.mxu0 %v15459_v35  ;;  %v18358_v23 = vadd.f32 %v2151_v30, %v2030_v13  ;;  %v15489_v13 = vld [vmem:[%s20734_s1 + $0x1a8] ss:$16 sps:$4 sm:$0xff]  }
 0x140   :  { %3410 = vmatprep.subr.bf16.mxu0 %v15467_v36  ;;  %v2153_v22 = vpop.f32.mrf.mxu1  ;;  %v2036_v27 = vpop.f32.mrf.mxu0  ;;  %v20893_v36 = vld [vmem:[#allocation33_spill] sm:$0xff] }
 0x141   :  { %3530 = vmatpush1.bf16.msra.mxu1 %v15462_v38  ;;  %v18367_v37 = vadd.f32 %v2153_v22, %v2032_v60  ;;  %v15492_v60 = vld [vmem:[%s20734_s1 + $0x3a8] ss:$16 sps:$4 sm:$0xff]  }
 0x142   :  { %3219 = vmatmul.mubr.bf16.gmra.mxu0 %v20883_v7  ;;  %3531 = vmatprep.subr.bf16.mxu1 %v15470_v12  ;;  %v2155_v24 = vpop.f32.mrf.mxu1  ;;  %v15495_v22 = vld [vmem:[%s20734_s1 + $0x188] ss:$16 sps:$4 sm:$0xff]  }
 0x143   :  { %3228 = vmatprep.mubr.bf16.mxu0 %v20884_v14  ;;  %3411 = vmatpush1.bf16.msra.mxu0 %v15465_v16  ;;  %20886 = vst [vmem:[#allocation17_spill] sm:$0xff] %v18367_v37  ;;  %v18376_v41 = vadd.f32 %v2155_v24, %v2034_v54  ;;  %v15494_v16 = vld [vmem:[%s20734_s1 + $0x3ac] ss:$16 sps:$4 sm:$0xff]  }
 0x144   :  { %3340 = vmatmul.mubr.bf16.gmra.mxu1 %v20885_v34  ;;  %3412 = vmatprep.subr.bf16.mxu0 %v15473_v55  ;;  %v2157_v48 = vpop.f32.mrf.mxu1  ;;  %v15500_v24 = vld [vmem:[%s20734_s1 + $0x38c] ss:$16 sps:$4 sm:$0xff]  }
 0x145   :  { %3349 = vmatprep.mubr.bf16.mxu1 %v20887_v62  ;;  %3532 = vmatpush1.bf16.msra.mxu1 %v15468_v52  ;;  %20888 = vst [vmem:[#allocation21_spill] sm:$0xff] %v18376_v41  ;;  %v18384_v61 = vadd.f32 %v2157_v48, %v2036_v27  ;;  %v15497_v52 = vld [vmem:[%s20734_s1 + $0x18c] ss:$16 sps:$4 sm:$0xff]  }
 0x146   :  { %3533 = vmatprep.subr.bf16.mxu1 %v15476_v9 }
 0x147   :  { %3413 = vmatpush1.bf16.msra.mxu0 %v15471_v45  ;;  %20889 = vst [vmem:[#allocation18_spill] sm:$0xff] %v18384_v61  ;;  %v20896_v45 = vld [vmem:[#allocation30_spill] sm:$0xff]  ;;  %v15534_v61 = vld [vmem:[%s20734_s1 + $0xae4] ss:$16 sps:$4 sm:$0xff]  }
 0x148   :  { %3414 = vmatprep.subr.bf16.mxu0 %v15479_v32  ;;  %v20897_v32 = vld [vmem:[#allocation35_spill] sm:$0xff] }
 0x149   :  { %3534 = vmatpush1.bf16.msra.mxu1 %v15474_v59  ;;  %v2040_v42 = vpop.f32.mrf.mxu0 }
 0x14a   :  { %3229 = vmatmul.mubr.bf16.gmra.mxu0 %v20890_v47  ;;  %3535 = vmatprep.subr.bf16.mxu1 %v15482_v3  ;;  %v15503_v3 = vld [vmem:[%s20734_s1 + $0x16c] ss:$16 sps:$4 sm:$0xff]  }
 0x14b   :  { %3238 = vmatprep.mubr.bf16.mxu0 %v20891_v26  ;;  %3415 = vmatpush2.bf16.msra.mxu0 %v15477_v46  ;;  %v2042_v35 = vpop.f32.mrf.mxu0  ;;  %v15498_v46 = vld [vmem:[%s20734_s1 + $0x388] ss:$16 sps:$4 sm:$0xff]  }
 0x14c   :  { %3350 = vmatmul.mubr.bf16.gmra.mxu1 %v20892_v11  ;;  %3416 = vmatprep.subr.bf16.mxu0 %v15485_v29  ;;  %v20899_v29 = vld [vmem:[#allocation34_spill] sm:$0xff] }
 0x14d   :  { %3359 = vmatprep.mubr.bf16.mxu1 %v20893_v36  ;;  %3536 = vmatpush2.bf16.msra.mxu1 %v15480_v43  ;;  %v2161_v38 = vpop.f32.mrf.mxu1  ;;  %v2044_v12 = vpop.f32.mrf.mxu0 }
 0x14e   :  { %3537 = vmatprep.subr.bf16.mxu1 %v15488_v53  ;;  %v18408_v55 = vadd.f32 %v2161_v38, %v2040_v42  ;;  %v15501_v42 = vld [vmem:[%s20734_s1 + $0x168] ss:$16 sps:$4 sm:$0xff]  }
 0x14f   :  { %3417 = vmatpush2.bf16.msra.mxu0 %v15483_v28  ;;  %v2163_v30 = vpop.f32.mrf.mxu1  ;;  %v2046_v59 = vpop.f32.mrf.mxu0  ;;  %v15506_v28 = vld [vmem:[%s20734_s1 + $0x36c] ss:$16 sps:$4 sm:$0xff]   ;;  %v15504_v53 = vld [vmem:[%s20734_s1 + $0x368] ss:$16 sps:$4 sm:$0xff]  }
 0x150   :  { %20894 = vst [vmem:[#allocation23_spill] sm:$0xff] %v18408_v55  ;;  %3418 = vmatprep.subr.bf16.mxu0 %v15491_v33  ;;  %v18416_v54 = vadd.f32 %v2163_v30, %v2042_v35  ;;  %v15507_v33 = vld [vmem:[%s20734_s1 + $0x148] ss:$16 sps:$4 sm:$0xff]   ;;  %v15512_v35 = vld [vmem:[%s20734_s1 + $0x34c] ss:$16 sps:$4 sm:$0xff]  }
 0x151   :  { %3538 = vmatpush2.bf16.msra.mxu1 %v15486_v50  ;;  %v2165_v9 = vpop.f32.mrf.mxu1  ;;  %v15509_v50 = vld [vmem:[%s20734_s1 + $0x14c] ss:$16 sps:$4 sm:$0xff]   ;;  %v15510_v38 = vld [vmem:[%s20734_s1 + $0x348] ss:$16 sps:$4 sm:$0xff]  }
 0x152   :  { %20895 = vst [vmem:[#allocation22_spill] sm:$0xff] %v18416_v54  ;;  %3239 = vmatmul.mubr.bf16.gmra.mxu0 %v20896_v45  ;;  %3539 = vmatprep.subr.bf16.mxu1 %v15494_v16  ;;  %v18426_v27 = vadd.f32 %v2165_v9, %v2044_v12  ;;  %v626_v12 = vld [vmem:[#allocation2 + $0x50] sm:$0x11]  ;;  %v20901_v16 = vld [vmem:[#allocation36_spill] sm:$0xff] }
 0x153   :  { %3248 = vmatprep.mubr.bf16.mxu0 %v20897_v32  ;;  %3419 = vmatpush2.bf16.msra.mxu0 %v15489_v13  ;;  %v2167_v43 = vpop.f32.mrf.mxu1  ;;  %v15519_v13 = vld [vmem:[%s20734_s1 + $0x12c] ss:$16 sps:$4 sm:$0xff]   ;;  %v18466_v30 = vcombine.high %v626_v12, %v626_v12  ;;  %v15517_v9 = vld [vmem:[%s20734_s1 + $0x128] ss:$16 sps:$4 sm:$0xff]  }
 0x154   :  { %20898 = vst [vmem:[#allocation27_spill] sm:$0xff] %v18426_v27  ;;  %3360 = vmatmul.mubr.bf16.gmra.mxu1 %v20899_v29  ;;  %3420 = vmatprep.subr.bf16.mxu0 %v15497_v52  ;;  %v18435_v48 = vadd.f32 %v2167_v43, %v2046_v59  ;;  %v20902_v52 = vld [vmem:[#allocation39_spill] sm:$0xff]  ;;  %v15522_v59 = vld [vmem:[%s20734_s1 + $0x32c] ss:$16 sps:$4 sm:$0xff]   ;;  %v18500_v27 = vcombine.low %v626_v12, %v626_v12 }
 0x155   :  { %3369 = vmatprep.mubr.bf16.mxu1 %v17857_v25  ;;  %3540 = vmatpush2.bf16.msra.mxu1 %v15492_v60  ;;  %v627_v60 = vld [vmem:[#allocation2 + $0x28] sm:$0x11]  ;;  %v20903_v43 = vld [vmem:[#allocation38_spill] sm:$0xff] }
 0x156   :  { %20900 = vst [vmem:[#allocation24_spill] sm:$0xff] %v18435_v48  ;;  %3541 = vmatprep.subr.bf16.mxu1 %v15500_v24  ;;  %v15520_v24 = vld [vmem:[%s20734_s1 + $0x328] ss:$16 sps:$4 sm:$0xff]  }
 0x157   :  { %3421 = vmatpush2.bf16.msra.mxu0 %v15495_v22 }
 0x158   :  { %3422 = vmatprep.subr.bf16.mxu0 %v15503_v3 }
 0x159   :  { %3542 = vmatpush2.bf16.msra.mxu1 %v15498_v46  ;;  %v15525_v46 = vld [vmem:[%s20734_s1 + $0x10c] ss:$16 sps:$4 sm:$0xff]  }
 0x15a   :  { %3249 = vmatmul.mubr.bf16.gmra.mxu0 %v17847_v10  ;;  %3543 = vmatprep.subr.bf16.mxu1 %v15506_v28  ;;  %v15523_v28 = vld [vmem:[%s20734_s1 + $0x108] ss:$16 sps:$4 sm:$0xff]  }
 0x15b   :  { %3258 = vmatprep.mubr.bf16.mxu0 %v17917_v51  ;;  %3423 = vmatpush2.bf16.msra.mxu0 %v15501_v42  ;;  %v18481_v42 = vcombine.high %v627_v60, %v627_v60 }
 0x15c   :  { %3370 = vmatmul.mubr.bf16.gmra.mxu1 %v20901_v16  ;;  %3424 = vmatprep.subr.bf16.mxu0 %v15509_v50 }
 0x15d   :  { %3379 = vmatprep.mubr.bf16.mxu1 %v20902_v52  ;;  %3544 = vmatpush2.bf16.msra.mxu1 %v15504_v53  ;;  %v15528_v53 = vld [vmem:[%s20734_s1 + $0x30c] ss:$16 sps:$4 sm:$0xff]  }
 0x15e   :  { %3545 = vmatprep.subr.bf16.mxu1 %v15512_v35  ;;  %v2050_v22 = vpop.f32.mrf.mxu0 }
 0x15f   :  { %3425 = vmatpush2.bf16.msra.mxu0 %v15507_v33  ;;  %v15526_v33 = vld [vmem:[%s20734_s1 + $0x308] ss:$16 sps:$4 sm:$0xff]  }
 0x160   :  { %3426 = vmatprep.subr.bf16.mxu0 %v15519_v13  ;;  %v2052_v3 = vpop.f32.mrf.mxu0  ;;  %v20904_v13 = vld [vmem:[#allocation40_spill] sm:$0xff] }
 0x161   :  { %3546 = vmatpush2.bf16.msra.mxu1 %v15510_v38  ;;  %v15531_v38 = vld [vmem:[%s20734_s1 + $0x8e4] ss:$16 sps:$4 sm:$0xff]  }
 0x162   :  { %3259 = vmatmul.mubr.bf16.gmra.mxu0 %v20903_v43  ;;  %3547 = vmatprep.subr.bf16.mxu1 %v15522_v59  ;;  %v2054_v50 = vpop.f32.mrf.mxu0 }
 0x163   :  { %3268 = vmatprep.mubr.bf16.mxu0 %v18466_v30  ;;  %3427 = vmatpush2.bf16.msra.mxu0 %v15517_v9 }
 0x164   :  { %v2171_v35 = vpop.f32.mrf.mxu1  ;;  %3380 = vmatmul.mubr.bf16.gmra.mxu1 %v20904_v13  ;;  %3428 = vmatprep.subr.bf16.mxu0 %v15525_v46  ;;  %v2056_v48 = vpop.f32.mrf.mxu0  ;;  %v18507_v46 = vcombine.low %v627_v60, %v627_v60  ;;  %v15529_v60 = vld [vmem:[%s20734_s1 + $0x8e0] ss:$16 sps:$4 sm:$0xff]  }
 0x165   :  { %v18497_v59 = vadd.f32 %v2171_v35, %v2050_v22  ;;  %3389 = vmatprep.mubr.bf16.mxu1 %v18481_v42  ;;  %3548 = vmatpush2.bf16.msra.mxu1 %v15520_v24 }
 0x166   :  { %v2173_v9 = vpop.f32.mrf.mxu1  ;;  %3549 = vmatprep.subr.bf16.mxu1 %v15528_v53  ;;  %v2060_v55 = vpop.f32.mrf.mxu0 }
 0x167   :  { %20905 = vst [vmem:[#allocation31_spill] sm:$0xff] %v18497_v59  ;;  %v18502_v54 = vadd.f32 %v2173_v9, %v2052_v3  ;;  %3429 = vmatpush2.bf16.msra.mxu0 %v15523_v28  ;;  %v15540_v9 = vld [vmem:[%s20734_s1 + $0xac4] ss:$16 sps:$4 sm:$0xff]  }
 0x168   :  { %v2175_v41 = vpop.f32.mrf.mxu1  ;;  %4526 = vmatprep.subr.bf16.mxu0 %v15531_v38  ;;  %v2062_v35 = vpop.f32.mrf.mxu0  ;;  %v15535_v38 = vld [vmem:[%s20734_s1 + $0x8c0] ss:$16 sps:$4 sm:$0xff]  }
 0x169   :  { %20906 = vst [vmem:[#allocation28_spill] sm:$0xff] %v18502_v54  ;;  %v18509_v22 = vadd.f32 %v2175_v41, %v2054_v50  ;;  %3550 = vmatpush2.bf16.msra.mxu1 %v15526_v33  ;;  %v3786_v54 = vrot.slane %v17137_v44, 1 }
 0x16a   :  { %3269 = vmatmul.mubr.bf16.gmra.mxu0 %v18500_v27  ;;  %v2177_v12 = vpop.f32.mrf.mxu1  ;;  %4647 = vmatprep.subr.bf16.mxu1 %v15534_v61  ;;  %v2064_v53 = vpop.f32.mrf.mxu0 }
 0x16b   :  { %20907 = vst [vmem:[#allocation29_spill] sm:$0xff] %v18509_v22  ;;  %3430 = vmatprep.mubr.bf16.mxu0 %v17142_v49  ;;  %v18513_v24 = vadd.f32 %v2177_v12, %v2056_v48  ;;  %v15532_v49 = vld [vmem:[%s20734_s1 + $0xae0] ss:$16 sps:$4 sm:$0xff]   ;;  %v15537_v48 = vld [vmem:[%s20734_s1 + $0x8c4] ss:$16 sps:$4 sm:$0xff]  }
 0x16c   :  { %v2181_v3 = vpop.f32.mrf.mxu1  ;;  %3390 = vmatmul.mubr.bf16.gmra.mxu1 %v18507_v46  ;;  %v15538_v12 = vld [vmem:[%s20734_s1 + $0xac0] ss:$16 sps:$4 sm:$0xff]  }
 0x16d   :  { %20908 = vst [vmem:[#allocation32_spill] sm:$0xff] %v18513_v24  ;;  %v18516_v28 = vadd.f32 %v2181_v3, %v2060_v55  ;;  %3551 = vmatprep.mubr.bf16.mxu1 %v17173_v8  ;;  %v2066_v55 = vpop.f32.mrf.mxu0  ;;  %v15543_v3 = vld [vmem:[%s20734_s1 + $0x8a4] ss:$16 sps:$4 sm:$0xff]  }
 0x16e   :  { %v2183_v41 = vpop.f32.mrf.mxu1 }
 0x16f   :  { %20909 = vst [vmem:[#allocation33_spill] sm:$0xff] %v18516_v28  ;;  %v18522_v50 = vadd.f32 %v2183_v41, %v2062_v35 }
 0x170   :  { %v2185_v61 = vpop.f32.mrf.mxu1 }
 0x171   :  { %20910 = vst [vmem:[#allocation30_spill] sm:$0xff] %v18522_v50  ;;  %v18530_v33 = vadd.f32 %v2185_v61, %v2064_v53  ;;  %v15546_v61 = vld [vmem:[%s20734_s1 + $0xaa4] ss:$16 sps:$4 sm:$0xff]  }
 0x172   :  { %3431 = vmatmul.mubr.bf16.vlgmr.msra.gmra.mxu0 %v17147_v57  ;;  %v2187_v8 = vpop.f32.mrf.mxu1 }
 0x173   :  { %20911 = vst [vmem:[#allocation35_spill] sm:$0xff] %v18530_v33  ;;  %3440 = vmatprep.mubr.bf16.mxu0 %v17137_v44  ;;  %4527 = vmatpush1.bf16.msra.mxu0 %v15529_v60  ;;  %v18540_v35 = vadd.f32 %v2187_v8, %v2066_v55  ;;  %v15541_v60 = vld [vmem:[%s20734_s1 + $0x8a0] ss:$16 sps:$4 sm:$0xff]   ;;  %v15549_v55 = vld [vmem:[%s20734_s1 + $0x884] ss:$16 sps:$4 sm:$0xff]  }
 0x174   :  { %4528 = vmatprep.subr.bf16.mxu0 %v15537_v48  ;;  %v2070_v57 = vpop.f32.mrf.mxu0  ;;  %3552 = vmatmul.mubr.bf16.vlgmr.msra.gmra.mxu1 %v17185_v17  ;;  %v15544_v17 = vld [vmem:[%s20734_s1 + $0xaa0] ss:$16 sps:$4 sm:$0xff]  }
 0x175   :  { %20912 = vst [vmem:[#allocation34_spill] sm:$0xff] %v18540_v35  ;;  %3561 = vmatprep.mubr.bf16.mxu1 %v17205_v15  ;;  %4648 = vmatpush1.bf16.msra.mxu1 %v15532_v49  ;;  %v15573_v35 = vld [vmem:[%s20734_s1 + $0x804] ss:$16 sps:$4 sm:$0xff]   ;;  %v15568_v33 = vld [vmem:[%s20734_s1 + $0xa20] ss:$16 sps:$4 sm:$0xff]  }
 0x176   :  { %v2072_v53 = vpop.f32.mrf.mxu0  ;;  %4649 = vmatprep.subr.bf16.mxu1 %v15540_v9 }
 0x177   :  { %4529 = vmatpush1.bf16.msra.mxu0 %v15535_v38  ;;  %v2191_v41 = vpop.f32.mrf.mxu1 }
 0x178   :  { %v18556_v48 = vadd.f32 %v2191_v41, %v2070_v57  ;;  %4530 = vmatprep.subr.bf16.mxu0 %v15543_v3  ;;  %v2074_v49 = vpop.f32.mrf.mxu0  ;;  %v15547_v57 = vld [vmem:[%s20734_s1 + $0x880] ss:$16 sps:$4 sm:$0xff]   ;;  %v15552_v3 = vld [vmem:[%s20734_s1 + $0xa84] ss:$16 sps:$4 sm:$0xff]  }
 0x179   :  { %v2193_v8 = vpop.f32.mrf.mxu1  ;;  %4650 = vmatpush1.bf16.msra.mxu1 %v15538_v12  ;;  %v15550_v12 = vld [vmem:[%s20734_s1 + $0xa80] ss:$16 sps:$4 sm:$0xff]  }
 0x17a   :  { %20913 = vst [vmem:[#allocation36_spill] sm:$0xff] %v18556_v48  ;;  %3441 = vmatmul.mubr.bf16.gmra.mxu0 %v17166_v4  ;;  %v18565_v38 = vadd.f32 %v2193_v8, %v2072_v53  ;;  %4651 = vmatprep.subr.bf16.mxu1 %v15546_v61  ;;  %v2076_v41 = vpop.f32.mrf.mxu0  ;;  %v15555_v53 = vld [vmem:[%s20734_s1 + $0x864] ss:$16 sps:$4 sm:$0xff]  }
 0x17b   :  { %3450 = vmatprep.mubr.bf16.mxu0 %v17279_v21  ;;  %v2195_v9 = vpop.f32.mrf.mxu1  ;;  %4531 = vmatpush1.bf16.msra.mxu0 %v15541_v60 }
 0x17c   :  { %20914 = vst [vmem:[#allocation39_spill] sm:$0xff] %v18565_v38  ;;  %v18574_v48 = vadd.f32 %v2195_v9, %v2074_v49  ;;  %3562 = vmatmul.mubr.bf16.gmra.mxu1 %v17207_v31  ;;  %4532 = vmatprep.subr.bf16.mxu0 %v15549_v55  ;;  %v15553_v49 = vld [vmem:[%s20734_s1 + $0x860] ss:$16 sps:$4 sm:$0xff]   ;;  %v15558_v9 = vld [vmem:[%s20734_s1 + $0xa64] ss:$16 sps:$4 sm:$0xff]  }
 0x17d   :  { %v2197_v61 = vpop.f32.mrf.mxu1  ;;  %3571 = vmatprep.mubr.bf16.mxu1 %v17336_v56  ;;  %4652 = vmatpush1.bf16.msra.mxu1 %v15544_v17  ;;  %v15556_v55 = vld [vmem:[%s20734_s1 + $0xa60] ss:$16 sps:$4 sm:$0xff]   ;;  %v15561_v17 = vld [vmem:[%s20734_s1 + $0x844] ss:$16 sps:$4 sm:$0xff]  }
 0x17e   :  { %20915 = vst [vmem:[#allocation38_spill] sm:$0xff] %v18574_v48  ;;  %v18584_v8 = vadd.f32 %v2197_v61, %v2076_v41  ;;  %4653 = vmatprep.subr.bf16.mxu1 %v15552_v3  ;;  %v15564_v41 = vld [vmem:[%s20734_s1 + $0xa44] ss:$16 sps:$4 sm:$0xff]  }
 0x17f   :  { %v2080_v60 = vpop.f32.mrf.mxu0  ;;  %4533 = vmatpush1.bf16.msra.mxu0 %v15547_v57  ;;  %v15559_v57 = vld [vmem:[%s20734_s1 + $0x840] ss:$16 sps:$4 sm:$0xff]   ;;  %v15567_v61 = vld [vmem:[%s20734_s1 + $0x824] ss:$16 sps:$4 sm:$0xff]  }
 0x180   :  { %20916 = vst [vmem:[#allocation40_spill] sm:$0xff] %v18584_v8  ;;  %4534 = vmatprep.subr.bf16.mxu0 %v15555_v53  ;;  %v15562_v53 = vld [vmem:[%s20734_s1 + $0xa40] ss:$16 sps:$4 sm:$0xff]   ;;  %v15570_v48 = vld [vmem:[%s20734_s1 + $0xa24] ss:$16 sps:$4 sm:$0xff]  }
 0x181   :  { %v2082_v3 = vpop.f32.mrf.mxu0  ;;  %4654 = vmatpush1.bf16.msra.mxu1 %v15550_v12 }
 0x182   :  { %3451 = vmatmul.mubr.bf16.gmra.mxu0 %v20879_v18  ;;  %4655 = vmatprep.subr.bf16.mxu1 %v15558_v9 }
 0x183   :  { %3460 = vmatprep.mubr.bf16.mxu0 %v20880_v20  ;;  %4535 = vmatpush1.bf16.msra.mxu0 %v15553_v49  ;;  %v2084_v12 = vpop.f32.mrf.mxu0  ;;  %v15565_v49 = vld [vmem:[%s20734_s1 + $0x820] ss:$16 sps:$4 sm:$0xff]  }
 0x184   :  { %3572 = vmatmul.mubr.bf16.gmra.mxu1 %v20881_v5  ;;  %4536 = vmatprep.subr.bf16.mxu0 %v15561_v17 }
 0x185   :  { %v2201_v8 = vpop.f32.mrf.mxu1  ;;  %3581 = vmatprep.mubr.bf16.mxu1 %v20882_v2  ;;  %4656 = vmatpush1.bf16.msra.mxu1 %v15556_v55  ;;  %v15576_v55 = vld [vmem:[%s20734_s1 + $0xa04] ss:$16 sps:$4 sm:$0xff]  }
 0x186   :  { %v18617_v9 = vadd.f32 %v2201_v8, %v2080_v60  ;;  %4657 = vmatprep.subr.bf16.mxu1 %v15564_v41  ;;  %v2086_v60 = vpop.f32.mrf.mxu0 }
 0x187   :  { %v2203_v38 = vpop.f32.mrf.mxu1  ;;  %4537 = vmatpush1.bf16.msra.mxu0 %v15559_v57  ;;  %v15579_v57 = vld [vmem:[%s20734_s1 + $0x9e4] ss:$16 sps:$4 sm:$0xff]  }
 0x188   :  { %20917 = vst [vmem:[#allocation43_spill] sm:$0xff] %v18617_v9  ;;  %v18625_v17 = vadd.f32 %v2203_v38, %v2082_v3  ;;  %4538 = vmatprep.subr.bf16.mxu0 %v15567_v61  ;;  %v15571_v38 = vld [vmem:[%s20734_s1 + $0x800] ss:$16 sps:$4 sm:$0xff]  }
 0x189   :  { %v2205_v8 = vpop.f32.mrf.mxu1  ;;  %4658 = vmatpush1.bf16.msra.mxu1 %v15562_v53  ;;  %v15582_v53 = vld [vmem:[%s20734_s1 + $0xbe4] ss:$16 sps:$4 sm:$0xff]  }
 0x18a   :  { %20918 = vst [vmem:[#allocation44_spill] sm:$0xff] %v18625_v17  ;;  %3461 = vmatmul.mubr.bf16.gmra.mxu0 %v20883_v7  ;;  %v18634_v41 = vadd.f32 %v2205_v8, %v2084_v12  ;;  %4659 = vmatprep.subr.bf16.mxu1 %v15570_v48  ;;  %v15574_v12 = vld [vmem:[%s20734_s1 + $0xa00] ss:$16 sps:$4 sm:$0xff]   ;;  %v15588_v8 = vld [vmem:[%s20734_s1 + $0xbc4] ss:$16 sps:$4 sm:$0xff]  }
 0x18b   :  { %v2207_v3 = vpop.f32.mrf.mxu1  ;;  %3470 = vmatprep.mubr.bf16.mxu0 %v20884_v14  ;;  %4539 = vmatpush1.bf16.msra.mxu0 %v15565_v49  ;;  %v15577_v48 = vld [vmem:[%s20734_s1 + $0x9e0] ss:$16 sps:$4 sm:$0xff]   ;;  %v15585_v49 = vld [vmem:[%s20734_s1 + $0x9c4] ss:$16 sps:$4 sm:$0xff]  }
 0x18c   :  { %20919 = vst [vmem:[#allocation45_spill] sm:$0xff] %v18634_v41  ;;  %v18643_v61 = vadd.f32 %v2207_v3, %v2086_v60  ;;  %3582 = vmatmul.mubr.bf16.gmra.mxu1 %v20885_v34  ;;  %4540 = vmatprep.subr.bf16.mxu0 %v15573_v35  ;;  %v15580_v35 = vld [vmem:[%s20734_s1 + $0xbe0] ss:$16 sps:$4 sm:$0xff]  }
 0x18d   :  { %3591 = vmatprep.mubr.bf16.mxu1 %v20887_v62  ;;  %4660 = vmatpush1.bf16.msra.mxu1 %v15568_v33  ;;  %v15583_v60 = vld [vmem:[%s20734_s1 + $0x9c0] ss:$16 sps:$4 sm:$0xff]  }
 0x18e   :  { %20920 = vst [vmem:[#allocation46_spill] sm:$0xff] %v18643_v61  ;;  %4661 = vmatprep.subr.bf16.mxu1 %v15576_v55  ;;  %v15591_v55 = vld [vmem:[%s20734_s1 + $0x9a4] ss:$16 sps:$4 sm:$0xff]   ;;  %v15586_v3 = vld [vmem:[%s20734_s1 + $0xbc0] ss:$16 sps:$4 sm:$0xff]  }
 0x18f   :  { %4541 = vmatpush1.bf16.msra.mxu0 %v15571_v38 }
 0x190   :  { %4542 = vmatprep.subr.bf16.mxu0 %v15579_v57 }
 0x191   :  { %4662 = vmatpush1.bf16.msra.mxu1 %v15574_v12  ;;  %v15594_v12 = vld [vmem:[%s20734_s1 + $0xba4] ss:$16 sps:$4 sm:$0xff]  }
 0x192   :  { %v2090_v33 = vpop.f32.mrf.mxu0  ;;  %3471 = vmatmul.mubr.bf16.gmra.mxu0 %v20890_v47  ;;  %4663 = vmatprep.subr.bf16.mxu1 %v15582_v53 }
 0x193   :  { %3480 = vmatprep.mubr.bf16.mxu0 %v20891_v26  ;;  %4543 = vmatpush2.bf16.msra.mxu0 %v15577_v48  ;;  %v15589_v48 = vld [vmem:[%s20734_s1 + $0x9a0] ss:$16 sps:$4 sm:$0xff]  }
 0x194   :  { %v2092_v38 = vpop.f32.mrf.mxu0  ;;  %v2211_v57 = vpop.f32.mrf.mxu1  ;;  %3592 = vmatmul.mubr.bf16.gmra.mxu1 %v20892_v11  ;;  %4544 = vmatprep.subr.bf16.mxu0 %v15585_v49  ;;  %v15597_v49 = vld [vmem:[%s20734_s1 + $0x984] ss:$16 sps:$4 sm:$0xff]  }
 0x195   :  { %v18680_v61 = vadd.f32 %v2211_v57, %v2090_v33  ;;  %3601 = vmatprep.mubr.bf16.mxu1 %v20893_v36  ;;  %4664 = vmatpush2.bf16.msra.mxu1 %v15580_v35  ;;  %v15592_v33 = vld [vmem:[%s20734_s1 + $0xba0] ss:$16 sps:$4 sm:$0xff]   ;;  %v15600_v35 = vld [vmem:[%s20734_s1 + $0xb84] ss:$16 sps:$4 sm:$0xff]  }
 0x196   :  { %v2094_v53 = vpop.f32.mrf.mxu0  ;;  %v2213_v41 = vpop.f32.mrf.mxu1  ;;  %4665 = vmatprep.subr.bf16.mxu1 %v15588_v8 }
 0x197   :  { %20921 = vst [vmem:[#allocation47_spill] sm:$0xff] %v18680_v61  ;;  %v18689_v17 = vadd.f32 %v2213_v41, %v2092_v38  ;;  %4545 = vmatpush2.bf16.msra.mxu0 %v15583_v60  ;;  %v15595_v41 = vld [vmem:[%s20734_s1 + $0x980] ss:$16 sps:$4 sm:$0xff]  }
 0x198   :  { %v2096_v9 = vpop.f32.mrf.mxu0  ;;  %v2215_v57 = vpop.f32.mrf.mxu1  ;;  %4546 = vmatprep.subr.bf16.mxu0 %v15591_v55  ;;  %v15603_v55 = vld [vmem:[%s20734_s1 + $0x964] ss:$16 sps:$4 sm:$0xff]  }
 0x199   :  { %20922 = vst [vmem:[#allocation48_spill] sm:$0xff] %v18689_v17  ;;  %v18697_v61 = vadd.f32 %v2215_v57, %v2094_v53  ;;  %4666 = vmatpush2.bf16.msra.mxu1 %v15586_v3  ;;  %v15598_v3 = vld [vmem:[%s20734_s1 + $0xb80] ss:$16 sps:$4 sm:$0xff]  }
 0x19a   :  { %v2100_v8 = vpop.f32.mrf.mxu0  ;;  %3481 = vmatmul.mubr.bf16.gmra.mxu0 %v20896_v45  ;;  %v2217_v60 = vpop.f32.mrf.mxu1  ;;  %4667 = vmatprep.subr.bf16.mxu1 %v15594_v12  ;;  %v15606_v12 = vld [vmem:[%s20734_s1 + $0xb64] ss:$16 sps:$4 sm:$0xff]  }
 0x19b   :  { %20923 = vst [vmem:[#allocation49_spill] sm:$0xff] %v18697_v61  ;;  %3490 = vmatprep.mubr.bf16.mxu0 %v20897_v32  ;;  %v18707_v38 = vadd.f32 %v2217_v60, %v2096_v9  ;;  %4547 = vmatpush2.bf16.msra.mxu0 %v15589_v48  ;;  %v15601_v9 = vld [vmem:[%s20734_s1 + $0x960] ss:$16 sps:$4 sm:$0xff]  }
 0x19c   :  { %v2102_v53 = vpop.f32.mrf.mxu0  ;;  %v2221_v57 = vpop.f32.mrf.mxu1  ;;  %3602 = vmatmul.mubr.bf16.gmra.mxu1 %v20899_v29  ;;  %4548 = vmatprep.subr.bf16.mxu0 %v15597_v49  ;;  %v15609_v49 = vld [vmem:[%s20734_s1 + $0x944] ss:$16 sps:$4 sm:$0xff]  }
 0x19d   :  { %20924 = vst [vmem:[#allocation50_spill] sm:$0xff] %v18707_v38  ;;  %v18716_v61 = vadd.f32 %v2221_v57, %v2100_v8  ;;  %3611 = vmatprep.mubr.bf16.mxu1 %v17857_v25  ;;  %4668 = vmatpush2.bf16.msra.mxu1 %v15592_v33  ;;  %v15612_v33 = vld [vmem:[%s20734_s1 + $0xb44] ss:$16 sps:$4 sm:$0xff]  }
 0x19e   :  { %v2104_v17 = vpop.f32.mrf.mxu0  ;;  %v2223_v48 = vpop.f32.mrf.mxu1  ;;  %4669 = vmatprep.subr.bf16.mxu1 %v15600_v35  ;;  %v15607_v35 = vld [vmem:[%s20734_s1 + $0x940] ss:$16 sps:$4 sm:$0xff]  }
 0x19f   :  { %20925 = vst [vmem:[#allocation51_spill] sm:$0xff] %v18716_v61  ;;  %v18725_v60 = vadd.f32 %v2223_v48, %v2102_v53  ;;  %4549 = vmatpush2.bf16.msra.mxu0 %v15595_v41  ;;  %v15604_v17 = vld [vmem:[%s20734_s1 + $0xb60] ss:$16 sps:$4 sm:$0xff]   ;;  %v15615_v41 = vld [vmem:[%s20734_s1 + $0x924] ss:$16 sps:$4 sm:$0xff]  }
 0x1a0   :  { %v2105_v38 = vpop.f32.mrf.mxu0  ;;  %v2225_v8 = vpop.f32.mrf.mxu1  ;;  %4550 = vmatprep.subr.bf16.mxu0 %v15603_v55  ;;  %v18741_v55 = vld [vmem:[#allocation2 + $0xa0] sm:$0xee] }
 0x1a1   :  { %20926 = vst [vmem:[#allocation52_spill] sm:$0xff] %v18725_v60  ;;  %4670 = vmatpush2.bf16.msra.mxu1 %v15598_v3  ;;  %v15610_v3 = vld [vmem:[%s20734_s1 + $0xb40] ss:$16 sps:$4 sm:$0xff]  }
 0x1a2   :  { %v2262_v57 = vpop.f32.mrf.mxu0  ;;  %3491 = vmatmul.mubr.bf16.gmra.mxu0 %v17847_v10  ;;  %v2226_v38 = vpop.f32.mrf.mxu1  ;;  %4671 = vmatprep.subr.bf16.mxu1 %v15606_v12  ;;  %v15618_v12 = vld [vmem:[%s20734_s1 + $0xb24] ss:$16 sps:$4 sm:$0xff]  }
 0x1a3   :  { %3500 = vmatprep.mubr.bf16.mxu0 %v17917_v51  ;;  %4551 = vmatpush2.bf16.msra.mxu0 %v15601_v9  ;;  %v15613_v9 = vld [vmem:[%s20734_s1 + $0x920] ss:$16 sps:$4 sm:$0xff]  }
 0x1a4   :  { %v2264_v53 = vpop.f32.mrf.mxu0  ;;  %v2383_v48 = vpop.f32.mrf.mxu1  ;;  %3612 = vmatmul.mubr.bf16.gmra.mxu1 %v20901_v16  ;;  %4552 = vmatprep.subr.bf16.mxu0 %v15609_v49  ;;  %v18756_v60 = vld [vmem:[#allocation2 + $0xc0] sm:$0xee] }
 0x1a5   :  { %v18750_v8 = vadd.f32 %v2383_v48, %v2262_v57  ;;  %3621 = vmatprep.mubr.bf16.mxu1 %v20902_v52  ;;  %4672 = vmatpush2.bf16.msra.mxu1 %v15604_v17  ;;  %v15621_v49 = vld [vmem:[%s20734_s1 + $0x904] ss:$16 sps:$4 sm:$0xff]   ;;  %v15616_v17 = vld [vmem:[%s20734_s1 + $0xb20] ss:$16 sps:$4 sm:$0xff]   ;;  %v16697_v48 = vld [vmem:[#allocation2 + $0xf8] sm:$0xff] }
 0x1a6   :  { %v2266_v38 = vpop.f32.mrf.mxu0  ;;  %v2385_v61 = vpop.f32.mrf.mxu1  ;;  %4673 = vmatprep.subr.bf16.mxu1 %v15612_v33  ;;  %v15624_v33 = vld [vmem:[%s20734_s1 + $0xb04] ss:$16 sps:$4 sm:$0xff]  }
 0x1a7   :  { %20927 = vst [vmem:[#allocation53_spill] sm:$0xff] %v18750_v8  ;;  %v18761_v50 = vadd.f32 %v2385_v61, %v2264_v53  ;;  %4553 = vmatpush2.bf16.msra.mxu0 %v15607_v35  ;;  %v13784_v8 = vcombine.high %v18741_v55, %v16697_v48  ;;  %v15619_v61 = vld [vmem:[%s20734_s1 + $0x900] ss:$16 sps:$4 sm:$0xff]   ;;  %v16698_v53 = vld [vmem:[#allocation2 + $0x58] sm:$0xff] }
 0x1a8   :  { %v2268_v57 = vpop.f32.mrf.mxu0  ;;  %v2387_v28 = vpop.f32.mrf.mxu1  ;;  %4554 = vmatprep.subr.bf16.mxu0 %v15615_v41  ;;  %v13786_v41 = vcombine.high %v18756_v60, %v16698_v53 }
 0x1a9   :  { %20928 = vst [vmem:[#allocation54_spill] sm:$0xff] %v18761_v50  ;;  %v18770_v24 = vadd.f32 %v2387_v28, %v2266_v38  ;;  %4674 = vmatpush2.bf16.msra.mxu1 %v15610_v3  ;;  %v15627_v28 = vld [vmem:[%s20734_s1 + $0x8ec] ss:$16 sps:$4 sm:$0xff]   ;;  %v15622_v3 = vld [vmem:[%s20734_s1 + $0xb00] ss:$16 sps:$4 sm:$0xff]   ;;  %v3785_v50 = vrot.slane %v13784_v8, 1  ;;  %v13783_v8 = vcombine.low %v18741_v55, %v16697_v48  ;;  %v13785_v55 = vcombine.low %v18756_v60, %v16698_v53 }
 0x1aa   :  { %v2272_v22 = vpop.f32.mrf.mxu0  ;;  %3501 = vmatmul.mubr.bf16.gmra.mxu0 %v20903_v43  ;;  %v2389_v35 = vpop.f32.mrf.mxu1  ;;  %4675 = vmatprep.subr.bf16.mxu1 %v15618_v12  ;;  %v15630_v12 = vld [vmem:[%s20734_s1 + $0xaec] ss:$16 sps:$4 sm:$0xff]   ;;  %v3791_v44 = vrot.slane %v13786_v41, 1 }
 0x1ab   :  { %20929 = vst [vmem:[#allocation55_spill] sm:$0xff] %v18770_v24  ;;  %3510 = vmatprep.mubr.bf16.mxu0 %v18466_v30  ;;  %v18781_v38 = vadd.f32 %v2389_v35, %v2268_v57  ;;  %4555 = vmatpush2.bf16.msra.mxu0 %v15613_v9  ;;  %v18799_v37 = vsel %vm3781_vm1, %v3785_v50, %v3786_v54  ;;  %v3782_v48 = vrot.slane %v13783_v8, 1 }
 0x1ac   :  { %v2274_v24 = vpop.f32.mrf.mxu0  ;;  %v2393_v30 = vpop.f32.mrf.mxu1  ;;  %3622 = vmatmul.mubr.bf16.gmra.mxu1 %v20904_v13  ;;  %4556 = vmatprep.subr.bf16.mxu0 %v15621_v49 }
 0x1ad   :  { %20930 = vst [vmem:[#allocation56_spill] sm:$0xff] %v18781_v38  ;;  %v18791_v57 = vadd.f32 %v2393_v30, %v2272_v22  ;;  %3631 = vmatprep.mubr.bf16.mxu1 %v18481_v42  ;;  %4676 = vmatpush2.bf16.msra.mxu1 %v15616_v17  ;;  %v3792_v38 = vrot.slane %v17205_v15, 1 }
 0x1ae   :  { %v2276_v35 = vpop.f32.mrf.mxu0  ;;  %v2395_v9 = vpop.f32.mrf.mxu1  ;;  %4677 = vmatprep.subr.bf16.mxu1 %v15624_v33 }
 0x1af   :  { %v18796_v59 = vadd.f32 %v2395_v9, %v2274_v24  ;;  %4557 = vmatpush2.bf16.msra.mxu0 %v15619_v61  ;;  %v18807_v15 = vsel %vm3781_vm1, %v3791_v44, %v3792_v38  ;;  %v3783_v24 = vrot.slane %v17166_v4, 1  ;;  %v3796_v61 = vrot.slane %v17279_v21, 1 }
 0x1b0   :  { %v2278_v49 = vpop.f32.mrf.mxu0  ;;  %v2397_v22 = vpop.f32.mrf.mxu1  ;;  %4768 = vmatprep.subr.bf16.mxu0 %v15627_v28  ;;  %v3788_v28 = vrot.slane %v13785_v55, 1  ;;  %v3789_v4 = vrot.slane %v17207_v31, 1  ;;  %v15628_v31 = vld [vmem:[%s20734_s1 + $0xae8] ss:$16 sps:$4 sm:$0xff]   ;;  %v15639_v55 = vld [vmem:[%s20734_s1 + $0x8ac] ss:$16 sps:$4 sm:$0xff]  }
 0x1b1   :  { %v18801_v30 = vadd.f32 %v2397_v22, %v2276_v35  ;;  %4678 = vmatpush2.bf16.msra.mxu1 %v15622_v3  ;;  %v15633_v3 = vld [vmem:[%s20734_s1 + $0x8cc] ss:$16 sps:$4 sm:$0xff]   ;;  %v18831_v8 = vsel %vm3781_vm1, %v3786_v54, %v3796_v61 }
 0x1b2   :  { %v2282_v42 = vpop.f32.mrf.mxu0  ;;  %3511 = vmatmul.mubr.bf16.gmra.mxu0 %v18500_v27  ;;  %v2399_v17 = vpop.f32.mrf.mxu1  ;;  %4889 = vmatprep.subr.bf16.mxu1 %v15630_v12  ;;  %v15625_v27 = vld [vmem:[%s20734_s1 + $0x8e8] ss:$16 sps:$4 sm:$0xff]   ;;  %v18825_v12 = vsel %vm3781_vm1, %v3782_v48, %v3783_v24  ;;  %v15636_v22 = vld [vmem:[%s20734_s1 + $0xacc] ss:$16 sps:$4 sm:$0xff]   ;;  %v18846_v54 = vsel %vm3781_vm1, %v3788_v28, %v3789_v4 }
 0x1b3   :  { %4558 = vmatprep.mubr.bf16.mxu0 %v18799_v37  ;;  %v18810_v50 = vadd.f32 %v2399_v17, %v2278_v49  ;;  %v15631_v49 = vld [vmem:[%s20734_s1 + $0x8c8] ss:$16 sps:$4 sm:$0xff]  }
 0x1b4   :  { %v2284_v33 = vpop.f32.mrf.mxu0  ;;  %v2403_v41 = vpop.f32.mrf.mxu1  ;;  %3632 = vmatmul.mubr.bf16.gmra.mxu1 %v18507_v46  ;;  %v3800_v46 = vrot.slane %v17336_v56, 1  ;;  %v15634_v28 = vld [vmem:[%s20734_s1 + $0xac8] ss:$16 sps:$4 sm:$0xff]  }
 0x1b5   :  { %20931 = vst [vmem:[#allocation57_spill] sm:$0xff] %v18810_v50  ;;  %v18817_v60 = vadd.f32 %v2403_v41, %v2282_v42  ;;  %4679 = vmatprep.mubr.bf16.mxu1 %v18807_v15 }
 0x1b6   :  { %v2286_v53 = vpop.f32.mrf.mxu0  ;;  %v2405_v21 = vpop.f32.mrf.mxu1  ;;  %v18853_v48 = vsel %vm3781_vm1, %v3792_v38, %v3800_v46  ;;  %v15642_v38 = vld [vmem:[%s20734_s1 + $0xaac] ss:$16 sps:$4 sm:$0xff]  }
 0x1b7   :  { %v18828_v35 = vadd.f32 %v2405_v21, %v2284_v33  ;;  %v3794_v33 = vrot.slane %v20879_v18, 1  ;;  %v3804_v21 = vrot.slane %v20880_v20, 1 }
 0x1b8   :  { %v2288_v9 = vpop.f32.mrf.mxu0  ;;  %v2407_v44 = vpop.f32.mrf.mxu1 }
 0x1b9   :  { %v18842_v56 = vadd.f32 %v2407_v44, %v2286_v53 }
 0x1ba   :  { %v2292_v42 = vpop.f32.mrf.mxu0  ;;  %4559 = vmatmul.mubr.bf16.vlgmr.msra.gmra.mxu0 %v18825_v12  ;;  %v2409_v17 = vpop.f32.mrf.mxu1 }
 0x1bb   :  { %4568 = vmatprep.mubr.bf16.mxu0 %v18831_v8  ;;  %4769 = vmatpush1.bf16.msra.mxu0 %v15625_v27  ;;  %v18856_v41 = vadd.f32 %v2409_v17, %v2288_v9  ;;  %v3798_v27 = vrot.slane %v20881_v5, 1  ;;  %v18874_v9 = vsel %vm3781_vm1, %v3783_v24, %v3794_v33  ;;  %v3808_v17 = vrot.slane %v20882_v2, 1  ;;  %v15640_v24 = vld [vmem:[%s20734_s1 + $0xaa8] ss:$16 sps:$4 sm:$0xff]   ;;  %v15648_v2 = vld [vmem:[%s20734_s1 + $0xa8c] ss:$16 sps:$4 sm:$0xff]  }
 0x1bc   :  { %v2294_v53 = vpop.f32.mrf.mxu0  ;;  %4770 = vmatprep.subr.bf16.mxu0 %v15633_v3  ;;  %v2413_v44 = vpop.f32.mrf.mxu1  ;;  %4680 = vmatmul.mubr.bf16.vlgmr.msra.gmra.mxu1 %v18846_v54  ;;  %v15637_v3 = vld [vmem:[%s20734_s1 + $0x8a8] ss:$16 sps:$4 sm:$0xff]  }
 0x1bd   :  { %20932 = vst [vmem:[#allocation58_spill] sm:$0xff] %v18856_v41  ;;  %v18866_v50 = vadd.f32 %v2413_v44, %v2292_v42  ;;  %4689 = vmatprep.mubr.bf16.mxu1 %v18853_v48  ;;  %4890 = vmatpush1.bf16.msra.mxu1 %v15628_v31  ;;  %v15645_v42 = vld [vmem:[%s20734_s1 + $0x88c] ss:$16 sps:$4 sm:$0xff]   ;;  %v18883_v31 = vsel %vm3781_vm1, %v3796_v61, %v3804_v21  ;;  %v15643_v61 = vld [vmem:[%s20734_s1 + $0x888] ss:$16 sps:$4 sm:$0xff]  }
 0x1be   :  { %v2296_v18 = vpop.f32.mrf.mxu0  ;;  %v2415_v20 = vpop.f32.mrf.mxu1  ;;  %4891 = vmatprep.subr.bf16.mxu1 %v15636_v22 }
 0x1bf   :  { %20933 = vst [vmem:[#allocation59_spill] sm:$0xff] %v18866_v50  ;;  %4771 = vmatpush1.bf16.msra.mxu0 %v15631_v49  ;;  %v18880_v44 = vadd.f32 %v2415_v20, %v2294_v53  ;;  %v18895_v53 = vsel %vm3781_vm1, %v3789_v4, %v3798_v27  ;;  %v18902_v20 = vsel %vm3781_vm1, %v3800_v46, %v3808_v17 }
 0x1c0   :  { %v2298_v5 = vpop.f32.mrf.mxu0  ;;  %4772 = vmatprep.subr.bf16.mxu0 %v15639_v55  ;;  %v2417_v41 = vpop.f32.mrf.mxu1 }
 0x1c1   :  { %20934 = vst [vmem:[#allocation60_spill] sm:$0xff] %v18880_v44  ;;  %v18891_v49 = vadd.f32 %v2417_v41, %v2296_v18  ;;  %4892 = vmatpush1.bf16.msra.mxu1 %v15634_v28  ;;  %v3802_v41 = vrot.slane %v20883_v7, 1  ;;  %v15651_v18 = vld [vmem:[%s20734_s1 + $0x86c] ss:$16 sps:$4 sm:$0xff]   ;;  %v3812_v44 = vrot.slane %v20884_v14, 1 }
 0x1c2   :  { %v2302_v22 = vpop.f32.mrf.mxu0  ;;  %4569 = vmatmul.mubr.bf16.gmra.mxu0 %v18874_v9  ;;  %v2419_v55 = vpop.f32.mrf.mxu1  ;;  %4893 = vmatprep.subr.bf16.mxu1 %v15642_v38  ;;  %v15654_v7 = vld [vmem:[%s20734_s1 + $0xa6c] ss:$16 sps:$4 sm:$0xff]   ;;  %v15649_v14 = vld [vmem:[%s20734_s1 + $0x868] ss:$16 sps:$4 sm:$0xff]  }
 0x1c3   :  { %20935 = vst [vmem:[#allocation61_spill] sm:$0xff] %v18891_v49  ;;  %4578 = vmatprep.mubr.bf16.mxu0 %v18883_v31  ;;  %v18908_v4 = vadd.f32 %v2419_v55, %v2298_v5  ;;  %4773 = vmatpush1.bf16.msra.mxu0 %v15637_v3  ;;  %v15646_v49 = vld [vmem:[%s20734_s1 + $0xa88] ss:$16 sps:$4 sm:$0xff]   ;;  %v3806_v3 = vrot.slane %v20885_v34, 1  ;;  %v18926_v55 = vsel %vm3781_vm1, %v3794_v33, %v3802_v41 }
 0x1c4   :  { %v2304_v28 = vpop.f32.mrf.mxu0  ;;  %v2423_v50 = vpop.f32.mrf.mxu1  ;;  %4690 = vmatmul.mubr.bf16.gmra.mxu1 %v18895_v53  ;;  %4774 = vmatprep.subr.bf16.mxu0 %v15645_v42  ;;  %v3816_v42 = vrot.slane %v20887_v62, 1  ;;  %v18935_v34 = vsel %vm3781_vm1, %v3804_v21, %v3812_v44  ;;  %v15660_v62 = vld [vmem:[%s20734_s1 + $0xa4c] ss:$16 sps:$4 sm:$0xff]   ;;  %v15655_v21 = vld [vmem:[%s20734_s1 + $0x848] ss:$16 sps:$4 sm:$0xff]  }
 0x1c5   :  { %20936 = vst [vmem:[#allocation62_spill] sm:$0xff] %v18908_v4  ;;  %v18918_v46 = vadd.f32 %v2423_v50, %v2302_v22  ;;  %4699 = vmatprep.mubr.bf16.mxu1 %v18902_v20  ;;  %4894 = vmatpush1.bf16.msra.mxu1 %v15640_v24  ;;  %v15657_v50 = vld [vmem:[%s20734_s1 + $0x84c] ss:$16 sps:$4 sm:$0xff]   ;;  %v15652_v24 = vld [vmem:[%s20734_s1 + $0xa68] ss:$16 sps:$4 sm:$0xff]  }
 0x1c6   :  { %v2306_v38 = vpop.f32.mrf.mxu0  ;;  %v2425_v5 = vpop.f32.mrf.mxu1  ;;  %4895 = vmatprep.subr.bf16.mxu1 %v15648_v2 }
 0x1c7   :  { %20937 = vst [vmem:[#allocation63_spill] sm:$0xff] %v18918_v46  ;;  %v18932_v22 = vadd.f32 %v2425_v5, %v2304_v28  ;;  %4775 = vmatpush1.bf16.msra.mxu0 %v15643_v61  ;;  %v18947_v61 = vsel %vm3781_vm1, %v3798_v27, %v3806_v3  ;;  %v15663_v5 = vld [vmem:[%s20734_s1 + $0x82c] ss:$16 sps:$4 sm:$0xff]  }
 0x1c8   :  { %v2308_v4 = vpop.f32.mrf.mxu0  ;;  %v2427_v33 = vpop.f32.mrf.mxu1  ;;  %4776 = vmatprep.subr.bf16.mxu0 %v15651_v18  ;;  %v18954_v18 = vsel %vm3781_vm1, %v3808_v17, %v3816_v42 }
 0x1c9   :  { %20938 = vst [vmem:[#allocation64_spill] sm:$0xff] %v18932_v22  ;;  %v18943_v2 = vadd.f32 %v2427_v33, %v2306_v38  ;;  %4896 = vmatpush1.bf16.msra.mxu1 %v15646_v49  ;;  %v3810_v38 = vrot.slane %v20890_v47, 1  ;;  %v15658_v33 = vld [vmem:[%s20734_s1 + $0xa48] ss:$16 sps:$4 sm:$0xff]   ;;  %v15666_v47 = vld [vmem:[%s20734_s1 + $0xa2c] ss:$16 sps:$4 sm:$0xff]  }
 0x1ca   :  { %v2312_v46 = vpop.f32.mrf.mxu0  ;;  %4579 = vmatmul.mubr.bf16.gmra.mxu0 %v18926_v55  ;;  %v2429_v28 = vpop.f32.mrf.mxu1  ;;  %4897 = vmatprep.subr.bf16.mxu1 %v15654_v7  ;;  %v3814_v7 = vrot.slane %v20892_v11, 1 }
 0x1cb   :  { %20939 = vst [vmem:[#allocation65_spill] sm:$0xff] %v18943_v2  ;;  %4588 = vmatprep.mubr.bf16.mxu0 %v18935_v34  ;;  %v18960_v27 = vadd.f32 %v2429_v28, %v2308_v4  ;;  %4777 = vmatpush1.bf16.msra.mxu0 %v15649_v14  ;;  %v3820_v2 = vrot.slane %v20891_v26, 1  ;;  %v15661_v26 = vld [vmem:[%s20734_s1 + $0x828] ss:$16 sps:$4 sm:$0xff]   ;;  %v18978_v28 = vsel %vm3781_vm1, %v3802_v41, %v3810_v38 }
 0x1cc   :  { %v2314_v49 = vpop.f32.mrf.mxu0  ;;  %v2433_v22 = vpop.f32.mrf.mxu1  ;;  %4700 = vmatmul.mubr.bf16.gmra.mxu1 %v18947_v61  ;;  %4778 = vmatprep.subr.bf16.mxu0 %v15657_v50  ;;  %v3824_v50 = vrot.slane %v20893_v36, 1  ;;  %v15672_v36 = vld [vmem:[%s20734_s1 + $0xa0c] ss:$16 sps:$4 sm:$0xff]  }
 0x1cd   :  { %20940 = vst [vmem:[#allocation66_spill] sm:$0xff] %v18960_v27  ;;  %v18970_v17 = vadd.f32 %v2433_v22, %v2312_v46  ;;  %4709 = vmatprep.mubr.bf16.mxu1 %v18954_v18  ;;  %4898 = vmatpush1.bf16.msra.mxu1 %v15652_v24  ;;  %v15669_v46 = vld [vmem:[%s20734_s1 + $0x80c] ss:$16 sps:$4 sm:$0xff]   ;;  %v18987_v11 = vsel %vm3781_vm1, %v3812_v44, %v3820_v2  ;;  %v15664_v24 = vld [vmem:[%s20734_s1 + $0xa28] ss:$16 sps:$4 sm:$0xff]  }
 0x1ce   :  { %v2316_v4 = vpop.f32.mrf.mxu0  ;;  %v2435_v14 = vpop.f32.mrf.mxu1  ;;  %4899 = vmatprep.subr.bf16.mxu1 %v15660_v62  ;;  %v15667_v44 = vld [vmem:[%s20734_s1 + $0x808] ss:$16 sps:$4 sm:$0xff]  }
 0x1cf   :  { %20941 = vst [vmem:[#allocation67_spill] sm:$0xff] %v18970_v17  ;;  %v18984_v22 = vadd.f32 %v2435_v14, %v2314_v49  ;;  %4779 = vmatpush1.bf16.msra.mxu0 %v15655_v21  ;;  %v18999_v21 = vsel %vm3781_vm1, %v3806_v3, %v3814_v7  ;;  %v15675_v14 = vld [vmem:[%s20734_s1 + $0x9ec] ss:$16 sps:$4 sm:$0xff]  }
 0x1d0   :  { %v2318_v27 = vpop.f32.mrf.mxu0  ;;  %v2437_v41 = vpop.f32.mrf.mxu1  ;;  %4780 = vmatprep.subr.bf16.mxu0 %v15663_v5  ;;  %v19006_v5 = vsel %vm3781_vm1, %v3816_v42, %v3824_v50 }
 0x1d1   :  { %20942 = vst [vmem:[#allocation68_spill] sm:$0xff] %v18984_v22  ;;  %v18995_v62 = vadd.f32 %v2437_v41, %v2316_v4  ;;  %4900 = vmatpush1.bf16.msra.mxu1 %v15658_v33  ;;  %v3818_v4 = vrot.slane %v20896_v45, 1  ;;  %v15670_v41 = vld [vmem:[%s20734_s1 + $0xa08] ss:$16 sps:$4 sm:$0xff]   ;;  %v15678_v45 = vld [vmem:[%s20734_s1 + $0xbec] ss:$16 sps:$4 sm:$0xff]  }
 0x1d2   :  { %v2322_v17 = vpop.f32.mrf.mxu0  ;;  %4589 = vmatmul.mubr.bf16.gmra.mxu0 %v18978_v28  ;;  %v2439_v49 = vpop.f32.mrf.mxu1  ;;  %4901 = vmatprep.subr.bf16.mxu1 %v15666_v47  ;;  %v3822_v47 = vrot.slane %v20899_v29, 1 }
 0x1d3   :  { %20943 = vst [vmem:[#allocation69_spill] sm:$0xff] %v18995_v62  ;;  %4598 = vmatprep.mubr.bf16.mxu0 %v18987_v11  ;;  %v19012_v3 = vadd.f32 %v2439_v49, %v2318_v27  ;;  %4781 = vmatpush1.bf16.msra.mxu0 %v15661_v26  ;;  %v3828_v62 = vrot.slane %v20897_v32, 1  ;;  %v15673_v32 = vld [vmem:[%s20734_s1 + $0x9e8] ss:$16 sps:$4 sm:$0xff]   ;;  %v19030_v49 = vsel %vm3781_vm1, %v3810_v38, %v3818_v4 }
 0x1d4   :  { %v2324_v33 = vpop.f32.mrf.mxu0  ;;  %v2443_v22 = vpop.f32.mrf.mxu1  ;;  %4710 = vmatmul.mubr.bf16.gmra.mxu1 %v18999_v21  ;;  %4782 = vmatprep.subr.bf16.mxu0 %v15669_v46  ;;  %v3832_v46 = vrot.slane %v17857_v25, 1  ;;  %v15684_v25 = vld [vmem:[%s20734_s1 + $0xbcc] ss:$16 sps:$4 sm:$0xff]  }
 0x1d5   :  { %20944 = vst [vmem:[#allocation70_spill] sm:$0xff] %v19012_v3  ;;  %v19022_v42 = vadd.f32 %v2443_v22, %v2322_v17  ;;  %4719 = vmatprep.mubr.bf16.mxu1 %v19006_v5  ;;  %4902 = vmatpush1.bf16.msra.mxu1 %v15664_v24  ;;  %v15681_v17 = vld [vmem:[%s20734_s1 + $0x9cc] ss:$16 sps:$4 sm:$0xff]   ;;  %v19039_v29 = vsel %vm3781_vm1, %v3820_v2, %v3828_v62  ;;  %v15676_v24 = vld [vmem:[%s20734_s1 + $0xbe8] ss:$16 sps:$4 sm:$0xff]  }
 0x1d6   :  { %v2326_v27 = vpop.f32.mrf.mxu0  ;;  %v2445_v26 = vpop.f32.mrf.mxu1  ;;  %4903 = vmatprep.subr.bf16.mxu1 %v15672_v36  ;;  %v15679_v2 = vld [vmem:[%s20734_s1 + $0x9c8] ss:$16 sps:$4 sm:$0xff]  }
 0x1d7   :  { %20945 = vst [vmem:[#allocation71_spill] sm:$0xff] %v19022_v42  ;;  %v19036_v22 = vadd.f32 %v2445_v26, %v2324_v33  ;;  %4783 = vmatpush1.bf16.msra.mxu0 %v15667_v44  ;;  %v19051_v44 = vsel %vm3781_vm1, %v3814_v7, %v3822_v47  ;;  %v15687_v26 = vld [vmem:[%s20734_s1 + $0x9ac] ss:$16 sps:$4 sm:$0xff]  }
 0x1d8   :  { %v2328_v3 = vpop.f32.mrf.mxu0  ;;  %v2447_v38 = vpop.f32.mrf.mxu1  ;;  %4784 = vmatprep.subr.bf16.mxu0 %v15675_v14  ;;  %v19058_v14 = vsel %vm3781_vm1, %v3824_v50, %v3832_v46 }
 0x1d9   :  { %20946 = vst [vmem:[#allocation72_spill] sm:$0xff] %v19036_v22  ;;  %v19047_v36 = vadd.f32 %v2447_v38, %v2326_v27  ;;  %4904 = vmatpush1.bf16.msra.mxu1 %v15670_v41  ;;  %v3826_v27 = vrot.slane %v17847_v10, 1  ;;  %v15682_v38 = vld [vmem:[%s20734_s1 + $0xbc8] ss:$16 sps:$4 sm:$0xff]   ;;  %v15690_v10 = vld [vmem:[%s20734_s1 + $0xbac] ss:$16 sps:$4 sm:$0xff]  }
 0x1da   :  { %v2332_v42 = vpop.f32.mrf.mxu0  ;;  %4599 = vmatmul.mubr.bf16.gmra.mxu0 %v19030_v49  ;;  %v2449_v33 = vpop.f32.mrf.mxu1  ;;  %4905 = vmatprep.subr.bf16.mxu1 %v15678_v45  ;;  %v3830_v45 = vrot.slane %v20901_v16, 1 }
 0x1db   :  { %20947 = vst [vmem:[#allocation73_spill] sm:$0xff] %v19047_v36  ;;  %4608 = vmatprep.mubr.bf16.mxu0 %v19039_v29  ;;  %v19064_v7 = vadd.f32 %v2449_v33, %v2328_v3  ;;  %4785 = vmatpush2.bf16.msra.mxu0 %v15673_v32  ;;  %v3836_v36 = vrot.slane %v17917_v51, 1  ;;  %v15685_v51 = vld [vmem:[%s20734_s1 + $0x9a8] ss:$16 sps:$4 sm:$0xff]   ;;  %v19082_v33 = vsel %vm3781_vm1, %v3818_v4, %v3826_v27 }
 0x1dc   :  { %v2334_v41 = vpop.f32.mrf.mxu0  ;;  %v2453_v22 = vpop.f32.mrf.mxu1  ;;  %4720 = vmatmul.mubr.bf16.gmra.mxu1 %v19051_v44  ;;  %4786 = vmatprep.subr.bf16.mxu0 %v15681_v17  ;;  %v3840_v17 = vrot.slane %v20902_v52, 1  ;;  %v15696_v52 = vld [vmem:[%s20734_s1 + $0xb8c] ss:$16 sps:$4 sm:$0xff]  }
 0x1dd   :  { %20948 = vst [vmem:[#allocation74_spill] sm:$0xff] %v19064_v7  ;;  %v19074_v50 = vadd.f32 %v2453_v22, %v2332_v42  ;;  %4729 = vmatprep.mubr.bf16.mxu1 %v19058_v14  ;;  %4906 = vmatpush2.bf16.msra.mxu1 %v15676_v24  ;;  %v15693_v42 = vld [vmem:[%s20734_s1 + $0x98c] ss:$16 sps:$4 sm:$0xff]   ;;  %v19091_v16 = vsel %vm3781_vm1, %v3828_v62, %v3836_v36  ;;  %v15688_v24 = vld [vmem:[%s20734_s1 + $0xba8] ss:$16 sps:$4 sm:$0xff]  }
 0x1de   :  { %v2336_v3 = vpop.f32.mrf.mxu0  ;;  %v2455_v32 = vpop.f32.mrf.mxu1  ;;  %4907 = vmatprep.subr.bf16.mxu1 %v15684_v25  ;;  %v15691_v62 = vld [vmem:[%s20734_s1 + $0x988] ss:$16 sps:$4 sm:$0xff]  }
 0x1df   :  { %20949 = vst [vmem:[#allocation75_spill] sm:$0xff] %v19074_v50  ;;  %v19088_v22 = vadd.f32 %v2455_v32, %v2334_v41  ;;  %4787 = vmatpush2.bf16.msra.mxu0 %v15679_v2  ;;  %v19103_v2 = vsel %vm3781_vm1, %v3822_v47, %v3830_v45  ;;  %v15699_v32 = vld [vmem:[%s20734_s1 + $0x96c] ss:$16 sps:$4 sm:$0xff]  }
 0x1e0   :  { %v2338_v7 = vpop.f32.mrf.mxu0  ;;  %v2457_v4 = vpop.f32.mrf.mxu1  ;;  %4788 = vmatprep.subr.bf16.mxu0 %v15687_v26  ;;  %v19110_v26 = vsel %vm3781_vm1, %v3832_v46, %v3840_v17 }
 0x1e1   :  { %20950 = vst [vmem:[#allocation76_spill] sm:$0xff] %v19088_v22  ;;  %v19099_v25 = vadd.f32 %v2457_v4, %v2336_v3  ;;  %4908 = vmatpush2.bf16.msra.mxu1 %v15682_v38  ;;  %v3834_v3 = vrot.slane %v20903_v43, 1  ;;  %v15694_v4 = vld [vmem:[%s20734_s1 + $0xb88] ss:$16 sps:$4 sm:$0xff]   ;;  %v15702_v43 = vld [vmem:[%s20734_s1 + $0xb6c] ss:$16 sps:$4 sm:$0xff]  }
 0x1e2   :  { %v2342_v50 = vpop.f32.mrf.mxu0  ;;  %4609 = vmatmul.mubr.bf16.gmra.mxu0 %v19082_v33  ;;  %v2459_v41 = vpop.f32.mrf.mxu1  ;;  %4909 = vmatprep.subr.bf16.mxu1 %v15690_v10 }
 0x1e3   :  { %20951 = vst [vmem:[#allocation77_spill] sm:$0xff] %v19099_v25  ;;  %4618 = vmatprep.mubr.bf16.mxu0 %v19091_v16  ;;  %v19116_v47 = vadd.f32 %v2459_v41, %v2338_v7  ;;  %4789 = vmatpush2.bf16.msra.mxu0 %v15685_v51  ;;  %v20953_v25 = vld [vmem:[#allocation42_spill] sm:$0xff]  ;;  %v3838_v51 = vrot.slane %v20904_v13, 1 }
 0x1e4   :  { %v2344_v38 = vpop.f32.mrf.mxu0  ;;  %v19122_v22 = vrot.slane %v20953_v25, 1  ;;  %v2463_v46 = vpop.f32.mrf.mxu1  ;;  %4730 = vmatmul.mubr.bf16.gmra.mxu1 %v19103_v2  ;;  %4790 = vmatprep.subr.bf16.mxu0 %v15693_v42  ;;  %v15697_v25 = vld [vmem:[%s20734_s1 + $0x968] ss:$16 sps:$4 sm:$0xff]   ;;  %v19139_v42 = vrot.slane %v17980_v19, 1  ;;  %v15708_v19 = vld [vmem:[%s20734_s1 + $0xb4c] ss:$16 sps:$4 sm:$0xff]  }
 0x1e5   :  { %20952 = vst [vmem:[#allocation78_spill] sm:$0xff] %v19116_v47  ;;  %v19128_v10 = vadd.f32 %v2463_v46, %v2342_v50  ;;  %4739 = vmatprep.mubr.bf16.mxu1 %v19110_v26  ;;  %4910 = vmatpush2.bf16.msra.mxu1 %v15688_v24  ;;  %v19136_v47 = vsel %vm3781_vm1, %v3826_v27, %v3834_v3  ;;  %v15705_v50 = vld [vmem:[%s20734_s1 + $0x94c] ss:$16 sps:$4 sm:$0xff]   ;;  %v15700_v27 = vld [vmem:[%s20734_s1 + $0xb68] ss:$16 sps:$4 sm:$0xff]  }
 0x1e6   :  { %v2346_v7 = vpop.f32.mrf.mxu0  ;;  %v2465_v41 = vpop.f32.mrf.mxu1  ;;  %4911 = vmatprep.subr.bf16.mxu1 %v15696_v52  ;;  %v19148_v24 = vsel %vm3781_vm1, %v3836_v36, %v19122_v22  ;;  %v15703_v36 = vld [vmem:[%s20734_s1 + $0x948] ss:$16 sps:$4 sm:$0xff]  }
 0x1e7   :  { %v19144_v46 = vadd.f32 %v2465_v41, %v2344_v38  ;;  %4791 = vmatpush2.bf16.msra.mxu0 %v15691_v62  ;;  %v19158_v38 = vsel %vm3781_vm1, %v3830_v45, %v3838_v51  ;;  %v15711_v45 = vld [vmem:[%s20734_s1 + $0x92c] ss:$16 sps:$4 sm:$0xff]  }
 0x1e8   :  { %v2347_v13 = vpop.f32.mrf.mxu0  ;;  %v2467_v52 = vpop.f32.mrf.mxu1  ;;  %4792 = vmatprep.subr.bf16.mxu0 %v15699_v32  ;;  %v19167_v32 = vsel %vm3781_vm1, %v3840_v17, %v19139_v42 }
 0x1e9   :  { %20954 = vst [vmem:[#allocation42_spill] sm:$0xff] %v19144_v46  ;;  %4912 = vmatpush2.bf16.msra.mxu1 %v15694_v4  ;;  %v19170_v13 = vrot.slane %v17974_v63, 1  ;;  %v15714_v63 = vld [vmem:[%s20734_s1 + $0xb2c] ss:$16 sps:$4 sm:$0xff]  }
 0x1ea   :  { %v3190_v7 = vpop.f32.mrf.mxu0  ;;  %4619 = vmatmul.mubr.bf16.gmra.mxu0 %v19136_v47  ;;  %v2468_v62 = vpop.f32.mrf.mxu1  ;;  %4913 = vmatprep.subr.bf16.mxu1 %v15702_v43 }
 0x1eb   :  { %v3191_v41 = vadd.f32 %v3190_v7, %v18296_v1  ;;  %4628 = vmatprep.mubr.bf16.mxu0 %v19148_v24  ;;  %4793 = vmatpush2.bf16.msra.mxu0 %v15697_v25  ;;  %v15706_v1 = vld [vmem:[%s20734_s1 + $0xb48] ss:$16 sps:$4 sm:$0xff]   ;;  %v19187_v25 = vrot.slane %v17982_v58, 1  ;;  %v15717_v58 = vld [vmem:[%s20734_s1 + $0x90c] ss:$16 sps:$4 sm:$0xff]  }
 0x1ec   :  { %v3192_v4 = vpop.f32.mrf.mxu0  ;;  %v3311_v52 = vpop.f32.mrf.mxu1  ;;  %4740 = vmatmul.mubr.bf16.gmra.mxu1 %v19158_v38  ;;  %4794 = vmatprep.subr.bf16.mxu0 %v15705_v50  ;;  %v15709_v62 = vld [vmem:[%s20734_s1 + $0x928] ss:$16 sps:$4 sm:$0xff]  }
 0x1ed   :  { %v3193_v17 = vadd.f32 %v3192_v4, %v18308_v0  ;;  %v19183_v43 = vadd.f32 %v3311_v52, %v3191_v41  ;;  %4749 = vmatprep.mubr.bf16.mxu1 %v19167_v32  ;;  %4914 = vmatpush2.bf16.msra.mxu1 %v15700_v27  ;;  %v2148_v0 = vadd.f32 %v18342_v40, %v18318_v39  ;;  %v15712_v39 = vld [vmem:[%s20734_s1 + $0xb28] ss:$16 sps:$4 sm:$0xff]  }
 0x1ee   :  { %v3194_v7 = vpop.f32.mrf.mxu0  ;;  %v3313_v50 = vpop.f32.mrf.mxu1  ;;  %v19197_v41 = vsel %vm3781_vm1, %v3834_v3, %v19170_v13  ;;  %4915 = vmatprep.subr.bf16.mxu1 %v15708_v19 }
 0x1ef   :  { %20955 = vst [vmem:[#allocation79_spill] sm:$0xff] %v19183_v43  ;;  %v3195_v4 = vadd.f32 %v3194_v7, %v18316_v6  ;;  %v19202_v27 = vadd.f32 %v3313_v50, %v3193_v17  ;;  %4795 = vmatpush2.bf16.msra.mxu0 %v15703_v36  ;;  %v15720_v6 = vld [vmem:[%s20734_s1 + $0xb0c] ss:$16 sps:$4 sm:$0xff]   ;;  %v19215_v17 = vsel %vm3781_vm1, %v3838_v51, %v19187_v25  ;;  %v15715_v36 = vld [vmem:[%s20734_s1 + $0x908] ss:$16 sps:$4 sm:$0xff]  }
 0x1f0   :  { %v3196_v52 = vpop.f32.mrf.mxu0  ;;  %v3315_v40 = vpop.f32.mrf.mxu1  ;;  %4796 = vmatprep.subr.bf16.mxu0 %v15711_v45  ;;  %v15718_v51 = vld [vmem:[%s20734_s1 + $0xb08] ss:$16 sps:$4 sm:$0xff]  }
 0x1f1   :  { %20956 = vst [vmem:[#allocation80_spill] sm:$0xff] %v19202_v27  ;;  %v3197_v43 = vadd.f32 %v3196_v52, %v2148_v0  ;;  %v19210_v3 = vadd.f32 %v3315_v40, %v3195_v4  ;;  %4916 = vmatpush2.bf16.msra.mxu1 %v15706_v1  ;;  %v20959_v1 = vld [vmem:[#allocation17_spill] sm:$0xff] }
 0x1f2   :  { %v3200_v19 = vpop.f32.mrf.mxu0  ;;  %4629 = vmatmul.mubr.bf16.gmra.mxu0 %v19197_v41  ;;  %v3317_v7 = vpop.f32.mrf.mxu1  ;;  %4917 = vmatprep.subr.bf16.mxu1 %v15714_v63 }
 0x1f3   :  { %20957 = vst [vmem:[#allocation81_spill] sm:$0xff] %v19210_v3  ;;  %v3201_v45 = vadd.f32 %v3200_v19, %v18358_v23  ;;  %4638 = vmatprep.mubr.bf16.mxu0 %v19122_v22  ;;  %v19222_v0 = vadd.f32 %v3317_v7, %v3197_v43  ;;  %4797 = vmatpush2.bf16.msra.mxu0 %v15709_v62  ;;  %v20960_v43 = vld [vmem:[#allocation21_spill] sm:$0xff]  ;;  %v20961_v3 = vld [vmem:[#allocation18_spill] sm:$0xff] }
 0x1f4   :  { %v3202_v50 = vpop.f32.mrf.mxu0  ;;  %v3321_v4 = vpop.f32.mrf.mxu1  ;;  %4750 = vmatmul.mubr.bf16.gmra.mxu1 %v19215_v17  ;;  %4798 = vmatprep.subr.bf16.mxu0 %v15717_v58 }
 0x1f5   :  { %20958 = vst [vmem:[#allocation82_spill] sm:$0xff] %v19222_v0  ;;  %v3203_v52 = vadd.f32 %v3202_v50, %v20959_v1  ;;  %v19229_v40 = vadd.f32 %v3321_v4, %v3201_v45  ;;  %4759 = vmatprep.mubr.bf16.mxu1 %v19139_v42  ;;  %4918 = vmatpush2.bf16.msra.mxu1 %v15712_v39  ;;  %v20962_v50 = vld [vmem:[#allocation23_spill] sm:$0xff] }
 0x1f6   :  { %v3204_v23 = vpop.f32.mrf.mxu0  ;;  %v3323_v63 = vpop.f32.mrf.mxu1  ;;  %4919 = vmatprep.subr.bf16.mxu1 %v15720_v6 }
 0x1f7   :  { %v3205_v19 = vadd.f32 %v3204_v23, %v20960_v43  ;;  %v19233_v62 = vadd.f32 %v3323_v63, %v3203_v52  ;;  %4799 = vmatpush2.bf16.msra.mxu0 %v15715_v36  ;;  %v20963_v36 = vld [vmem:[#allocation22_spill] sm:$0xff] }
 0x1f8   :  { %v3206_v7 = vpop.f32.mrf.mxu0  ;;  %v3325_v0 = vpop.f32.mrf.mxu1 }
 0x1f9   :  { %v3207_v27 = vadd.f32 %v3206_v7, %v20961_v3  ;;  %v19236_v46 = vadd.f32 %v3325_v0, %v3205_v19  ;;  %4920 = vmatpush2.bf16.msra.mxu1 %v15718_v51  ;;  %v20964_v51 = vld [vmem:[#allocation27_spill] sm:$0xff] }
 0x1fa   :  { %v3210_v58 = vpop.f32.mrf.mxu0  ;;  %4639 = vmatmul.mubr.bf16.gmra.mxu0 %v19170_v13  ;;  %v3327_v45 = vpop.f32.mrf.mxu1 }
 0x1fb   :  { %v3211_v39 = vadd.f32 %v3210_v58, %v20962_v50  ;;  %4800 = vmatprep.mubr.bf16.mxu0 %v18799_v37  ;;  %v19241_v4 = vadd.f32 %v3327_v45, %v3207_v27  ;;  %v20965_v27 = vld [vmem:[#allocation24_spill] sm:$0xff] }
 0x1fc   :  { %v3212_v6 = vpop.f32.mrf.mxu0  ;;  %v3331_v1 = vpop.f32.mrf.mxu1  ;;  %4760 = vmatmul.mubr.bf16.gmra.mxu1 %v19187_v25 }
 0x1fd   :  { %v3213_v52 = vadd.f32 %v3212_v6, %v20963_v36  ;;  %v19245_v3 = vadd.f32 %v3331_v1, %v3211_v39  ;;  %4921 = vmatprep.mubr.bf16.mxu1 %v18807_v15  ;;  %v20966_v39 = vld [vmem:[#allocation31_spill] sm:$0xff] }
 0x1fe   :  { %v3214_v0 = vpop.f32.mrf.mxu0  ;;  %v3333_v23 = vpop.f32.mrf.mxu1 }
 0x1ff   :  { %v3215_v63 = vadd.f32 %v3214_v0, %v20964_v51  ;;  %v19249_v43 = vadd.f32 %v3333_v23, %v3213_v52  ;;  %v20967_v52 = vld [vmem:[#allocation28_spill] sm:$0xff] }
 0x200   :  { %v3216_v19 = vpop.f32.mrf.mxu0  ;;  %v3335_v37 = vpop.f32.mrf.mxu1 }
 0x201   :  { %v3217_v7 = vadd.f32 %v3216_v19, %v20965_v27  ;;  %v19252_v58 = vadd.f32 %v3335_v37, %v3215_v63 }
 0x202   :  { %v3220_v45 = vpop.f32.mrf.mxu0  ;;  %4801 = vmatmul.mubr.bf16.vlgmr.msra.gmra.mxu0 %v18825_v12  ;;  %v3337_v50 = vpop.f32.mrf.mxu1  ;;  %v20968_v12 = vld [vmem:[#allocation29_spill] sm:$0xff] }
 0x203   :  { %v3221_v6 = vadd.f32 %v3220_v45, %v20966_v39  ;;  %4810 = vmatprep.mubr.bf16.mxu0 %v18831_v8  ;;  %v19257_v15 = vadd.f32 %v3337_v50, %v3217_v7  ;;  %v20969_v7 = vld [vmem:[#allocation32_spill] sm:$0xff] }
 0x204   :  { %v3222_v1 = vpop.f32.mrf.mxu0  ;;  %v3341_v36 = vpop.f32.mrf.mxu1  ;;  %4922 = vmatmul.mubr.bf16.vlgmr.msra.gmra.mxu1 %v18846_v54 }
 0x205   :  { %v3223_v0 = vadd.f32 %v3222_v1, %v20967_v52  ;;  %v19261_v23 = vadd.f32 %v3341_v36, %v3221_v6  ;;  %4931 = vmatprep.mubr.bf16.mxu1 %v18853_v48  ;;  %v20970_v6 = vld [vmem:[#allocation33_spill] sm:$0xff] }
 0x206   :  { %v3224_v51 = vpop.f32.mrf.mxu0  ;;  %v3343_v63 = vpop.f32.mrf.mxu1 }
 0x207   :  { %v3225_v19 = vadd.f32 %v3224_v51, %v20968_v12  ;;  %v19265_v37 = vadd.f32 %v3343_v63, %v3223_v0  ;;  %v20971_v0 = vld [vmem:[#allocation30_spill] sm:$0xff] }
 0x208   :  { %v3226_v27 = vpop.f32.mrf.mxu0  ;;  %v3345_v8 = vpop.f32.mrf.mxu1 }
 0x209   :  { %v3227_v45 = vadd.f32 %v3226_v27, %v20969_v7  ;;  %v19268_v50 = vadd.f32 %v3345_v8, %v3225_v19 }
 0x20a   :  { %v3230_v39 = vpop.f32.mrf.mxu0  ;;  %4811 = vmatmul.mubr.bf16.gmra.mxu0 %v18874_v9  ;;  %v3347_v54 = vpop.f32.mrf.mxu1  ;;  %v20972_v9 = vld [vmem:[#allocation35_spill] sm:$0xff] }
 0x20b   :  { %v3231_v1 = vadd.f32 %v3230_v39, %v20970_v6  ;;  %4820 = vmatprep.mubr.bf16.mxu0 %v18883_v31  ;;  %v19273_v48 = vadd.f32 %v3347_v54, %v3227_v45  ;;  %v20973_v45 = vld [vmem:[#allocation34_spill] sm:$0xff] }
 0x20c   :  { %v3232_v36 = vpop.f32.mrf.mxu0  ;;  %v3351_v52 = vpop.f32.mrf.mxu1  ;;  %4932 = vmatmul.mubr.bf16.gmra.mxu1 %v18895_v53 }
 0x20d   :  { %v3233_v51 = vadd.f32 %v3232_v36, %v20971_v0  ;;  %v19277_v63 = vadd.f32 %v3351_v52, %v3231_v1  ;;  %4941 = vmatprep.mubr.bf16.mxu1 %v18902_v20  ;;  %v20974_v1 = vld [vmem:[#allocation36_spill] sm:$0xff] }
 0x20e   :  { %v3234_v12 = vpop.f32.mrf.mxu0  ;;  %v3353_v19 = vpop.f32.mrf.mxu1 }
 0x20f   :  { %v3235_v27 = vadd.f32 %v3234_v12, %v20972_v9  ;;  %v19281_v8 = vadd.f32 %v3353_v19, %v3233_v51  ;;  %v20975_v51 = vld [vmem:[#allocation39_spill] sm:$0xff] }
 0x210   :  { %v3236_v7 = vpop.f32.mrf.mxu0  ;;  %v3355_v31 = vpop.f32.mrf.mxu1 }
 0x211   :  { %v3237_v39 = vadd.f32 %v3236_v7, %v20973_v45  ;;  %v19284_v54 = vadd.f32 %v3355_v31, %v3235_v27 }
 0x212   :  { %v3240_v6 = vpop.f32.mrf.mxu0  ;;  %4821 = vmatmul.mubr.bf16.gmra.mxu0 %v18926_v55  ;;  %v3357_v53 = vpop.f32.mrf.mxu1  ;;  %v20976_v55 = vld [vmem:[#allocation38_spill] sm:$0xff] }
 0x213   :  { %v3241_v36 = vadd.f32 %v3240_v6, %v20974_v1  ;;  %4830 = vmatprep.mubr.bf16.mxu0 %v18935_v34  ;;  %v19289_v20 = vadd.f32 %v3357_v53, %v3237_v39  ;;  %v20977_v39 = vld [vmem:[#allocation40_spill] sm:$0xff] }
 0x214   :  { %v3242_v52 = vpop.f32.mrf.mxu0  ;;  %v3361_v0 = vpop.f32.mrf.mxu1  ;;  %4942 = vmatmul.mubr.bf16.gmra.mxu1 %v18947_v61 }
 0x215   :  { %v3243_v12 = vadd.f32 %v3242_v52, %v20975_v51  ;;  %v19293_v19 = vadd.f32 %v3361_v0, %v3241_v36  ;;  %4951 = vmatprep.mubr.bf16.mxu1 %v18954_v18  ;;  %v20978_v36 = vld [vmem:[#allocation43_spill] sm:$0xff] }
 0x216   :  { %v3244_v9 = vpop.f32.mrf.mxu0  ;;  %v3363_v27 = vpop.f32.mrf.mxu1 }
 0x217   :  { %v3245_v7 = vadd.f32 %v3244_v9, %v20976_v55  ;;  %v19297_v31 = vadd.f32 %v3363_v27, %v3243_v12  ;;  %v20979_v12 = vld [vmem:[#allocation44_spill] sm:$0xff] }
 0x218   :  { %v3246_v45 = vpop.f32.mrf.mxu0  ;;  %v3365_v34 = vpop.f32.mrf.mxu1 }
 0x219   :  { %v3247_v6 = vadd.f32 %v3246_v45, %v20977_v39  ;;  %v19300_v53 = vadd.f32 %v3365_v34, %v3245_v7 }
 0x21a   :  { %v3250_v1 = vpop.f32.mrf.mxu0  ;;  %4831 = vmatmul.mubr.bf16.gmra.mxu0 %v18978_v28  ;;  %v3367_v61 = vpop.f32.mrf.mxu1  ;;  %v20980_v28 = vld [vmem:[#allocation45_spill] sm:$0xff] }
 0x21b   :  { %v3251_v52 = vadd.f32 %v3250_v1, %v20978_v36  ;;  %4840 = vmatprep.mubr.bf16.mxu0 %v18987_v11  ;;  %v19305_v18 = vadd.f32 %v3367_v61, %v3247_v6  ;;  %v20981_v6 = vld [vmem:[#allocation46_spill] sm:$0xff] }
 0x21c   :  { %v3252_v0 = vpop.f32.mrf.mxu0  ;;  %v3371_v51 = vpop.f32.mrf.mxu1  ;;  %4952 = vmatmul.mubr.bf16.gmra.mxu1 %v18999_v21 }
 0x21d   :  { %v3253_v9 = vadd.f32 %v3252_v0, %v20979_v12  ;;  %v19309_v27 = vadd.f32 %v3371_v51, %v3251_v52  ;;  %4961 = vmatprep.mubr.bf16.mxu1 %v19006_v5  ;;  %v20982_v52 = vld [vmem:[#allocation47_spill] sm:$0xff] }
 0x21e   :  { %v3254_v55 = vpop.f32.mrf.mxu0  ;;  %v3373_v7 = vpop.f32.mrf.mxu1 }
 0x21f   :  { %v3255_v45 = vadd.f32 %v3254_v55, %v20980_v28  ;;  %v19313_v34 = vadd.f32 %v3373_v7, %v3253_v9  ;;  %v20983_v9 = vld [vmem:[#allocation48_spill] sm:$0xff] }
 0x220   :  { %v3256_v39 = vpop.f32.mrf.mxu0  ;;  %v3375_v11 = vpop.f32.mrf.mxu1 }
 0x221   :  { %v3257_v1 = vadd.f32 %v3256_v39, %v20981_v6  ;;  %v19316_v61 = vadd.f32 %v3375_v11, %v3255_v45 }
 0x222   :  { %v3260_v36 = vpop.f32.mrf.mxu0  ;;  %4841 = vmatmul.mubr.bf16.gmra.mxu0 %v19030_v49  ;;  %v3377_v21 = vpop.f32.mrf.mxu1  ;;  %v20984_v49 = vld [vmem:[#allocation49_spill] sm:$0xff] }
 0x223   :  { %v3261_v0 = vadd.f32 %v3260_v36, %v20982_v52  ;;  %4850 = vmatprep.mubr.bf16.mxu0 %v19039_v29  ;;  %v19321_v5 = vadd.f32 %v3377_v21, %v3257_v1  ;;  %v20985_v1 = vld [vmem:[#allocation50_spill] sm:$0xff] }
 0x224   :  { %v3262_v51 = vpop.f32.mrf.mxu0  ;;  %v3381_v12 = vpop.f32.mrf.mxu1  ;;  %4962 = vmatmul.mubr.bf16.gmra.mxu1 %v19051_v44 }
 0x225   :  { %v3263_v55 = vadd.f32 %v3262_v51, %v20983_v9  ;;  %v19325_v7 = vadd.f32 %v3381_v12, %v3261_v0  ;;  %4971 = vmatprep.mubr.bf16.mxu1 %v19058_v14  ;;  %v20986_v0 = vld [vmem:[#allocation51_spill] sm:$0xff] }
 0x226   :  { %v3264_v28 = vpop.f32.mrf.mxu0  ;;  %v3383_v45 = vpop.f32.mrf.mxu1 }
 0x227   :  { %v3265_v39 = vadd.f32 %v3264_v28, %v20984_v49  ;;  %v19329_v11 = vadd.f32 %v3383_v45, %v3263_v55  ;;  %v20987_v55 = vld [vmem:[#allocation52_spill] sm:$0xff] }
 0x228   :  { %v3266_v6 = vpop.f32.mrf.mxu0  ;;  %v3385_v29 = vpop.f32.mrf.mxu1 }
 0x229   :  { %v3267_v36 = vadd.f32 %v3266_v6, %v20985_v1  ;;  %v19332_v21 = vadd.f32 %v3385_v29, %v3265_v39 }
 0x22a   :  { %v3270_v52 = vpop.f32.mrf.mxu0  ;;  %4851 = vmatmul.mubr.bf16.gmra.mxu0 %v19082_v33  ;;  %v3387_v44 = vpop.f32.mrf.mxu1 }
 0x22b   :  { %v3271_v51 = vadd.f32 %v3270_v52, %v20986_v0  ;;  %4860 = vmatprep.mubr.bf16.mxu0 %v19091_v16  ;;  %v19337_v14 = vadd.f32 %v3387_v44, %v3267_v36  ;;  %v20990_v36 = vld [vmem:[#allocation53_spill] sm:$0xff]  ;;  %v20991_v0 = vld [vmem:[#allocation54_spill] sm:$0xff] }
 0x22c   :  { %v3272_v12 = vpop.f32.mrf.mxu0  ;;  %v3391_v9 = vpop.f32.mrf.mxu1  ;;  %4972 = vmatmul.mubr.bf16.gmra.mxu1 %v19103_v2 }
 0x22d   :  { %v3273_v28 = vadd.f32 %v3272_v12, %v20987_v55  ;;  %v19341_v45 = vadd.f32 %v3391_v9, %v3271_v51  ;;  %4981 = vmatprep.mubr.bf16.mxu1 %v19110_v26  ;;  %v20992_v55 = vld [vmem:[#allocation55_spill] sm:$0xff] }
 0x22e   :  { %v3274_v49 = vpop.f32.mrf.mxu0  ;;  %v3393_v39 = vpop.f32.mrf.mxu1 }
 0x22f   :  { %20988 = vst [vmem:[#allocation17_spill] sm:$0xff] %v19341_v45  ;;  %v19344_v33 = vadd.f32 %v3393_v39, %v3273_v28 }
 0x230   :  { %v3275_v6 = vpop.f32.mrf.mxu0  ;;  %v3395_v29 = vpop.f32.mrf.mxu1 }
 0x231   :  { %20989 = vst [vmem:[#allocation21_spill] sm:$0xff] %v19344_v33 }
 0x232   :  { %v3432_v1 = vpop.f32.mrf.mxu0  ;;  %4861 = vmatmul.mubr.bf16.gmra.mxu0 %v19136_v47  ;;  %v3396_v16 = vpop.f32.mrf.mxu1 }
 0x233   :  { %v3433_v52 = vadd.f32 %v3432_v1, %v20990_v36  ;;  %4870 = vmatprep.mubr.bf16.mxu0 %v19148_v24 }
 0x234   :  { %v3434_v2 = vpop.f32.mrf.mxu0  ;;  %v3553_v44 = vpop.f32.mrf.mxu1  ;;  %4982 = vmatmul.mubr.bf16.gmra.mxu1 %v19158_v38 }
 0x235   :  { %v3435_v51 = vadd.f32 %v3434_v2, %v20991_v0  ;;  %v19351_v26 = vadd.f32 %v3553_v44, %v3433_v52  ;;  %4991 = vmatprep.mubr.bf16.mxu1 %v19167_v32 }
 0x236   :  { %v3436_v12 = vpop.f32.mrf.mxu0  ;;  %v3555_v9 = vpop.f32.mrf.mxu1 }
 0x237   :  { %v3437_v28 = vadd.f32 %v3436_v12, %v20992_v55  ;;  %v19355_v47 = vadd.f32 %v3555_v9, %v3435_v51 }
 0x238   :  { %v19357_v49 = vpop.f32.mrf.mxu0  ;;  %v3557_v39 = vpop.f32.mrf.mxu1 }
 0x239   :  { %v19359_v24 = vadd.f32 %v3557_v39, %v3437_v28 }
 0x23a   :  { %v3442_v6 = vpop.f32.mrf.mxu0  ;;  %4871 = vmatmul.mubr.bf16.gmra.mxu0 %v19197_v41  ;;  %v19362_v38 = vpop.f32.mrf.mxu1 }
 0x23b   :  { %v3443_v29 = vadd.f32 %v3442_v6, %v18791_v57  ;;  %4880 = vmatprep.mubr.bf16.mxu0 %v19122_v22 }
 0x23c   :  { %v3444_v32 = vpop.f32.mrf.mxu0  ;;  %v3563_v1 = vpop.f32.mrf.mxu1  ;;  %4992 = vmatmul.mubr.bf16.gmra.mxu1 %v19215_v17 }
 0x23d   :  { %v3445_v16 = vadd.f32 %v3444_v32, %v18796_v59  ;;  %v19368_v36 = vadd.f32 %v3563_v1, %v3443_v29  ;;  %5001 = vmatprep.mubr.bf16.mxu1 %v19139_v42 }
 0x23e   :  { %v3446_v52 = vpop.f32.mrf.mxu0  ;;  %v3565_v2 = vpop.f32.mrf.mxu1 }
 0x23f   :  { %v3447_v41 = vadd.f32 %v3446_v52, %v18801_v30  ;;  %v19372_v44 = vadd.f32 %v3565_v2, %v3445_v16  ;;  %v21000_v16 = vld [vmem:[#allocation59_spill] sm:$0xff]  ;;  %v21001_v2 = vld [vmem:[#allocation60_spill] sm:$0xff] }
 0x240   :  { %v19374_v0 = vpop.f32.mrf.mxu0  ;;  %v3567_v57 = vpop.f32.mrf.mxu1 }
 0x241   :  { %v19376_v22 = vadd.f32 %v3567_v57, %v3447_v41 }
 0x242   :  { %v3452_v51 = vpop.f32.mrf.mxu0  ;;  %4881 = vmatmul.mubr.bf16.gmra.mxu0 %v19170_v13  ;;  %v19379_v17 = vpop.f32.mrf.mxu1 }
 0x243   :  { %20993 = vst [vmem:[#allocation18_spill] sm:$0xff] %v19376_v22  ;;  %20994 = vst [vmem:[#allocation23_spill] sm:$0xff] %v19379_v17  ;;  %v3453_v59 = vadd.f32 %v3452_v51, %v18817_v60 }
 0x244   :  { %v3454_v12 = vpop.f32.mrf.mxu0  ;;  %v3573_v9 = vpop.f32.mrf.mxu1  ;;  %5002 = vmatmul.mubr.bf16.gmra.mxu1 %v19187_v25 }
 0x245   :  { %v3455_v30 = vadd.f32 %v3454_v12, %v18828_v35  ;;  %v19384_v42 = vadd.f32 %v3573_v9, %v3453_v59  ;;  %v21003_v59 = vld [vmem:[#allocation61_spill] sm:$0xff] }
 0x246   :  { %v3456_v55 = vpop.f32.mrf.mxu0  ;;  %v3575_v28 = vpop.f32.mrf.mxu1 }
 0x247   :  { %20995 = vst [vmem:[#allocation22_spill] sm:$0xff] %v19384_v42  ;;  %v3457_v39 = vadd.f32 %v3456_v55, %v18842_v56  ;;  %v19387_v6 = vadd.f32 %v3575_v28, %v3455_v30 }
 0x248   :  { %v19389_v29 = vpop.f32.mrf.mxu0  ;;  %v3577_v13 = vpop.f32.mrf.mxu1 }
 0x249   :  { %20996 = vst [vmem:[#allocation27_spill] sm:$0xff] %v19387_v6  ;;  %20997 = vst [vmem:[#allocation24_spill] sm:$0xff] %v19389_v29  ;;  %v19391_v32 = vadd.f32 %v3577_v13, %v3457_v39 }
 0x24a   :  { %v3462_v60 = vpop.f32.mrf.mxu0  ;;  %v19393_v1 = vpop.f32.mrf.mxu1 }
 0x24b   :  { %20998 = vst [vmem:[#allocation31_spill] sm:$0xff] %v19391_v32  ;;  %20999 = vst [vmem:[#allocation28_spill] sm:$0xff] %v19393_v1  ;;  %v3463_v25 = vadd.f32 %v3462_v60, %v21000_v16  ;;  %v21008_v60 = vld [vmem:[#allocation63_spill] sm:$0xff]  ;;  %v21046_v1 = vld [vmem:[#allocation81_spill] sm:$0xff] }
 0x24c   :  { %v3464_v52 = vpop.f32.mrf.mxu0  ;;  %v3583_v35 = vpop.f32.mrf.mxu1 }
 0x24d   :  { %v3465_v41 = vadd.f32 %v3464_v52, %v21001_v2  ;;  %v19397_v57 = vadd.f32 %v3583_v35, %v3463_v25  ;;  %v21009_v25 = vld [vmem:[#allocation64_spill] sm:$0xff] }
 0x24e   :  { %v3466_v51 = vpop.f32.mrf.mxu0  ;;  %v3585_v56 = vpop.f32.mrf.mxu1 }
 0x24f   :  { %21002 = vst [vmem:[#allocation29_spill] sm:$0xff] %v19397_v57  ;;  %v3467_v12 = vadd.f32 %v3466_v51, %v21003_v59  ;;  %v19400_v9 = vadd.f32 %v3585_v56, %v3465_v41  ;;  %v21011_v41 = vld [vmem:[#allocation65_spill] sm:$0xff] }
 0x250   :  { %v19402_v30 = vpop.f32.mrf.mxu0  ;;  %v3587_v55 = vpop.f32.mrf.mxu1 }
 0x251   :  { %21004 = vst [vmem:[#allocation32_spill] sm:$0xff] %v19400_v9  ;;  %21005 = vst [vmem:[#allocation33_spill] sm:$0xff] %v19402_v30  ;;  %v19404_v28 = vadd.f32 %v3587_v55, %v3467_v12 }
 0x252   :  { %v3472_v39 = vpop.f32.mrf.mxu0  ;;  %v19406_v13 = vpop.f32.mrf.mxu1 }
 0x253   :  { %21006 = vst [vmem:[#allocation30_spill] sm:$0xff] %v19404_v28  ;;  %21007 = vst [vmem:[#allocation35_spill] sm:$0xff] %v19406_v13  ;;  %v3473_v16 = vadd.f32 %v3472_v39, %v21008_v60  ;;  %v21016_v39 = vld [vmem:[#allocation67_spill] sm:$0xff] }
 0x254   :  { %v3474_v32 = vpop.f32.mrf.mxu0  ;;  %v3593_v52 = vpop.f32.mrf.mxu1 }
 0x255   :  { %v3475_v35 = vadd.f32 %v3474_v32, %v21009_v25  ;;  %v19410_v2 = vadd.f32 %v3593_v52, %v3473_v16  ;;  %v21017_v16 = vld [vmem:[#allocation68_spill] sm:$0xff] }
 0x256   :  { %v3476_v57 = vpop.f32.mrf.mxu0  ;;  %v3595_v51 = vpop.f32.mrf.mxu1 }
 0x257   :  { %21010 = vst [vmem:[#allocation34_spill] sm:$0xff] %v19410_v2  ;;  %v3477_v56 = vadd.f32 %v3476_v57, %v21011_v41  ;;  %v19413_v59 = vadd.f32 %v3595_v51, %v3475_v35  ;;  %v21019_v35 = vld [vmem:[#allocation69_spill] sm:$0xff] }
 0x258   :  { %v19415_v9 = vpop.f32.mrf.mxu0  ;;  %v3597_v12 = vpop.f32.mrf.mxu1 }
 0x259   :  { %21012 = vst [vmem:[#allocation36_spill] sm:$0xff] %v19413_v59  ;;  %21013 = vst [vmem:[#allocation39_spill] sm:$0xff] %v19415_v9  ;;  %v19417_v55 = vadd.f32 %v3597_v12, %v3477_v56 }
 0x25a   :  { %v3482_v28 = vpop.f32.mrf.mxu0  ;;  %v19419_v13 = vpop.f32.mrf.mxu1 }
 0x25b   :  { %21014 = vst [vmem:[#allocation38_spill] sm:$0xff] %v19417_v55  ;;  %21015 = vst [vmem:[#allocation40_spill] sm:$0xff] %v19419_v13  ;;  %v3483_v60 = vadd.f32 %v3482_v28, %v21016_v39  ;;  %v21024_v28 = vld [vmem:[#allocation71_spill] sm:$0xff] }
 0x25c   :  { %v3484_v30 = vpop.f32.mrf.mxu0  ;;  %v3603_v32 = vpop.f32.mrf.mxu1 }
 0x25d   :  { %v3485_v52 = vadd.f32 %v3484_v30, %v21017_v16  ;;  %v19423_v25 = vadd.f32 %v3603_v32, %v3483_v60  ;;  %v21025_v60 = vld [vmem:[#allocation72_spill] sm:$0xff] }
 0x25e   :  { %v3486_v2 = vpop.f32.mrf.mxu0  ;;  %v3605_v57 = vpop.f32.mrf.mxu1 }
 0x25f   :  { %21018 = vst [vmem:[#allocation43_spill] sm:$0xff] %v19423_v25  ;;  %v3487_v51 = vadd.f32 %v3486_v2, %v21019_v35  ;;  %v19426_v41 = vadd.f32 %v3605_v57, %v3485_v52  ;;  %v21027_v52 = vld [vmem:[#allocation73_spill] sm:$0xff] }
 0x260   :  { %v19428_v59 = vpop.f32.mrf.mxu0  ;;  %v3607_v56 = vpop.f32.mrf.mxu1 }
 0x261   :  { %21020 = vst [vmem:[#allocation44_spill] sm:$0xff] %v19426_v41  ;;  %21021 = vst [vmem:[#allocation45_spill] sm:$0xff] %v19428_v59  ;;  %v19430_v12 = vadd.f32 %v3607_v56, %v3487_v51  ;;  %v15723_v51 = vld [vmem:[%s20736_s3 + $0x4] ss:$8 sps:$4 sm:$0xff]  }
 0x262   :  { %v3492_v55 = vpop.f32.mrf.mxu0  ;;  %v19432_v13 = vpop.f32.mrf.mxu1  ;;  %13932 = vmatprep.mubr.msk.bf16.mxu0 %vm5360_vm11, %v15723_v51  ;;  %13941 = vmatprep.mubr.msk.bf16.mxu1 %vm5360_vm11, %v15723_v51 }
 0x263   :  { %21022 = vst [vmem:[#allocation46_spill] sm:$0xff] %v19430_v12  ;;  %21023 = vst [vmem:[#allocation47_spill] sm:$0xff] %v19432_v13  ;;  %v3493_v39 = vadd.f32 %v3492_v55, %v21024_v28 }
 0x264   :  { %v3494_v9 = vpop.f32.mrf.mxu0  ;;  %v3613_v30 = vpop.f32.mrf.mxu1 }
 0x265   :  { %v3495_v32 = vadd.f32 %v3494_v9, %v21025_v60  ;;  %v19436_v16 = vadd.f32 %v3613_v30, %v3493_v39 }
 0x266   :  { %v3496_v25 = vpop.f32.mrf.mxu0  ;;  %v3615_v2 = vpop.f32.mrf.mxu1 }
 0x267   :  { %21026 = vst [vmem:[#allocation48_spill] sm:$0xff] %v19436_v16  ;;  %v3497_v57 = vadd.f32 %v3496_v25, %v21027_v52  ;;  %v19439_v35 = vadd.f32 %v3615_v2, %v3495_v32  ;;  %v21032_v25 = vld [vmem:[#allocation75_spill] sm:$0xff]  ;;  %v21033_v32 = vld [vmem:[#allocation76_spill] sm:$0xff]  ;;  %v5080_v52 = vlaneseq }
 0x268   :  { %v19441_v41 = vpop.f32.mrf.mxu0  ;;  %v3617_v56 = vpop.f32.mrf.mxu1 }
 0x269   :  { %21028 = vst [vmem:[#allocation49_spill] sm:$0xff] %v19439_v35  ;;  %21029 = vst [vmem:[#allocation50_spill] sm:$0xff] %v19441_v41  ;;  %v19446_v55 = vadd.f32 %v3617_v56, %v3497_v57  ;;  %v21035_v57 = vld [vmem:[#allocation77_spill] sm:$0xff]  ;;  %v19461_v13 = vshrl.u32 %v5080_v52, 7 }
 0x26a   :  { %v3502_v28 = vpop.f32.mrf.mxu0  ;;  %v19450_v9 = vpop.f32.mrf.mxu1 }
 0x26b   :  { %21030 = vst [vmem:[#allocation51_spill] sm:$0xff] %v19446_v55  ;;  %21031 = vst [vmem:[#allocation52_spill] sm:$0xff] %v19450_v9  ;;  %v3503_v39 = vadd.f32 %v3502_v28, %v21032_v25 }
 0x26c   :  { %v3504_v30 = vpop.f32.mrf.mxu0  ;;  %v3623_v60 = vpop.f32.mrf.mxu1 }
 0x26d   :  { %v3505_v2 = vadd.f32 %v3504_v30, %v21033_v32  ;;  %v19454_v35 = vadd.f32 %v3623_v60, %v3503_v39  ;;  %v21040_v32 = vld [vmem:[#allocation42_spill] sm:$0xff] }
 0x26e   :  { %v3506_v16 = vpop.f32.mrf.mxu0  ;;  %v3625_v41 = vpop.f32.mrf.mxu1 }
 0x26f   :  { %21034 = vst [vmem:[#allocation53_spill] sm:$0xff] %v19454_v35  ;;  %v3507_v56 = vadd.f32 %v3506_v16, %v21035_v57  ;;  %v19457_v55 = vadd.f32 %v3625_v41, %v3505_v2 }
 0x270   :  { %v19459_v12 = vpop.f32.mrf.mxu0  ;;  %v3627_v51 = vpop.f32.mrf.mxu1 }
 0x271   :  { %21036 = vst [vmem:[#allocation54_spill] sm:$0xff] %v19457_v55  ;;  %21037 = vst [vmem:[#allocation55_spill] sm:$0xff] %v19459_v12  ;;  %v19463_v9 = vadd.f32 %v3627_v51, %v3507_v56  ;;  %v19476_v56 = vld [vmem:[%s20735_s2] sm:$0xf]  ;;  %v20803_v51 = vsub.s32 0, %v19461_v13 }
 0x272   :  { %v3512_v28 = vpop.f32.mrf.mxu0  ;;  %v19465_v25 = vpop.f32.mrf.mxu1 }
 0x273   :  { %21038 = vst [vmem:[#allocation59_spill] sm:$0xff] %v19463_v9  ;;  %21039 = vst [vmem:[#allocation60_spill] sm:$0xff] %v19465_v25  ;;  %v3513_v30 = vadd.f32 %v3512_v28, %v19128_v10  ;;  %v21044_v10 = vld [vmem:[#allocation80_spill] sm:$0xff] }
 0x274   :  { %v3514_v39 = vpop.f32.mrf.mxu0  ;;  %v3633_v60 = vpop.f32.mrf.mxu1 }
 0x275   :  { %v3515_v35 = vadd.f32 %v3514_v39, %v21040_v32  ;;  %v19469_v59 = vadd.f32 %v3633_v60, %v3513_v30 }
 0x276   :  { %v3516_v41 = vpop.f32.mrf.mxu0  ;;  %v3635_v16 = vpop.f32.mrf.mxu1 }
 0x277   :  { %21041 = vst [vmem:[#allocation61_spill] sm:$0xff] %v19469_v59  ;;  %v19471_v2 = vadd.f32 %v3635_v16, %v3515_v35  ;;  %v19483_v35 = vrot.slane %v19476_v56, %v20803_v51  ;;  %v21043_v16 = vld [vmem:[#allocation79_spill] sm:$0xff] }
 0x278   :  { %v3517_v57 = vpop.f32.mrf.mxu0  ;;  %v3637_v52 = vpop.f32.mrf.mxu1 }
 0x279   :  { %21042 = vst [vmem:[#allocation63_spill] sm:$0xff] %v19471_v2 }
 0x27a   :  { %v4560_v28 = vpop.f32.mrf.mxu0  ;;  %v3638_v9 = vpop.f32.mrf.mxu1 }
 0x27c   :  { %v4562_v39 = vpop.f32.mrf.mxu0  ;;  %v4681_v30 = vpop.f32.mrf.mxu1 }
 0x27d   :  { %v4682_v60 = vadd.f32 %v4681_v30, %v4560_v28  ;;  %v21045_v28 = vsub.s32 1, %v19461_v13 }
 0x27e   :  { %v4564_v32 = vpop.f32.mrf.mxu0  ;;  %v4683_v41 = vpop.f32.mrf.mxu1 }
 0x27f   :  { %v5010_v57 = vadd.f32 %v4682_v60, %v21043_v16  ;;  %v4684_v52 = vadd.f32 %v4683_v41, %v4562_v39  ;;  %v19491_v30 = vrot.slane %v19476_v56, %v21045_v28  ;;  %v21047_v16 = vld [vmem:[#allocation82_spill] sm:$0xff] }
 0x280   :  { %v4566_v2 = vpop.f32.mrf.mxu0  ;;  %v4685_v59 = vpop.f32.mrf.mxu1 }
 0x281   :  { %v5100_v25 = vadd.f32 %v19483_v35, %v5010_v57  ;;  %v5011_v55 = vadd.f32 %v4684_v52, %v21044_v10  ;;  %v4686_v9 = vadd.f32 %v4685_v59, %v4564_v32 }
 0x282   :  { %v4570_v12 = vpop.f32.mrf.mxu0  ;;  %v4687_v51 = vpop.f32.mrf.mxu1 }
 0x283   :  { %v5014_v6 = vadd.f32 %v4686_v9, %v21046_v1  ;;  %v4688_v42 = vadd.f32 %v4687_v51, %v4566_v2  ;;  %v5168_v39 = vmax.f32 %v5100_v25, 0.0  ;;  %v5101_v59 = vadd.f32 %v19491_v30, %v5011_v55 }
 0x284   :  { %v4572_v29 = vpop.f32.mrf.mxu0  ;;  %v4691_v60 = vpop.f32.mrf.mxu1 }
 0x285   :  { %v5104_v41 = vadd.f32 %v19483_v35, %v5014_v6  ;;  %v5015_v57 = vadd.f32 %v4688_v42, %v21047_v16  ;;  %v4692_v33 = vadd.f32 %v4691_v60, %v4570_v12  ;;  %v5169_v9 = vmax.f32 %v5101_v59, 0.0 }
 0x286   :  { %v4574_v10 = vpop.f32.mrf.mxu0  ;;  %v4693_v32 = vpop.f32.mrf.mxu1 }
 0x287   :  { %v5172_v52 = vmax.f32 %v5104_v41, 0.0  ;;  %v5105_v28 = vadd.f32 %v19491_v30, %v5015_v57  ;;  %v5018_v45 = vadd.f32 %v4692_v33, %v19229_v40  ;;  %v4694_v22 = vadd.f32 %v4693_v32, %v4572_v29 }
 0x288   :  { %v4576_v1 = vpop.f32.mrf.mxu0  ;;  %v4695_v2 = vpop.f32.mrf.mxu1 }
 0x289   :  { %v19499_v51 = vpack.c.bf16 %v5172_v52, %v5168_v39  ;;  %v5108_v25 = vadd.f32 %v19483_v35, %v5018_v45  ;;  %v5019_v6 = vadd.f32 %v4694_v22, %v19233_v62  ;;  %v4696_v42 = vadd.f32 %v4695_v2, %v4574_v10 }
 0x28a   :  { %v4580_v12 = vpop.f32.mrf.mxu0  ;;  %v4697_v60 = vpop.f32.mrf.mxu1  ;;  %v5173_v55 = vmax.f32 %v5105_v28, 0.0 }
 0x28b   :  { %v5022_v41 = vadd.f32 %v4696_v42, %v19236_v46  ;;  %v4698_v16 = vadd.f32 %v4697_v60, %v4576_v1  ;;  %v5176_v33 = vmax.f32 %v5108_v25, 0.0  ;;  %v5109_v62 = vadd.f32 %v19491_v30, %v5019_v6 }
 0x28c   :  { %v4582_v57 = vpop.f32.mrf.mxu0  ;;  %v4701_v17 = vpop.f32.mrf.mxu1  ;;  %v19504_v40 = vpack.c.bf16 %v5173_v55, %v5169_v9 }
 0x28d   :  { %v5112_v29 = vadd.f32 %v19483_v35, %v5022_v41  ;;  %v5023_v39 = vadd.f32 %v4698_v16, %v19241_v4  ;;  %v4702_v45 = vadd.f32 %v4701_v17, %v4580_v12  ;;  %v5177_v12 = vmax.f32 %v5109_v62, 0.0 }
 0x28e   :  { %v4584_v32 = vpop.f32.mrf.mxu0  ;;  %v4703_v22 = vpop.f32.mrf.mxu1 }
 0x28f   :  { %v5180_v10 = vmax.f32 %v5112_v29, 0.0  ;;  %v5113_v59 = vadd.f32 %v19491_v30, %v5023_v39  ;;  %v5026_v46 = vadd.f32 %v4702_v45, %v19245_v3  ;;  %v4704_v52 = vadd.f32 %v4703_v22, %v4582_v57 }
 0x290   :  { %v4586_v28 = vpop.f32.mrf.mxu0  ;;  %v4705_v1 = vpop.f32.mrf.mxu1 }
 0x291   :  { %v19511_v2 = vpack.c.bf16 %v5180_v10, %v5176_v33  ;;  %v5116_v25 = vadd.f32 %v19483_v35, %v5026_v46  ;;  %v5027_v42 = vadd.f32 %v4704_v52, %v19249_v43  ;;  %v4706_v4 = vadd.f32 %v4705_v1, %v4584_v32 }
 0x292   :  { %v4590_v17 = vpop.f32.mrf.mxu0  ;;  %v4707_v9 = vpop.f32.mrf.mxu1  ;;  %v5181_v6 = vmax.f32 %v5113_v59, 0.0 }
 0x293   :  { %v5030_v60 = vadd.f32 %v4706_v4, %v19252_v58  ;;  %v4708_v55 = vadd.f32 %v4707_v9, %v4586_v28  ;;  %v5184_v57 = vmax.f32 %v5116_v25, 0.0  ;;  %v5117_v43 = vadd.f32 %v19491_v30, %v5027_v42 }
 0x294   :  { %v4592_v41 = vpop.f32.mrf.mxu0  ;;  %v4711_v16 = vpop.f32.mrf.mxu1  ;;  %v19516_v3 = vpack.c.bf16 %v5181_v6, %v5177_v12 }
 0x295   :  { %v5120_v33 = vadd.f32 %v19483_v35, %v5030_v60  ;;  %v5031_v29 = vadd.f32 %v4708_v55, %v19257_v15  ;;  %v4712_v39 = vadd.f32 %v4711_v16, %v4590_v17  ;;  %v5185_v15 = vmax.f32 %v5117_v43, 0.0 }
 0x296   :  { %v4594_v45 = vpop.f32.mrf.mxu0  ;;  %v4713_v32 = vpop.f32.mrf.mxu1 }
 0x297   :  { %v5188_v62 = vmax.f32 %v5120_v33, 0.0  ;;  %v5121_v22 = vadd.f32 %v19491_v30, %v5031_v29  ;;  %v5034_v58 = vadd.f32 %v4712_v39, %v19261_v23  ;;  %v4714_v10 = vadd.f32 %v4713_v32, %v4592_v41 }
 0x298   :  { %v4596_v59 = vpop.f32.mrf.mxu0  ;;  %v4715_v46 = vpop.f32.mrf.mxu1 }
 0x299   :  { %v19523_v52 = vpack.c.bf16 %v5188_v62, %v5184_v57  ;;  %v5124_v28 = vadd.f32 %v19483_v35, %v5034_v58  ;;  %v4716_v1 = vadd.f32 %v4715_v46, %v4594_v45  ;;  %v5035_v4 = vadd.f32 %v4714_v10, %v19265_v37 }
 0x29a   :  { %v4600_v25 = vpop.f32.mrf.mxu0  ;;  %v4717_v17 = vpop.f32.mrf.mxu1  ;;  %v5189_v42 = vmax.f32 %v5121_v22, 0.0 }
 0x29b   :  { %v5038_v12 = vadd.f32 %v4716_v1, %v19268_v50  ;;  %v4718_v9 = vadd.f32 %v4717_v17, %v4596_v59  ;;  %v5192_v55 = vmax.f32 %v5124_v28, 0.0  ;;  %v5125_v29 = vadd.f32 %v19491_v30, %v5035_v4 }
 0x29c   :  { %v4602_v6 = vpop.f32.mrf.mxu0  ;;  %v4721_v60 = vpop.f32.mrf.mxu1  ;;  %v19528_v23 = vpack.c.bf16 %v5189_v42, %v5185_v15 }
 0x29d   :  { %v5128_v41 = vadd.f32 %v19483_v35, %v5038_v12  ;;  %v5039_v16 = vadd.f32 %v4718_v9, %v19273_v48  ;;  %v4722_v57 = vadd.f32 %v4721_v60, %v4600_v25  ;;  %v5193_v48 = vmax.f32 %v5125_v29, 0.0 }
 0x29e   :  { %v4604_v33 = vpop.f32.mrf.mxu0  ;;  %v4723_v39 = vpop.f32.mrf.mxu1 }
 0x29f   :  { %v5196_v37 = vmax.f32 %v5128_v41, 0.0  ;;  %v5129_v45 = vadd.f32 %v19491_v30, %v5039_v16  ;;  %v5042_v50 = vadd.f32 %v4722_v57, %v19277_v63  ;;  %v4724_v43 = vadd.f32 %v4723_v39, %v4602_v6 }
 0x2a0   :  { %v4606_v32 = vpop.f32.mrf.mxu0  ;;  %v4725_v62 = vpop.f32.mrf.mxu1 }
 0x2a1   :  { %v19535_v22 = vpack.c.bf16 %v5196_v37, %v5192_v55  ;;  %v5132_v58 = vadd.f32 %v19483_v35, %v5042_v50  ;;  %v4726_v10 = vadd.f32 %v4725_v62, %v4604_v33  ;;  %v5043_v46 = vadd.f32 %v4724_v43, %v19281_v8 }
 0x2a2   :  { %v4610_v59 = vpop.f32.mrf.mxu0  ;;  %v4727_v28 = vpop.f32.mrf.mxu1  ;;  %v5197_v1 = vmax.f32 %v5129_v45, 0.0 }
 0x2a3   :  { %v5046_v25 = vadd.f32 %v4726_v10, %v19284_v54  ;;  %v4728_v15 = vadd.f32 %v4727_v28, %v4606_v32  ;;  %v5200_v42 = vmax.f32 %v5132_v58, 0.0  ;;  %v5133_v55 = vadd.f32 %v19491_v30, %v5043_v46 }
 0x2a4   :  { %v4612_v4 = vpop.f32.mrf.mxu0  ;;  %v4731_v17 = vpop.f32.mrf.mxu1  ;;  %v19540_v63 = vpack.c.bf16 %v5197_v1, %v5193_v48 }
 0x2a5   :  { %v5136_v12 = vadd.f32 %v19483_v35, %v5046_v25  ;;  %v5047_v9 = vadd.f32 %v4728_v15, %v19289_v20  ;;  %v4732_v6 = vadd.f32 %v4731_v17, %v4610_v59  ;;  %v5201_v20 = vmax.f32 %v5133_v55, 0.0 }
 0x2a6   :  { %v4614_v60 = vpop.f32.mrf.mxu0  ;;  %v4733_v41 = vpop.f32.mrf.mxu1 }
 0x2a7   :  { %v5204_v8 = vmax.f32 %v5136_v12, 0.0  ;;  %v5137_v16 = vadd.f32 %v19491_v30, %v5047_v9  ;;  %v5050_v54 = vadd.f32 %v4732_v6, %v19293_v19  ;;  %v4734_v57 = vadd.f32 %v4733_v41, %v4612_v4 }
 0x2a8   :  { %v4616_v33 = vpop.f32.mrf.mxu0  ;;  %v4735_v29 = vpop.f32.mrf.mxu1 }
 0x2a9   :  { %v19547_v39 = vpack.c.bf16 %v5204_v8, %v5200_v42  ;;  %v5140_v37 = vadd.f32 %v19483_v35, %v5050_v54  ;;  %v4736_v45 = vadd.f32 %v4735_v29, %v4614_v60  ;;  %v5051_v43 = vadd.f32 %v4734_v57, %v19297_v31 }
 0x2aa   :  { %v4620_v50 = vpop.f32.mrf.mxu0  ;;  %v4737_v32 = vpop.f32.mrf.mxu1  ;;  %v5205_v62 = vmax.f32 %v5137_v16, 0.0 }
 0x2ab   :  { %v5054_v58 = vadd.f32 %v4736_v45, %v19300_v53  ;;  %v4738_v10 = vadd.f32 %v4737_v32, %v4616_v33  ;;  %v5208_v46 = vmax.f32 %v5140_v37, 0.0  ;;  %v5141_v4 = vadd.f32 %v19491_v30, %v5051_v43 }
 0x2ac   :  { %v4622_v59 = vpop.f32.mrf.mxu0  ;;  %v4741_v48 = vpop.f32.mrf.mxu1  ;;  %v19552_v19 = vpack.c.bf16 %v5205_v62, %v5201_v20 }
 0x2ad   :  { %v5144_v28 = vadd.f32 %v19483_v35, %v5054_v58  ;;  %v5055_v1 = vadd.f32 %v4738_v10, %v19305_v18  ;;  %v4742_v25 = vadd.f32 %v4741_v48, %v4620_v50  ;;  %v5209_v18 = vmax.f32 %v5141_v4, 0.0 }
 0x2ae   :  { %v4624_v15 = vpop.f32.mrf.mxu0  ;;  %v4743_v17 = vpop.f32.mrf.mxu1 }
 0x2af   :  { %v5212_v31 = vmax.f32 %v5144_v28, 0.0  ;;  %v5145_v42 = vadd.f32 %v19491_v30, %v5055_v1  ;;  %v5058_v53 = vadd.f32 %v4742_v25, %v19309_v27  ;;  %v4744_v12 = vadd.f32 %v4743_v17, %v4622_v59 }
 0x2b0   :  { %v4626_v9 = vpop.f32.mrf.mxu0  ;;  %v4745_v6 = vpop.f32.mrf.mxu1 }
 0x2b1   :  { %v19559_v60 = vpack.c.bf16 %v5212_v31, %v5208_v46  ;;  %v5148_v55 = vadd.f32 %v19483_v35, %v5058_v53  ;;  %v4746_v41 = vadd.f32 %v4745_v6, %v4624_v15  ;;  %v5059_v16 = vadd.f32 %v4744_v12, %v19313_v34 }
 0x2b2   :  { %v4630_v8 = vpop.f32.mrf.mxu0  ;;  %v4747_v54 = vpop.f32.mrf.mxu1  ;;  %v5213_v57 = vmax.f32 %v5145_v42, 0.0 }
 0x2b3   :  { %v5062_v33 = vadd.f32 %v4746_v41, %v19316_v61  ;;  %v4748_v29 = vadd.f32 %v4747_v54, %v4626_v9  ;;  %v5216_v50 = vmax.f32 %v5148_v55, 0.0  ;;  %v5149_v58 = vadd.f32 %v19491_v30, %v5059_v16 }
 0x2b4   :  { %v4632_v37 = vpop.f32.mrf.mxu0  ;;  %v4751_v45 = vpop.f32.mrf.mxu1  ;;  %v19564_v27 = vpack.c.bf16 %v5213_v57, %v5209_v18 }
 0x2b5   :  { %v5152_v20 = vadd.f32 %v19483_v35, %v5062_v33  ;;  %v5063_v43 = vadd.f32 %v4748_v29, %v19321_v5  ;;  %v4752_v32 = vadd.f32 %v4751_v45, %v4630_v8  ;;  %v5217_v5 = vmax.f32 %v5149_v58, 0.0 }
 0x2b6   :  { %v4634_v62 = vpop.f32.mrf.mxu0  ;;  %v4753_v10 = vpop.f32.mrf.mxu1 }
 0x2b7   :  { %v5220_v34 = vmax.f32 %v5152_v20, 0.0  ;;  %v5153_v59 = vadd.f32 %v19491_v30, %v5063_v43  ;;  %v5066_v61 = vadd.f32 %v4752_v32, %v19325_v7  ;;  %v4754_v48 = vadd.f32 %v4753_v10, %v4632_v37 }
 0x2b8   :  { %v4636_v46 = vpop.f32.mrf.mxu0  ;;  %v4755_v28 = vpop.f32.mrf.mxu1  ;;  %v20805_v43 = vsub.s32 2, %v19461_v13 }
 0x2b9   :  { %v5260_v1 = vpack.c.bf16 %v5220_v34, %v5216_v50  ;;  %v5067_v25 = vadd.f32 %v4754_v48, %v19329_v11  ;;  %v4756_v15 = vadd.f32 %v4755_v28, %v4634_v62  ;;  %v5221_v31 = vmax.f32 %v5153_v59, 0.0  ;;  %v21048_v48 = vld [vmem:[#allocation56_spill] sm:$0xff] }
 0x2ba   :  { %v19572_v4 = vpop.f32.mrf.mxu0  ;;  %v4757_v17 = vpop.f32.mrf.mxu1  ;;  %v5156_v42 = vadd.f32 %v19483_v35, %v5066_v61  ;;  %v19586_v34 = vrot.slane %v19476_v56, %v20805_v43  ;;  %v20804_v61 = vsub.s32 3, %v19461_v13 }
 0x2bb   :  { %v5070_v53 = vadd.f32 %v4756_v15, %v19332_v21  ;;  %v4758_v12 = vadd.f32 %v4757_v17, %v4636_v46  ;;  %v5261_v6 = vpack.c.bf16 %v5221_v31, %v5217_v5  ;;  %v5157_v55 = vadd.f32 %v19491_v30, %v5067_v25 }
 0x2bc   :  { %v19576_v9 = vpop.f32.mrf.mxu0  ;;  %v4761_v7 = vpop.f32.mrf.mxu1  ;;  %v5224_v16 = vmax.f32 %v5156_v42, 0.0  ;;  %v3439_v46 = vadd.f32 %v19357_v49, %v21048_v48  ;;  %v21051_v48 = vld [vmem:[#allocation18_spill] sm:$0xff] }
 0x2bd   :  { %v5160_v41 = vadd.f32 %v19483_v35, %v5070_v53  ;;  %v5071_v11 = vadd.f32 %v4758_v12, %v19337_v14  ;;  %v5225_v21 = vmax.f32 %v5157_v55, 0.0  ;;  %v19597_v12 = vrot.slane %v19476_v56, %v20804_v61 }
 0x2be   :  { %v4644_v8 = vpop.f32.mrf.mxu0  ;;  %v4763_v18 = vpop.f32.mrf.mxu1  ;;  %v3560_v49 = vadd.f32 %v19362_v38, %v3439_v46 }
 0x2bf   :  { %v5228_v54 = vmax.f32 %v5160_v41, 0.0  ;;  %v5161_v57 = vadd.f32 %v19491_v30, %v5071_v11 }
 0x2c0   :  { %v4645_v33 = vpop.f32.mrf.mxu0  ;;  %v4765_v29 = vpop.f32.mrf.mxu1 }
 0x2c1   :  { %v5264_v37 = vpack.c.bf16 %v5228_v54, %v5224_v16  ;;  %v5229_v50 = vmax.f32 %v5161_v57, 0.0  ;;  %v21049_v57 = vld [vmem:[#allocation57_spill] sm:$0xff] }
 0x2c2   :  { %v4802_v45 = vpop.f32.mrf.mxu0  ;;  %v4766_v20 = vpop.f32.mrf.mxu1  ;;  %v3449_v56 = vadd.f32 %v19374_v0, %v21049_v57  ;;  %v4764_v0 = vadd.f32 %v4763_v18, %v19576_v9  ;;  %v21052_v18 = vld [vmem:[#allocation17_spill] sm:$0xff] }
 0x2c3   :  { %v5265_v32 = vpack.c.bf16 %v5229_v50, %v5225_v21 }
 0x2c4   :  { %v4804_v62 = vpop.f32.mrf.mxu0  ;;  %v4923_v58 = vpop.f32.mrf.mxu1 }
 0x2c5   :  { %v4924_v10 = vadd.f32 %v4923_v58, %v4802_v45  ;;  %5398 = vmatprep.subr.bf16.mxu0 %v5265_v32  ;;  %v4762_v45 = vadd.f32 %v4761_v7, %v19572_v4 }
 0x2c6   :  { %v4806_v14 = vpop.f32.mrf.mxu0  ;;  %v4925_v59 = vpop.f32.mrf.mxu1  ;;  %5399 = vmatpush1.bf16.msra.mxu0 %v5264_v37 }
 0x2c7   :  { %v5012_v28 = vadd.f32 %v4924_v10, %v19351_v26  ;;  %v4926_v25 = vadd.f32 %v4925_v59, %v4804_v62  ;;  %5400 = vmatprep.subr.bf16.mxu0 %v5261_v6  ;;  %v5074_v46 = vadd.f32 %v4762_v45, %v21052_v18 }
 0x2c8   :  { %v4808_v15 = vpop.f32.mrf.mxu0  ;;  %v4927_v5 = vpop.f32.mrf.mxu1 }
 0x2c9   :  { %v5013_v17 = vadd.f32 %v4926_v25, %v19355_v47  ;;  %v4928_v31 = vadd.f32 %v4927_v5, %v4806_v14  ;;  %v5102_v53 = vadd.f32 %v19586_v34, %v5012_v28  ;;  %v21053_v25 = vld [vmem:[#allocation21_spill] sm:$0xff] }
 0x2ca   :  { %v4812_v42 = vpop.f32.mrf.mxu0  ;;  %v4929_v55 = vpop.f32.mrf.mxu1  ;;  %5401 = vmatpush1.bf16.msra.mxu0 %v5260_v1 }
 0x2cb   :  { %v5016_v26 = vadd.f32 %v4928_v31, %v19359_v24  ;;  %v4930_v6 = vadd.f32 %v4929_v55, %v4808_v15  ;;  %5402 = vmatprep.subr.bf16.mxu0 %v19564_v27  ;;  %v5170_v33 = vmax.f32 %v5102_v53, 0.0  ;;  %v5103_v1 = vadd.f32 %v19597_v12, %v5013_v17  ;;  %v21055_v53 = vld [vmem:[#allocation24_spill] sm:$0xff] }
 0x2cc   :  { %v4814_v41 = vpop.f32.mrf.mxu0  ;;  %v4933_v47 = vpop.f32.mrf.mxu1  ;;  %v5075_v15 = vadd.f32 %v4764_v0, %v21053_v25 }
 0x2cd   :  { %v5106_v11 = vadd.f32 %v19586_v34, %v5016_v26  ;;  %v5017_v8 = vadd.f32 %v4930_v6, %v3560_v49  ;;  %v4934_v16 = vadd.f32 %v4933_v47, %v4812_v42  ;;  %v5171_v58 = vmax.f32 %v5103_v1, 0.0  ;;  %v21054_v42 = vld [vmem:[#allocation58_spill] sm:$0xff]  ;;  %v21057_v1 = vld [vmem:[#allocation27_spill] sm:$0xff] }
 0x2ce   :  { %v4816_v54 = vpop.f32.mrf.mxu0  ;;  %v4935_v29 = vpop.f32.mrf.mxu1  ;;  %5403 = vmatpush1.bf16.msra.mxu0 %v19559_v60  ;;  %v3459_v55 = vadd.f32 %v21055_v53, %v21054_v42  ;;  %v21056_v47 = vld [vmem:[#allocation22_spill] sm:$0xff] }
 0x2cf   :  { %v5174_v24 = vmax.f32 %v5106_v11, 0.0  ;;  %v5107_v38 = vadd.f32 %v19597_v12, %v5017_v8  ;;  %v5020_v27 = vadd.f32 %v4934_v16, %v19368_v36  ;;  %v4936_v21 = vadd.f32 %v4935_v29, %v4814_v41  ;;  %5404 = vmatprep.subr.bf16.mxu0 %v19552_v19  ;;  %v21050_v19 = vld [vmem:[#allocation23_spill] sm:$0xff] }
 0x2d0   :  { %v4818_v37 = vpop.f32.mrf.mxu0  ;;  %v4937_v50 = vpop.f32.mrf.mxu1  ;;  %v3570_v59 = vadd.f32 %v21050_v19, %v3449_v56  ;;  %v5165_v56 = vadd.f32 %v19491_v30, %v5075_v15 }
 0x2d1   :  { %v19612_v20 = vpack.c.bf16 %v5174_v24, %v5170_v33  ;;  %v5021_v32 = vadd.f32 %v4936_v21, %v19372_v44  ;;  %v4938_v62 = vadd.f32 %v4937_v50, %v4816_v54  ;;  %v5110_v10 = vadd.f32 %v19586_v34, %v5020_v27  ;;  %v21059_v50 = vld [vmem:[#allocation31_spill] sm:$0xff] }
 0x2d2   :  { %v4822_v60 = vpop.f32.mrf.mxu0  ;;  %v4939_v14 = vpop.f32.mrf.mxu1  ;;  %5405 = vmatpush1.bf16.msra.mxu0 %v19547_v39  ;;  %v5175_v36 = vmax.f32 %v5107_v38, 0.0  ;;  %v5164_v54 = vadd.f32 %v19483_v35, %v5074_v46  ;;  %v21062_v46 = vld [vmem:[#allocation29_spill] sm:$0xff] }
 0x2d3   :  { %v5024_v4 = vadd.f32 %v4938_v62, %v21051_v48  ;;  %v4940_v7 = vadd.f32 %v4939_v14, %v4818_v37  ;;  %5406 = vmatprep.subr.bf16.mxu0 %v19540_v63  ;;  %v5178_v49 = vmax.f32 %v5110_v10, 0.0  ;;  %v5111_v26 = vadd.f32 %v19597_v12, %v5021_v32 }
 0x2d4   :  { %v4824_v9 = vpop.f32.mrf.mxu0  ;;  %v4943_v44 = vpop.f32.mrf.mxu1  ;;  %v19621_v28 = vpack.c.bf16 %v5175_v36, %v5171_v58  ;;  %v5232_v32 = vmax.f32 %v5164_v54, 0.0  ;;  %v5233_v58 = vmax.f32 %v5165_v56, 0.0 }
 0x2d5   :  { %v5114_v5 = vadd.f32 %v19586_v34, %v5024_v4  ;;  %v5025_v17 = vadd.f32 %v4940_v7, %v3570_v59  ;;  %v4944_v39 = vadd.f32 %v4943_v44, %v4822_v60  ;;  %v5179_v38 = vmax.f32 %v5111_v26, 0.0  ;;  %v21061_v59 = vld [vmem:[#allocation33_spill] sm:$0xff] }
 0x2d6   :  { %v4826_v31 = vpop.f32.mrf.mxu0  ;;  %v4945_v63 = vpop.f32.mrf.mxu1  ;;  %5407 = vmatpush1.bf16.msra.mxu0 %v19535_v22  ;;  %v5268_v53 = vpack.c.bf16 %v5232_v32, %v5232_v32 }
 0x2d7   :  { %v5182_v6 = vmax.f32 %v5114_v5, 0.0  ;;  %v5115_v41 = vadd.f32 %v19597_v12, %v5025_v17  ;;  %v5028_v11 = vadd.f32 %v4944_v39, %v21056_v47  ;;  %v4946_v8 = vadd.f32 %v4945_v63, %v4824_v9  ;;  %5408 = vmatprep.subr.bf16.mxu0 %v19528_v23  ;;  %v21058_v23 = vld [vmem:[#allocation28_spill] sm:$0xff] }
 0x2d8   :  { %v4828_v16 = vpop.f32.mrf.mxu0  ;;  %v4947_v57 = vpop.f32.mrf.mxu1  ;;  %v3580_v45 = vadd.f32 %v21058_v23, %v3459_v55  ;;  %v5269_v17 = vpack.c.bf16 %v5233_v58, %v5233_v58 }
 0x2d9   :  { %v19634_v33 = vpack.c.bf16 %v5182_v6, %v5178_v49  ;;  %v5029_v29 = vadd.f32 %v4946_v8, %v21057_v1  ;;  %v4948_v24 = vadd.f32 %v4947_v57, %v4826_v31  ;;  %v5118_v27 = vadd.f32 %v19586_v34, %v5028_v11 }
 0x2da   :  { %v4832_v22 = vpop.f32.mrf.mxu0  ;;  %v4949_v21 = vpop.f32.mrf.mxu1  ;;  %5409 = vmatpush1.bf16.msra.mxu0 %v19523_v52  ;;  %v5183_v37 = vmax.f32 %v5115_v41, 0.0  ;;  %v21060_v52 = vld [vmem:[#allocation62_spill] sm:$0xff]  ;;  %v21064_v41 = vld [vmem:[#allocation35_spill] sm:$0xff] }
 0x2db   :  { %v5032_v35 = vadd.f32 %v4948_v24, %v21059_v50  ;;  %v4950_v0 = vadd.f32 %v4949_v21, %v4828_v16  ;;  %5410 = vmatprep.subr.bf16.mxu0 %v19516_v3  ;;  %v3469_v48 = vadd.f32 %v21061_v59, %v21060_v52  ;;  %v5186_v4 = vmax.f32 %v5118_v27, 0.0  ;;  %v21069_v27 = vld [vmem:[#allocation39_spill] sm:$0xff]  ;;  %v19675_v50 = vld [vmem:[%s20736_s3 + $0x14] ss:$8 sps:$4 sm:$0xff]   ;;  %v15745_v52 = vld [vmem:[#allocation4 + $0xe0] ss:$16 sps:$4 sm:$0xff]  }
 0x2dc   :  { %v4834_v30 = vpop.f32.mrf.mxu0  ;;  %v4953_v62 = vpop.f32.mrf.mxu1  ;;  %v19642_v60 = vpack.c.bf16 %v5183_v37, %v5179_v38  ;;  %v5119_v7 = vadd.f32 %v19597_v12, %v5029_v29  ;;  %v5387_v24 = vsel %vm21067_vm6, %v5268_v53, 0  ;;  %v21068_v38 = vld [vmem:[#allocation66_spill] sm:$0xff] }
 0x2dd   :  { %v5122_v10 = vadd.f32 %v19586_v34, %v5032_v35  ;;  %v5033_v14 = vadd.f32 %v4950_v0, %v3580_v45  ;;  %v4954_v36 = vadd.f32 %v4953_v62, %v4832_v22  ;;  %v3590_v47 = vadd.f32 %v21064_v41, %v3469_v48  ;;  %v15747_v59 = vld [vmem:[#allocation4 + $0xe4] ss:$16 sps:$4 sm:$0xff]  }
 0x2de   :  { %v4836_v19 = vpop.f32.mrf.mxu0  ;;  %v4955_v9 = vpop.f32.mrf.mxu1  ;;  %5411 = vmatpush1.bf16.msra.mxu0 %v19511_v2  ;;  %v5187_v55 = vmax.f32 %v5119_v7, 0.0  ;;  %v21063_v2 = vld [vmem:[#allocation32_spill] sm:$0xff]  ;;  %v3479_v21 = vadd.f32 %v21069_v27, %v21068_v38  ;;  %v21074_v41 = vld [vmem:[#allocation70_spill] sm:$0xff] }
 0x2df   :  { %v5190_v3 = vmax.f32 %v5122_v10, 0.0  ;;  %v5123_v18 = vadd.f32 %v19597_v12, %v5033_v14  ;;  %v5036_v44 = vadd.f32 %v4954_v36, %v21062_v46  ;;  %v4956_v25 = vadd.f32 %v4955_v9, %v4834_v30  ;;  %5412 = vmatprep.subr.bf16.mxu0 %v19504_v40  ;;  %v21065_v40 = vld [vmem:[#allocation30_spill] sm:$0xff]  ;;  %v21071_v7 = vld [vmem:[#allocation36_spill] sm:$0xff] }
 0x2e0   :  { %v4838_v15 = vpop.f32.mrf.mxu0  ;;  %v4957_v5 = vpop.f32.mrf.mxu1  ;;  %v21070_v30 = vld [vmem:[#allocation34_spill] sm:$0xff] }
 0x2e1   :  { %v19652_v39 = vpack.c.bf16 %v5190_v3, %v5186_v4  ;;  %v4958_v31 = vadd.f32 %v4957_v5, %v4836_v19  ;;  %v5126_v49 = vadd.f32 %v19586_v34, %v5036_v44  ;;  %v5037_v26 = vadd.f32 %v4956_v25, %v21063_v2  ;;  %v15750_v46 = vld [vmem:[#allocation4 + $0xc4] ss:$16 sps:$4 sm:$0xff]  }
 0x2e2   :  { %v4842_v42 = vpop.f32.mrf.mxu0  ;;  %v4959_v63 = vpop.f32.mrf.mxu1  ;;  %5413 = vmatpush1.bf16.msra.mxu0 %v19499_v51  ;;  %v5191_v6 = vmax.f32 %v5123_v18, 0.0  ;;  %v19667_v51 = vld [vmem:[%s20736_s3] ss:$8 sps:$4 sm:$0xff]  }
 0x2e3   :  { %v5040_v11 = vadd.f32 %v4958_v31, %v21065_v40  ;;  %v4960_v8 = vadd.f32 %v4959_v63, %v4838_v15  ;;  %13931 = vmatprep.subr.msk.bf16.mxu0 %vm21066_vm2, %v5269_v17  ;;  %v5194_v37 = vmax.f32 %v5126_v49, 0.0  ;;  %v5127_v23 = vadd.f32 %v19597_v12, %v5037_v26  ;;  %v21072_v44 = vld [vmem:[#allocation40_spill] sm:$0xff]  ;;  %v21073_v15 = vld [vmem:[#allocation38_spill] sm:$0xff] }
 0x2e4   :  { %v4844_v16 = vpop.f32.mrf.mxu0  ;;  %v4963_v54 = vpop.f32.mrf.mxu1  ;;  %v19660_v57 = vpack.c.bf16 %v5191_v6, %v5187_v55  ;;  %v3600_v25 = vadd.f32 %v21072_v44, %v3479_v21  ;;  %v15748_v55 = vld [vmem:[#allocation4 + $0xc0] ss:$16 sps:$4 sm:$0xff]  }
 0x2e5   :  { %v5130_v56 = vadd.f32 %v19586_v34, %v5040_v11  ;;  %v5041_v1 = vadd.f32 %v4960_v8, %v3590_v47  ;;  %v4964_v29 = vadd.f32 %v4963_v54, %v4842_v42  ;;  %v5195_v48 = vmax.f32 %v5127_v23, 0.0  ;;  %v19694_v6 = vld [vmem:[%s20736_s3 + $0x10] ss:$8 sps:$4 sm:$0xff]   ;;  %v19702_v54 = vld [vmem:[%s20736_s3 + $0x24] ss:$8 sps:$4 sm:$0xff]  }
 0x2e6   :  { %v4846_v22 = vpop.f32.mrf.mxu0  ;;  %v4965_v45 = vpop.f32.mrf.mxu1  ;;  %5429 = vmatpush2.bf16.msra.mxu0 %v5387_v24  ;;  %v21075_v47 = vld [vmem:[#allocation45_spill] sm:$0xff]  ;;  %v21076_v24 = vld [vmem:[#allocation43_spill] sm:$0xff] }
 0x2e7   :  { %v5198_v35 = vmax.f32 %v5130_v56, 0.0  ;;  %v5131_v0 = vadd.f32 %v19597_v12, %v5041_v1  ;;  %v5044_v32 = vadd.f32 %v4964_v29, %v21070_v30  ;;  %v4966_v62 = vadd.f32 %v4965_v45, %v4844_v16  ;;  %6440 = vmatprep.subr.bf16.mxu0 %v15747_v59  ;;  %v15753_v56 = vld [vmem:[#allocation4 + $0xa4] ss:$16 sps:$4 sm:$0xff]  }
 0x2e8   :  { %v4848_v58 = vpop.f32.mrf.mxu0  ;;  %v4967_v10 = vpop.f32.mrf.mxu1  ;;  %v3489_v40 = vadd.f32 %v21075_v47, %v21074_v41  ;;  %v21079_v59 = vld [vmem:[#allocation46_spill] sm:$0xff] }
 0x2e9   :  { %v19679_v14 = vpack.c.bf16 %v5198_v35, %v5194_v37  ;;  %v4968_v36 = vadd.f32 %v4967_v10, %v4846_v22  ;;  %5431 = vmatmul.mubr.bf16.vlgmr.msra.gmra.mxu0 %v19667_v51  ;;  %v5134_v4 = vadd.f32 %v19586_v34, %v5044_v32  ;;  %v5045_v9 = vadd.f32 %v4966_v62, %v21071_v7  ;;  %v15751_v37 = vld [vmem:[#allocation4 + $0xa0] ss:$16 sps:$4 sm:$0xff]  }
 0x2ea   :  { %v4852_v19 = vpop.f32.mrf.mxu0  ;;  %v4969_v3 = vpop.f32.mrf.mxu1  ;;  %13933 = vmatprep.mubr.msk.bf16.mxu0 %vm5360_vm11, %v19675_v50  ;;  %v5199_v18 = vmax.f32 %v5131_v0, 0.0  ;;  %6441 = vmatpush1.bf16.msra.mxu0 %v15745_v52  ;;  %v15756_v0 = vld [vmem:[#allocation4 + $0x84] ss:$16 sps:$4 sm:$0xff]  }
 0x2eb   :  { %v5048_v5 = vadd.f32 %v4968_v36, %v21073_v15  ;;  %v4970_v17 = vadd.f32 %v4969_v3, %v4848_v58  ;;  %6442 = vmatprep.subr.bf16.mxu0 %v15750_v46  ;;  %v5202_v11 = vmax.f32 %v5134_v4, 0.0  ;;  %v5135_v8 = vadd.f32 %v19597_v12, %v5045_v9  ;;  %v21077_v62 = vld [vmem:[#allocation44_spill] sm:$0xff] }
 0x2ec   :  { %v4854_v31 = vpop.f32.mrf.mxu0  ;;  %v4973_v42 = vpop.f32.mrf.mxu1  ;;  %v19688_v53 = vpack.c.bf16 %v5199_v18, %v5195_v48  ;;  %v15754_v18 = vld [vmem:[#allocation4 + $0x80] ss:$16 sps:$4 sm:$0xff]  }
 0x2ed   :  { %v5138_v49 = vadd.f32 %v19586_v34, %v5048_v5  ;;  %v5049_v2 = vadd.f32 %v4970_v17, %v3600_v25  ;;  %v4974_v26 = vadd.f32 %v4973_v42, %v4852_v19  ;;  %v5203_v30 = vmax.f32 %v5135_v8, 0.0  ;;  %v21078_v19 = vld [vmem:[#allocation47_spill] sm:$0xff]  ;;  %v21080_v17 = vld [vmem:[#allocation74_spill] sm:$0xff] }
 0x2ee   :  { %v4856_v63 = vpop.f32.mrf.mxu0  ;;  %v4975_v16 = vpop.f32.mrf.mxu1  ;;  %6443 = vmatpush1.bf16.msra.mxu0 %v15748_v55  ;;  %v3610_v52 = vadd.f32 %v21078_v19, %v3489_v40  ;;  %v19721_v5 = vld [vmem:[%s20736_s3 + $0x20] ss:$8 sps:$4 sm:$0xff]  }
 0x2ef   :  { %v5206_v1 = vmax.f32 %v5138_v49, 0.0  ;;  %v5139_v29 = vadd.f32 %v19597_v12, %v5049_v2  ;;  %v5052_v22 = vadd.f32 %v4974_v26, %v21076_v24  ;;  %v4976_v38 = vadd.f32 %v4975_v16, %v4854_v31  ;;  %6444 = vmatprep.subr.bf16.mxu0 %v15753_v56  ;;  %v21081_v31 = vld [vmem:[#allocation50_spill] sm:$0xff]  ;;  %v21082_v40 = vld [vmem:[#allocation48_spill] sm:$0xff] }
 0x2f0   :  { %v4858_v27 = vpop.f32.mrf.mxu0  ;;  %v4977_v21 = vpop.f32.mrf.mxu1  ;;  %v3499_v42 = vadd.f32 %v21081_v31, %v21080_v17  ;;  %v19729_v26 = vld [vmem:[%s20736_s3 + $0x34] ss:$8 sps:$4 sm:$0xff]  }
 0x2f1   :  { %v19706_v23 = vpack.c.bf16 %v5206_v1, %v5202_v11  ;;  %v4978_v45 = vadd.f32 %v4977_v21, %v4856_v63  ;;  %5441 = vmatmul.mubr.bf16.gmra.mxu0 %v19694_v6  ;;  %v5142_v32 = vadd.f32 %v19586_v34, %v5052_v22  ;;  %v5053_v58 = vadd.f32 %v4976_v38, %v21077_v62  ;;  %v15759_v63 = vld [vmem:[#allocation4 + $0x64] ss:$16 sps:$4 sm:$0xff]   ;;  %v15757_v1 = vld [vmem:[#allocation4 + $0x60] ss:$16 sps:$4 sm:$0xff]   ;;  %v21085_v62 = vld [vmem:[#allocation51_spill] sm:$0xff] }
 0x2f2   :  { %v4862_v35 = vpop.f32.mrf.mxu0  ;;  %v4979_v10 = vpop.f32.mrf.mxu1  ;;  %13934 = vmatprep.mubr.msk.bf16.mxu0 %vm5360_vm11, %v19702_v54  ;;  %v5207_v36 = vmax.f32 %v5139_v29, 0.0  ;;  %6445 = vmatpush1.bf16.msra.mxu0 %v15751_v37  ;;  %v15762_v38 = vld [vmem:[#allocation4 + $0x44] ss:$16 sps:$4 sm:$0xff]   ;;  %v21083_v37 = vld [vmem:[#allocation49_spill] sm:$0xff] }
 0x2f3   :  { %v5056_v48 = vadd.f32 %v4978_v45, %v21079_v59  ;;  %v4980_v4 = vadd.f32 %v4979_v10, %v4858_v27  ;;  %6446 = vmatprep.subr.bf16.mxu0 %v15756_v0  ;;  %v5210_v55 = vmax.f32 %v5142_v32, 0.0  ;;  %v5143_v49 = vadd.f32 %v19597_v12, %v5053_v58  ;;  %v15760_v59 = vld [vmem:[#allocation4 + $0x40] ss:$16 sps:$4 sm:$0xff]  }
 0x2f4   :  { %v4864_v7 = vpop.f32.mrf.mxu0  ;;  %v4983_v9 = vpop.f32.mrf.mxu1  ;;  %v19715_v3 = vpack.c.bf16 %v5207_v36, %v5203_v30  ;;  %v21084_v30 = vld [vmem:[#allocation52_spill] sm:$0xff] }
 0x2f5   :  { %v5146_v46 = vadd.f32 %v19586_v34, %v5056_v48  ;;  %v5057_v44 = vadd.f32 %v4980_v4, %v3610_v52  ;;  %v4984_v25 = vadd.f32 %v4983_v9, %v4862_v35  ;;  %v5211_v27 = vmax.f32 %v5143_v49, 0.0 }
 0x2f6   :  { %v4866_v15 = vpop.f32.mrf.mxu0  ;;  %v4985_v2 = vpop.f32.mrf.mxu1  ;;  %6447 = vmatpush1.bf16.msra.mxu0 %v15754_v18  ;;  %v3620_v32 = vadd.f32 %v21084_v30, %v3499_v42  ;;  %v19748_v18 = vld [vmem:[%s20736_s3 + $0x30] ss:$8 sps:$4 sm:$0xff]   ;;  %v19756_v42 = vld [vmem:[%s20736_s3 + $0x44] ss:$8 sps:$4 sm:$0xff]  }
 0x2f7   :  { %v5214_v41 = vmax.f32 %v5146_v46, 0.0  ;;  %v5147_v47 = vadd.f32 %v19597_v12, %v5057_v44  ;;  %v5060_v11 = vadd.f32 %v4984_v25, %v21082_v40  ;;  %v4986_v8 = vadd.f32 %v4985_v2, %v4864_v7  ;;  %6448 = vmatprep.subr.bf16.mxu0 %v15759_v63  ;;  %v21086_v46 = vld [vmem:[#allocation78_spill] sm:$0xff]  ;;  %v21087_v44 = vld [vmem:[#allocation55_spill] sm:$0xff]  ;;  %v21088_v2 = vld [vmem:[#allocation53_spill] sm:$0xff] }
 0x2f8   :  { %v4868_v16 = vpop.f32.mrf.mxu0  ;;  %v4987_v56 = vpop.f32.mrf.mxu1  ;;  %v3509_v25 = vadd.f32 %v21087_v44, %v21086_v46 }
 0x2f9   :  { %v19733_v29 = vpack.c.bf16 %v5214_v41, %v5210_v55  ;;  %v4988_v24 = vadd.f32 %v4987_v56, %v4866_v15  ;;  %5451 = vmatmul.mubr.bf16.gmra.mxu0 %v19721_v5  ;;  %v5150_v21 = vadd.f32 %v19586_v34, %v5060_v11  ;;  %v5061_v45 = vadd.f32 %v4986_v8, %v21083_v37  ;;  %v21089_v8 = vld [vmem:[#allocation54_spill] sm:$0xff] }
 0x2fa   :  { %v4872_v22 = vpop.f32.mrf.mxu0  ;;  %v4989_v35 = vpop.f32.mrf.mxu1  ;;  %13935 = vmatprep.mubr.msk.bf16.mxu0 %vm5360_vm11, %v19729_v26  ;;  %v5215_v0 = vmax.f32 %v5147_v47, 0.0  ;;  %6449 = vmatpush1.bf16.msra.mxu0 %v15757_v1 }
 0x2fb   :  { %v5064_v58 = vadd.f32 %v4988_v24, %v21085_v62  ;;  %v4990_v10 = vadd.f32 %v4989_v35, %v4868_v16  ;;  %6450 = vmatprep.subr.bf16.mxu0 %v15762_v38  ;;  %v5218_v15 = vmax.f32 %v5150_v21, 0.0  ;;  %v5151_v17 = vadd.f32 %v19597_v12, %v5061_v45  ;;  %v21091_v45 = vld [vmem:[#allocation59_spill] sm:$0xff] }
 0x2fc   :  { %v4874_v36 = vpop.f32.mrf.mxu0  ;;  %v4993_v19 = vpop.f32.mrf.mxu1  ;;  %v19742_v52 = vpack.c.bf16 %v5215_v0, %v5211_v27  ;;  %v21090_v27 = vld [vmem:[#allocation60_spill] sm:$0xff] }
 0x2fd   :  { %v5154_v48 = vadd.f32 %v19586_v34, %v5064_v58  ;;  %v5065_v4 = vadd.f32 %v4990_v10, %v3620_v32  ;;  %v4994_v7 = vadd.f32 %v4993_v19, %v4872_v22  ;;  %v5219_v24 = vmax.f32 %v5151_v17, 0.0  ;;  %v19772_v19 = vld [vmem:[%s20736_s3 + $0x40] ss:$8 sps:$4 sm:$0xff]  }
 0x2fe   :  { %v4876_v9 = vpop.f32.mrf.mxu0  ;;  %v4995_v31 = vpop.f32.mrf.mxu1  ;;  %6451 = vmatpush1.bf16.msra.mxu0 %v15760_v59  ;;  %v3630_v21 = vadd.f32 %v21090_v27, %v3509_v25  ;;  %v15778_v27 = vld [vmem:[#allocation4 + $0x180] ss:$16 sps:$4 sm:$0xff]  }
 0x2ff   :  { %v5222_v55 = vmax.f32 %v5154_v48, 0.0  ;;  %v5155_v49 = vadd.f32 %v19597_v12, %v5065_v4  ;;  %v5068_v63 = vadd.f32 %v4994_v7, %v21088_v2  ;;  %v4996_v41 = vadd.f32 %v4995_v31, %v4874_v36  ;;  %v19777_v4 = vld [vmem:[%s20736_s3 + $0x54] ss:$8 sps:$4 sm:$0xff]   ;;  %v19786_v2 = vld [vmem:[%s20736_s3 + $0x50] ss:$8 sps:$4 sm:$0xff]  }
 0x300   :  { %v4878_v47 = vpop.f32.mrf.mxu0  ;;  %v4997_v40 = vpop.f32.mrf.mxu1 }
 0x301   :  { %v5262_v11 = vpack.c.bf16 %v5222_v55, %v5218_v15  ;;  %v5069_v16 = vadd.f32 %v4996_v41, %v21089_v8  ;;  %v4998_v56 = vadd.f32 %v4997_v40, %v4876_v9  ;;  %5461 = vmatmul.mubr.bf16.gmra.mxu0 %v19748_v18  ;;  %v5223_v38 = vmax.f32 %v5155_v49, 0.0  ;;  %v19800_v41 = vld [vmem:[%s20736_s3 + $0x60] ss:$8 sps:$4 sm:$0xff]  }
 0x302   :  { %v4882_v1 = vpop.f32.mrf.mxu0  ;;  %v4999_v22 = vpop.f32.mrf.mxu1  ;;  %13936 = vmatprep.mubr.msk.bf16.mxu0 %vm5360_vm11, %v19756_v42  ;;  %v5158_v37 = vadd.f32 %v19586_v34, %v5068_v63  ;;  %v19791_v63 = vld [vmem:[%s20736_s3 + $0x64] ss:$8 sps:$4 sm:$0xff]  }
 0x303   :  { %v5072_v35 = vadd.f32 %v4998_v56, %v21091_v45  ;;  %v5000_v0 = vadd.f32 %v4999_v22, %v4878_v47  ;;  %v5263_v62 = vpack.c.bf16 %v5223_v38, %v5219_v24  ;;  %v5159_v58 = vadd.f32 %v19597_v12, %v5069_v16  ;;  %v19806_v47 = vld [vmem:[%s20736_s3 + $0x74] ss:$8 sps:$4 sm:$0xff]   ;;  %v21093_v8 = vld [vmem:[#allocation63_spill] sm:$0xff]  ;;  %v19819_v56 = vld [vmem:[%s20736_s3 + $0x70] ss:$8 sps:$4 sm:$0xff]  }
 0x304   :  { %v4884_v30 = vpop.f32.mrf.mxu0  ;;  %v5003_v32 = vpop.f32.mrf.mxu1  ;;  %v5226_v7 = vmax.f32 %v5158_v37, 0.0  ;;  %v15774_v22 = vld [vmem:[#allocation4 + $0x1c4] ss:$16 sps:$4 sm:$0xff]   ;;  %v15775_v38 = vld [vmem:[#allocation4 + $0x1a0] ss:$16 sps:$4 sm:$0xff]  }
 0x305   :  { %v5162_v10 = vadd.f32 %v19586_v34, %v5072_v35  ;;  %v5073_v36 = vadd.f32 %v5000_v0, %v3630_v21  ;;  %v5227_v15 = vmax.f32 %v5159_v58, 0.0  ;;  %v5004_v40 = vadd.f32 %v5003_v32, %v4882_v1  ;;  %v15781_v21 = vld [vmem:[#allocation4 + $0x160] ss:$16 sps:$4 sm:$0xff]   ;;  %v15789_v45 = vld [vmem:[#allocation4 + $0x124] ss:$16 sps:$4 sm:$0xff]  }
 0x306   :  { %v4886_v59 = vpop.f32.mrf.mxu0  ;;  %v5005_v48 = vpop.f32.mrf.mxu1  ;;  %v15784_v37 = vld [vmem:[#allocation4 + $0x140] ss:$16 sps:$4 sm:$0xff]   ;;  %v15792_v35 = vld [vmem:[#allocation4 + $0x104] ss:$16 sps:$4 sm:$0xff]   ;;  %v15795_v0 = vld [vmem:[#allocation4 + $0xec] ss:$16 sps:$4 sm:$0xff]  }
 0x307   :  { %v5230_v9 = vmax.f32 %v5162_v10, 0.0  ;;  %v5163_v46 = vadd.f32 %v19597_v12, %v5073_v36  ;;  %v15807_v32 = vld [vmem:[#allocation4 + $0x2c4] ss:$16 sps:$4 sm:$0xff]   ;;  %v15817_v10 = vld [vmem:[#allocation4 + $0x280] ss:$16 sps:$4 sm:$0xff]  }
 0x308   :  { %v4887_v44 = vpop.f32.mrf.mxu0  ;;  %v5007_v25 = vpop.f32.mrf.mxu1  ;;  %v15813_v58 = vld [vmem:[#allocation4 + $0x2a4] ss:$16 sps:$4 sm:$0xff]  }
 0x309   :  { %v5266_v17 = vpack.c.bf16 %v5230_v9, %v5226_v7  ;;  %5471 = vmatmul.mubr.bf16.gmra.mxu0 %v19772_v19  ;;  %v5231_v31 = vmax.f32 %v5163_v46, 0.0  ;;  %v15819_v36 = vld [vmem:[#allocation4 + $0x284] ss:$16 sps:$4 sm:$0xff]   ;;  %v15835_v7 = vld [vmem:[#allocation4 + $0x220] ss:$16 sps:$4 sm:$0xff]  }
 0x30a   :  { %13937 = vmatprep.mubr.msk.bf16.mxu0 %vm5360_vm11, %v19777_v4  ;;  %v5008_v55 = vpop.f32.mrf.mxu1  ;;  %v15825_v59 = vld [vmem:[#allocation4 + $0x264] ss:$16 sps:$4 sm:$0xff]   ;;  %v15841_v46 = vld [vmem:[#allocation4 + $0x200] ss:$16 sps:$4 sm:$0xff]  }
 0x30b   :  { %v5267_v49 = vpack.c.bf16 %v5231_v31, %v5227_v15  ;;  %v15837_v9 = vld [vmem:[#allocation4 + $0x224] ss:$16 sps:$4 sm:$0xff]   ;;  %v15847_v25 = vld [vmem:[#allocation4 + $0x3e0] ss:$16 sps:$4 sm:$0xff]  }
 0x30c   :  { %v15843_v44 = vld [vmem:[#allocation4 + $0x204] ss:$16 sps:$4 sm:$0xff]   ;;  %v15859_v55 = vld [vmem:[#allocation4 + $0x3a0] ss:$16 sps:$4 sm:$0xff]  }
 0x30d   :  { %5511 = vmatprep.subr.bf16.mxu1 %v5267_v49  ;;  %v15849_v15 = vld [vmem:[#allocation4 + $0x3e4] ss:$16 sps:$4 sm:$0xff]  }
 0x30e   :  { %5512 = vmatpush1.bf16.msra.mxu1 %v5266_v17  ;;  %v15853_v17 = vld [vmem:[#allocation4 + $0x3c0] ss:$16 sps:$4 sm:$0xff]   ;;  %v15855_v31 = vld [vmem:[#allocation4 + $0x3c4] ss:$16 sps:$4 sm:$0xff]  }
 0x30f   :  { %5513 = vmatprep.subr.bf16.mxu1 %v5263_v62  ;;  %v15811_v62 = vld [vmem:[#allocation4 + $0x2a0] ss:$16 sps:$4 sm:$0xff]   ;;  %v15861_v49 = vld [vmem:[#allocation4 + $0x3a4] ss:$16 sps:$4 sm:$0xff]  }
 0x311   :  { %5481 = vmatmul.mubr.bf16.gmra.mxu0 %v19786_v2 }
 0x312   :  { %5514 = vmatpush1.bf16.msra.mxu1 %v5262_v11  ;;  %13938 = vmatprep.mubr.msk.bf16.mxu0 %vm5360_vm11, %v19791_v63  ;;  %v5006_v11 = vadd.f32 %v5005_v48, %v4884_v30  ;;  %v15805_v30 = vld [vmem:[#allocation4 + $0x2c0] ss:$16 sps:$4 sm:$0xff]  }
 0x313   :  { %5515 = vmatprep.subr.bf16.mxu1 %v19742_v52  ;;  %v21092_v52 = vld [vmem:[#allocation61_spill] sm:$0xff]  ;;  %v15829_v48 = vld [vmem:[#allocation4 + $0x240] ss:$16 sps:$4 sm:$0xff]  }
 0x314   :  { %v5077_v16 = vadd.f32 %v5006_v11, %v21093_v8  ;;  %v15879_v11 = vld [vmem:[#allocation4 + $0x344] ss:$16 sps:$4 sm:$0xff]  }
 0x315   :  { %v15888_v8 = vld [vmem:[#allocation4 + $0x304] ss:$16 sps:$4 sm:$0xff]  }
 0x316   :  { %5516 = vmatpush1.bf16.msra.mxu1 %v19733_v29  ;;  %v5076_v29 = vadd.f32 %v5004_v40, %v21092_v52  ;;  %v15877_v40 = vld [vmem:[#allocation4 + $0x340] ss:$16 sps:$4 sm:$0xff]   ;;  %v15885_v52 = vld [vmem:[#allocation4 + $0x324] ss:$16 sps:$4 sm:$0xff]  }
 0x317   :  { %5517 = vmatprep.subr.bf16.mxu1 %v19715_v3  ;;  %v5167_v3 = vadd.f32 %v19597_v12, %v5077_v16  ;;  %v15765_v12 = vld [vmem:[#allocation4 + $0x24] ss:$16 sps:$4 sm:$0xff]   ;;  %v15886_v16 = vld [vmem:[#allocation4 + $0x300] ss:$16 sps:$4 sm:$0xff]  }
 0x318   :  { %6452 = vmatprep.subr.bf16.mxu0 %v15765_v12 }
 0x319   :  { %5491 = vmatmul.mubr.bf16.gmra.mxu0 %v19800_v41  ;;  %v5235_v1 = vmax.f32 %v5167_v3, 0.0 }
 0x31a   :  { %5518 = vmatpush1.bf16.msra.mxu1 %v19706_v23  ;;  %13939 = vmatprep.mubr.msk.bf16.mxu0 %vm5360_vm11, %v19806_v47  ;;  %v5166_v23 = vadd.f32 %v19586_v34, %v5076_v29  ;;  %v15763_v34 = vld [vmem:[#allocation4 + $0x20] ss:$16 sps:$4 sm:$0xff]  }
 0x31b   :  { %5519 = vmatprep.subr.bf16.mxu1 %v19688_v53  ;;  %v5271_v24 = vpack.c.bf16 %v5235_v1, %v5235_v1  ;;  %6453 = vmatpush1.bf16.msra.mxu0 %v15763_v34  ;;  %v15883_v29 = vld [vmem:[#allocation4 + $0x320] ss:$16 sps:$4 sm:$0xff]  }
 0x31c   :  { %v5234_v53 = vmax.f32 %v5166_v23, 0.0 }
 0x31e   :  { %5520 = vmatpush1.bf16.msra.mxu1 %v19679_v14  ;;  %v5270_v14 = vpack.c.bf16 %v5234_v53, %v5234_v53 }
 0x31f   :  { %5521 = vmatprep.subr.bf16.mxu1 %v19660_v57 }
 0x320   :  { %v5393_v57 = vsel %vm21095_vm13, %v5270_v14, 0 }
 0x321   :  { %5501 = vmatmul.mubr.bf16.gmra.mxu0 %v19819_v56 }
 0x322   :  { %5522 = vmatpush1.bf16.msra.mxu1 %v19652_v39  ;;  %v15768_v39 = vld [vmem:[#allocation4 + $0x4] ss:$16 sps:$4 sm:$0xff]  }
 0x323   :  { %5523 = vmatprep.subr.bf16.mxu1 %v19642_v60  ;;  %v15766_v60 = vld [vmem:[#allocation4] ss:$16 sps:$4 sm:$0xff]   ;;  %6454 = vmatprep.subr.bf16.mxu0 %v15768_v39 }
 0x324   :  { %6455 = vmatpush1.bf16.msra.mxu0 %v15766_v60 }
 0x326   :  { %5524 = vmatpush1.bf16.msra.mxu1 %v19634_v33  ;;  %v15772_v33 = vld [vmem:[#allocation4 + $0x1c0] ss:$16 sps:$4 sm:$0xff]  }
 0x327   :  { %5525 = vmatprep.subr.bf16.mxu1 %v19621_v28  ;;  %v15769_v28 = vld [vmem:[#allocation4 + $0x1e0] ss:$16 sps:$4 sm:$0xff]  }
 0x32a   :  { %5526 = vmatpush1.bf16.msra.mxu1 %v19612_v20  ;;  %v15771_v20 = vld [vmem:[#allocation4 + $0x1e4] ss:$16 sps:$4 sm:$0xff]  }
 0x32b   :  { %13940 = vmatprep.subr.msk.bf16.mxu1 %vm21094_vm8, %v5271_v24  ;;  %6456 = vmatprep.subr.bf16.mxu0 %v15771_v20 }
 0x32c   :  { %6457 = vmatpush2.bf16.msra.mxu0 %v15769_v28 }
 0x32d   :  { %6458 = vmatprep.subr.bf16.mxu0 %v15774_v22 }
 0x32e   :  { %5542 = vmatpush2.bf16.msra.mxu1 %v5393_v57 }
 0x330   :  { %6459 = vmatpush2.bf16.msra.mxu0 %v15772_v33 }
 0x331   :  { %5544 = vmatmul.mubr.bf16.vlgmr.msra.gmra.mxu1 %v19667_v51  ;;  %v15777_v51 = vld [vmem:[#allocation4 + $0x1a4] ss:$16 sps:$4 sm:$0xff]  }
 0x332   :  { %13942 = vmatprep.mubr.msk.bf16.mxu1 %vm5360_vm11, %v19675_v50  ;;  %6460 = vmatprep.subr.bf16.mxu0 %v15777_v51  ;;  %v15780_v50 = vld [vmem:[#allocation4 + $0x184] ss:$16 sps:$4 sm:$0xff]  }
 0x334   :  { %6461 = vmatpush2.bf16.msra.mxu0 %v15775_v38 }
 0x335   :  { %6462 = vmatprep.subr.bf16.mxu0 %v15780_v50 }
 0x338   :  { %6463 = vmatpush2.bf16.msra.mxu0 %v15778_v27 }
 0x339   :  { %5554 = vmatmul.mubr.bf16.gmra.mxu1 %v19694_v6  ;;  %v15783_v6 = vld [vmem:[#allocation4 + $0x164] ss:$16 sps:$4 sm:$0xff]  }
 0x33a   :  { %13943 = vmatprep.mubr.msk.bf16.mxu1 %vm5360_vm11, %v19702_v54  ;;  %6464 = vmatprep.subr.bf16.mxu0 %v15783_v6  ;;  %v15786_v54 = vld [vmem:[#allocation4 + $0x144] ss:$16 sps:$4 sm:$0xff]  }
 0x33c   :  { %6465 = vmatpush2.bf16.msra.mxu0 %v15781_v21 }
 0x33d   :  { %6466 = vmatprep.subr.bf16.mxu0 %v15786_v54 }
 0x340   :  { %6467 = vmatpush2.bf16.msra.mxu0 %v15784_v37 }
 0x341   :  { %5564 = vmatmul.mubr.bf16.gmra.mxu1 %v19721_v5  ;;  %v15787_v5 = vld [vmem:[#allocation4 + $0x120] ss:$16 sps:$4 sm:$0xff]   ;;  %6468 = vmatprep.subr.bf16.mxu0 %v15789_v45 }
 0x342   :  { %13944 = vmatprep.mubr.msk.bf16.mxu1 %vm5360_vm11, %v19729_v26  ;;  %v15790_v26 = vld [vmem:[#allocation4 + $0x100] ss:$16 sps:$4 sm:$0xff]  }
 0x344   :  { %6469 = vmatpush2.bf16.msra.mxu0 %v15787_v5 }
 0x345   :  { %6470 = vmatprep.subr.bf16.mxu0 %v15792_v35 }
 0x348   :  { %6471 = vmatpush2.bf16.msra.mxu0 %v15790_v26 }
 0x349   :  { %5574 = vmatmul.mubr.bf16.gmra.mxu1 %v19748_v18  ;;  %6586 = vmatprep.subr.bf16.mxu0 %v15795_v0  ;;  %v15799_v18 = vld [vmem:[#allocation4 + $0x2e0] ss:$16 sps:$4 sm:$0xff]   ;;  %v15793_v0 = vld [vmem:[#allocation4 + $0xe8] ss:$16 sps:$4 sm:$0xff]  }
 0x34a   :  { %13945 = vmatprep.mubr.msk.bf16.mxu1 %vm5360_vm11, %v19756_v42  ;;  %v15801_v42 = vld [vmem:[#allocation4 + $0x2e4] ss:$16 sps:$4 sm:$0xff]  }
 0x34b   :  { %6513 = vmatprep.subr.bf16.mxu1 %v15801_v42 }
 0x34c   :  { %6514 = vmatpush1.bf16.msra.mxu1 %v15799_v18  ;;  %v15798_v18 = vld [vmem:[#allocation4 + $0xcc] ss:$16 sps:$4 sm:$0xff]  }
 0x34d   :  { %6515 = vmatprep.subr.bf16.mxu1 %v15807_v32 }
 0x350   :  { %6516 = vmatpush1.bf16.msra.mxu1 %v15805_v30 }
 0x351   :  { %5584 = vmatmul.mubr.bf16.gmra.mxu1 %v19772_v19  ;;  %6517 = vmatprep.subr.bf16.mxu1 %v15813_v58  ;;  %v15823_v19 = vld [vmem:[#allocation4 + $0x260] ss:$16 sps:$4 sm:$0xff]  }
 0x352   :  { %13946 = vmatprep.mubr.msk.bf16.mxu1 %vm5360_vm11, %v19777_v4  ;;  %v15831_v4 = vld [vmem:[#allocation4 + $0x244] ss:$16 sps:$4 sm:$0xff]  }
 0x354   :  { %6518 = vmatpush1.bf16.msra.mxu1 %v15811_v62  ;;  %v15796_v62 = vld [vmem:[#allocation4 + $0xc8] ss:$16 sps:$4 sm:$0xff]  }
 0x355   :  { %6519 = vmatprep.subr.bf16.mxu1 %v15819_v36  ;;  %v15804_v36 = vld [vmem:[#allocation4 + $0xac] ss:$16 sps:$4 sm:$0xff]  }
 0x358   :  { %6520 = vmatpush1.bf16.msra.mxu1 %v15817_v10 }
 0x359   :  { %5594 = vmatmul.mubr.bf16.gmra.mxu1 %v19786_v2  ;;  %6521 = vmatprep.subr.bf16.mxu1 %v15825_v59  ;;  %v15865_v2 = vld [vmem:[#allocation4 + $0x380] ss:$16 sps:$4 sm:$0xff]  }
 0x35a   :  { %13947 = vmatprep.mubr.msk.bf16.mxu1 %vm5360_vm11, %v19791_v63  ;;  %v15867_v63 = vld [vmem:[#allocation4 + $0x384] ss:$16 sps:$4 sm:$0xff]  }
 0x35c   :  { %6522 = vmatpush1.bf16.msra.mxu1 %v15823_v19 }
 0x35d   :  { %6523 = vmatprep.subr.bf16.mxu1 %v15831_v4 }
 0x360   :  { %6524 = vmatpush1.bf16.msra.mxu1 %v15829_v48 }
 0x361   :  { %5604 = vmatmul.mubr.bf16.gmra.mxu1 %v19800_v41  ;;  %6525 = vmatprep.subr.bf16.mxu1 %v15837_v9  ;;  %v15871_v41 = vld [vmem:[#allocation4 + $0x360] ss:$16 sps:$4 sm:$0xff]  }
 0x362   :  { %13948 = vmatprep.mubr.msk.bf16.mxu1 %vm5360_vm11, %v19806_v47  ;;  %v15873_v47 = vld [vmem:[#allocation4 + $0x364] ss:$16 sps:$4 sm:$0xff]  }
 0x364   :  { %6526 = vmatpush1.bf16.msra.mxu1 %v15835_v7  ;;  %v15802_v7 = vld [vmem:[#allocation4 + $0xa8] ss:$16 sps:$4 sm:$0xff]  }
 0x365   :  { %6527 = vmatprep.subr.bf16.mxu1 %v15843_v44 }
 0x368   :  { %6528 = vmatpush1.bf16.msra.mxu1 %v15841_v46  ;;  %v15810_v46 = vld [vmem:[#allocation4 + $0x8c] ss:$16 sps:$4 sm:$0xff]  }
 0x369   :  { %5614 = vmatmul.mubr.bf16.gmra.mxu1 %v19819_v56  ;;  %6529 = vmatprep.subr.bf16.mxu1 %v15849_v15  ;;  %v15891_v56 = vld [vmem:[#allocation4 + $0x2ec] ss:$16 sps:$4 sm:$0xff]  }
 0x36c   :  { %6530 = vmatpush2.bf16.msra.mxu1 %v15847_v25 }
 0x36d   :  { %6531 = vmatprep.subr.bf16.mxu1 %v15855_v31 }
 0x370   :  { %6532 = vmatpush2.bf16.msra.mxu1 %v15853_v17  ;;  %v15808_v17 = vld [vmem:[#allocation4 + $0x88] ss:$16 sps:$4 sm:$0xff]  }
 0x371   :  { %6533 = vmatprep.subr.bf16.mxu1 %v15861_v49  ;;  %v15816_v49 = vld [vmem:[#allocation4 + $0x6c] ss:$16 sps:$4 sm:$0xff]  }
 0x374   :  { %6534 = vmatpush2.bf16.msra.mxu1 %v15859_v55 }
 0x375   :  { %6535 = vmatprep.subr.bf16.mxu1 %v15867_v63 }
 0x378   :  { %6536 = vmatpush2.bf16.msra.mxu1 %v15865_v2 }
 0x379   :  { %6537 = vmatprep.subr.bf16.mxu1 %v15873_v47 }
 0x37c   :  { %6538 = vmatpush2.bf16.msra.mxu1 %v15871_v41 }
 0x37d   :  { %6539 = vmatprep.subr.bf16.mxu1 %v15879_v11 }
 0x380   :  { %6540 = vmatpush2.bf16.msra.mxu1 %v15877_v40  ;;  %v15814_v40 = vld [vmem:[#allocation4 + $0x68] ss:$16 sps:$4 sm:$0xff]  }
 0x381   :  { %6541 = vmatprep.subr.bf16.mxu1 %v15885_v52  ;;  %v15822_v52 = vld [vmem:[#allocation4 + $0x4c] ss:$16 sps:$4 sm:$0xff]  }
 0x384   :  { %6542 = vmatpush2.bf16.msra.mxu1 %v15883_v29 }
 0x385   :  { %6543 = vmatprep.subr.bf16.mxu1 %v15888_v8 }
 0x388   :  { %6544 = vmatpush2.bf16.msra.mxu1 %v15886_v16 }
 0x389   :  { %6659 = vmatprep.subr.bf16.mxu1 %v15891_v56  ;;  %v15820_v56 = vld [vmem:[#allocation4 + $0x48] ss:$16 sps:$4 sm:$0xff]  }
 0x3a9   :  { %v5432_v23 = vpop.f32.mrf.mxu0 }
 0x3ab   :  { %v5434_v3 = vpop.f32.mrf.mxu0 }
 0x3ad   :  { %v5436_v53 = vpop.f32.mrf.mxu0 }
 0x3af   :  { %v5438_v1 = vpop.f32.mrf.mxu0 }
 0x3b1   :  { %v5442_v24 = vpop.f32.mrf.mxu0 }
 0x3b3   :  { %v5444_v14 = vpop.f32.mrf.mxu0 }
 0x3b5   :  { %v5446_v34 = vpop.f32.mrf.mxu0 }
 0x3b7   :  { %v5448_v12 = vpop.f32.mrf.mxu0 }
 0x3b9   :  { %v5452_v57 = vpop.f32.mrf.mxu0 }
 0x3bb   :  { %v5454_v60 = vpop.f32.mrf.mxu0 }
 0x3bd   :  { %v5456_v39 = vpop.f32.mrf.mxu0 }
 0x3bf   :  { %v5458_v28 = vpop.f32.mrf.mxu0 }
 0x3c1   :  { %v19855_v20 = vpop.f32.mrf.mxu0 }
 0x3c3   :  { %v19857_v33 = vpop.f32.mrf.mxu0 }
 0x3c5   :  { %v19859_v22 = vpop.f32.mrf.mxu0 }
 0x3c7   :  { %v19861_v38 = vpop.f32.mrf.mxu0 }
 0x3c9   :  { %v5472_v51 = vpop.f32.mrf.mxu0 }
 0x3ca   :  { %v5624_v50 = vmax.f32 %v5432_v23, %v5472_v51  ;;  %v15844_v51 = vld [vmem:[#allocation4 + $0x1c8] ss:$16 sps:$4 sm:$0xff]  }
 0x3cb   :  { %v5474_v27 = vpop.f32.mrf.mxu0 }
 0x3cc   :  { %v5625_v6 = vmax.f32 %v5434_v3, %v5474_v27 }
 0x3cd   :  { %v5476_v21 = vpop.f32.mrf.mxu0 }
 0x3ce   :  { %v5628_v37 = vmax.f32 %v5436_v53, %v5476_v21  ;;  %v15828_v53 = vld [vmem:[#allocation4 + $0x2c] ss:$16 sps:$4 sm:$0xff]  }
 0x3cf   :  { %v5478_v54 = vpop.f32.mrf.mxu0 }
 0x3d0   :  { %v5629_v45 = vmax.f32 %v5438_v1, %v5478_v54  ;;  %v19863_v5 = vpack.c.bf16 %v5628_v37, %v5624_v50  ;;  %v15852_v50 = vld [vmem:[#allocation4 + $0x1ac] ss:$16 sps:$4 sm:$0xff]  }
 0x3d1   :  { %v5482_v35 = vpop.f32.mrf.mxu0  ;;  %v15858_v54 = vld [vmem:[#allocation4 + $0x18c] ss:$16 sps:$4 sm:$0xff]  }
 0x3d2   :  { %v19865_v26 = vpack.c.bf16 %v5629_v45, %v5625_v6  ;;  %v5632_v30 = vmax.f32 %v5442_v24, %v5482_v35  ;;  %v15850_v6 = vld [vmem:[#allocation4 + $0x1a8] ss:$16 sps:$4 sm:$0xff]  }
 0x3d3   :  { %v5484_v42 = vpop.f32.mrf.mxu0  ;;  %v15856_v35 = vld [vmem:[#allocation4 + $0x188] ss:$16 sps:$4 sm:$0xff]  }
 0x3d4   :  { %6472 = vmatprep.mubr.bf16.mxu0 %v19865_v26  ;;  %v5633_v58 = vmax.f32 %v5444_v14, %v5484_v42  ;;  %v15862_v42 = vld [vmem:[#allocation4 + $0x168] ss:$16 sps:$4 sm:$0xff]  }
 0x3d5   :  { %6473 = vmatmul.mubr.bf16.vlgmr.msra.gmra.mxu0 %v19863_v5  ;;  %v5486_v32 = vpop.f32.mrf.mxu0 }
 0x3d6   :  { %6587 = vmatpush1.bf16.msra.mxu0 %v15793_v0  ;;  %v5636_v10 = vmax.f32 %v5446_v34, %v5486_v32  ;;  %v15826_v34 = vld [vmem:[#allocation4 + $0x28] ss:$16 sps:$4 sm:$0xff]   ;;  %v15864_v0 = vld [vmem:[#allocation4 + $0x16c] ss:$16 sps:$4 sm:$0xff]  }
 0x3d7   :  { %6588 = vmatprep.subr.bf16.mxu0 %v15798_v18  ;;  %v5488_v19 = vpop.f32.mrf.mxu0  ;;  %v15870_v32 = vld [vmem:[#allocation4 + $0x14c] ss:$16 sps:$4 sm:$0xff]  }
 0x3d8   :  { %v5637_v59 = vmax.f32 %v5448_v12, %v5488_v19  ;;  %v19869_v48 = vpack.c.bf16 %v5636_v10, %v5632_v30 }
 0x3d9   :  { %v5492_v4 = vpop.f32.mrf.mxu0 }
 0x3da   :  { %6589 = vmatpush1.bf16.msra.mxu0 %v15796_v62  ;;  %v19871_v9 = vpack.c.bf16 %v5637_v59, %v5633_v58  ;;  %v5640_v25 = vmax.f32 %v5452_v57, %v5492_v4  ;;  %v15834_v57 = vld [vmem:[#allocation4 + $0xc] ss:$16 sps:$4 sm:$0xff]   ;;  %v15868_v58 = vld [vmem:[#allocation4 + $0x148] ss:$16 sps:$4 sm:$0xff]  }
 0x3db   :  { %6590 = vmatprep.subr.bf16.mxu0 %v15804_v36  ;;  %v5494_v44 = vpop.f32.mrf.mxu0  ;;  %v15876_v36 = vld [vmem:[#allocation4 + $0x12c] ss:$16 sps:$4 sm:$0xff]   ;;  %v15874_v59 = vld [vmem:[#allocation4 + $0x128] ss:$16 sps:$4 sm:$0xff]  }
 0x3dc   :  { %6482 = vmatprep.mubr.bf16.mxu0 %v19871_v9  ;;  %v5641_v31 = vmax.f32 %v5454_v60, %v5494_v44  ;;  %v15832_v60 = vld [vmem:[#allocation4 + $0x8] ss:$16 sps:$4 sm:$0xff]  }
 0x3dd   :  { %v5496_v15 = vpop.f32.mrf.mxu0  ;;  %6483 = vmatmul.mubr.bf16.gmra.mxu0 %v19869_v48  ;;  %v15880_v44 = vld [vmem:[#allocation4 + $0x108] ss:$16 sps:$4 sm:$0xff]  }
 0x3de   :  { %6591 = vmatpush1.bf16.msra.mxu0 %v15802_v7  ;;  %v5644_v55 = vmax.f32 %v5456_v39, %v5496_v15  ;;  %v15840_v39 = vld [vmem:[#allocation4 + $0x1ec] ss:$16 sps:$4 sm:$0xff]  }
 0x3df   :  { %6592 = vmatprep.subr.bf16.mxu0 %v15810_v46  ;;  %v5498_v2 = vpop.f32.mrf.mxu0  ;;  %v15882_v7 = vld [vmem:[#allocation4 + $0x10c] ss:$16 sps:$4 sm:$0xff]  }
 0x3e0   :  { %v5645_v63 = vmax.f32 %v5458_v28, %v5498_v2  ;;  %v19875_v41 = vpack.c.bf16 %v5644_v55, %v5640_v25 }
 0x3e1   :  { %v5502_v47 = vpop.f32.mrf.mxu0 }
 0x3e2   :  { %6593 = vmatpush1.bf16.msra.mxu0 %v15808_v17  ;;  %v19877_v11 = vpack.c.bf16 %v5645_v63, %v5641_v31  ;;  %v5648_v8 = vmax.f32 %v19855_v20, %v5502_v47  ;;  %v15838_v20 = vld [vmem:[#allocation4 + $0x1e8] ss:$16 sps:$4 sm:$0xff]  }
 0x3e3   :  { %6594 = vmatprep.subr.bf16.mxu0 %v15816_v49  ;;  %v5504_v29 = vpop.f32.mrf.mxu0 }
 0x3e4   :  { %6492 = vmatprep.mubr.bf16.mxu0 %v19877_v11  ;;  %v5649_v23 = vmax.f32 %v19857_v33, %v5504_v29  ;;  %v15889_v29 = vld [vmem:[#allocation4 + $0x2e8] ss:$16 sps:$4 sm:$0xff]  }
 0x3e5   :  { %v5506_v16 = vpop.f32.mrf.mxu0  ;;  %6493 = vmatmul.mubr.bf16.gmra.mxu0 %v19875_v41 }
 0x3e6   :  { %6595 = vmatpush1.bf16.msra.mxu0 %v15814_v40  ;;  %v5652_v3 = vmax.f32 %v19859_v22, %v5506_v16  ;;  %v15846_v22 = vld [vmem:[#allocation4 + $0x1cc] ss:$16 sps:$4 sm:$0xff]  }
 0x3e7   :  { %6596 = vmatprep.subr.bf16.mxu0 %v15822_v52  ;;  %v5508_v1 = vpop.f32.mrf.mxu0 }
 0x3e8   :  { %v5653_v24 = vmax.f32 %v19861_v38, %v5508_v1  ;;  %v19885_v14 = vpack.c.bf16 %v5652_v3, %v5648_v8 }
 0x3ea   :  { %6597 = vmatpush1.bf16.msra.mxu0 %v15820_v56  ;;  %v19887_v12 = vpack.c.bf16 %v5653_v24, %v5649_v23  ;;  %v15894_v56 = vld [vmem:[#allocation4 + $0x2cc] ss:$16 sps:$4 sm:$0xff]  }
 0x3eb   :  { %6598 = vmatprep.subr.bf16.mxu0 %v15828_v53  ;;  %v15897_v53 = vld [vmem:[#allocation4 + $0x2ac] ss:$16 sps:$4 sm:$0xff]  }
 0x3ec   :  { %6502 = vmatprep.mubr.bf16.mxu0 %v19887_v12 }
 0x3ed   :  { %6503 = vmatmul.mubr.bf16.gmra.mxu0 %v19885_v14 }
 0x3ee   :  { %6599 = vmatpush1.bf16.msra.mxu0 %v15826_v34  ;;  %6618 = vmatprep.mubr.bf16.mxu0 %v19865_v26 }
 0x3ef   :  { %6600 = vmatprep.subr.bf16.mxu0 %v15834_v57 }
 0x3f1   :  { %v5545_v28 = vpop.f32.mrf.mxu1 }
 0x3f2   :  { %6601 = vmatpush1.bf16.msra.mxu0 %v15832_v60 }
 0x3f3   :  { %v5547_v33 = vpop.f32.mrf.mxu1  ;;  %6602 = vmatprep.subr.bf16.mxu0 %v15840_v39 }
 0x3f5   :  { %v5549_v38 = vpop.f32.mrf.mxu1 }
 0x3f6   :  { %6603 = vmatpush2.bf16.msra.mxu0 %v15838_v20 }
 0x3f7   :  { %v5551_v27 = vpop.f32.mrf.mxu1  ;;  %6604 = vmatprep.subr.bf16.mxu0 %v15846_v22 }
 0x3f9   :  { %v19892_v21 = vpop.f32.mrf.mxu1 }
 0x3fa   :  { %6605 = vmatpush2.bf16.msra.mxu0 %v15844_v51  ;;  %v15903_v51 = vld [vmem:[#allocation4 + $0x26c] ss:$16 sps:$4 sm:$0xff]  }
 0x3fb   :  { %v19894_v37 = vpop.f32.mrf.mxu1  ;;  %6606 = vmatprep.subr.bf16.mxu0 %v15852_v50 }
 0x3fd   :  { %v19896_v45 = vpop.f32.mrf.mxu1 }
 0x3fe   :  { %6607 = vmatpush2.bf16.msra.mxu0 %v15850_v6 }
 0x3ff   :  { %v5561_v26 = vpop.f32.mrf.mxu1  ;;  %6608 = vmatprep.subr.bf16.mxu0 %v15858_v54 }
 0x401   :  { %v19898_v18 = vpop.f32.mrf.mxu1 }
 0x402   :  { %6609 = vmatpush2.bf16.msra.mxu0 %v15856_v35 }
 0x403   :  { %v19900_v30 = vpop.f32.mrf.mxu1  ;;  %6610 = vmatprep.subr.bf16.mxu0 %v15864_v0 }
 0x405   :  { %v19902_v62 = vpop.f32.mrf.mxu1 }
 0x406   :  { %6611 = vmatpush2.bf16.msra.mxu0 %v15862_v42  ;;  %v15909_v42 = vld [vmem:[#allocation4 + $0x22c] ss:$16 sps:$4 sm:$0xff]  }
 0x407   :  { %v19904_v10 = vpop.f32.mrf.mxu1  ;;  %6612 = vmatprep.subr.bf16.mxu0 %v15870_v32 }
 0x409   :  { %v19906_v19 = vpop.f32.mrf.mxu1 }
 0x40a   :  { %6613 = vmatpush2.bf16.msra.mxu0 %v15868_v58 }
 0x40b   :  { %v19908_v4 = vpop.f32.mrf.mxu1  ;;  %6614 = vmatprep.subr.bf16.mxu0 %v15876_v36  ;;  %v15912_v36 = vld [vmem:[#allocation4 + $0x20c] ss:$16 sps:$4 sm:$0xff]  }
 0x40d   :  { %v19910_v46 = vpop.f32.mrf.mxu1 }
 0x40e   :  { %6615 = vmatpush2.bf16.msra.mxu0 %v15874_v59  ;;  %v15910_v59 = vld [vmem:[#allocation4 + $0x208] ss:$16 sps:$4 sm:$0xff]  }
 0x40f   :  { %v19912_v25 = vpop.f32.mrf.mxu1  ;;  %6616 = vmatprep.subr.bf16.mxu0 %v15882_v7  ;;  %v15915_v7 = vld [vmem:[#allocation4 + $0x3ec] ss:$16 sps:$4 sm:$0xff]  }
 0x411   :  { %v5585_v15 = vpop.f32.mrf.mxu1 }
 0x412   :  { %6617 = vmatpush2.bf16.msra.mxu0 %v15880_v44  ;;  %v5626_v47 = vmax.f32 %v5545_v28, %v5585_v15  ;;  %v15900_v28 = vld [vmem:[#allocation4 + $0x28c] ss:$16 sps:$4 sm:$0xff]  }
 0x413   :  { %v5587_v17 = vpop.f32.mrf.mxu1  ;;  %v15921_v44 = vld [vmem:[#allocation4 + $0x3ac] ss:$16 sps:$4 sm:$0xff]  }
 0x414   :  { %v5627_v2 = vmax.f32 %v5547_v33, %v5587_v17  ;;  %v15898_v33 = vld [vmem:[#allocation4 + $0x288] ss:$16 sps:$4 sm:$0xff]   ;;  %v15924_v15 = vld [vmem:[#allocation4 + $0x38c] ss:$16 sps:$4 sm:$0xff]  }
 0x415   :  { %6619 = vmatmul.mubr.bf16.vlgmr.msra.gmra.mxu0 %v19863_v5  ;;  %v5589_v31 = vpop.f32.mrf.mxu1  ;;  %v15922_v17 = vld [vmem:[#allocation4 + $0x388] ss:$16 sps:$4 sm:$0xff]  }
 0x416   :  { %6628 = vmatprep.mubr.bf16.mxu0 %v19871_v9  ;;  %v5630_v55 = vmax.f32 %v5549_v38, %v5589_v31  ;;  %v15892_v9 = vld [vmem:[#allocation4 + $0x2c8] ss:$16 sps:$4 sm:$0xff]   ;;  %v15927_v31 = vld [vmem:[#allocation4 + $0x36c] ss:$16 sps:$4 sm:$0xff]  }
 0x417   :  { %v5591_v49 = vpop.f32.mrf.mxu1 }
 0x418   :  { %v5631_v63 = vmax.f32 %v5551_v27, %v5591_v49  ;;  %v19918_v8 = vpack.c.bf16 %v5630_v55, %v5626_v47  ;;  %v15925_v55 = vld [vmem:[#allocation4 + $0x368] ss:$16 sps:$4 sm:$0xff]   ;;  %v15930_v49 = vld [vmem:[#allocation4 + $0x34c] ss:$16 sps:$4 sm:$0xff]  }
 0x419   :  { %v5595_v40 = vpop.f32.mrf.mxu1  ;;  %v15931_v47 = vld [vmem:[#allocation4 + $0x328] ss:$16 sps:$4 sm:$0xff]  }
 0x41a   :  { %v19916_v52 = vpack.c.bf16 %v5631_v63, %v5627_v2  ;;  %v5634_v34 = vmax.f32 %v19892_v21, %v5595_v40  ;;  %v15928_v2 = vld [vmem:[#allocation4 + $0x348] ss:$16 sps:$4 sm:$0xff]   ;;  %v15933_v63 = vld [vmem:[#allocation4 + $0x32c] ss:$16 sps:$4 sm:$0xff]  }
 0x41b   :  { %v5597_v16 = vpop.f32.mrf.mxu1  ;;  %v15936_v40 = vld [vmem:[#allocation4 + $0x30c] ss:$16 sps:$4 sm:$0xff]  }
 0x41c   :  { %6545 = vmatprep.mubr.bf16.mxu1 %v19916_v52  ;;  %v5635_v1 = vmax.f32 %v19894_v37, %v5597_v16  ;;  %v15901_v37 = vld [vmem:[#allocation4 + $0x268] ss:$16 sps:$4 sm:$0xff]   ;;  %v15939_v16 = vld [vmem:[#allocation6 + $0x2e4] ss:$16 sps:$4 sm:$0xff]  }
 0x41d   :  { %6629 = vmatmul.mubr.bf16.gmra.mxu0 %v19869_v48  ;;  %v5599_v5 = vpop.f32.mrf.mxu1  ;;  %6546 = vmatmul.mubr.bf16.vlgmr.msra.gmra.mxu1 %v19918_v8  ;;  %v15895_v48 = vld [vmem:[#allocation4 + $0x2a8] ss:$16 sps:$4 sm:$0xff]  }
 0x41e   :  { %6638 = vmatprep.mubr.bf16.mxu0 %v19877_v11  ;;  %6660 = vmatpush1.bf16.msra.mxu1 %v15889_v29  ;;  %v5638_v23 = vmax.f32 %v19896_v45, %v5599_v5  ;;  %v15906_v45 = vld [vmem:[#allocation4 + $0x24c] ss:$16 sps:$4 sm:$0xff]   ;;  %v15937_v29 = vld [vmem:[#allocation6 + $0x2e0] ss:$16 sps:$4 sm:$0xff]  }
 0x41f   :  { %v5601_v3 = vpop.f32.mrf.mxu1  ;;  %6661 = vmatprep.subr.bf16.mxu1 %v15894_v56  ;;  %v15940_v56 = vld [vmem:[#allocation6 + $0x2e8] ss:$16 sps:$4 sm:$0xff]   ;;  %v15942_v5 = vld [vmem:[#allocation6 + $0x2ec] ss:$16 sps:$4 sm:$0xff]   ;;  %7486 = vmatprep.subr.bf16.mxu0 %v15939_v16 }
 0x420   :  { %v5639_v24 = vmax.f32 %v5561_v26, %v5601_v3  ;;  %v19929_v39 = vpack.c.bf16 %v5638_v23, %v5634_v34  ;;  %v15904_v26 = vld [vmem:[#allocation4 + $0x248] ss:$16 sps:$4 sm:$0xff]   ;;  %v15948_v23 = vld [vmem:[#allocation6 + $0x2cc] ss:$16 sps:$4 sm:$0xff]   ;;  %7487 = vmatpush1.bf16.msra.mxu0 %v15937_v29 }
 0x421   :  { %v5605_v57 = vpop.f32.mrf.mxu1  ;;  %v15946_v3 = vld [vmem:[#allocation6 + $0x2c8] ss:$16 sps:$4 sm:$0xff]  }
 0x422   :  { %v19927_v60 = vpack.c.bf16 %v5639_v24, %v5635_v1  ;;  %6662 = vmatpush1.bf16.msra.mxu1 %v15892_v9  ;;  %v5642_v21 = vmax.f32 %v19898_v18, %v5605_v57  ;;  %v15945_v9 = vld [vmem:[#allocation6 + $0x2c4] ss:$16 sps:$4 sm:$0xff]   ;;  %v15954_v1 = vld [vmem:[#allocation6 + $0x2ac] ss:$16 sps:$4 sm:$0xff]   ;;  %v15949_v24 = vld [vmem:[#allocation6 + $0x2a0] ss:$16 sps:$4 sm:$0xff]  }
 0x423   :  { %v5607_v11 = vpop.f32.mrf.mxu1  ;;  %6663 = vmatprep.subr.bf16.mxu1 %v15897_v53  ;;  %7488 = vmatprep.subr.bf16.mxu0 %v15945_v9  ;;  %v15951_v53 = vld [vmem:[#allocation6 + $0x2a4] ss:$16 sps:$4 sm:$0xff]   ;;  %v15952_v34 = vld [vmem:[#allocation6 + $0x2a8] ss:$16 sps:$4 sm:$0xff]  }
 0x424   :  { %6555 = vmatprep.mubr.bf16.mxu1 %v19927_v60  ;;  %v5643_v27 = vmax.f32 %v19900_v30, %v5607_v11  ;;  %v15957_v57 = vld [vmem:[#allocation6 + $0x284] ss:$16 sps:$4 sm:$0xff]  }
 0x425   :  { %6639 = vmatmul.mubr.bf16.gmra.mxu0 %v19875_v41  ;;  %v5609_v20 = vpop.f32.mrf.mxu1  ;;  %6556 = vmatmul.mubr.bf16.gmra.mxu1 %v19929_v39  ;;  %v15963_v11 = vld [vmem:[#allocation6 + $0x264] ss:$16 sps:$4 sm:$0xff]  }
 0x426   :  { %6648 = vmatprep.mubr.bf16.mxu0 %v19887_v12  ;;  %6664 = vmatpush1.bf16.msra.mxu1 %v15895_v48  ;;  %v5646_v22 = vmax.f32 %v19902_v62, %v5609_v20  ;;  %v15955_v48 = vld [vmem:[#allocation6 + $0x280] ss:$16 sps:$4 sm:$0xff]   ;;  %v16023_v9 = vld [vmem:[#allocation6 + $0x324] ss:$16 sps:$4 sm:$0xff]  }
 0x427   :  { %v5611_v38 = vpop.f32.mrf.mxu1  ;;  %6665 = vmatprep.subr.bf16.mxu1 %v15900_v28  ;;  %v15966_v28 = vld [vmem:[#allocation6 + $0x26c] ss:$16 sps:$4 sm:$0xff]   ;;  %v15961_v20 = vld [vmem:[#allocation6 + $0x260] ss:$16 sps:$4 sm:$0xff]  }
 0x428   :  { %v5647_v50 = vmax.f32 %v19904_v10, %v5611_v38  ;;  %v19941_v54 = vpack.c.bf16 %v5646_v22, %v5642_v21  ;;  %v15907_v10 = vld [vmem:[#allocation4 + $0x228] ss:$16 sps:$4 sm:$0xff]   ;;  %v15969_v22 = vld [vmem:[#allocation6 + $0x244] ss:$16 sps:$4 sm:$0xff]   ;;  %v15972_v38 = vld [vmem:[#allocation6 + $0x24c] ss:$16 sps:$4 sm:$0xff]  }
 0x429   :  { %v5615_v6 = vpop.f32.mrf.mxu1  ;;  %v15978_v21 = vld [vmem:[#allocation6 + $0x22c] ss:$16 sps:$4 sm:$0xff]  }
 0x42a   :  { %v19939_v41 = vpack.c.bf16 %v5647_v50, %v5643_v27  ;;  %6666 = vmatpush1.bf16.msra.mxu1 %v15898_v33  ;;  %v5650_v62 = vmax.f32 %v19906_v19, %v5615_v6  ;;  %v15916_v19 = vld [vmem:[#allocation4 + $0x3c8] ss:$16 sps:$4 sm:$0xff]   ;;  %v15975_v50 = vld [vmem:[#allocation6 + $0x224] ss:$16 sps:$4 sm:$0xff]   ;;  %v15973_v6 = vld [vmem:[#allocation6 + $0x220] ss:$16 sps:$4 sm:$0xff]  }
 0x42b   :  { %v5617_v12 = vpop.f32.mrf.mxu1  ;;  %6667 = vmatprep.subr.bf16.mxu1 %v15903_v51  ;;  %v15964_v33 = vld [vmem:[#allocation6 + $0x268] ss:$16 sps:$4 sm:$0xff]   ;;  %v15967_v51 = vld [vmem:[#allocation6 + $0x240] ss:$16 sps:$4 sm:$0xff]  }
 0x42c   :  { %6565 = vmatprep.mubr.bf16.mxu1 %v19939_v41  ;;  %v5651_v30 = vmax.f32 %v19908_v4, %v5617_v12  ;;  %v15913_v4 = vld [vmem:[#allocation4 + $0x3e8] ss:$16 sps:$4 sm:$0xff]   ;;  %v15979_v12 = vld [vmem:[#allocation6 + $0x200] ss:$16 sps:$4 sm:$0xff]  }
 0x42d   :  { %6649 = vmatmul.mubr.bf16.gmra.mxu0 %v19885_v14  ;;  %v5619_v35 = vpop.f32.mrf.mxu1  ;;  %6566 = vmatmul.mubr.bf16.gmra.mxu1 %v19941_v54  ;;  %v15970_v27 = vld [vmem:[#allocation6 + $0x248] ss:$16 sps:$4 sm:$0xff]  }
 0x42e   :  { %6668 = vmatpush1.bf16.msra.mxu1 %v15901_v37  ;;  %v5654_v0 = vmax.f32 %v19910_v46, %v5619_v35  ;;  %v15918_v46 = vld [vmem:[#allocation4 + $0x3cc] ss:$16 sps:$4 sm:$0xff]   ;;  %v15981_v37 = vld [vmem:[#allocation6 + $0x204] ss:$16 sps:$4 sm:$0xff]  }
 0x42f   :  { %v5621_v18 = vpop.f32.mrf.mxu1  ;;  %6669 = vmatprep.subr.bf16.mxu1 %v15906_v45  ;;  %v15982_v45 = vld [vmem:[#allocation6 + $0x208] ss:$16 sps:$4 sm:$0xff]   ;;  %v15987_v35 = vld [vmem:[#allocation6 + $0x3e4] ss:$16 sps:$4 sm:$0xff]  }
 0x430   :  { %v5655_v32 = vmax.f32 %v19912_v25, %v5621_v18  ;;  %v5670_v14 = vpack.c.bf16 %v5654_v0, %v5650_v62  ;;  %v15919_v25 = vld [vmem:[#allocation4 + $0x3a8] ss:$16 sps:$4 sm:$0xff]   ;;  %v15985_v0 = vld [vmem:[#allocation6 + $0x3e0] ss:$16 sps:$4 sm:$0xff]   ;;  %v15993_v62 = vld [vmem:[#allocation6 + $0x3c4] ss:$16 sps:$4 sm:$0xff]  }
 0x431   :  { %v15988_v18 = vld [vmem:[#allocation6 + $0x3e8] ss:$16 sps:$4 sm:$0xff]  }
 0x432   :  { %v5671_v58 = vpack.c.bf16 %v5655_v32, %v5651_v30  ;;  %6670 = vmatpush1.bf16.msra.mxu1 %v15904_v26  ;;  %v15990_v26 = vld [vmem:[#allocation6 + $0x3ec] ss:$16 sps:$4 sm:$0xff]  }
 0x433   :  { %6671 = vmatprep.subr.bf16.mxu1 %v15909_v42  ;;  %v6756_v42 = vld [vmem:[#allocation3] sm:$0x11] }
 0x434   :  { %6575 = vmatprep.mubr.bf16.mxu1 %v5671_v58  ;;  %v6757_v32 = vsel %vm17029_vm7, 0, %v6756_v42 }
 0x435   :  { %6576 = vmatmul.mubr.bf16.gmra.mxu1 %v5670_v14  ;;  %6758 = vst [vmem:[#allocation3] sm:$0x11] %v6757_v32 }
 0x436   :  { %6672 = vmatpush1.bf16.msra.mxu1 %v15907_v10  ;;  %6691 = vmatprep.mubr.bf16.mxu1 %v19916_v52  ;;  %v15934_v52 = vld [vmem:[#allocation4 + $0x308] ss:$16 sps:$4 sm:$0xff]   ;;  %v15991_v10 = vld [vmem:[#allocation6 + $0x3c0] ss:$16 sps:$4 sm:$0xff]  }
 0x437   :  { %6673 = vmatprep.subr.bf16.mxu1 %v15912_v36  ;;  %v15999_v36 = vld [vmem:[#allocation6 + $0x3a4] ss:$16 sps:$4 sm:$0xff]  }
 0x43a   :  { %6674 = vmatpush1.bf16.msra.mxu1 %v15910_v59  ;;  %v16002_v59 = vld [vmem:[#allocation6 + $0x3ac] ss:$16 sps:$4 sm:$0xff]  }
 0x43b   :  { %6675 = vmatprep.subr.bf16.mxu1 %v15915_v7  ;;  %v15997_v7 = vld [vmem:[#allocation6 + $0x3a0] ss:$16 sps:$4 sm:$0xff]  }
 0x43e   :  { %6676 = vmatpush2.bf16.msra.mxu1 %v15913_v4  ;;  %v16000_v4 = vld [vmem:[#allocation6 + $0x3a8] ss:$16 sps:$4 sm:$0xff]  }
 0x43f   :  { %6677 = vmatprep.subr.bf16.mxu1 %v15918_v46  ;;  %v16005_v46 = vld [vmem:[#allocation6 + $0x384] ss:$16 sps:$4 sm:$0xff]  }
 0x442   :  { %6678 = vmatpush2.bf16.msra.mxu1 %v15916_v19  ;;  %v16008_v19 = vld [vmem:[#allocation6 + $0x38c] ss:$16 sps:$4 sm:$0xff]  }
 0x443   :  { %6679 = vmatprep.subr.bf16.mxu1 %v15921_v44  ;;  %v16003_v44 = vld [vmem:[#allocation6 + $0x380] ss:$16 sps:$4 sm:$0xff]  }
 0x446   :  { %6680 = vmatpush2.bf16.msra.mxu1 %v15919_v25  ;;  %v16006_v25 = vld [vmem:[#allocation6 + $0x388] ss:$16 sps:$4 sm:$0xff]  }
 0x447   :  { %6681 = vmatprep.subr.bf16.mxu1 %v15924_v15  ;;  %v6759_v15 = vld [vmem:[#allocation3 + $0x20] sm:$0x11] }
 0x44a   :  { %6682 = vmatpush2.bf16.msra.mxu1 %v15922_v17  ;;  %v16011_v17 = vld [vmem:[#allocation6 + $0x364] ss:$16 sps:$4 sm:$0xff]  }
 0x44b   :  { %6683 = vmatprep.subr.bf16.mxu1 %v15927_v31  ;;  %v16014_v31 = vld [vmem:[#allocation6 + $0x36c] ss:$16 sps:$4 sm:$0xff]  }
 0x44e   :  { %6684 = vmatpush2.bf16.msra.mxu1 %v15925_v55 }
 0x44f   :  { %6685 = vmatprep.subr.bf16.mxu1 %v15930_v49  ;;  %v6760_v49 = vsel %vm17395_vm3, 0, %v6759_v15  ;;  %vm8904_vm3 = vcmask 539648  }
 0x450   :  { %6761 = vst [vmem:[#allocation3 + $0x20] sm:$0x11] %v6760_v49 }
 0x452   :  { %6686 = vmatpush2.bf16.msra.mxu1 %v15928_v2  ;;  %v16009_v2 = vld [vmem:[#allocation6 + $0x360] ss:$16 sps:$4 sm:$0xff]  }
 0x453   :  { %6687 = vmatprep.subr.bf16.mxu1 %v15933_v63  ;;  %v16012_v63 = vld [vmem:[#allocation6 + $0x368] ss:$16 sps:$4 sm:$0xff]  }
 0x456   :  { %6688 = vmatpush2.bf16.msra.mxu1 %v15931_v47  ;;  %v6827_v47 = vld [vmem:[#allocation3 + $0x20] sm:$0x22] }
 0x457   :  { %6689 = vmatprep.subr.bf16.mxu1 %v15936_v40  ;;  %v16017_v40 = vld [vmem:[#allocation6 + $0x344] ss:$16 sps:$4 sm:$0xff]   ;;  %v6828_v16 = vsel %vm17428_vm10, 0, %v6827_v47 }
 0x458   :  { %6829 = vst [vmem:[#allocation3 + $0x20] sm:$0x22] %v6828_v16 }
 0x45a   :  { %6690 = vmatpush2.bf16.msra.mxu1 %v15934_v52  ;;  %v16020_v52 = vld [vmem:[#allocation6 + $0x34c] ss:$16 sps:$4 sm:$0xff]  }
 0x45b   :  { %7567 = vmatprep.subr.bf16.mxu1 %v15942_v5  ;;  %v16018_v5 = vld [vmem:[#allocation6 + $0x348] ss:$16 sps:$4 sm:$0xff]  }
 0x45d   :  { %6692 = vmatmul.mubr.bf16.vlgmr.msra.gmra.mxu1 %v19918_v8  ;;  %v15943_v8 = vld [vmem:[#allocation6 + $0x2c0] ss:$16 sps:$4 sm:$0xff]  }
 0x45e   :  { %6701 = vmatprep.mubr.bf16.mxu1 %v19927_v60  ;;  %7568 = vmatpush1.bf16.msra.mxu1 %v15940_v56  ;;  %v15960_v60 = vld [vmem:[#allocation6 + $0x28c] ss:$16 sps:$4 sm:$0xff]   ;;  %v16015_v56 = vld [vmem:[#allocation6 + $0x340] ss:$16 sps:$4 sm:$0xff]  }
 0x45f   :  { %7569 = vmatprep.subr.bf16.mxu1 %v15948_v23  ;;  %7489 = vmatpush1.bf16.msra.mxu0 %v15943_v8  ;;  %v16026_v23 = vld [vmem:[#allocation6 + $0x32c] ss:$16 sps:$4 sm:$0xff]   ;;  %v16021_v8 = vld [vmem:[#allocation6 + $0x320] ss:$16 sps:$4 sm:$0xff]  }
 0x460   :  { %7490 = vmatprep.subr.bf16.mxu0 %v15951_v53  ;;  %v16029_v53 = vld [vmem:[#allocation6 + $0x304] ss:$16 sps:$4 sm:$0xff]  }
 0x462   :  { %7570 = vmatpush1.bf16.msra.mxu1 %v15946_v3  ;;  %v16024_v3 = vld [vmem:[#allocation6 + $0x328] ss:$16 sps:$4 sm:$0xff]  }
 0x463   :  { %7571 = vmatprep.subr.bf16.mxu1 %v15954_v1  ;;  %7491 = vmatpush1.bf16.msra.mxu0 %v15949_v24  ;;  %v16032_v1 = vld [vmem:[#allocation6 + $0x30c] ss:$16 sps:$4 sm:$0xff]   ;;  %v16027_v24 = vld [vmem:[#allocation6 + $0x300] ss:$16 sps:$4 sm:$0xff]  }
 0x464   :  { %7492 = vmatprep.subr.bf16.mxu0 %v15957_v57 }
 0x465   :  { %6702 = vmatmul.mubr.bf16.gmra.mxu1 %v19929_v39  ;;  %v15958_v39 = vld [vmem:[#allocation6 + $0x288] ss:$16 sps:$4 sm:$0xff]  }
 0x466   :  { %6711 = vmatprep.mubr.bf16.mxu1 %v19939_v41  ;;  %7572 = vmatpush1.bf16.msra.mxu1 %v15952_v34  ;;  %v15976_v41 = vld [vmem:[#allocation6 + $0x228] ss:$16 sps:$4 sm:$0xff]  }
 0x467   :  { %7573 = vmatprep.subr.bf16.mxu1 %v15960_v60  ;;  %7493 = vmatpush1.bf16.msra.mxu0 %v15955_v48  ;;  %v16030_v34 = vld [vmem:[#allocation6 + $0x308] ss:$16 sps:$4 sm:$0xff]   ;;  %v6830_v60 = vld [vmem:[#allocation3 + $0x18] sm:$0x22] }
 0x468   :  { %7494 = vmatprep.subr.bf16.mxu0 %v15963_v11  ;;  %v16035_v48 = vld [vmem:[#allocation6 + $0xe4] ss:$16 sps:$4 sm:$0xff]  }
 0x46a   :  { %7574 = vmatpush1.bf16.msra.mxu1 %v15958_v39  ;;  %v16038_v39 = vld [vmem:[#allocation6 + $0xec] ss:$16 sps:$4 sm:$0xff]  }
 0x46b   :  { %7575 = vmatprep.subr.bf16.mxu1 %v15966_v28  ;;  %7495 = vmatpush1.bf16.msra.mxu0 %v15961_v20  ;;  %v6831_v28 = vsel %vm17900_vm5, 0, %v6830_v60 }
 0x46c   :  { %7496 = vmatprep.subr.bf16.mxu0 %v15969_v22  ;;  %6832 = vst [vmem:[#allocation3 + $0x18] sm:$0x22] %v6831_v28 }
 0x46d   :  { %6712 = vmatmul.mubr.bf16.gmra.mxu1 %v19941_v54  ;;  %v15984_v54 = vld [vmem:[#allocation6 + $0x20c] ss:$16 sps:$4 sm:$0xff]  }
 0x46e   :  { %6721 = vmatprep.mubr.bf16.mxu1 %v5671_v58  ;;  %7576 = vmatpush1.bf16.msra.mxu1 %v15964_v33  ;;  %v15996_v58 = vld [vmem:[#allocation6 + $0x3cc] ss:$16 sps:$4 sm:$0xff]  }
 0x46f   :  { %7577 = vmatprep.subr.bf16.mxu1 %v15972_v38  ;;  %7497 = vmatpush1.bf16.msra.mxu0 %v15967_v51 }
 0x470   :  { %7498 = vmatprep.subr.bf16.mxu0 %v15975_v50 }
 0x472   :  { %7578 = vmatpush1.bf16.msra.mxu1 %v15970_v27 }
 0x473   :  { %7579 = vmatprep.subr.bf16.mxu1 %v15978_v21  ;;  %7499 = vmatpush1.bf16.msra.mxu0 %v15973_v6 }
 0x474   :  { %7500 = vmatprep.subr.bf16.mxu0 %v15981_v37 }
 0x475   :  { %6722 = vmatmul.mubr.bf16.gmra.mxu1 %v5670_v14  ;;  %v15994_v14 = vld [vmem:[#allocation6 + $0x3c8] ss:$16 sps:$4 sm:$0xff]  }
 0x476   :  { %7580 = vmatpush1.bf16.msra.mxu1 %v15976_v41 }
 0x477   :  { %7581 = vmatprep.subr.bf16.mxu1 %v15984_v54  ;;  %7501 = vmatpush1.bf16.msra.mxu0 %v15979_v12 }
 0x478   :  { %7502 = vmatprep.subr.bf16.mxu0 %v15987_v35 }
 0x47a   :  { %7582 = vmatpush1.bf16.msra.mxu1 %v15982_v45 }
 0x47b   :  { %7583 = vmatprep.subr.bf16.mxu1 %v15990_v26  ;;  %7503 = vmatpush2.bf16.msra.mxu0 %v15985_v0 }
 0x47c   :  { %7504 = vmatprep.subr.bf16.mxu0 %v15993_v62 }
 0x47e   :  { %7584 = vmatpush2.bf16.msra.mxu1 %v15988_v18 }
 0x47f   :  { %7585 = vmatprep.subr.bf16.mxu1 %v15996_v58  ;;  %7505 = vmatpush2.bf16.msra.mxu0 %v15991_v10 }
 0x480   :  { %7506 = vmatprep.subr.bf16.mxu0 %v15999_v36 }
 0x482   :  { %7586 = vmatpush2.bf16.msra.mxu1 %v15994_v14 }
 0x483   :  { %7587 = vmatprep.subr.bf16.mxu1 %v16002_v59  ;;  %7507 = vmatpush2.bf16.msra.mxu0 %v15997_v7 }
 0x484   :  { %7508 = vmatprep.subr.bf16.mxu0 %v16005_v46 }
 0x486   :  { %7588 = vmatpush2.bf16.msra.mxu1 %v16000_v4 }
 0x487   :  { %7589 = vmatprep.subr.bf16.mxu1 %v16008_v19  ;;  %7509 = vmatpush2.bf16.msra.mxu0 %v16003_v44 }
 0x488   :  { %7510 = vmatprep.subr.bf16.mxu0 %v16011_v17 }
 0x48a   :  { %7590 = vmatpush2.bf16.msra.mxu1 %v16006_v25 }
 0x48b   :  { %7591 = vmatprep.subr.bf16.mxu1 %v16014_v31  ;;  %7511 = vmatpush2.bf16.msra.mxu0 %v16009_v2 }
 0x48c   :  { %7512 = vmatprep.subr.bf16.mxu0 %v16017_v40 }
 0x48e   :  { %7592 = vmatpush2.bf16.msra.mxu1 %v16012_v63 }
 0x48f   :  { %7593 = vmatprep.subr.bf16.mxu1 %v16020_v52  ;;  %7513 = vmatpush2.bf16.msra.mxu0 %v16015_v56 }
 0x490   :  { %7514 = vmatprep.subr.bf16.mxu0 %v16023_v9 }
 0x492   :  { %7594 = vmatpush2.bf16.msra.mxu1 %v16018_v5 }
 0x493   :  { %7595 = vmatprep.subr.bf16.mxu1 %v16026_v23  ;;  %7515 = vmatpush2.bf16.msra.mxu0 %v16021_v8 }
 0x494   :  { %7516 = vmatprep.subr.bf16.mxu0 %v16029_v53 }
 0x495   :  { %v6474_v57 = vpop.f32.mrf.mxu0 }
 0x496   :  { %7596 = vmatpush2.bf16.msra.mxu1 %v16024_v3 }
 0x497   :  { %7597 = vmatprep.subr.bf16.mxu1 %v16032_v1  ;;  %7517 = vmatpush2.bf16.msra.mxu0 %v16027_v24  ;;  %v6476_v20 = vpop.f32.mrf.mxu0 }
 0x498   :  { %7983 = vmatprep.subr.bf16.mxu0 %v16035_v48 }
 0x499   :  { %v6478_v33 = vpop.f32.mrf.mxu0 }
 0x49a   :  { %7598 = vmatpush2.bf16.msra.mxu1 %v16030_v34 }
 0x49b   :  { %8064 = vmatprep.subr.bf16.mxu1 %v16038_v39  ;;  %v6480_v22 = vpop.f32.mrf.mxu0 }
 0x49d   :  { %v19964_v38 = vpop.f32.mrf.mxu0 }
 0x49f   :  { %v19966_v51 = vpop.f32.mrf.mxu0 }
 0x4a1   :  { %v19968_v27 = vpop.f32.mrf.mxu0 }
 0x4a3   :  { %v19970_v50 = vpop.f32.mrf.mxu0 }
 0x4a5   :  { %v19972_v6 = vpop.f32.mrf.mxu0 }
 0x4a7   :  { %v19974_v37 = vpop.f32.mrf.mxu0 }
 0x4a9   :  { %v19976_v12 = vpop.f32.mrf.mxu0 }
 0x4ab   :  { %v19978_v35 = vpop.f32.mrf.mxu0 }
 0x4ad   :  { %v19980_v0 = vpop.f32.mrf.mxu0 }
 0x4af   :  { %v19982_v42 = vpop.f32.mrf.mxu0 }
 0x4b1   :  { %v19984_v62 = vpop.f32.mrf.mxu0 }
 0x4b3   :  { %v19986_v10 = vpop.f32.mrf.mxu0 }
 0x4d5   :  { %v6620_v14 = vpop.f32.mrf.mxu0 }
 0x4d7   :  { %v6622_v59 = vpop.f32.mrf.mxu0 }
 0x4d9   :  { %v6624_v4 = vpop.f32.mrf.mxu0 }
 0x4db   :  { %v6626_v19 = vpop.f32.mrf.mxu0 }
 0x4dd   :  { %v6547_v21 = vpop.f32.mrf.mxu1  ;;  %v6630_v25 = vpop.f32.mrf.mxu0 }
 0x4de   :  { %v6548_v16 = vadd.f32 %v6547_v21, %v6474_v57 }
 0x4df   :  { %v6549_v41 = vpop.f32.mrf.mxu1  ;;  %v6632_v17 = vpop.f32.mrf.mxu0 }
 0x4e0   :  { %v6550_v56 = vadd.f32 %v6549_v41, %v6476_v20 }
 0x4e1   :  { %v6551_v54 = vpop.f32.mrf.mxu1  ;;  %v6634_v55 = vpop.f32.mrf.mxu0 }
 0x4e2   :  { %v6552_v24 = vadd.f32 %v6551_v54, %v6478_v33 }
 0x4e3   :  { %v6553_v45 = vpop.f32.mrf.mxu1  ;;  %v6636_v2 = vpop.f32.mrf.mxu0 }
 0x4e4   :  { %v6554_v34 = vadd.f32 %v6553_v45, %v6480_v22 }
 0x4e5   :  { %v6557_v26 = vpop.f32.mrf.mxu1  ;;  %v6640_v52 = vpop.f32.mrf.mxu0 }
 0x4e7   :  { %v6559_v18 = vpop.f32.mrf.mxu1  ;;  %v6642_v53 = vpop.f32.mrf.mxu0 }
 0x4e9   :  { %v6561_v32 = vpop.f32.mrf.mxu1 }
 0x4ea   :  { %v6562_v22 = vadd.f32 %v6561_v32, %v19968_v27 }
 0x4eb   :  { %v6563_v58 = vpop.f32.mrf.mxu1 }
 0x4ec   :  { %v6564_v54 = vadd.f32 %v6563_v58, %v19970_v50 }
 0x4ed   :  { %v6567_v36 = vpop.f32.mrf.mxu1 }
 0x4ef   :  { %v6569_v7 = vpop.f32.mrf.mxu1 }
 0x4f1   :  { %v6571_v46 = vpop.f32.mrf.mxu1 }
 0x4f2   :  { %v6572_v27 = vadd.f32 %v6571_v46, %v19976_v12 }
 0x4f3   :  { %v19988_v44 = vpop.f32.mrf.mxu1 }
 0x4f5   :  { %v19990_v15 = vpop.f32.mrf.mxu1 }
 0x4f7   :  { %v19992_v31 = vpop.f32.mrf.mxu1 }
 0x4f9   :  { %v19994_v49 = vpop.f32.mrf.mxu1 }
 0x4fa   :  { %v20019_v46 = vadd.f32 %v19994_v49, %v19984_v62 }
 0x4fb   :  { %v19996_v63 = vpop.f32.mrf.mxu1 }
 0x51d   :  { %v6693_v47 = vpop.f32.mrf.mxu1 }
 0x51e   :  { %v6694_v40 = vadd.f32 %v6693_v47, %v6620_v14  ;;  %v6644_v14 = vpop.f32.mrf.mxu0 }
 0x51f   :  { %v6695_v29 = vpop.f32.mrf.mxu1 }
 0x520   :  { %v6696_v5 = vadd.f32 %v6695_v29, %v6622_v59  ;;  %v6732_v23 = vmax.f32 %v6548_v16, %v6694_v40  ;;  %v6558_v59 = vadd.f32 %v6557_v26, %v19964_v38  ;;  %v6818_v40 = vld [vmem:[#allocation3] sm:$0xff]  ;;  %v6646_v29 = vpop.f32.mrf.mxu0 }
 0x521   :  { %v6697_v9 = vpop.f32.mrf.mxu1 }
 0x522   :  { %v6733_v8 = vmax.f32 %v6550_v56, %v6696_v5  ;;  %v6698_v3 = vadd.f32 %v6697_v9, %v6624_v4  ;;  %v6560_v4 = vadd.f32 %v6559_v18, %v19966_v51 }
 0x523   :  { %v6699_v1 = vpop.f32.mrf.mxu1 }
 0x524   :  { %v14708_v60 = vpack.c.bf16 %v6733_v8, %v6732_v23  ;;  %v6700_v48 = vadd.f32 %v6699_v1, %v6626_v19  ;;  %v6734_v28 = vmax.f32 %v6552_v24, %v6698_v3  ;;  %v6574_v8 = vadd.f32 %v19988_v44, %v19978_v35 }
 0x525   :  { %v6703_v39 = vpop.f32.mrf.mxu1  ;;  %v20011_v3 = vadd.f32 %v19990_v15, %v19980_v0 }
 0x526   :  { %v6779_v11 = vshrl.u32 %v14708_v60, 16  ;;  %v6735_v61 = vmax.f32 %v6554_v34, %v6700_v48  ;;  %v6704_v47 = vadd.f32 %v6703_v39, %v6630_v25  ;;  %v6782_v20 = vshll.u32 %v14708_v60, 16 }
 0x527   :  { %v6705_v43 = vpop.f32.mrf.mxu1  ;;  %v6568_v25 = vadd.f32 %v6567_v36, %v19972_v6 }
 0x528   :  { %v6781_v57 = vrot.slane %v6779_v11, 7  ;;  %v14709_v21 = vpack.c.bf16 %v6735_v61, %v6734_v28  ;;  %v6706_v41 = vadd.f32 %v6705_v43, %v6632_v17  ;;  %v6736_v16 = vmax.f32 %v6558_v59, %v6704_v47  ;;  %v6824_v59 = vld [vmem:[#allocation3 + $0x20] sm:$0x11] }
 0x529   :  { %v6707_v33 = vpop.f32.mrf.mxu1  ;;  %v6570_v17 = vadd.f32 %v6569_v7, %v19974_v37  ;;  %v20015_v37 = vadd.f32 %v19992_v31, %v19982_v42  ;;  %v20033_v31 = vadd.f32 %v19996_v63, %v19986_v10 }
 0x52a   :  { %v6784_v45 = vor.u32 %v6782_v20, %v6781_v57  ;;  %v6787_v19 = vshrl.u32 %v14709_v21, 16  ;;  %v6737_v56 = vmax.f32 %v6560_v4, %v6706_v41  ;;  %v6708_v5 = vadd.f32 %v6707_v33, %v6634_v55  ;;  %v6650_v55 = vpop.f32.mrf.mxu0 }
 0x52b   :  { %v6709_v61 = vpop.f32.mrf.mxu1  ;;  %v6790_v51 = vshll.u32 %v14709_v21, 16  ;;  %v6785_v50 = vrot.slane %v6781_v57, 4 }
 0x52c   :  { %v6819_v38 = vsel %vm17113_vm15, %v6784_v45, %v6818_v40  ;;  %v6789_v26 = vrot.slane %v6787_v19, 7  ;;  %v6710_v18 = vadd.f32 %v6709_v61, %v6636_v2  ;;  %v14710_v32 = vpack.c.bf16 %v6737_v56, %v6736_v16  ;;  %v6652_v60 = vpop.f32.mrf.mxu0  ;;  %vm21115_vm15 = vmmov %vm21066_vm2 }
 0x52d   :  { %6820 = vst [vmem:[#allocation3] sm:$0xff] %v6819_v38  ;;  %v6713_v58 = vpop.f32.mrf.mxu1  ;;  %v6738_v6 = vmax.f32 %v6562_v22, %v6708_v5 }
 0x52e   :  { %v6792_v9 = vor.u32 %v6790_v51, %v6789_v26  ;;  %v6739_v36 = vmax.f32 %v6564_v54, %v6710_v18  ;;  %v6714_v23 = vadd.f32 %v6713_v58, %v6640_v52  ;;  %v6796_v12 = vshrl.u32 %v14710_v32, 16  ;;  %v6654_v45 = vpop.f32.mrf.mxu0 }
 0x52f   :  { %v6715_v7 = vpop.f32.mrf.mxu1  ;;  %v6799_v24 = vshll.u32 %v14710_v32, 16  ;;  %v6794_v48 = vrot.slane %v6789_v26, 4  ;;  %v6893_v26 = vld [vmem:[#allocation3 + $0x20] sm:$0xee] }
 0x530   :  { %v20023_v52 = vsel %vm17093_vm14, %v6785_v50, %v6792_v9  ;;  %v14711_v1 = vpack.c.bf16 %v6739_v36, %v6738_v6  ;;  %v6716_v35 = vadd.f32 %v6715_v7, %v6642_v53  ;;  %v6798_v44 = vrot.slane %v6796_v12, 7  ;;  %v6656_v36 = vpop.f32.mrf.mxu0  ;;  %v16083_v7 = vld [vmem:[#allocation6 + $0x1e0] ss:$16 sps:$4 sm:$0xff]  }
 0x531   :  { %v6717_v0 = vpop.f32.mrf.mxu1  ;;  %v20026_v15 = vcombine.low %v6819_v38, %v20023_v52  ;;  %v20029_v42 = vcombine.high %v6819_v38, %v20023_v52  ;;  %v6740_v49 = vmax.f32 %v6568_v25, %v6714_v23 }
 0x532   :  { %v6805_v62 = vshrl.u32 %v14711_v1, 16  ;;  %v6741_v34 = vmax.f32 %v6570_v17, %v6716_v35  ;;  %v6801_v39 = vor.u32 %v6799_v24, %v6798_v44  ;;  %v6808_v53 = vshll.u32 %v14711_v1, 16 }
 0x533   :  { %v6718_v11 = vadd.f32 %v6717_v0, %v6644_v14  ;;  %v6719_v28 = vpop.f32.mrf.mxu1  ;;  %v6803_v47 = vrot.slane %v6798_v44, 4  ;;  %v7091_v10 = vshrl.u32 %v20029_v42, 16  ;;  %v7093_v63 = vshll.u32 %v20029_v42, 16 }
 0x534   :  { %v6807_v57 = vrot.slane %v6805_v62, 7  ;;  %v14712_v20 = vpack.c.bf16 %v6741_v34, %v6740_v49  ;;  %v6720_v21 = vadd.f32 %v6719_v28, %v6646_v29  ;;  %v6802_v41 = vsel %vm17093_vm14, %v6794_v48, %v6801_v39 }
 0x535   :  { %v6723_v4 = vpop.f32.mrf.mxu1  ;;  %v7081_v40 = vshll.u32 %v20026_v15, 16  ;;  %v6742_v19 = vmax.f32 %v6572_v27, %v6718_v11  ;;  %v7079_v27 = vshrl.u32 %v20026_v15, 16  ;;  %v7095_v35 = vrot.slane %v7093_v63, 1 }
 0x536   :  { %v6810_v33 = vor.u32 %v6808_v53, %v6807_v57  ;;  %v6812_v22 = vrot.slane %v6807_v57, 4  ;;  %v6850_v54 = vshrl.u32 %v14712_v20, 16  ;;  %v6853_v14 = vshll.u32 %v14712_v20, 16 }
 0x537   :  { %v6743_v25 = vmax.f32 %v6574_v8, %v6720_v21  ;;  %v6724_v16 = vadd.f32 %v6723_v4, %v6650_v55  ;;  %v6725_v29 = vpop.f32.mrf.mxu1  ;;  %v7083_v56 = vrot.slane %v7081_v40, 1  ;;  %v16036_v4 = vld [vmem:[#allocation6 + $0xe8] ss:$16 sps:$4 sm:$0xff]  }
 0x538   :  { %v6811_v5 = vsel %vm17093_vm14, %v6803_v47, %v6810_v33  ;;  %v6825_v61 = vsel %vm17029_vm7, %v6812_v22, %v6824_v59  ;;  %v6852_v43 = vrot.slane %v6850_v54, 6  ;;  %v6855_v38 = vrot.slane %v6853_v14, 7  ;;  %v16033_v59 = vld [vmem:[#allocation6 + $0xe0] ss:$16 sps:$4 sm:$0xff]   ;;  %v16041_v33 = vld [vmem:[#allocation6 + $0xc4] ss:$16 sps:$4 sm:$0xff]   ;;  %vm21113_vm7 = vmmov %vm21066_vm2 }
 0x539   :  { %6826 = vst [vmem:[#allocation3 + $0x20] sm:$0x11] %v6825_v61  ;;  %v14713_v51 = vpack.c.bf16 %v6743_v25, %v6742_v19  ;;  %v6726_v18 = vadd.f32 %v6725_v29, %v6652_v60  ;;  %v6727_v17 = vpop.f32.mrf.mxu1  ;;  %v20044_v50 = vcombine.low %v6802_v41, %v6811_v5  ;;  %v6744_v58 = vmax.f32 %v20011_v3, %v6724_v16  ;;  %v16044_v22 = vld [vmem:[#allocation6 + $0xcc] ss:$16 sps:$4 sm:$0xff]   ;;  %v16039_v16 = vld [vmem:[#allocation6 + $0xc0] ss:$16 sps:$4 sm:$0xff]   ;;  %vm21114_vm14 = vmmov %vm21066_vm2 }
 0x53a   :  { %v6856_v32 = vor.u32 %v6855_v38, %v6852_v43  ;;  %v6728_v9 = vadd.f32 %v6727_v17, %v6654_v45  ;;  %v20048_v6 = vcombine.high %v6802_v41, %v6811_v5  ;;  %v7084_v44 = vor.u32 %v7083_v56, %v7079_v27  ;;  %v16042_v29 = vld [vmem:[#allocation6 + $0xc8] ss:$16 sps:$4 sm:$0xff]   ;;  %v16047_v5 = vld [vmem:[#allocation6 + $0xa4] ss:$16 sps:$4 sm:$0xff]  }
 0x53b   :  { %v6859_v30 = vshrl.u32 %v14713_v51, 16  ;;  %v6862_v23 = vshll.u32 %v14713_v51, 16  ;;  %v6745_v55 = vmax.f32 %v20015_v37, %v6726_v18  ;;  %v6729_v8 = vpop.f32.mrf.mxu1  ;;  %v7086_v12 = vshll.u32 %v20044_v50, 16  ;;  %v16050_v51 = vld [vmem:[#allocation6 + $0xac] ss:$16 sps:$4 sm:$0xff]  }
 0x53c   :  { %v6894_v2 = vsel %vm17551_vm9, %v6856_v32, %v6893_v26  ;;  %v6730_v1 = vadd.f32 %v6729_v8, %v6656_v36  ;;  %v7098_v62 = vshll.u32 %v20048_v6, 16  ;;  %v6857_v49 = vrot.slane %v6856_v32, 4  ;;  %v6899_v17 = vld [vmem:[#allocation3 + $0x18] sm:$0x33] }
 0x53d   :  { %6895 = vst [vmem:[#allocation3 + $0x20] sm:$0xee] %v6894_v2  ;;  %v6861_v24 = vrot.slane %v6859_v30, 6  ;;  %v6864_v3 = vrot.slane %v6862_v23, 7  ;;  %v14714_v0 = vpack.c.bf16 %v6745_v55, %v6744_v58  ;;  %v6746_v34 = vmax.f32 %v20019_v46, %v6728_v9 }
 0x53e   :  { %v6747_v37 = vmax.f32 %v20033_v31, %v6730_v1  ;;  %v7088_v60 = vrot.slane %v7086_v12, 1  ;;  %v7100_v11 = vrot.slane %v7098_v62, 1  ;;  %v7096_v47 = vor.u32 %v7095_v35, %v7091_v10  ;;  %v16045_v1 = vld [vmem:[#allocation6 + $0xa0] ss:$16 sps:$4 sm:$0xff]   ;;  %v16048_v35 = vld [vmem:[#allocation6 + $0xa8] ss:$16 sps:$4 sm:$0xff]  }
 0x53f   :  { %v6865_v48 = vor.u32 %v6864_v3, %v6861_v24  ;;  %v6869_v39 = vshrl.u32 %v14714_v0, 16  ;;  %v6872_v53 = vshll.u32 %v14714_v0, 16  ;;  %v7110_v26 = vshrl.u32 %v20048_v6, 16  ;;  %v16053_v3 = vld [vmem:[#allocation6 + $0x84] ss:$16 sps:$4 sm:$0xff]  }
 0x540   :  { %v14715_v28 = vpack.c.bf16 %v6747_v37, %v6746_v34  ;;  %v7089_v63 = vsel %vm1025_vm0, %v7084_v44, %v7088_v60  ;;  %v7101_v31 = vsel %vm1025_vm0, %v7096_v47, %v7100_v11  ;;  %v7102_v18 = vshrl.u32 %v20044_v50, 16  ;;  %v16056_v0 = vld [vmem:[#allocation6 + $0x8c] ss:$16 sps:$4 sm:$0xff]  }
 0x541   :  { %v6866_v20 = vsel %vm17534_vm12, %v6857_v49, %v6865_v48  ;;  %v6871_v21 = vrot.slane %v6869_v39, 6  ;;  %v6874_v41 = vrot.slane %v6872_v53, 7  ;;  %v6867_v54 = vrot.slane %v6865_v48, 4  ;;  %7518 = vmatprep.mubr.bf16.mxu0 %v7101_v31  ;;  %7599 = vmatprep.mubr.bf16.mxu1 %v7101_v31  ;;  %v16051_v48 = vld [vmem:[#allocation6 + $0x80] ss:$16 sps:$4 sm:$0xff]  }
 0x542   :  { %v6879_v40 = vshrl.u32 %v14715_v28, 16  ;;  %v6882_v46 = vshll.u32 %v14715_v28, 16  ;;  %7519 = vmatmul.mubr.bf16.vlgmr.msra.gmra.mxu0 %v7089_v63  ;;  %7600 = vmatmul.mubr.bf16.vlgmr.msra.gmra.mxu1 %v7089_v63  ;;  %v7112_v36 = vor.u32 %v7110_v26, %v7100_v11  ;;  %v7104_v30 = vor.u32 %v7102_v18, %v7088_v60  ;;  %v16054_v39 = vld [vmem:[#allocation6 + $0x88] ss:$16 sps:$4 sm:$0xff]   ;;  %v16059_v11 = vld [vmem:[#allocation6 + $0x64] ss:$16 sps:$4 sm:$0xff]  }
 0x543   :  { %v6875_v14 = vor.u32 %v6874_v41, %v6871_v21  ;;  %7984 = vmatpush1.bf16.msra.mxu0 %v16033_v59  ;;  %8065 = vmatpush1.bf16.msra.mxu1 %v16036_v4  ;;  %v16062_v28 = vld [vmem:[#allocation6 + $0x6c] ss:$16 sps:$4 sm:$0xff]   ;;  %v16060_v21 = vld [vmem:[#allocation6 + $0x68] ss:$16 sps:$4 sm:$0xff]   ;;  %v16066_v63 = vld [vmem:[#allocation6 + $0x44] ss:$16 sps:$4 sm:$0xff]  }
 0x544   :  { %v6881_v10 = vrot.slane %v6879_v40, 6  ;;  %v6884_v45 = vrot.slane %v6882_v46, 7  ;;  %v6906_v19 = vld [vmem:[#allocation3 + $0x20] sm:$0xff]  ;;  %7985 = vmatprep.subr.bf16.mxu0 %v16041_v33  ;;  %8066 = vmatprep.subr.bf16.mxu1 %v16044_v22 }
 0x545   :  { %v6876_v25 = vsel %vm17534_vm12, %v6867_v54, %v6875_v14  ;;  %v20063_v56 = vcombine.high %v6906_v19, %v6866_v20  ;;  %v20065_v61 = vcombine.low %v6906_v19, %v6866_v20  ;;  %v6877_v43 = vrot.slane %v6875_v14, 4  ;;  %v16057_v20 = vld [vmem:[#allocation6 + $0x60] ss:$16 sps:$4 sm:$0xff]   ;;  %v16069_v40 = vld [vmem:[#allocation6 + $0x4c] ss:$16 sps:$4 sm:$0xff]  }
 0x546   :  { %v6885_v38 = vor.u32 %v6884_v45, %v6881_v10  ;;  %v16064_v45 = vld [vmem:[#allocation6 + $0x40] ss:$16 sps:$4 sm:$0xff]   ;;  %v16067_v19 = vld [vmem:[#allocation6 + $0x48] ss:$16 sps:$4 sm:$0xff]  }
 0x547   :  { %v7114_v27 = vshll.u32 %v20063_v56, 16  ;;  %v7106_v32 = vshll.u32 %v20065_v61, 16  ;;  %7986 = vmatpush1.bf16.msra.mxu0 %v16039_v16  ;;  %8067 = vmatpush1.bf16.msra.mxu1 %v16042_v29  ;;  %v7126_v62 = vshrl.u32 %v20063_v56, 16  ;;  %v7118_v47 = vshrl.u32 %v20065_v61, 16  ;;  %v16075_v16 = vld [vmem:[#allocation6 + $0x2c] ss:$16 sps:$4 sm:$0xff]  }
 0x548   :  { %v6886_v58 = vsel %vm17534_vm12, %v6877_v43, %v6885_v38  ;;  %v6887_v9 = vrot.slane %v6885_v38, 4  ;;  %7987 = vmatprep.subr.bf16.mxu0 %v16047_v5  ;;  %8068 = vmatprep.subr.bf16.mxu1 %v16050_v51  ;;  %v16070_v51 = vld [vmem:[#allocation6 + $0x20] ss:$16 sps:$4 sm:$0xff]   ;;  %v16073_v18 = vld [vmem:[#allocation6 + $0x28] ss:$16 sps:$4 sm:$0xff]  }
 0x549   :  { %v7116_v23 = vrot.slane %v7114_v27, 1  ;;  %v7108_v55 = vrot.slane %v7106_v32, 1  ;;  %v20073_v8 = vcombine.high %v6876_v25, %v6886_v58  ;;  %v20075_v12 = vcombine.low %v6876_v25, %v6886_v58  ;;  %v16072_v25 = vld [vmem:[#allocation6 + $0x24] ss:$16 sps:$4 sm:$0xff]   ;;  %v16082_v58 = vld [vmem:[#allocation6 + $0xc] ss:$16 sps:$4 sm:$0xff]  }
 0x54a   :  { %v6900_v2 = vsel %vm17950_vm4, %v6887_v9, %v6899_v17  ;;  %v16079_v32 = vld [vmem:[#allocation6 + $0x4] ss:$16 sps:$4 sm:$0xff]   ;;  %v16077_v9 = vld [vmem:[#allocation6] ss:$16 sps:$4 sm:$0xff]  }
 0x54b   :  { %6901 = vst [vmem:[#allocation3 + $0x18] sm:$0x33] %v6900_v2  ;;  %v7117_v44 = vsel %vm1025_vm0, %v7112_v36, %v7116_v23  ;;  %v7109_v24 = vsel %vm1025_vm0, %v7104_v30, %v7108_v55  ;;  %v7130_v49 = vshll.u32 %v20073_v8, 16  ;;  %v7122_v34 = vshll.u32 %v20075_v12, 16  ;;  %7988 = vmatpush1.bf16.msra.mxu0 %v16045_v1  ;;  %8069 = vmatpush1.bf16.msra.mxu1 %v16048_v35  ;;  %v16080_v36 = vld [vmem:[#allocation6 + $0x8] ss:$16 sps:$4 sm:$0xff]  }
 0x54c   :  { %7528 = vmatprep.mubr.bf16.mxu0 %v7117_v44  ;;  %7609 = vmatprep.mubr.bf16.mxu1 %v7117_v44  ;;  %v7128_v37 = vor.u32 %v7126_v62, %v7116_v23  ;;  %v7120_v41 = vor.u32 %v7118_v47, %v7108_v55  ;;  %v7142_v33 = vshrl.u32 %v20073_v8, 16  ;;  %v7134_v29 = vshrl.u32 %v20075_v12, 16  ;;  %v16085_v30 = vld [vmem:[#allocation6 + $0x1e4] ss:$16 sps:$4 sm:$0xff]   ;;  %v16088_v23 = vld [vmem:[#allocation6 + $0x1ec] ss:$16 sps:$4 sm:$0xff]  }
 0x54d   :  { %7529 = vmatmul.mubr.bf16.gmra.mxu0 %v7109_v24  ;;  %7610 = vmatmul.mubr.bf16.gmra.mxu1 %v7109_v24  ;;  %v7132_v60 = vrot.slane %v7130_v49, 1  ;;  %v7124_v57 = vrot.slane %v7122_v34, 1  ;;  %v16086_v2 = vld [vmem:[#allocation6 + $0x1e8] ss:$16 sps:$4 sm:$0xff]   ;;  %v16091_v35 = vld [vmem:[#allocation6 + $0x1c4] ss:$16 sps:$4 sm:$0xff]  }
 0x54e   :  { %7989 = vmatprep.subr.bf16.mxu0 %v16053_v3  ;;  %8070 = vmatprep.subr.bf16.mxu1 %v16056_v0  ;;  %v16094_v44 = vld [vmem:[#allocation6 + $0x1cc] ss:$16 sps:$4 sm:$0xff]   ;;  %v16089_v24 = vld [vmem:[#allocation6 + $0x1c0] ss:$16 sps:$4 sm:$0xff]   ;;  %v16092_v3 = vld [vmem:[#allocation6 + $0x1c8] ss:$16 sps:$4 sm:$0xff]  }
 0x54f   :  { %v7133_v53 = vsel %vm1025_vm0, %v7128_v37, %v7132_v60  ;;  %7990 = vmatpush1.bf16.msra.mxu0 %v16051_v48  ;;  %8071 = vmatpush1.bf16.msra.mxu1 %v16054_v39  ;;  %v7125_v31 = vsel %vm1025_vm0, %v7120_v41, %v7124_v57  ;;  %v7144_v14 = vor.u32 %v7142_v33, %v7132_v60  ;;  %v16097_v0 = vld [vmem:[#allocation6 + $0x1a4] ss:$16 sps:$4 sm:$0xff]   ;;  %v16100_v62 = vld [vmem:[#allocation6 + $0x1ac] ss:$16 sps:$4 sm:$0xff]   ;;  %v16095_v49 = vld [vmem:[#allocation6 + $0x1a0] ss:$16 sps:$4 sm:$0xff]  }
 0x550   :  { %7538 = vmatprep.mubr.bf16.mxu0 %v7133_v53  ;;  %7619 = vmatprep.mubr.bf16.mxu1 %v7133_v53  ;;  %v7136_v38 = vor.u32 %v7134_v29, %v7124_v57  ;;  %v16098_v34 = vld [vmem:[#allocation6 + $0x1a8] ss:$16 sps:$4 sm:$0xff]   ;;  %v16103_v37 = vld [vmem:[#allocation6 + $0x184] ss:$16 sps:$4 sm:$0xff]   ;;  %v16106_v60 = vld [vmem:[#allocation6 + $0x18c] ss:$16 sps:$4 sm:$0xff]  }
 0x551   :  { %7991 = vmatprep.subr.bf16.mxu0 %v16059_v11  ;;  %8072 = vmatprep.subr.bf16.mxu1 %v16062_v28  ;;  %v16101_v48 = vld [vmem:[#allocation6 + $0x180] ss:$16 sps:$4 sm:$0xff]   ;;  %v16109_v39 = vld [vmem:[#allocation6 + $0x164] ss:$16 sps:$4 sm:$0xff]   ;;  %v16112_v53 = vld [vmem:[#allocation6 + $0x16c] ss:$16 sps:$4 sm:$0xff]  }
 0x552   :  { %v6975_v59 = vld [vmem:[#allocation3 + $0x18] sm:$0x33]  ;;  %v16110_v28 = vld [vmem:[#allocation6 + $0x168] ss:$16 sps:$4 sm:$0xff]   ;;  %v16118_v57 = vld [vmem:[#allocation6 + $0x14c] ss:$16 sps:$4 sm:$0xff]  }
 0x553   :  { %v20086_v4 = vcombine.high %v6975_v59, %v6975_v59  ;;  %v20088_v46 = vcombine.low %v6975_v59, %v6975_v59  ;;  %7992 = vmatpush1.bf16.msra.mxu0 %v16057_v20  ;;  %8073 = vmatpush1.bf16.msra.mxu1 %v16060_v21  ;;  %v16107_v11 = vld [vmem:[#allocation6 + $0x160] ss:$16 sps:$4 sm:$0xff]   ;;  %v16115_v47 = vld [vmem:[#allocation6 + $0x144] ss:$16 sps:$4 sm:$0xff]   ;;  %v16116_v21 = vld [vmem:[#allocation6 + $0x148] ss:$16 sps:$4 sm:$0xff]  }
 0x554   :  { %7993 = vmatprep.subr.bf16.mxu0 %v16066_v63  ;;  %8074 = vmatprep.subr.bf16.mxu1 %v16069_v40  ;;  %v16113_v20 = vld [vmem:[#allocation6 + $0x140] ss:$16 sps:$4 sm:$0xff]   ;;  %v16121_v41 = vld [vmem:[#allocation6 + $0x124] ss:$16 sps:$4 sm:$0xff]   ;;  %v16124_v59 = vld [vmem:[#allocation6 + $0x12c] ss:$16 sps:$4 sm:$0xff]  }
 0x555   :  { %7539 = vmatmul.mubr.bf16.gmra.mxu0 %v7125_v31  ;;  %7620 = vmatmul.mubr.bf16.gmra.mxu1 %v7125_v31  ;;  %v7146_v22 = vshll.u32 %v20086_v4, 16  ;;  %v7138_v54 = vshll.u32 %v20088_v46, 16  ;;  %v7153_v26 = vshrl.u32 %v20086_v4, 16  ;;  %v7150_v55 = vshrl.u32 %v20088_v46, 16  ;;  %v16119_v63 = vld [vmem:[#allocation6 + $0x120] ss:$16 sps:$4 sm:$0xff]  }
 0x556   :  { %v16122_v40 = vld [vmem:[#allocation6 + $0x128] ss:$16 sps:$4 sm:$0xff]   ;;  %v16127_v31 = vld [vmem:[#allocation6 + $0x104] ss:$16 sps:$4 sm:$0xff]   ;;  %v16130_v33 = vld [vmem:[#allocation6 + $0x10c] ss:$16 sps:$4 sm:$0xff]  }
 0x557   :  { %v7148_v10 = vrot.slane %v7146_v22, 1  ;;  %v7140_v5 = vrot.slane %v7138_v54, 1  ;;  %7994 = vmatpush1.bf16.msra.mxu0 %v16064_v45  ;;  %8075 = vmatpush1.bf16.msra.mxu1 %v16067_v19  ;;  %v16125_v22 = vld [vmem:[#allocation6 + $0x100] ss:$16 sps:$4 sm:$0xff]   ;;  %v16128_v54 = vld [vmem:[#allocation6 + $0x108] ss:$16 sps:$4 sm:$0xff]  }
 0x558   :  { %7995 = vmatprep.subr.bf16.mxu0 %v16072_v25  ;;  %8076 = vmatprep.subr.bf16.mxu1 %v16075_v16  ;;  %v16131_v45 = vld [vmem:[#allocation6 + $0x4e0] ss:$16 sps:$4 sm:$0xff]   ;;  %v16134_v19 = vld [vmem:[#allocation6 + $0x4e8] ss:$16 sps:$4 sm:$0xff]   ;;  %v16139_v25 = vld [vmem:[#allocation6 + $0x4c4] ss:$16 sps:$4 sm:$0xff]  }
 0x559   :  { %v7149_v43 = vsel %vm1025_vm0, %v7144_v14, %v7148_v10  ;;  %v7141_v17 = vsel %vm1025_vm0, %v7136_v38, %v7140_v5  ;;  %v7155_v27 = vor.u32 %v7153_v26, %v7148_v10  ;;  %v7152_v1 = vor.u32 %v7150_v55, %v7140_v5  ;;  %v16133_v14 = vld [vmem:[#allocation6 + $0x4e4] ss:$16 sps:$4 sm:$0xff]   ;;  %v16136_v10 = vld [vmem:[#allocation6 + $0x4ec] ss:$16 sps:$4 sm:$0xff]   ;;  %v16137_v29 = vld [vmem:[#allocation6 + $0x4c0] ss:$16 sps:$4 sm:$0xff]  }
 0x55a   :  { %7548 = vmatprep.mubr.bf16.mxu0 %v7149_v43  ;;  %7629 = vmatprep.mubr.bf16.mxu1 %v7149_v43  ;;  %v16142_v16 = vld [vmem:[#allocation6 + $0x4cc] ss:$16 sps:$4 sm:$0xff]   ;;  %v16140_v5 = vld [vmem:[#allocation6 + $0x4c8] ss:$16 sps:$4 sm:$0xff]   ;;  %v16145_v43 = vld [vmem:[#allocation6 + $0x4a4] ss:$16 sps:$4 sm:$0xff]  }
 0x55b   :  { %7996 = vmatpush1.bf16.msra.mxu0 %v16070_v51  ;;  %8077 = vmatpush1.bf16.msra.mxu1 %v16073_v18  ;;  %v16148_v38 = vld [vmem:[#allocation6 + $0x4ac] ss:$16 sps:$4 sm:$0xff]   ;;  %v16143_v26 = vld [vmem:[#allocation6 + $0x4a0] ss:$16 sps:$4 sm:$0xff]   ;;  %v16146_v51 = vld [vmem:[#allocation6 + $0x4a8] ss:$16 sps:$4 sm:$0xff]  }
 0x55c   :  { %7997 = vmatprep.subr.bf16.mxu0 %v16079_v32  ;;  %8078 = vmatprep.subr.bf16.mxu1 %v16082_v58  ;;  %v16151_v18 = vld [vmem:[#allocation6 + $0x484] ss:$16 sps:$4 sm:$0xff]   ;;  %v16160_v58 = vld [vmem:[#allocation6 + $0x46c] ss:$16 sps:$4 sm:$0xff]   ;;  %v16161_v55 = vld [vmem:[#allocation6 + $0x440] ss:$16 sps:$4 sm:$0xff]  }
 0x55d   :  { %7549 = vmatmul.mubr.bf16.gmra.mxu0 %v7141_v17  ;;  %7630 = vmatmul.mubr.bf16.gmra.mxu1 %v7141_v17  ;;  %v16149_v17 = vld [vmem:[#allocation6 + $0x480] ss:$16 sps:$4 sm:$0xff]   ;;  %v16157_v32 = vld [vmem:[#allocation6 + $0x464] ss:$16 sps:$4 sm:$0xff]   ;;  %vm21116_vm0 = vmmov %vm21066_vm2 }
 0x55e   :  { %7558 = vmatprep.mubr.bf16.mxu0 %v7155_v27  ;;  %7639 = vmatprep.mubr.bf16.mxu1 %v7155_v27  ;;  %v16152_v27 = vld [vmem:[#allocation6 + $0x488] ss:$16 sps:$4 sm:$0xff]   ;;  %vm21118_vm10 = vmmov %vm21116_vm0 }
 0x55f   :  { %7998 = vmatpush1.bf16.msra.mxu0 %v16077_v9  ;;  %8079 = vmatpush1.bf16.msra.mxu1 %v16080_v36  ;;  %v16155_v9 = vld [vmem:[#allocation6 + $0x460] ss:$16 sps:$4 sm:$0xff]   ;;  %v16158_v36 = vld [vmem:[#allocation6 + $0x468] ss:$16 sps:$4 sm:$0xff]   ;;  %vm21119_vm12 = vmmov %vm21116_vm0 }
 0x560   :  { %7999 = vmatprep.subr.bf16.mxu0 %v16085_v30  ;;  %8080 = vmatprep.subr.bf16.mxu1 %v16088_v23  ;;  %v16163_v30 = vld [vmem:[#allocation6 + $0x444] ss:$16 sps:$4 sm:$0xff]   ;;  %v16166_v23 = vld [vmem:[#allocation6 + $0x44c] ss:$16 sps:$4 sm:$0xff]   ;;  %vm21120_vm9 = vmmov %vm21116_vm0 }
 0x561   :  { %vm21121_vm5 = vmmov %vm21116_vm0 }
 0x562   :  { %vm21122_vm4 = vmmov %vm21116_vm0 }
 0x563   :  { %8000 = vmatpush2.bf16.msra.mxu0 %v16083_v7  ;;  %8081 = vmatpush2.bf16.msra.mxu1 %v16086_v2  ;;  %v16164_v7 = vld [vmem:[#allocation6 + $0x448] ss:$16 sps:$4 sm:$0xff]   ;;  %v16169_v2 = vld [vmem:[#allocation6 + $0x424] ss:$16 sps:$4 sm:$0xff]   ;;  %vm21124_vm11 = vmmov %vm21116_vm0 }
 0x564   :  { %8001 = vmatprep.subr.bf16.mxu0 %v16091_v35  ;;  %8082 = vmatprep.subr.bf16.mxu1 %v16094_v44  ;;  %v6910_v35 = vld [vmem:[#allocation3 + $0x18] sm:$0x11]  ;;  %vm21125_vm2 = vmmov %vm21116_vm0 }
 0x565   :  { %7559 = vmatmul.mubr.bf16.gmra.mxu0 %v7152_v1  ;;  %7640 = vmatmul.mubr.bf16.gmra.mxu1 %v7152_v1  ;;  %v16172_v1 = vld [vmem:[#allocation6 + $0x42c] ss:$16 sps:$4 sm:$0xff]   ;;  %v16167_v44 = vld [vmem:[#allocation6 + $0x420] ss:$16 sps:$4 sm:$0xff]   ;;  %vm21126_vm6 = vmmov %vm21116_vm0 }
 0x566   :  { %8015 = vmatprep.mubr.bf16.mxu0 %v20029_v42  ;;  %8096 = vmatprep.mubr.bf16.mxu1 %v20029_v42  ;;  %v16104_v42 = vld [vmem:[#allocation6 + $0x188] ss:$16 sps:$4 sm:$0xff]   ;;  %vm21127_vm8 = vmmov %vm21116_vm0 }
 0x567   :  { %8002 = vmatpush2.bf16.msra.mxu0 %v16089_v24  ;;  %8083 = vmatpush2.bf16.msra.mxu1 %v16092_v3  ;;  %v16170_v24 = vld [vmem:[#allocation6 + $0x428] ss:$16 sps:$4 sm:$0xff]   ;;  %v14160_v3 = vcombine.high %v6910_v35, %v6910_v35  ;;  %vm21128_vm13 = vmmov %vm21116_vm0 }
 0x568   :  { %8003 = vmatprep.subr.bf16.mxu0 %v16097_v0  ;;  %8084 = vmatprep.subr.bf16.mxu1 %v16100_v62  ;;  %v16177_v0 = vld [vmem:[#allocation6 + $0x404] ss:$16 sps:$4 sm:$0xff]   ;;  %v16180_v62 = vld [vmem:[#allocation6 + $0x40c] ss:$16 sps:$4 sm:$0xff]  }
 0x56b   :  { %8004 = vmatpush2.bf16.msra.mxu0 %v16095_v49  ;;  %8085 = vmatpush2.bf16.msra.mxu1 %v16098_v34  ;;  %v20113_v49 = vld [vmem:[#allocation3] sm:$0xee]  ;;  %v16175_v34 = vld [vmem:[#allocation6 + $0x400] ss:$16 sps:$4 sm:$0xff]  }
 0x56c   :  { %8005 = vmatprep.subr.bf16.mxu0 %v16103_v37  ;;  %8086 = vmatprep.subr.bf16.mxu1 %v16106_v60  ;;  %v16178_v37 = vld [vmem:[#allocation6 + $0x408] ss:$16 sps:$4 sm:$0xff]   ;;  %v14226_v60 = vcombine.high %v20113_v49, %v20023_v52 }
 0x56f   :  { %8006 = vmatpush2.bf16.msra.mxu0 %v16101_v48  ;;  %8087 = vmatpush2.bf16.msra.mxu1 %v16104_v42  ;;  %v16183_v48 = vld [vmem:[#allocation6 + $0x5e4] ss:$16 sps:$4 sm:$0xff]   ;;  %v16186_v42 = vld [vmem:[#allocation6 + $0x5ec] ss:$16 sps:$4 sm:$0xff]  }
 0x570   :  { %8007 = vmatprep.subr.bf16.mxu0 %v16109_v39  ;;  %8088 = vmatprep.subr.bf16.mxu1 %v16112_v53  ;;  %v8220_v39 = vrot.slane %v20048_v6, 1  ;;  %v14159_v53 = vcombine.low %v6910_v35, %v6910_v35 }
 0x573   :  { %8008 = vmatpush2.bf16.msra.mxu0 %v16107_v11  ;;  %8089 = vmatpush2.bf16.msra.mxu1 %v16110_v28  ;;  %v16181_v11 = vld [vmem:[#allocation6 + $0x5e0] ss:$16 sps:$4 sm:$0xff]   ;;  %v16184_v28 = vld [vmem:[#allocation6 + $0x5e8] ss:$16 sps:$4 sm:$0xff]  }
 0x574   :  { %8009 = vmatprep.subr.bf16.mxu0 %v16115_v47  ;;  %8090 = vmatprep.subr.bf16.mxu1 %v16118_v57  ;;  %v8219_v47 = vrot.slane %v14226_v60, 1  ;;  %v16189_v57 = vld [vmem:[#allocation6 + $0x5c4] ss:$16 sps:$4 sm:$0xff]  }
 0x577   :  { %8010 = vmatpush2.bf16.msra.mxu0 %v16113_v20  ;;  %8091 = vmatpush2.bf16.msra.mxu1 %v16116_v21  ;;  %v16192_v20 = vld [vmem:[#allocation6 + $0x5cc] ss:$16 sps:$4 sm:$0xff]   ;;  %v8221_v21 = vsel %vm3781_vm1, %v8219_v47, %v8220_v39 }
 0x578   :  { %8011 = vmatprep.subr.bf16.mxu0 %v16121_v41  ;;  %8092 = vmatprep.subr.bf16.mxu1 %v16124_v59  ;;  %v16187_v41 = vld [vmem:[#allocation6 + $0x5c0] ss:$16 sps:$4 sm:$0xff]   ;;  %v16190_v59 = vld [vmem:[#allocation6 + $0x5c8] ss:$16 sps:$4 sm:$0xff]  }
 0x57b   :  { %8012 = vmatpush2.bf16.msra.mxu0 %v16119_v63  ;;  %8093 = vmatpush2.bf16.msra.mxu1 %v16122_v40  ;;  %v16195_v63 = vld [vmem:[#allocation6 + $0x5a4] ss:$16 sps:$4 sm:$0xff]   ;;  %v16198_v40 = vld [vmem:[#allocation6 + $0x5ac] ss:$16 sps:$4 sm:$0xff]  }
 0x57c   :  { %8013 = vmatprep.subr.bf16.mxu0 %v16127_v31  ;;  %8094 = vmatprep.subr.bf16.mxu1 %v16130_v33  ;;  %v16193_v31 = vld [vmem:[#allocation6 + $0x5a0] ss:$16 sps:$4 sm:$0xff]   ;;  %v16196_v33 = vld [vmem:[#allocation6 + $0x5a8] ss:$16 sps:$4 sm:$0xff]  }
 0x57f   :  { %8014 = vmatpush2.bf16.msra.mxu0 %v16125_v22  ;;  %8095 = vmatpush2.bf16.msra.mxu1 %v16128_v54  ;;  %v16201_v22 = vld [vmem:[#allocation6 + $0x584] ss:$16 sps:$4 sm:$0xff]   ;;  %v16204_v54 = vld [vmem:[#allocation6 + $0x58c] ss:$16 sps:$4 sm:$0xff]  }
 0x580   :  { %8564 = vmatprep.subr.bf16.mxu0 %v16133_v14  ;;  %8645 = vmatprep.subr.bf16.mxu1 %v16136_v10  ;;  %v16199_v14 = vld [vmem:[#allocation6 + $0x580] ss:$16 sps:$4 sm:$0xff]   ;;  %v16202_v10 = vld [vmem:[#allocation6 + $0x588] ss:$16 sps:$4 sm:$0xff]  }
 0x582   :  { %8016 = vmatmul.mubr.bf16.vlgmr.msra.gmra.mxu0 %v20026_v15  ;;  %8097 = vmatmul.mubr.bf16.vlgmr.msra.gmra.mxu1 %v20026_v15  ;;  %v16154_v15 = vld [vmem:[#allocation6 + $0x48c] ss:$16 sps:$4 sm:$0xff]  }
 0x583   :  { %8025 = vmatprep.mubr.bf16.mxu0 %v20048_v6  ;;  %8106 = vmatprep.mubr.bf16.mxu1 %v20048_v6  ;;  %v8232_v6 = vrot.slane %v20086_v4, 1 }
 0x584   :  { %8565 = vmatpush1.bf16.msra.mxu0 %v16131_v45  ;;  %8646 = vmatpush1.bf16.msra.mxu1 %v16134_v19  ;;  %v16207_v45 = vld [vmem:[#allocation6 + $0x564] ss:$16 sps:$4 sm:$0xff]   ;;  %v16210_v19 = vld [vmem:[#allocation6 + $0x56c] ss:$16 sps:$4 sm:$0xff]  }
 0x585   :  { %8566 = vmatprep.subr.bf16.mxu0 %v16139_v25  ;;  %8647 = vmatprep.subr.bf16.mxu1 %v16142_v16  ;;  %v16205_v25 = vld [vmem:[#allocation6 + $0x560] ss:$16 sps:$4 sm:$0xff]   ;;  %v16208_v16 = vld [vmem:[#allocation6 + $0x568] ss:$16 sps:$4 sm:$0xff]  }
 0x588   :  { %8567 = vmatpush1.bf16.msra.mxu0 %v16137_v29  ;;  %8648 = vmatpush1.bf16.msra.mxu1 %v16140_v5  ;;  %v16213_v29 = vld [vmem:[#allocation6 + $0x544] ss:$16 sps:$4 sm:$0xff]   ;;  %v16216_v5 = vld [vmem:[#allocation6 + $0x54c] ss:$16 sps:$4 sm:$0xff]  }
 0x589   :  { %8568 = vmatprep.subr.bf16.mxu0 %v16145_v43  ;;  %8649 = vmatprep.subr.bf16.mxu1 %v16148_v38  ;;  %v16211_v43 = vld [vmem:[#allocation6 + $0x540] ss:$16 sps:$4 sm:$0xff]   ;;  %v16214_v38 = vld [vmem:[#allocation6 + $0x548] ss:$16 sps:$4 sm:$0xff]  }
 0x58a   :  { %8026 = vmatmul.mubr.bf16.gmra.mxu0 %v20044_v50  ;;  %8107 = vmatmul.mubr.bf16.gmra.mxu1 %v20044_v50 }
 0x58b   :  { %8035 = vmatprep.mubr.bf16.mxu0 %v20063_v56  ;;  %8116 = vmatprep.mubr.bf16.mxu1 %v20063_v56 }
 0x58c   :  { %8569 = vmatpush1.bf16.msra.mxu0 %v16143_v26  ;;  %8650 = vmatpush1.bf16.msra.mxu1 %v16146_v51  ;;  %v16219_v26 = vld [vmem:[#allocation6 + $0x524] ss:$16 sps:$4 sm:$0xff]   ;;  %v16222_v51 = vld [vmem:[#allocation6 + $0x52c] ss:$16 sps:$4 sm:$0xff]  }
 0x58d   :  { %8570 = vmatprep.subr.bf16.mxu0 %v16151_v18  ;;  %8651 = vmatprep.subr.bf16.mxu1 %v16154_v15  ;;  %v16217_v18 = vld [vmem:[#allocation6 + $0x520] ss:$16 sps:$4 sm:$0xff]   ;;  %v16220_v15 = vld [vmem:[#allocation6 + $0x528] ss:$16 sps:$4 sm:$0xff]  }
 0x590   :  { %8571 = vmatpush1.bf16.msra.mxu0 %v16149_v17  ;;  %8652 = vmatpush1.bf16.msra.mxu1 %v16152_v27  ;;  %v16225_v17 = vld [vmem:[#allocation6 + $0x504] ss:$16 sps:$4 sm:$0xff]   ;;  %v16228_v27 = vld [vmem:[#allocation6 + $0x50c] ss:$16 sps:$4 sm:$0xff]  }
 0x591   :  { %8572 = vmatprep.subr.bf16.mxu0 %v16157_v32  ;;  %8653 = vmatprep.subr.bf16.mxu1 %v16160_v58  ;;  %v14225_v32 = vcombine.low %v20113_v49, %v20023_v52  ;;  %v16223_v58 = vld [vmem:[#allocation6 + $0x500] ss:$16 sps:$4 sm:$0xff]  }
 0x592   :  { %8036 = vmatmul.mubr.bf16.gmra.mxu0 %v20065_v61  ;;  %8117 = vmatmul.mubr.bf16.gmra.mxu1 %v20065_v61 }
 0x593   :  { %8045 = vmatprep.mubr.bf16.mxu0 %v20073_v8  ;;  %8126 = vmatprep.mubr.bf16.mxu1 %v20073_v8 }
 0x594   :  { %8573 = vmatpush1.bf16.msra.mxu0 %v16155_v9  ;;  %8654 = vmatpush1.bf16.msra.mxu1 %v16158_v36  ;;  %v16226_v9 = vld [vmem:[#allocation6 + $0x508] ss:$16 sps:$4 sm:$0xff]   ;;  %v8217_v36 = vrot.slane %v20044_v50, 1 }
 0x595   :  { %8574 = vmatprep.subr.bf16.mxu0 %v16163_v30  ;;  %8655 = vmatprep.subr.bf16.mxu1 %v16166_v23  ;;  %v8224_v30 = vrot.slane %v20063_v56, 1  ;;  %v8216_v23 = vrot.slane %v14225_v32, 1 }
 0x597   :  { %v8225_v52 = vsel %vm3781_vm1, %v8220_v39, %v8224_v30 }
 0x598   :  { %8575 = vmatpush1.bf16.msra.mxu0 %v16161_v55  ;;  %8656 = vmatpush1.bf16.msra.mxu1 %v16164_v7  ;;  %v8218_v55 = vsel %vm3781_vm1, %v8216_v23, %v8217_v36  ;;  %v8222_v7 = vrot.slane %v20065_v61, 1 }
 0x599   :  { %8576 = vmatprep.subr.bf16.mxu0 %v16169_v2  ;;  %8657 = vmatprep.subr.bf16.mxu1 %v16172_v1  ;;  %v8228_v2 = vrot.slane %v20073_v8, 1  ;;  %v8226_v1 = vrot.slane %v20075_v12, 1  ;;  %v8230_v8 = vrot.slane %v20088_v46, 1 }
 0x59a   :  { %8046 = vmatmul.mubr.bf16.gmra.mxu0 %v20075_v12  ;;  %8127 = vmatmul.mubr.bf16.gmra.mxu1 %v20075_v12  ;;  %v8223_v50 = vsel %vm3781_vm1, %v8217_v36, %v8222_v7 }
 0x59b   :  { %8055 = vmatprep.mubr.bf16.mxu0 %v14160_v3  ;;  %8136 = vmatprep.mubr.bf16.mxu1 %v14160_v3  ;;  %v8229_v56 = vsel %vm3781_vm1, %v8224_v30, %v8228_v2  ;;  %v8227_v35 = vsel %vm3781_vm1, %v8222_v7, %v8226_v1  ;;  %v8233_v61 = vsel %vm3781_vm1, %v8228_v2, %v8232_v6 }
 0x59c   :  { %8577 = vmatpush1.bf16.msra.mxu0 %v16167_v44  ;;  %8658 = vmatpush1.bf16.msra.mxu1 %v16170_v24  ;;  %v8231_v44 = vsel %vm3781_vm1, %v8226_v1, %v8230_v8  ;;  %vm21123_vm1 = vmmov %vm21116_vm0 }
 0x59d   :  { %8578 = vmatprep.subr.bf16.mxu0 %v16177_v0  ;;  %8659 = vmatprep.subr.bf16.mxu1 %v16180_v62 }
 0x5a0   :  { %8579 = vmatpush1.bf16.msra.mxu0 %v16175_v34  ;;  %8660 = vmatpush1.bf16.msra.mxu1 %v16178_v37 }
 0x5a1   :  { %8580 = vmatprep.subr.bf16.mxu0 %v16183_v48  ;;  %8661 = vmatprep.subr.bf16.mxu1 %v16186_v42 }
 0x5a2   :  { %8056 = vmatmul.mubr.bf16.gmra.mxu0 %v14159_v53  ;;  %8137 = vmatmul.mubr.bf16.gmra.mxu1 %v14159_v53 }
 0x5a3   :  { %8596 = vmatprep.mubr.bf16.mxu0 %v8221_v21  ;;  %8677 = vmatprep.mubr.bf16.mxu1 %v8221_v21 }
 0x5a4   :  { %8581 = vmatpush2.bf16.msra.mxu0 %v16181_v11  ;;  %8662 = vmatpush2.bf16.msra.mxu1 %v16184_v28 }
 0x5a5   :  { %8582 = vmatprep.subr.bf16.mxu0 %v16189_v57  ;;  %8663 = vmatprep.subr.bf16.mxu1 %v16192_v20 }
 0x5a8   :  { %8583 = vmatpush2.bf16.msra.mxu0 %v16187_v41  ;;  %8664 = vmatpush2.bf16.msra.mxu1 %v16190_v59 }
 0x5a9   :  { %8584 = vmatprep.subr.bf16.mxu0 %v16195_v63  ;;  %8665 = vmatprep.subr.bf16.mxu1 %v16198_v40 }
 0x5ac   :  { %8585 = vmatpush2.bf16.msra.mxu0 %v16193_v31  ;;  %8666 = vmatpush2.bf16.msra.mxu1 %v16196_v33 }
 0x5ad   :  { %8586 = vmatprep.subr.bf16.mxu0 %v16201_v22  ;;  %8667 = vmatprep.subr.bf16.mxu1 %v16204_v54 }
 0x5b0   :  { %8587 = vmatpush2.bf16.msra.mxu0 %v16199_v14  ;;  %8668 = vmatpush2.bf16.msra.mxu1 %v16202_v10 }
 0x5b1   :  { %8588 = vmatprep.subr.bf16.mxu0 %v16207_v45  ;;  %8669 = vmatprep.subr.bf16.mxu1 %v16210_v19 }
 0x5b4   :  { %8589 = vmatpush2.bf16.msra.mxu0 %v16205_v25  ;;  %8670 = vmatpush2.bf16.msra.mxu1 %v16208_v16 }
 0x5b5   :  { %8590 = vmatprep.subr.bf16.mxu0 %v16213_v29  ;;  %8671 = vmatprep.subr.bf16.mxu1 %v16216_v5 }
 0x5b8   :  { %8591 = vmatpush2.bf16.msra.mxu0 %v16211_v43  ;;  %8672 = vmatpush2.bf16.msra.mxu1 %v16214_v38 }
 0x5b9   :  { %8592 = vmatprep.subr.bf16.mxu0 %v16219_v26  ;;  %8673 = vmatprep.subr.bf16.mxu1 %v16222_v51  ;;  %v20806_v51 = vmov 0  }
 0x5bc   :  { %8593 = vmatpush2.bf16.msra.mxu0 %v16217_v18  ;;  %8674 = vmatpush2.bf16.msra.mxu1 %v16220_v15 }
 0x5bd   :  { %8594 = vmatprep.subr.bf16.mxu0 %v16225_v17  ;;  %8675 = vmatprep.subr.bf16.mxu1 %v16228_v27 }
 0x5c0   :  { %8595 = vmatpush2.bf16.msra.mxu0 %v16223_v58  ;;  %8676 = vmatpush2.bf16.msra.mxu1 %v16226_v9 }
 0x5c3   :  { %8597 = vmatmul.mubr.bf16.vlgmr.msra.gmra.mxu0 %v8218_v55  ;;  %8678 = vmatmul.mubr.bf16.vlgmr.msra.gmra.mxu1 %v8218_v55 }
 0x5c4   :  { %8606 = vmatprep.mubr.bf16.mxu0 %v8225_v52  ;;  %8687 = vmatprep.mubr.bf16.mxu1 %v8225_v52 }
 0x5cb   :  { %8607 = vmatmul.mubr.bf16.gmra.mxu0 %v8223_v50  ;;  %8688 = vmatmul.mubr.bf16.gmra.mxu1 %v8223_v50 }
 0x5cc   :  { %8616 = vmatprep.mubr.bf16.mxu0 %v8229_v56  ;;  %8697 = vmatprep.mubr.bf16.mxu1 %v8229_v56 }
 0x5d3   :  { %8617 = vmatmul.mubr.bf16.gmra.mxu0 %v8227_v35  ;;  %8698 = vmatmul.mubr.bf16.gmra.mxu1 %v8227_v35 }
 0x5d4   :  { %8626 = vmatprep.mubr.bf16.mxu0 %v8233_v61  ;;  %8707 = vmatprep.mubr.bf16.mxu1 %v8233_v61 }
 0x5db   :  { %8627 = vmatmul.mubr.bf16.gmra.mxu0 %v8231_v44  ;;  %8708 = vmatmul.mubr.bf16.gmra.mxu1 %v8231_v44 }
 0x5dc   :  { %8636 = vmatprep.mubr.bf16.mxu0 %v8232_v6  ;;  %8717 = vmatprep.mubr.bf16.mxu1 %v8232_v6 }
 0x5e3   :  { %8637 = vmatmul.mubr.bf16.gmra.mxu0 %v8230_v8  ;;  %8718 = vmatmul.mubr.bf16.gmra.mxu1 %v8230_v8 }
 0x5e4   :  { %8961 = vmatprep.mubr.bf16.mxu0 %v20806_v51  ;;  %9034 = vmatprep.mubr.bf16.mxu1 %v20806_v51  ;;  %v21110_v51 = vsub.s32 3, %v19461_v13 }
 0x602   :  { %v20141_v12 = vpop.f32.mrf.mxu0  ;;  %v20143_v4 = vpop.f32.mrf.mxu1 }
 0x604   :  { %v20145_v24 = vpop.f32.mrf.mxu0  ;;  %v20147_v3 = vpop.f32.mrf.mxu1 }
 0x606   :  { %v20149_v0 = vpop.f32.mrf.mxu0  ;;  %v20151_v62 = vpop.f32.mrf.mxu1 }
 0x608   :  { %v20153_v46 = vpop.f32.mrf.mxu0  ;;  %v20155_v49 = vpop.f32.mrf.mxu1 }
 0x60d   :  { %v7530_v34 = vpop.f32.mrf.mxu0  ;;  %v7611_v37 = vpop.f32.mrf.mxu1 }
 0x60f   :  { %v7532_v60 = vpop.f32.mrf.mxu0  ;;  %v7613_v48 = vpop.f32.mrf.mxu1 }
 0x611   :  { %v7534_v42 = vpop.f32.mrf.mxu0  ;;  %v7615_v39 = vpop.f32.mrf.mxu1 }
 0x613   :  { %v20157_v53 = vpop.f32.mrf.mxu0  ;;  %v20159_v11 = vpop.f32.mrf.mxu1 }
 0x615   :  { %v7540_v28 = vpop.f32.mrf.mxu0  ;;  %v7621_v47 = vpop.f32.mrf.mxu1 }
 0x617   :  { %v7542_v57 = vpop.f32.mrf.mxu0  ;;  %v7623_v20 = vpop.f32.mrf.mxu1 }
 0x619   :  { %v7544_v21 = vpop.f32.mrf.mxu0  ;;  %v7625_v41 = vpop.f32.mrf.mxu1 }
 0x61b   :  { %v20161_v59 = vpop.f32.mrf.mxu0  ;;  %v20163_v63 = vpop.f32.mrf.mxu1 }
 0x61d   :  { %v7550_v40 = vpop.f32.mrf.mxu0  ;;  %v7631_v31 = vpop.f32.mrf.mxu1 }
 0x61f   :  { %v7552_v33 = vpop.f32.mrf.mxu0  ;;  %v7633_v22 = vpop.f32.mrf.mxu1 }
 0x621   :  { %v7554_v54 = vpop.f32.mrf.mxu0  ;;  %v7635_v14 = vpop.f32.mrf.mxu1 }
 0x623   :  { %v20165_v10 = vpop.f32.mrf.mxu0  ;;  %v20167_v45 = vpop.f32.mrf.mxu1 }
 0x625   :  { %v20169_v19 = vpop.f32.mrf.mxu0  ;;  %v20171_v25 = vpop.f32.mrf.mxu1 }
 0x627   :  { %v20173_v16 = vpop.f32.mrf.mxu0  ;;  %v20175_v29 = vpop.f32.mrf.mxu1 }
 0x629   :  { %v7564_v5 = vpop.f32.mrf.mxu0  ;;  %v7645_v43 = vpop.f32.mrf.mxu1 }
 0x62b   :  { %v7565_v38 = vpop.f32.mrf.mxu0  ;;  %v7646_v26 = vpop.f32.mrf.mxu1 }
 0x642   :  { %v20179_v18 = vpop.f32.mrf.mxu0  ;;  %v20181_v15 = vpop.f32.mrf.mxu1 }
 0x644   :  { %v20183_v17 = vpop.f32.mrf.mxu0  ;;  %v20185_v27 = vpop.f32.mrf.mxu1 }
 0x646   :  { %v20187_v32 = vpop.f32.mrf.mxu0  ;;  %v20189_v58 = vpop.f32.mrf.mxu1 }
 0x648   :  { %v20191_v9 = vpop.f32.mrf.mxu0  ;;  %v20193_v36 = vpop.f32.mrf.mxu1 }
 0x64a   :  { %v8027_v30 = vpop.f32.mrf.mxu0  ;;  %v8108_v23 = vpop.f32.mrf.mxu1 }
 0x64b   :  { %v20195_v55 = vadd.f32 %v8027_v30, %v7530_v34  ;;  %v20197_v52 = vadd.f32 %v8108_v23, %v7611_v37 }
 0x64c   :  { %v8029_v7 = vpop.f32.mrf.mxu0  ;;  %v8110_v2 = vpop.f32.mrf.mxu1 }
 0x64d   :  { %v20199_v50 = vadd.f32 %v8029_v7, %v7532_v60  ;;  %v20201_v56 = vadd.f32 %v8110_v2, %v7613_v48 }
 0x64e   :  { %v8031_v1 = vpop.f32.mrf.mxu0  ;;  %v8112_v6 = vpop.f32.mrf.mxu1 }
 0x64f   :  { %v20203_v35 = vadd.f32 %v8031_v1, %v7534_v42  ;;  %v20205_v61 = vadd.f32 %v8112_v6, %v7615_v39 }
 0x650   :  { %v20207_v8 = vpop.f32.mrf.mxu0  ;;  %v20209_v44 = vpop.f32.mrf.mxu1 }
 0x652   :  { %v8037_v34 = vpop.f32.mrf.mxu0  ;;  %v8118_v5 = vpop.f32.mrf.mxu1 }
 0x653   :  { %v20211_v37 = vadd.f32 %v8037_v34, %v7540_v28  ;;  %v20213_v43 = vadd.f32 %v8118_v5, %v7621_v47 }
 0x654   :  { %v8039_v60 = vpop.f32.mrf.mxu0  ;;  %v8120_v38 = vpop.f32.mrf.mxu1 }
 0x655   :  { %v20215_v48 = vadd.f32 %v8039_v60, %v7542_v57  ;;  %v20217_v26 = vadd.f32 %v8120_v38, %v7623_v20 }
 0x656   :  { %v8041_v42 = vpop.f32.mrf.mxu0  ;;  %v8122_v30 = vpop.f32.mrf.mxu1 }
 0x657   :  { %v20219_v39 = vadd.f32 %v8041_v42, %v7544_v21  ;;  %v20221_v23 = vadd.f32 %v8122_v30, %v7625_v41 }
 0x658   :  { %v20223_v7 = vpop.f32.mrf.mxu0  ;;  %v20225_v2 = vpop.f32.mrf.mxu1 }
 0x65a   :  { %v8047_v28 = vpop.f32.mrf.mxu0  ;;  %v8128_v1 = vpop.f32.mrf.mxu1 }
 0x65b   :  { %v20227_v47 = vadd.f32 %v8047_v28, %v7550_v40  ;;  %v20229_v6 = vadd.f32 %v8128_v1, %v7631_v31 }
 0x65c   :  { %v8049_v57 = vpop.f32.mrf.mxu0  ;;  %v8130_v34 = vpop.f32.mrf.mxu1 }
 0x65d   :  { %v20231_v20 = vadd.f32 %v8049_v57, %v7552_v33  ;;  %v20233_v5 = vadd.f32 %v8130_v34, %v7633_v22 }
 0x65e   :  { %v8051_v21 = vpop.f32.mrf.mxu0  ;;  %v8132_v60 = vpop.f32.mrf.mxu1 }
 0x65f   :  { %v20235_v41 = vadd.f32 %v8051_v21, %v7554_v54  ;;  %v20237_v38 = vadd.f32 %v8132_v60, %v7635_v14 }
 0x660   :  { %v20239_v42 = vpop.f32.mrf.mxu0  ;;  %v20241_v30 = vpop.f32.mrf.mxu1 }
 0x662   :  { %v8057_v40 = vpop.f32.mrf.mxu0  ;;  %v8138_v28 = vpop.f32.mrf.mxu1 }
 0x663   :  { %v20244_v31 = vadd.f32 %v8057_v40, %v20169_v19  ;;  %v20247_v33 = vadd.f32 %v8138_v28, %v20171_v25  ;;  %v8762_v19 = vld [vmem:[%s20739_s6] sm:$0xf]  ;;  %v8018_v25 = vadd.f32 %v20179_v18, %v20141_v12  ;;  %v8099_v40 = vadd.f32 %v20181_v15, %v20143_v4 }
 0x664   :  { %v8059_v22 = vpop.f32.mrf.mxu0  ;;  %v8140_v1 = vpop.f32.mrf.mxu1  ;;  %v21109_v4 = vsub.s32 1, %v19461_v13 }
 0x665   :  { %v20250_v57 = vadd.f32 %v8059_v22, %v20173_v16  ;;  %v20253_v54 = vadd.f32 %v8140_v1, %v20175_v29  ;;  %v21107_v16 = vsub.s32 0, %v19461_v13  ;;  %v21108_v1 = vsub.s32 2, %v19461_v13 }
 0x666   :  { %v8061_v14 = vpop.f32.mrf.mxu0  ;;  %v8142_v34 = vpop.f32.mrf.mxu1  ;;  %v20276_v15 = vrot.slane %v8762_v19, %v21109_v4  ;;  %v8105_v13 = vadd.f32 %v20193_v36, %v20155_v49 }
 0x667   :  { %21105 = vst [vmem:[#allocation64_spill] sm:$0xff] %v20250_v57  ;;  %21106 = vst [vmem:[#allocation65_spill] sm:$0xff] %v20253_v54  ;;  %v20264_v22 = vrot.slane %v8762_v19, %v21107_v16  ;;  %v20268_v14 = vrot.slane %v8762_v19, %v21108_v1  ;;  %v8020_v34 = vadd.f32 %v20183_v17, %v20145_v24 }
 0x668   :  { %v8062_v21 = vpop.f32.mrf.mxu0  ;;  %v8143_v60 = vpop.f32.mrf.mxu1  ;;  %v20280_v54 = vrot.slane %v8762_v19, %v21110_v51  ;;  %v8022_v24 = vadd.f32 %v20187_v32, %v20149_v0 }
 0x669   :  { %v8101_v21 = vadd.f32 %v20185_v27, %v20147_v3  ;;  %v8103_v3 = vadd.f32 %v20189_v58, %v20151_v62 }
 0x683   :  { %v8598_v28 = vpop.f32.mrf.mxu0  ;;  %v8679_v29 = vpop.f32.mrf.mxu1 }
 0x684   :  { %v8726_v12 = vadd.f32 %v8598_v28, %v8018_v25  ;;  %v8728_v18 = vadd.f32 %v8679_v29, %v8099_v40  ;;  %v8024_v28 = vadd.f32 %v20191_v9, %v20153_v46 }
 0x685   :  { %v8600_v60 = vpop.f32.mrf.mxu0  ;;  %v8681_v16 = vpop.f32.mrf.mxu1 }
 0x686   :  { %v8727_v1 = vadd.f32 %v8600_v60, %v8020_v34  ;;  %v8729_v57 = vadd.f32 %v8681_v16, %v8101_v21  ;;  %v8784_v17 = vadd.f32 %v20264_v22, %v8726_v12  ;;  %v8786_v27 = vadd.f32 %v20268_v14, %v8728_v18 }
 0x687   :  { %v8602_v25 = vpop.f32.mrf.mxu0  ;;  %v8683_v40 = vpop.f32.mrf.mxu1 }
 0x688   :  { %v8785_v51 = vadd.f32 %v20276_v15, %v8727_v1  ;;  %v8787_v19 = vadd.f32 %v20280_v54, %v8729_v57  ;;  %v8730_v0 = vadd.f32 %v8602_v25, %v8022_v24  ;;  %v8732_v32 = vadd.f32 %v8683_v40, %v8103_v3 }
 0x689   :  { %v8604_v29 = vpop.f32.mrf.mxu0  ;;  %v8685_v62 = vpop.f32.mrf.mxu1  ;;  %v8820_v21 = vmax.f32 %v8784_v17, 0.0  ;;  %v8822_v12 = vmax.f32 %v8786_v27, 0.0 }
 0x68a   :  { %v8731_v58 = vadd.f32 %v8604_v29, %v8024_v28  ;;  %v8733_v34 = vadd.f32 %v8685_v62, %v8105_v13  ;;  %v8788_v18 = vadd.f32 %v20264_v22, %v8730_v0  ;;  %v8790_v60 = vadd.f32 %v20268_v14, %v8732_v32 }
 0x68b   :  { %v8608_v46 = vpop.f32.mrf.mxu0  ;;  %v8689_v9 = vpop.f32.mrf.mxu1  ;;  %v8821_v16 = vmax.f32 %v8785_v51, 0.0  ;;  %v8823_v1 = vmax.f32 %v8787_v19, 0.0  ;;  %v8034_v29 = vadd.f32 %v20207_v8, %v20157_v53  ;;  %v8115_v62 = vadd.f32 %v20209_v44, %v20159_v11 }
 0x68c   :  { %v8789_v49 = vadd.f32 %v20276_v15, %v8731_v58  ;;  %v8791_v36 = vadd.f32 %v20280_v54, %v8733_v34  ;;  %v8734_v57 = vadd.f32 %v8608_v46, %v20195_v55  ;;  %v8736_v4 = vadd.f32 %v8689_v9, %v20197_v52 }
 0x68d   :  { %v8824_v24 = vmax.f32 %v8788_v18, 0.0  ;;  %v8826_v3 = vmax.f32 %v8790_v60, 0.0  ;;  %v8610_v17 = vpop.f32.mrf.mxu0  ;;  %v8691_v27 = vpop.f32.mrf.mxu1 }
 0x68e   :  { %v8825_v25 = vmax.f32 %v8789_v49, 0.0  ;;  %v8827_v40 = vmax.f32 %v8791_v36, 0.0  ;;  %v8792_v28 = vadd.f32 %v20264_v22, %v8734_v57  ;;  %v8794_v13 = vadd.f32 %v20268_v14, %v8736_v4 }
 0x68f   :  { %v20302_v0 = vpack.c.bf16 %v8824_v24, %v8820_v21  ;;  %v20304_v32 = vpack.c.bf16 %v8826_v3, %v8822_v12  ;;  %v8735_v55 = vadd.f32 %v8610_v17, %v20199_v50  ;;  %v8737_v52 = vadd.f32 %v8691_v27, %v20201_v56  ;;  %v8612_v51 = vpop.f32.mrf.mxu0  ;;  %v8693_v19 = vpop.f32.mrf.mxu1 }
 0x690   :  { %v8738_v58 = vadd.f32 %v8612_v51, %v20203_v35  ;;  %v8740_v34 = vadd.f32 %v8693_v19, %v20205_v61  ;;  %v20316_v60 = vpack.c.bf16 %v8825_v25, %v8821_v16  ;;  %v20318_v56 = vpack.c.bf16 %v8827_v40, %v8823_v1 }
 0x691   :  { %v8793_v21 = vadd.f32 %v20276_v15, %v8735_v55  ;;  %v8795_v12 = vadd.f32 %v20280_v54, %v8737_v52  ;;  %v8614_v18 = vpop.f32.mrf.mxu0  ;;  %v8695_v50 = vpop.f32.mrf.mxu1  ;;  %v8044_v35 = vadd.f32 %v20223_v7, %v20161_v59  ;;  %v8125_v61 = vadd.f32 %v20225_v2, %v20163_v63 }
 0x692   :  { %v8796_v46 = vadd.f32 %v20264_v22, %v8738_v58  ;;  %v8798_v53 = vadd.f32 %v20268_v14, %v8740_v34  ;;  %v8739_v8 = vadd.f32 %v8614_v18, %v8034_v29  ;;  %v8741_v11 = vadd.f32 %v8695_v50, %v8115_v62 }
 0x693   :  { %v8828_v44 = vmax.f32 %v8792_v28, 0.0  ;;  %v8830_v9 = vmax.f32 %v8794_v13, 0.0  ;;  %v8618_v49 = vpop.f32.mrf.mxu0  ;;  %v8699_v36 = vpop.f32.mrf.mxu1  ;;  %v8829_v24 = vmax.f32 %v8793_v21, 0.0  ;;  %v8831_v3 = vmax.f32 %v8795_v12, 0.0 }
 0x694   :  { %v8832_v57 = vmax.f32 %v8796_v46, 0.0  ;;  %v8834_v4 = vmax.f32 %v8798_v53, 0.0  ;;  %v8797_v16 = vadd.f32 %v20276_v15, %v8739_v8  ;;  %v8799_v1 = vadd.f32 %v20280_v54, %v8741_v11 }
 0x695   :  { %v8742_v17 = vadd.f32 %v8618_v49, %v20211_v37  ;;  %v8744_v27 = vadd.f32 %v8699_v36, %v20213_v43  ;;  %v8620_v59 = vpop.f32.mrf.mxu0  ;;  %v8701_v7 = vpop.f32.mrf.mxu1 }
 0x696   :  { %v20330_v25 = vpack.c.bf16 %v8832_v57, %v8828_v44  ;;  %v20332_v63 = vpack.c.bf16 %v8834_v4, %v8830_v9  ;;  %v8833_v2 = vmax.f32 %v8797_v16, 0.0  ;;  %v8835_v40 = vmax.f32 %v8799_v1, 0.0 }
 0x697   :  { %v8800_v28 = vadd.f32 %v20264_v22, %v8742_v17  ;;  %v8802_v13 = vadd.f32 %v20268_v14, %v8744_v27  ;;  %v8743_v55 = vadd.f32 %v8620_v59, %v20215_v48  ;;  %v8745_v52 = vadd.f32 %v8701_v7, %v20217_v26  ;;  %v8622_v51 = vpop.f32.mrf.mxu0  ;;  %v8703_v37 = vpop.f32.mrf.mxu1 }
 0x698   :  { %v8746_v43 = vadd.f32 %v8622_v51, %v20219_v39  ;;  %v8748_v19 = vadd.f32 %v8703_v37, %v20221_v23  ;;  %v20340_v29 = vpack.c.bf16 %v8833_v2, %v8829_v24  ;;  %v20342_v62 = vpack.c.bf16 %v8835_v40, %v8831_v3 }
 0x699   :  { %v8801_v58 = vadd.f32 %v20276_v15, %v8743_v55  ;;  %v8803_v34 = vadd.f32 %v20280_v54, %v8745_v52  ;;  %v8624_v21 = vpop.f32.mrf.mxu0  ;;  %v8705_v12 = vpop.f32.mrf.mxu1  ;;  %v8054_v39 = vadd.f32 %v20239_v42, %v20165_v10  ;;  %v8135_v23 = vadd.f32 %v20241_v30, %v20167_v45 }
 0x69a   :  { %v8804_v48 = vadd.f32 %v20264_v22, %v8746_v43  ;;  %v8806_v26 = vadd.f32 %v20268_v14, %v8748_v19  ;;  %v8747_v18 = vadd.f32 %v8624_v21, %v8044_v35  ;;  %v8749_v50 = vadd.f32 %v8705_v12, %v8125_v61 }
 0x69b   :  { %v8836_v46 = vmax.f32 %v8800_v28, 0.0  ;;  %v8838_v53 = vmax.f32 %v8802_v13, 0.0  ;;  %v8628_v8 = vpop.f32.mrf.mxu0  ;;  %v8709_v11 = vpop.f32.mrf.mxu1  ;;  %v8837_v57 = vmax.f32 %v8801_v58, 0.0  ;;  %v8839_v4 = vmax.f32 %v8803_v34, 0.0 }
 0x69c   :  { %v8840_v44 = vmax.f32 %v8804_v48, 0.0  ;;  %v8842_v9 = vmax.f32 %v8806_v26, 0.0  ;;  %v8805_v49 = vadd.f32 %v20276_v15, %v8747_v18  ;;  %v8807_v36 = vadd.f32 %v20280_v54, %v8749_v50 }
 0x69d   :  { %v8750_v35 = vadd.f32 %v8628_v8, %v20227_v47  ;;  %v8752_v61 = vadd.f32 %v8709_v11, %v20229_v6  ;;  %v8630_v10 = vpop.f32.mrf.mxu0  ;;  %v8711_v42 = vpop.f32.mrf.mxu1 }
 0x69e   :  { %v20356_v16 = vpack.c.bf16 %v8840_v44, %v8836_v46  ;;  %v20358_v45 = vpack.c.bf16 %v8842_v9, %v8838_v53  ;;  %v8841_v30 = vmax.f32 %v8805_v49, 0.0  ;;  %v8843_v1 = vmax.f32 %v8807_v36, 0.0  ;;  %v21111_v49 = vld [vmem:[#allocation64_spill] sm:$0xff] }
 0x69f   :  { %v8808_v24 = vadd.f32 %v20264_v22, %v8750_v35  ;;  %v8810_v3 = vadd.f32 %v20268_v14, %v8752_v61  ;;  %v8751_v17 = vadd.f32 %v8630_v10, %v20231_v20  ;;  %v8753_v27 = vadd.f32 %v8711_v42, %v20233_v5  ;;  %v8632_v59 = vpop.f32.mrf.mxu0  ;;  %v8713_v47 = vpop.f32.mrf.mxu1 }
 0x6a0   :  { %v8754_v6 = vadd.f32 %v8632_v59, %v20235_v41  ;;  %v8756_v7 = vadd.f32 %v8713_v47, %v20237_v38  ;;  %v8865_v2 = vpack.c.bf16 %v8841_v30, %v8837_v57  ;;  %v8867_v40 = vpack.c.bf16 %v8843_v1, %v8839_v4  ;;  %v21112_v57 = vld [vmem:[#allocation65_spill] sm:$0xff] }
 0x6a1   :  { %v8809_v28 = vadd.f32 %v20276_v15, %v8751_v17  ;;  %v8811_v13 = vadd.f32 %v20280_v54, %v8753_v27  ;;  %v8634_v55 = vpop.f32.mrf.mxu0  ;;  %v8715_v52 = vpop.f32.mrf.mxu1  ;;  %v8844_v43 = vmax.f32 %v8808_v24, 0.0  ;;  %v8846_v19 = vmax.f32 %v8810_v3, 0.0 }
 0x6a2   :  { %v8812_v51 = vadd.f32 %v20264_v22, %v8754_v6  ;;  %v8814_v20 = vadd.f32 %v20268_v14, %v8756_v7  ;;  %v8755_v37 = vadd.f32 %v8634_v55, %v8054_v39  ;;  %v8757_v5 = vadd.f32 %v8715_v52, %v8135_v23  ;;  %v16256_v55 = vld [vmem:[#allocation8 + $0x284] ss:$16 sps:$4 sm:$0xff]   ;;  %v16251_v52 = vld [vmem:[#allocation8 + $0x80] ss:$16 sps:$4 sm:$0xff]  }
 0x6a3   :  { %v8638_v58 = vpop.f32.mrf.mxu0  ;;  %v8719_v41 = vpop.f32.mrf.mxu1  ;;  %v8845_v48 = vmax.f32 %v8809_v28, 0.0  ;;  %v8847_v26 = vmax.f32 %v8811_v13, 0.0  ;;  %v16248_v28 = vld [vmem:[#allocation8 + $0x2a0] ss:$16 sps:$4 sm:$0xff]   ;;  %v16253_v13 = vld [vmem:[#allocation8 + $0x84] ss:$16 sps:$4 sm:$0xff]  }
 0x6a4   :  { %v8848_v34 = vmax.f32 %v8812_v51, 0.0  ;;  %v8850_v38 = vmax.f32 %v8814_v20, 0.0  ;;  %v8813_v21 = vadd.f32 %v20276_v15, %v8755_v37  ;;  %v8815_v12 = vadd.f32 %v20280_v54, %v8757_v5  ;;  %v16254_v51 = vld [vmem:[#allocation8 + $0x280] ss:$16 sps:$4 sm:$0xff]   ;;  %v16259_v20 = vld [vmem:[#allocation8 + $0x64] ss:$16 sps:$4 sm:$0xff]  }
 0x6a5   :  { %v8758_v18 = vadd.f32 %v8638_v58, %v20244_v31  ;;  %v8760_v50 = vadd.f32 %v8719_v41, %v20247_v33  ;;  %v8640_v46 = vpop.f32.mrf.mxu0  ;;  %v8721_v53 = vpop.f32.mrf.mxu1  ;;  %v16262_v37 = vld [vmem:[#allocation8 + $0x264] ss:$16 sps:$4 sm:$0xff]   ;;  %v16231_v5 = vld [vmem:[%s20740_s7 + $0x10] sm:$0xff]  }
 0x6a6   :  { %v8868_v39 = vpack.c.bf16 %v8848_v34, %v8844_v43  ;;  %v8870_v23 = vpack.c.bf16 %v8850_v38, %v8846_v19  ;;  %v8849_v8 = vmax.f32 %v8813_v21, 0.0  ;;  %v8851_v11 = vmax.f32 %v8815_v12, 0.0  ;;  %v16257_v43 = vld [vmem:[#allocation8 + $0x60] ss:$16 sps:$4 sm:$0xff]   ;;  %v16265_v58 = vld [vmem:[#allocation8 + $0x44] ss:$16 sps:$4 sm:$0xff]  }
 0x6a7   :  { %v8816_v44 = vadd.f32 %v20264_v22, %v8758_v18  ;;  %v8818_v9 = vadd.f32 %v20268_v14, %v8760_v50  ;;  %v8759_v36 = vadd.f32 %v8640_v46, %v21111_v49  ;;  %v8761_v4 = vadd.f32 %v8721_v53, %v21112_v57  ;;  %v8642_v35 = vpop.f32.mrf.mxu0  ;;  %v8723_v61 = vpop.f32.mrf.mxu1  ;;  %v16260_v19 = vld [vmem:[#allocation8 + $0x260] ss:$16 sps:$4 sm:$0xff]   ;;  %v16268_v41 = vld [vmem:[#allocation8 + $0x244] ss:$16 sps:$4 sm:$0xff]  }
 0x6a8   :  { %v8869_v10 = vpack.c.bf16 %v8849_v8, %v8845_v48  ;;  %v8871_v31 = vpack.c.bf16 %v8851_v11, %v8847_v26  ;;  %v16263_v34 = vld [vmem:[#allocation8 + $0x40] ss:$16 sps:$4 sm:$0xff]   ;;  %v16271_v21 = vld [vmem:[#allocation8 + $0x24] ss:$16 sps:$4 sm:$0xff]  }
 0x6a9   :  { %v8852_v42 = vmax.f32 %v8816_v44, 0.0  ;;  %v8854_v33 = vmax.f32 %v8818_v9, 0.0  ;;  %v8817_v30 = vadd.f32 %v20276_v15, %v8759_v36  ;;  %v8819_v1 = vadd.f32 %v20280_v54, %v8761_v4  ;;  %v8643_v24 = vpop.f32.mrf.mxu0  ;;  %v8724_v3 = vpop.f32.mrf.mxu1  ;;  %v16235_v54 = vld [vmem:[#allocation8 + $0xe4] ss:$16 sps:$4 sm:$0xff]   ;;  %v16266_v38 = vld [vmem:[#allocation8 + $0x240] ss:$16 sps:$4 sm:$0xff]  }
 0x6aa   :  { %v16238_v15 = vld [vmem:[#allocation8 + $0x2e4] ss:$16 sps:$4 sm:$0xff]   ;;  %v16269_v26 = vld [vmem:[#allocation8 + $0x20] ss:$16 sps:$4 sm:$0xff]  }
 0x6ab   :  { %v8872_v17 = vpack.c.bf16 %v8852_v42, %v8852_v42  ;;  %v8874_v22 = vpack.c.bf16 %v8854_v33, %v8854_v33  ;;  %v8853_v27 = vmax.f32 %v8817_v30, 0.0  ;;  %v8855_v14 = vmax.f32 %v8819_v1, 0.0  ;;  %v16274_v12 = vld [vmem:[#allocation8 + $0x224] ss:$16 sps:$4 sm:$0xff]   ;;  %v16272_v18 = vld [vmem:[#allocation8 + $0x220] ss:$16 sps:$4 sm:$0xff]  }
 0x6ac   :  { %v16232_v48 = vld [vmem:[%s20740_s7 + $0x18] sm:$0xff]  }
 0x6ad   :  { %v8873_v59 = vpack.c.bf16 %v8853_v27, %v8853_v27  ;;  %v8875_v47 = vpack.c.bf16 %v8855_v14, %v8855_v14  ;;  %v8918_v6 = vsel %vm21115_vm15, %v8872_v17, 0  ;;  %v8924_v7 = vsel %vm21116_vm0, %v8874_v22, 0  ;;  %v16277_v50 = vld [vmem:[#allocation8 + $0x4] ss:$16 sps:$4 sm:$0xff]   ;;  %v16275_v53 = vld [vmem:[#allocation8] ss:$16 sps:$4 sm:$0xff]   ;;  %vm21131_vm15 = vmmov %vm21116_vm0 }
 0x6ae   :  { %v16280_v46 = vld [vmem:[#allocation8 + $0x204] ss:$16 sps:$4 sm:$0xff]   ;;  %v16281_v11 = vld [vmem:[#allocation8 + $0x1e0] ss:$16 sps:$4 sm:$0xff]  }
 0x6af   :  { %14295 = vmatprep.subr.msk.bf16.mxu0 %vm21113_vm7, %v8873_v59  ;;  %14300 = vmatprep.subr.msk.bf16.mxu1 %vm21114_vm14, %v8875_v47  ;;  %v16286_v8 = vld [vmem:[#allocation8 + $0x3e4] ss:$16 sps:$4 sm:$0xff]   ;;  %v16284_v44 = vld [vmem:[#allocation8 + $0x3e0] ss:$16 sps:$4 sm:$0xff]   ;;  %vm21129_vm7 = vmmov %vm21116_vm0 }
 0x6b0   :  { %8936 = vmatpush1.bf16.msra.mxu0 %v8918_v6  ;;  %9009 = vmatpush1.bf16.msra.mxu1 %v8924_v7  ;;  %v16289_v9 = vld [vmem:[#allocation8 + $0x1c4] ss:$16 sps:$4 sm:$0xff]   ;;  %v16287_v36 = vld [vmem:[#allocation8 + $0x1c0] ss:$16 sps:$4 sm:$0xff]   ;;  %vm21130_vm14 = vmmov %vm21116_vm0 }
 0x6b1   :  { %8937 = vmatprep.subr.bf16.mxu0 %v8869_v10  ;;  %9010 = vmatprep.subr.bf16.mxu1 %v8871_v31  ;;  %v16292_v49 = vld [vmem:[#allocation8 + $0x3c4] ss:$16 sps:$4 sm:$0xff]   ;;  %v16290_v57 = vld [vmem:[#allocation8 + $0x3c0] ss:$16 sps:$4 sm:$0xff]  }
 0x6b2   :  { %v16293_v4 = vld [vmem:[#allocation8 + $0x1a0] ss:$16 sps:$4 sm:$0xff]   ;;  %v16295_v35 = vld [vmem:[#allocation8 + $0x1a4] ss:$16 sps:$4 sm:$0xff]  }
 0x6b3   :  { %v16296_v61 = vld [vmem:[#allocation8 + $0x3a0] ss:$16 sps:$4 sm:$0xff]   ;;  %v16298_v10 = vld [vmem:[#allocation8 + $0x3a4] ss:$16 sps:$4 sm:$0xff]  }
 0x6b4   :  { %8938 = vmatpush1.bf16.msra.mxu0 %v8868_v39  ;;  %9011 = vmatpush1.bf16.msra.mxu1 %v8870_v23  ;;  %v16278_v39 = vld [vmem:[#allocation8 + $0x200] ss:$16 sps:$4 sm:$0xff]   ;;  %v16283_v23 = vld [vmem:[#allocation8 + $0x1e4] ss:$16 sps:$4 sm:$0xff]  }
 0x6b5   :  { %8939 = vmatprep.subr.bf16.mxu0 %v8865_v2  ;;  %9012 = vmatprep.subr.bf16.mxu1 %v8867_v40  ;;  %v16230_v2 = vld [vmem:[%s20740_s7 + $0x8] sm:$0xff]  }
 0x6b6   :  { %v16245_v40 = vld [vmem:[#allocation8 + $0xa0] ss:$16 sps:$4 sm:$0xff]   ;;  %v16301_v42 = vld [vmem:[#allocation8 + $0x184] ss:$16 sps:$4 sm:$0xff]  }
 0x6b7   :  { %v16299_v31 = vld [vmem:[#allocation8 + $0x180] ss:$16 sps:$4 sm:$0xff]   ;;  %v16304_v30 = vld [vmem:[#allocation8 + $0x384] ss:$16 sps:$4 sm:$0xff]  }
 0x6b8   :  { %8940 = vmatpush1.bf16.msra.mxu0 %v20356_v16  ;;  %9013 = vmatpush1.bf16.msra.mxu1 %v20358_v45  ;;  %v16229_v16 = vld [vmem:[%s20740_s7] sm:$0xff]   ;;  %v16250_v45 = vld [vmem:[#allocation8 + $0x2a4] ss:$16 sps:$4 sm:$0xff]   ;;  %v16302_v33 = vld [vmem:[#allocation8 + $0x380] ss:$16 sps:$4 sm:$0xff]  }
 0x6b9   :  { %8941 = vmatprep.subr.bf16.mxu0 %v20340_v29  ;;  %9014 = vmatprep.subr.bf16.mxu1 %v20342_v62  ;;  %v16233_v29 = vld [vmem:[#allocation8 + $0xe0] ss:$16 sps:$4 sm:$0xff]   ;;  %v16244_v62 = vld [vmem:[#allocation8 + $0x2c4] ss:$16 sps:$4 sm:$0xff]  }
 0x6ba   :  { %v16305_v1 = vld [vmem:[#allocation8 + $0x160] ss:$16 sps:$4 sm:$0xff]   ;;  %v16307_v24 = vld [vmem:[#allocation8 + $0x164] ss:$16 sps:$4 sm:$0xff]  }
 0x6bb   :  { %v16308_v3 = vld [vmem:[#allocation8 + $0x360] ss:$16 sps:$4 sm:$0xff]   ;;  %v16310_v17 = vld [vmem:[#allocation8 + $0x364] ss:$16 sps:$4 sm:$0xff]  }
 0x6bc   :  { %8942 = vmatpush1.bf16.msra.mxu0 %v20330_v25  ;;  %9015 = vmatpush1.bf16.msra.mxu1 %v20332_v63  ;;  %v16236_v25 = vld [vmem:[#allocation8 + $0x2e0] ss:$16 sps:$4 sm:$0xff]   ;;  %v16241_v63 = vld [vmem:[#allocation8 + $0xc4] ss:$16 sps:$4 sm:$0xff]  }
 0x6bd   :  { %8943 = vmatprep.subr.bf16.mxu0 %v20316_v60  ;;  %9016 = vmatprep.subr.bf16.mxu1 %v20318_v56  ;;  %v21117_v60 = vmov 0   ;;  %v16242_v56 = vld [vmem:[#allocation8 + $0x2c0] ss:$16 sps:$4 sm:$0xff]   ;;  %v16313_v27 = vld [vmem:[#allocation8 + $0x144] ss:$16 sps:$4 sm:$0xff]  }
 0x6be   :  { %v16311_v22 = vld [vmem:[#allocation8 + $0x140] ss:$16 sps:$4 sm:$0xff]   ;;  %v16316_v59 = vld [vmem:[#allocation8 + $0x344] ss:$16 sps:$4 sm:$0xff]  }
 0x6bf   :  { %v16314_v14 = vld [vmem:[#allocation8 + $0x340] ss:$16 sps:$4 sm:$0xff]   ;;  %v16319_v6 = vld [vmem:[#allocation8 + $0x124] ss:$16 sps:$4 sm:$0xff]  }
 0x6c0   :  { %8944 = vmatpush1.bf16.msra.mxu0 %v20302_v0  ;;  %9017 = vmatpush1.bf16.msra.mxu1 %v20304_v32  ;;  %v16239_v0 = vld [vmem:[#allocation8 + $0xc0] ss:$16 sps:$4 sm:$0xff]   ;;  %v16247_v32 = vld [vmem:[#allocation8 + $0xa4] ss:$16 sps:$4 sm:$0xff]  }
 0x6c1   :  { %9867 = vmatprep.subr.bf16.mxu0 %v16235_v54  ;;  %9920 = vmatprep.subr.bf16.mxu1 %v16238_v15  ;;  %v16317_v47 = vld [vmem:[#allocation8 + $0x120] ss:$16 sps:$4 sm:$0xff]   ;;  %v16322_v54 = vld [vmem:[#allocation8 + $0x324] ss:$16 sps:$4 sm:$0xff]  }
 0x6c2   :  { %v16320_v7 = vld [vmem:[#allocation8 + $0x320] ss:$16 sps:$4 sm:$0xff]  }
 0x6c3   :  { %14296 = vmatmul.mubr.msk.bf16.vlgmr.msra.gmra.mxu0 %vm8904_vm3, %v16229_v16  ;;  %14301 = vmatmul.mubr.msk.bf16.vlgmr.msra.gmra.mxu1 %vm8904_vm3, %v16229_v16  ;;  %v16323_v15 = vld [vmem:[#allocation8 + $0x100] ss:$16 sps:$4 sm:$0xff]   ;;  %v16325_v16 = vld [vmem:[#allocation8 + $0x104] ss:$16 sps:$4 sm:$0xff]  }
 0x6c4   :  { %8971 = vmatprep.mubr.bf16.mxu0 %v21117_v60  ;;  %9044 = vmatprep.mubr.bf16.mxu1 %v21117_v60 }
 0x6c5   :  { %9868 = vmatpush1.bf16.msra.mxu0 %v16233_v29  ;;  %9921 = vmatpush1.bf16.msra.mxu1 %v16236_v25  ;;  %v16326_v29 = vld [vmem:[#allocation8 + $0x300] ss:$16 sps:$4 sm:$0xff]   ;;  %v16328_v25 = vld [vmem:[#allocation8 + $0x304] ss:$16 sps:$4 sm:$0xff]  }
 0x6c6   :  { %9869 = vmatprep.subr.bf16.mxu0 %v16241_v63  ;;  %9922 = vmatprep.subr.bf16.mxu1 %v16244_v62  ;;  %v16331_v63 = vld [vmem:[#allocation8 + $0xec] ss:$16 sps:$4 sm:$0xff]  }
 0x6c7   :  { %v16334_v62 = vld [vmem:[#allocation8 + $0x2ec] ss:$16 sps:$4 sm:$0xff]  }
 0x6c9   :  { %9870 = vmatpush1.bf16.msra.mxu0 %v16239_v0  ;;  %9923 = vmatpush1.bf16.msra.mxu1 %v16242_v56 }
 0x6ca   :  { %9871 = vmatprep.subr.bf16.mxu0 %v16247_v32  ;;  %9924 = vmatprep.subr.bf16.mxu1 %v16250_v45 }
 0x6cb   :  { %14297 = vmatmul.mubr.msk.bf16.gmra.mxu0 %vm8904_vm3, %v16230_v2  ;;  %14302 = vmatmul.mubr.msk.bf16.gmra.mxu1 %vm8904_vm3, %v16230_v2 }
 0x6cc   :  { %8981 = vmatprep.mubr.bf16.mxu0 %v21117_v60  ;;  %9054 = vmatprep.mubr.bf16.mxu1 %v21117_v60 }
 0x6cd   :  { %9872 = vmatpush1.bf16.msra.mxu0 %v16245_v40  ;;  %9925 = vmatpush1.bf16.msra.mxu1 %v16248_v28 }
 0x6ce   :  { %9873 = vmatprep.subr.bf16.mxu0 %v16253_v13  ;;  %9926 = vmatprep.subr.bf16.mxu1 %v16256_v55 }
 0x6d1   :  { %9874 = vmatpush1.bf16.msra.mxu0 %v16251_v52  ;;  %9927 = vmatpush1.bf16.msra.mxu1 %v16254_v51 }
 0x6d2   :  { %9875 = vmatprep.subr.bf16.mxu0 %v16259_v20  ;;  %9928 = vmatprep.subr.bf16.mxu1 %v16262_v37 }
 0x6d3   :  { %14298 = vmatmul.mubr.msk.bf16.gmra.mxu0 %vm8904_vm3, %v16231_v5  ;;  %14303 = vmatmul.mubr.msk.bf16.gmra.mxu1 %vm8904_vm3, %v16231_v5 }
 0x6d4   :  { %8991 = vmatprep.mubr.bf16.mxu0 %v21117_v60  ;;  %9064 = vmatprep.mubr.bf16.mxu1 %v21117_v60 }
 0x6d5   :  { %9876 = vmatpush1.bf16.msra.mxu0 %v16257_v43  ;;  %9929 = vmatpush1.bf16.msra.mxu1 %v16260_v19 }
 0x6d6   :  { %9877 = vmatprep.subr.bf16.mxu0 %v16265_v58  ;;  %9930 = vmatprep.subr.bf16.mxu1 %v16268_v41 }
 0x6d9   :  { %9878 = vmatpush1.bf16.msra.mxu0 %v16263_v34  ;;  %9931 = vmatpush1.bf16.msra.mxu1 %v16266_v38 }
 0x6da   :  { %9879 = vmatprep.subr.bf16.mxu0 %v16271_v21  ;;  %9932 = vmatprep.subr.bf16.mxu1 %v16274_v12 }
 0x6db   :  { %14299 = vmatmul.mubr.msk.bf16.gmra.mxu0 %vm8904_vm3, %v16232_v48  ;;  %14304 = vmatmul.mubr.msk.bf16.gmra.mxu1 %vm8904_vm3, %v16232_v48  ;;  %vm21132_vm3 = vmmov %vm21116_vm0 }
 0x6dd   :  { %9880 = vmatpush1.bf16.msra.mxu0 %v16269_v26  ;;  %9933 = vmatpush1.bf16.msra.mxu1 %v16272_v18 }
 0x6de   :  { %9881 = vmatprep.subr.bf16.mxu0 %v16277_v50  ;;  %9934 = vmatprep.subr.bf16.mxu1 %v16280_v46 }
 0x6e1   :  { %9882 = vmatpush1.bf16.msra.mxu0 %v16275_v53  ;;  %9935 = vmatpush1.bf16.msra.mxu1 %v16278_v39 }
 0x6e2   :  { %9883 = vmatprep.subr.bf16.mxu0 %v16283_v23  ;;  %9936 = vmatprep.subr.bf16.mxu1 %v16286_v8 }
 0x6e5   :  { %9884 = vmatpush2.bf16.msra.mxu0 %v16281_v11  ;;  %9937 = vmatpush2.bf16.msra.mxu1 %v16284_v44 }
 0x6e6   :  { %9885 = vmatprep.subr.bf16.mxu0 %v16289_v9  ;;  %9938 = vmatprep.subr.bf16.mxu1 %v16292_v49 }
 0x6e9   :  { %9886 = vmatpush2.bf16.msra.mxu0 %v16287_v36  ;;  %9939 = vmatpush2.bf16.msra.mxu1 %v16290_v57  ;;  %v16329_v36 = vld [vmem:[#allocation8 + $0xe8] ss:$16 sps:$4 sm:$0xff]  }
 0x6ea   :  { %9887 = vmatprep.subr.bf16.mxu0 %v16295_v35  ;;  %9940 = vmatprep.subr.bf16.mxu1 %v16298_v10  ;;  %v16332_v57 = vld [vmem:[#allocation8 + $0x2e8] ss:$16 sps:$4 sm:$0xff]  }
 0x6ed   :  { %9888 = vmatpush2.bf16.msra.mxu0 %v16293_v4  ;;  %9941 = vmatpush2.bf16.msra.mxu1 %v16296_v61 }
 0x6ee   :  { %9889 = vmatprep.subr.bf16.mxu0 %v16301_v42  ;;  %9942 = vmatprep.subr.bf16.mxu1 %v16304_v30  ;;  %v16340_v42 = vld [vmem:[#allocation8 + $0x2cc] ss:$16 sps:$4 sm:$0xff]  }
 0x6f1   :  { %9890 = vmatpush2.bf16.msra.mxu0 %v16299_v31  ;;  %9943 = vmatpush2.bf16.msra.mxu1 %v16302_v33  ;;  %v16337_v31 = vld [vmem:[#allocation8 + $0xcc] ss:$16 sps:$4 sm:$0xff]  }
 0x6f2   :  { %9891 = vmatprep.subr.bf16.mxu0 %v16307_v24  ;;  %9944 = vmatprep.subr.bf16.mxu1 %v16310_v17  ;;  %v16338_v24 = vld [vmem:[#allocation8 + $0x2c8] ss:$16 sps:$4 sm:$0xff]  }
 0x6f5   :  { %9892 = vmatpush2.bf16.msra.mxu0 %v16305_v1  ;;  %9945 = vmatpush2.bf16.msra.mxu1 %v16308_v3  ;;  %v16335_v1 = vld [vmem:[#allocation8 + $0xc8] ss:$16 sps:$4 sm:$0xff]  }
 0x6f6   :  { %9893 = vmatprep.subr.bf16.mxu0 %v16313_v27  ;;  %9946 = vmatprep.subr.bf16.mxu1 %v16316_v59  ;;  %v16346_v59 = vld [vmem:[#allocation8 + $0x2ac] ss:$16 sps:$4 sm:$0xff]  }
 0x6f9   :  { %9894 = vmatpush2.bf16.msra.mxu0 %v16311_v22  ;;  %9947 = vmatpush2.bf16.msra.mxu1 %v16314_v14  ;;  %v16343_v14 = vld [vmem:[#allocation8 + $0xac] ss:$16 sps:$4 sm:$0xff]  }
 0x6fa   :  { %9895 = vmatprep.subr.bf16.mxu0 %v16319_v6  ;;  %9948 = vmatprep.subr.bf16.mxu1 %v16322_v54 }
 0x6fd   :  { %9896 = vmatpush2.bf16.msra.mxu0 %v16317_v47  ;;  %9949 = vmatpush2.bf16.msra.mxu1 %v16320_v7 }
 0x6fe   :  { %9897 = vmatprep.subr.bf16.mxu0 %v16325_v16  ;;  %9950 = vmatprep.subr.bf16.mxu1 %v16328_v25 }
 0x701   :  { %9898 = vmatpush2.bf16.msra.mxu0 %v16323_v15  ;;  %9951 = vmatpush2.bf16.msra.mxu1 %v16326_v29 }
 0x702   :  { %9973 = vmatprep.subr.bf16.mxu0 %v16331_v63  ;;  %10026 = vmatprep.subr.bf16.mxu1 %v16334_v62  ;;  %v16341_v63 = vld [vmem:[#allocation8 + $0xa8] ss:$16 sps:$4 sm:$0xff]  }
 0x703   :  { %v16344_v62 = vld [vmem:[#allocation8 + $0x2a8] ss:$16 sps:$4 sm:$0xff]  }
 0x783   :  { %v8963_v60 = vpop.f32.mrf.mxu0  ;;  %v9036_v0 = vpop.f32.mrf.mxu1 }
 0x785   :  { %v8965_v56 = vpop.f32.mrf.mxu0  ;;  %v9038_v32 = vpop.f32.mrf.mxu1 }
 0x787   :  { %v8967_v45 = vpop.f32.mrf.mxu0  ;;  %v9040_v2 = vpop.f32.mrf.mxu1 }
 0x789   :  { %v8969_v40 = vpop.f32.mrf.mxu0  ;;  %v9042_v28 = vpop.f32.mrf.mxu1 }
 0x78b   :  { %v20420_v13 = vpop.f32.mrf.mxu0  ;;  %v20422_v55 = vpop.f32.mrf.mxu1 }
 0x78d   :  { %v8975_v52 = vpop.f32.mrf.mxu0  ;;  %v9048_v51 = vpop.f32.mrf.mxu1 }
 0x78f   :  { %v20424_v20 = vpop.f32.mrf.mxu0  ;;  %v20426_v37 = vpop.f32.mrf.mxu1 }
 0x791   :  { %v8979_v5 = vpop.f32.mrf.mxu0  ;;  %v9052_v43 = vpop.f32.mrf.mxu1 }
 0x793   :  { %v8983_v19 = vpop.f32.mrf.mxu0  ;;  %v9056_v58 = vpop.f32.mrf.mxu1 }
 0x794   :  { %v9075_v23 = vmax.f32 %v8963_v60, %v8983_v19  ;;  %v9077_v8 = vmax.f32 %v9036_v0, %v9056_v58  ;;  %v16365_v19 = vld [vmem:[#allocation8 + $0x28] ss:$16 sps:$4 sm:$0xff]  }
 0x795   :  { %v8985_v41 = vpop.f32.mrf.mxu0  ;;  %v9058_v34 = vpop.f32.mrf.mxu1  ;;  %v16368_v58 = vld [vmem:[#allocation8 + $0x228] ss:$16 sps:$4 sm:$0xff]  }
 0x796   :  { %v9076_v50 = vmax.f32 %v8965_v56, %v8985_v41  ;;  %v9078_v46 = vmax.f32 %v9038_v32, %v9058_v34  ;;  %v16349_v56 = vld [vmem:[#allocation8 + $0x8c] ss:$16 sps:$4 sm:$0xff]  }
 0x797   :  { %v8987_v38 = vpop.f32.mrf.mxu0  ;;  %v9060_v21 = vpop.f32.mrf.mxu1  ;;  %v16352_v32 = vld [vmem:[#allocation8 + $0x28c] ss:$16 sps:$4 sm:$0xff]  }
 0x798   :  { %v9079_v12 = vmax.f32 %v8967_v45, %v8987_v38  ;;  %v9081_v48 = vmax.f32 %v9040_v2, %v9060_v21  ;;  %v16347_v45 = vld [vmem:[#allocation8 + $0x88] ss:$16 sps:$4 sm:$0xff]   ;;  %v16373_v41 = vld [vmem:[#allocation8 + $0xc] ss:$16 sps:$4 sm:$0xff]  }
 0x799   :  { %v8989_v26 = vpop.f32.mrf.mxu0  ;;  %v9062_v18 = vpop.f32.mrf.mxu1  ;;  %v16350_v2 = vld [vmem:[#allocation8 + $0x288] ss:$16 sps:$4 sm:$0xff]   ;;  %v16376_v34 = vld [vmem:[#allocation8 + $0x20c] ss:$16 sps:$4 sm:$0xff]  }
 0x79a   :  { %v9080_v53 = vmax.f32 %v8969_v40, %v8989_v26  ;;  %v9082_v39 = vmax.f32 %v9042_v28, %v9062_v18  ;;  %v20428_v4 = vpack.c.bf16 %v9079_v12, %v9075_v23  ;;  %v20430_v35 = vpack.c.bf16 %v9081_v48, %v9077_v8  ;;  %v16355_v40 = vld [vmem:[#allocation8 + $0x6c] ss:$16 sps:$4 sm:$0xff]   ;;  %v16371_v38 = vld [vmem:[#allocation8 + $0x8] ss:$16 sps:$4 sm:$0xff]  }
 0x79b   :  { %v8993_v11 = vpop.f32.mrf.mxu0  ;;  %v9066_v44 = vpop.f32.mrf.mxu1  ;;  %v16358_v28 = vld [vmem:[#allocation8 + $0x26c] ss:$16 sps:$4 sm:$0xff]   ;;  %v16374_v21 = vld [vmem:[#allocation8 + $0x208] ss:$16 sps:$4 sm:$0xff]  }
 0x79c   :  { %v9092_v9 = vpack.c.bf16 %v9080_v53, %v9076_v50  ;;  %v9094_v49 = vpack.c.bf16 %v9082_v39, %v9078_v46  ;;  %v9083_v15 = vmax.f32 %v20420_v13, %v8993_v11  ;;  %v9085_v16 = vmax.f32 %v20422_v55, %v9066_v44  ;;  %v16353_v13 = vld [vmem:[#allocation8 + $0x68] ss:$16 sps:$4 sm:$0xff]   ;;  %v16379_v12 = vld [vmem:[#allocation8 + $0x1ec] ss:$16 sps:$4 sm:$0xff]  }
 0x79d   :  { %v8995_v61 = vpop.f32.mrf.mxu0  ;;  %v9068_v10 = vpop.f32.mrf.mxu1  ;;  %v16356_v55 = vld [vmem:[#allocation8 + $0x268] ss:$16 sps:$4 sm:$0xff]   ;;  %v16382_v48 = vld [vmem:[#allocation8 + $0x3ec] ss:$16 sps:$4 sm:$0xff]  }
 0x79e   :  { %9899 = vmatprep.mubr.bf16.mxu0 %v9092_v9  ;;  %9952 = vmatprep.mubr.bf16.mxu1 %v9094_v49  ;;  %v9084_v47 = vmax.f32 %v8975_v52, %v8995_v61  ;;  %v9086_v6 = vmax.f32 %v9048_v51, %v9068_v10  ;;  %v16361_v52 = vld [vmem:[#allocation8 + $0x4c] ss:$16 sps:$4 sm:$0xff]   ;;  %v16377_v26 = vld [vmem:[#allocation8 + $0x1e8] ss:$16 sps:$4 sm:$0xff]  }
 0x79f   :  { %9900 = vmatmul.mubr.bf16.vlgmr.msra.gmra.mxu0 %v20428_v4  ;;  %9953 = vmatmul.mubr.bf16.vlgmr.msra.gmra.mxu1 %v20430_v35  ;;  %v8997_v33 = vpop.f32.mrf.mxu0  ;;  %v9070_v30 = vpop.f32.mrf.mxu1  ;;  %v16364_v51 = vld [vmem:[#allocation8 + $0x24c] ss:$16 sps:$4 sm:$0xff]   ;;  %v16380_v18 = vld [vmem:[#allocation8 + $0x3e8] ss:$16 sps:$4 sm:$0xff]  }
 0x7a0   :  { %9974 = vmatpush1.bf16.msra.mxu0 %v16329_v36  ;;  %10027 = vmatpush1.bf16.msra.mxu1 %v16332_v57  ;;  %v9087_v3 = vmax.f32 %v20424_v20, %v8997_v33  ;;  %v9089_v17 = vmax.f32 %v20426_v37, %v9070_v30  ;;  %v16359_v20 = vld [vmem:[#allocation8 + $0x48] ss:$16 sps:$4 sm:$0xff]   ;;  %v16385_v50 = vld [vmem:[#allocation8 + $0x1cc] ss:$16 sps:$4 sm:$0xff]  }
 0x7a1   :  { %9975 = vmatprep.subr.bf16.mxu0 %v16337_v31  ;;  %10028 = vmatprep.subr.bf16.mxu1 %v16340_v42  ;;  %v8999_v22 = vpop.f32.mrf.mxu0  ;;  %v9072_v27 = vpop.f32.mrf.mxu1  ;;  %v16362_v37 = vld [vmem:[#allocation8 + $0x248] ss:$16 sps:$4 sm:$0xff]   ;;  %v16388_v46 = vld [vmem:[#allocation8 + $0x3cc] ss:$16 sps:$4 sm:$0xff]  }
 0x7a2   :  { %v9088_v7 = vmax.f32 %v8979_v5, %v8999_v22  ;;  %v9090_v54 = vmax.f32 %v9052_v43, %v9072_v27  ;;  %v20442_v60 = vpack.c.bf16 %v9087_v3, %v9083_v15  ;;  %v20444_v0 = vpack.c.bf16 %v9089_v17, %v9085_v16  ;;  %v16367_v5 = vld [vmem:[#allocation8 + $0x2c] ss:$16 sps:$4 sm:$0xff]   ;;  %v16383_v53 = vld [vmem:[#allocation8 + $0x1c8] ss:$16 sps:$4 sm:$0xff]  }
 0x7a3   :  { %v16370_v43 = vld [vmem:[#allocation8 + $0x22c] ss:$16 sps:$4 sm:$0xff]   ;;  %v16386_v39 = vld [vmem:[#allocation8 + $0x3c8] ss:$16 sps:$4 sm:$0xff]  }
 0x7a4   :  { %9976 = vmatpush1.bf16.msra.mxu0 %v16335_v1  ;;  %10029 = vmatpush1.bf16.msra.mxu1 %v16338_v24  ;;  %v20438_v29 = vpack.c.bf16 %v9088_v7, %v9084_v47  ;;  %v20440_v25 = vpack.c.bf16 %v9090_v54, %v9086_v6  ;;  %v16391_v23 = vld [vmem:[#allocation8 + $0x1ac] ss:$16 sps:$4 sm:$0xff]   ;;  %v16389_v11 = vld [vmem:[#allocation8 + $0x1a8] ss:$16 sps:$4 sm:$0xff]  }
 0x7a5   :  { %9977 = vmatprep.subr.bf16.mxu0 %v16343_v14  ;;  %10030 = vmatprep.subr.bf16.mxu1 %v16346_v59  ;;  %v16394_v8 = vld [vmem:[#allocation8 + $0x3ac] ss:$16 sps:$4 sm:$0xff]   ;;  %v16392_v44 = vld [vmem:[#allocation8 + $0x3a8] ss:$16 sps:$4 sm:$0xff]  }
 0x7a6   :  { %9909 = vmatprep.mubr.bf16.mxu0 %v20438_v29  ;;  %9962 = vmatprep.mubr.bf16.mxu1 %v20440_v25  ;;  %v16395_v36 = vld [vmem:[#allocation8 + $0x188] ss:$16 sps:$4 sm:$0xff]   ;;  %v16403_v61 = vld [vmem:[#allocation8 + $0x16c] ss:$16 sps:$4 sm:$0xff]  }
 0x7a7   :  { %9910 = vmatmul.mubr.bf16.gmra.mxu0 %v20442_v60  ;;  %9963 = vmatmul.mubr.bf16.gmra.mxu1 %v20444_v0  ;;  %v16398_v57 = vld [vmem:[#allocation8 + $0x388] ss:$16 sps:$4 sm:$0xff]   ;;  %v16406_v10 = vld [vmem:[#allocation8 + $0x36c] ss:$16 sps:$4 sm:$0xff]  }
 0x7a8   :  { %9978 = vmatpush1.bf16.msra.mxu0 %v16341_v63  ;;  %10031 = vmatpush1.bf16.msra.mxu1 %v16344_v62  ;;  %v16401_v31 = vld [vmem:[#allocation8 + $0x168] ss:$16 sps:$4 sm:$0xff]   ;;  %v16409_v33 = vld [vmem:[#allocation8 + $0x14c] ss:$16 sps:$4 sm:$0xff]   ;;  %v16429_v63 = vld [vmem:[#allocation9 + $0xf0] sm:$0xff]  }
 0x7a9   :  { %9979 = vmatprep.subr.bf16.mxu0 %v16349_v56  ;;  %10032 = vmatprep.subr.bf16.mxu1 %v16352_v32  ;;  %v16404_v42 = vld [vmem:[#allocation8 + $0x368] ss:$16 sps:$4 sm:$0xff]   ;;  %v16412_v30 = vld [vmem:[#allocation8 + $0x34c] ss:$16 sps:$4 sm:$0xff]   ;;  %v16431_v62 = vld [vmem:[#allocation9 + $0x70] sm:$0xff]  }
 0x7aa   :  { %10005 = vmatprep.mubr.bf16.mxu0 %v9092_v9  ;;  %10058 = vmatprep.mubr.bf16.mxu1 %v9094_v49  ;;  %v16397_v9 = vld [vmem:[#allocation8 + $0x18c] ss:$16 sps:$4 sm:$0xff]   ;;  %v16407_v1 = vld [vmem:[#allocation8 + $0x148] ss:$16 sps:$4 sm:$0xff]   ;;  %v16437_v56 = vld [vmem:[#allocation9 + $0xe0] sm:$0xff]  }
 0x7ab   :  { %v16400_v49 = vld [vmem:[#allocation8 + $0x38c] ss:$16 sps:$4 sm:$0xff]   ;;  %v16410_v24 = vld [vmem:[#allocation8 + $0x348] ss:$16 sps:$4 sm:$0xff]   ;;  %v16438_v32 = vld [vmem:[#allocation9 + $0xa0] sm:$0xff]  }
 0x7ac   :  { %9980 = vmatpush1.bf16.msra.mxu0 %v16347_v45  ;;  %10033 = vmatpush1.bf16.msra.mxu1 %v16350_v2  ;;  %v16415_v3 = vld [vmem:[#allocation8 + $0x12c] ss:$16 sps:$4 sm:$0xff]   ;;  %v16413_v22 = vld [vmem:[#allocation8 + $0x128] ss:$16 sps:$4 sm:$0xff]   ;;  %v16439_v45 = vld [vmem:[#allocation9 + $0x60] sm:$0xff]  }
 0x7ad   :  { %9981 = vmatprep.subr.bf16.mxu0 %v16355_v40  ;;  %10034 = vmatprep.subr.bf16.mxu1 %v16358_v28  ;;  %v16418_v17 = vld [vmem:[#allocation8 + $0x32c] ss:$16 sps:$4 sm:$0xff]   ;;  %v16416_v27 = vld [vmem:[#allocation8 + $0x328] ss:$16 sps:$4 sm:$0xff]   ;;  %v16440_v2 = vld [vmem:[#allocation9 + $0x20] sm:$0xff]  }
 0x7ae   :  { %v16421_v14 = vld [vmem:[#allocation8 + $0x10c] ss:$16 sps:$4 sm:$0xff]   ;;  %v16419_v47 = vld [vmem:[#allocation8 + $0x108] ss:$16 sps:$4 sm:$0xff]  }
 0x7af   :  { %v16424_v59 = vld [vmem:[#allocation8 + $0x30c] ss:$16 sps:$4 sm:$0xff]   ;;  %v16422_v6 = vld [vmem:[#allocation8 + $0x308] ss:$16 sps:$4 sm:$0xff]  }
 0x7b0   :  { %9982 = vmatpush1.bf16.msra.mxu0 %v16353_v13  ;;  %10035 = vmatpush1.bf16.msra.mxu1 %v16356_v55  ;;  %v16425_v7 = vld [vmem:[#allocation9 + $0xf8] sm:$0xff]  }
 0x7b1   :  { %9983 = vmatprep.subr.bf16.mxu0 %v16361_v52  ;;  %10036 = vmatprep.subr.bf16.mxu1 %v16364_v51  ;;  %v16426_v54 = vld [vmem:[#allocation9 + $0xb8] sm:$0xff]   ;;  %v16445_v52 = vld [vmem:[#allocation9 + $0xd0] sm:$0xff]  }
 0x7b2   :  { %v16427_v15 = vld [vmem:[#allocation9 + $0x78] sm:$0xff]   ;;  %v16446_v51 = vld [vmem:[#allocation9 + $0x90] sm:$0xff]  }
 0x7b3   :  { %v16428_v16 = vld [vmem:[#allocation9 + $0x38] sm:$0xff]  }
 0x7b4   :  { %9984 = vmatpush1.bf16.msra.mxu0 %v16359_v20  ;;  %10037 = vmatpush1.bf16.msra.mxu1 %v16362_v37  ;;  %v16441_v40 = vld [vmem:[#allocation9 + $0xd8] sm:$0xff]   ;;  %v16447_v20 = vld [vmem:[#allocation9 + $0x50] sm:$0xff]  }
 0x7b5   :  { %9985 = vmatprep.subr.bf16.mxu0 %v16367_v5  ;;  %10038 = vmatprep.subr.bf16.mxu1 %v16370_v43  ;;  %v16442_v28 = vld [vmem:[#allocation9 + $0x98] sm:$0xff]   ;;  %v16448_v37 = vld [vmem:[#allocation9 + $0x10] sm:$0xff]   ;;  %v16449_v5 = vld [vmem:[#allocation9 + $0xc8] sm:$0xff]  }
 0x7b6   :  { %v16443_v13 = vld [vmem:[#allocation9 + $0x58] sm:$0xff]   ;;  %v16450_v43 = vld [vmem:[#allocation9 + $0x88] sm:$0xff]  }
 0x7b7   :  { %v16444_v55 = vld [vmem:[#allocation9 + $0x18] sm:$0xff]  }
 0x7b8   :  { %9986 = vmatpush1.bf16.msra.mxu0 %v16365_v19  ;;  %10039 = vmatpush1.bf16.msra.mxu1 %v16368_v58  ;;  %v16451_v19 = vld [vmem:[#allocation9 + $0x48] sm:$0xff]  }
 0x7b9   :  { %9987 = vmatprep.subr.bf16.mxu0 %v16373_v41  ;;  %10040 = vmatprep.subr.bf16.mxu1 %v16376_v34  ;;  %v16452_v58 = vld [vmem:[#allocation9 + $0x8] sm:$0xff]   ;;  %v16453_v41 = vld [vmem:[#allocation9 + $0xc0] sm:$0xff]  }
 0x7ba   :  { %v16454_v34 = vld [vmem:[#allocation9 + $0x80] sm:$0xff]  }
 0x7bc   :  { %9988 = vmatpush1.bf16.msra.mxu0 %v16371_v38  ;;  %10041 = vmatpush1.bf16.msra.mxu1 %v16374_v21  ;;  %v16455_v38 = vld [vmem:[#allocation9 + $0x40] sm:$0xff]  }
 0x7bd   :  { %9989 = vmatprep.subr.bf16.mxu0 %v16379_v12  ;;  %10042 = vmatprep.subr.bf16.mxu1 %v16382_v48  ;;  %v16456_v21 = vld [vmem:[#allocation9] sm:$0xff]   ;;  %v16457_v12 = vld [vmem:[#allocation9 + $0x178] sm:$0xff]  }
 0x7be   :  { %v16459_v48 = vld [vmem:[#allocation9 + $0x1f8] sm:$0xff]  }
 0x7c0   :  { %9990 = vmatpush2.bf16.msra.mxu0 %v16377_v26  ;;  %10043 = vmatpush2.bf16.msra.mxu1 %v16380_v18 }
 0x7c1   :  { %9991 = vmatprep.subr.bf16.mxu0 %v16385_v50  ;;  %10044 = vmatprep.subr.bf16.mxu1 %v16388_v46 }
 0x7c4   :  { %9992 = vmatpush2.bf16.msra.mxu0 %v16383_v53  ;;  %10045 = vmatpush2.bf16.msra.mxu1 %v16386_v39 }
 0x7c5   :  { %9993 = vmatprep.subr.bf16.mxu0 %v16391_v23  ;;  %10046 = vmatprep.subr.bf16.mxu1 %v16394_v8 }
 0x7c8   :  { %9994 = vmatpush2.bf16.msra.mxu0 %v16389_v11  ;;  %10047 = vmatpush2.bf16.msra.mxu1 %v16392_v44 }
 0x7c9   :  { %9995 = vmatprep.subr.bf16.mxu0 %v16397_v9  ;;  %10048 = vmatprep.subr.bf16.mxu1 %v16400_v49 }
 0x7cc   :  { %9996 = vmatpush2.bf16.msra.mxu0 %v16395_v36  ;;  %10049 = vmatpush2.bf16.msra.mxu1 %v16398_v57 }
 0x7cd   :  { %9997 = vmatprep.subr.bf16.mxu0 %v16403_v61  ;;  %10050 = vmatprep.subr.bf16.mxu1 %v16406_v10 }
 0x7d0   :  { %9998 = vmatpush2.bf16.msra.mxu0 %v16401_v31  ;;  %10051 = vmatpush2.bf16.msra.mxu1 %v16404_v42 }
 0x7d1   :  { %9999 = vmatprep.subr.bf16.mxu0 %v16409_v33  ;;  %10052 = vmatprep.subr.bf16.mxu1 %v16412_v30 }
 0x7d4   :  { %10000 = vmatpush2.bf16.msra.mxu0 %v16407_v1  ;;  %10053 = vmatpush2.bf16.msra.mxu1 %v16410_v24 }
 0x7d5   :  { %10001 = vmatprep.subr.bf16.mxu0 %v16415_v3  ;;  %10054 = vmatprep.subr.bf16.mxu1 %v16418_v17 }
 0x7d8   :  { %10002 = vmatpush2.bf16.msra.mxu0 %v16413_v22  ;;  %10055 = vmatpush2.bf16.msra.mxu1 %v16416_v27 }
 0x7d9   :  { %10003 = vmatprep.subr.bf16.mxu0 %v16421_v14  ;;  %10056 = vmatprep.subr.bf16.mxu1 %v16424_v59 }
 0x7dc   :  { %10004 = vmatpush2.bf16.msra.mxu0 %v16419_v47  ;;  %10057 = vmatpush2.bf16.msra.mxu1 %v16422_v6 }
 0x7dd   :  { %14716 = vmatprep.subr.bf16.mxu0 %v16425_v7  ;;  %14738 = vmatprep.subr.bf16.mxu1 %v16427_v15 }
 0x7df   :  { %10006 = vmatmul.mubr.bf16.vlgmr.msra.gmra.mxu0 %v20428_v4  ;;  %10059 = vmatmul.mubr.bf16.vlgmr.msra.gmra.mxu1 %v20430_v35  ;;  %v16430_v4 = vld [vmem:[#allocation9 + $0xb0] sm:$0xff]  }
 0x7e0   :  { %10015 = vmatprep.mubr.bf16.mxu0 %v20438_v29  ;;  %10068 = vmatprep.mubr.bf16.mxu1 %v20440_v25  ;;  %v16432_v35 = vld [vmem:[#allocation9 + $0x30] sm:$0xff]   ;;  %v16433_v29 = vld [vmem:[#allocation9 + $0xe8] sm:$0xff]  }
 0x7e1   :  { %14717 = vmatpush3.bf16.msra.mxu0 %v16426_v54  ;;  %14739 = vmatpush3.bf16.msra.mxu1 %v16428_v16  ;;  %v16435_v25 = vld [vmem:[#allocation9 + $0x68] sm:$0xff]  }
 0x7e2   :  { %14718 = vmatprep.subr.bf16.mxu0 %v16429_v63  ;;  %14740 = vmatprep.subr.bf16.mxu1 %v16431_v62 }
 0x7e5   :  { %14719 = vmatpush3.bf16.msra.mxu0 %v16430_v4  ;;  %14741 = vmatpush3.bf16.msra.mxu1 %v16432_v35 }
 0x7e6   :  { %14720 = vmatprep.subr.bf16.mxu0 %v16433_v29  ;;  %14742 = vmatprep.subr.bf16.mxu1 %v16435_v25 }
 0x7e7   :  { %10016 = vmatmul.mubr.bf16.gmra.mxu0 %v20442_v60  ;;  %10069 = vmatmul.mubr.bf16.gmra.mxu1 %v20444_v0  ;;  %v16434_v60 = vld [vmem:[#allocation9 + $0xa8] sm:$0xff]  }
 0x7e8   :  { %v16436_v0 = vld [vmem:[#allocation9 + $0x28] sm:$0xff]  }
 0x7e9   :  { %14721 = vmatpush3.bf16.msra.mxu0 %v16434_v60  ;;  %14743 = vmatpush3.bf16.msra.mxu1 %v16436_v0 }
 0x7ea   :  { %14722 = vmatprep.subr.bf16.mxu0 %v16437_v56  ;;  %14744 = vmatprep.subr.bf16.mxu1 %v16439_v45 }
 0x7ed   :  { %14723 = vmatpush3.bf16.msra.mxu0 %v16438_v32  ;;  %14745 = vmatpush3.bf16.msra.mxu1 %v16440_v2 }
 0x7ee   :  { %14724 = vmatprep.subr.bf16.mxu0 %v16441_v40  ;;  %14746 = vmatprep.subr.bf16.mxu1 %v16443_v13 }
 0x7f1   :  { %14725 = vmatpush3.bf16.msra.mxu0 %v16442_v28  ;;  %14747 = vmatpush3.bf16.msra.mxu1 %v16444_v55 }
 0x7f2   :  { %14726 = vmatprep.subr.bf16.mxu0 %v16445_v52  ;;  %14748 = vmatprep.subr.bf16.mxu1 %v16447_v20 }
 0x7f5   :  { %14727 = vmatpush3.bf16.msra.mxu0 %v16446_v51  ;;  %14749 = vmatpush3.bf16.msra.mxu1 %v16448_v37 }
 0x7f6   :  { %14728 = vmatprep.subr.bf16.mxu0 %v16449_v5  ;;  %14750 = vmatprep.subr.bf16.mxu1 %v16451_v19 }
 0x7f9   :  { %14729 = vmatpush3.bf16.msra.mxu0 %v16450_v43  ;;  %14751 = vmatpush3.bf16.msra.mxu1 %v16452_v58 }
 0x7fa   :  { %14730 = vmatprep.subr.bf16.mxu0 %v16453_v41  ;;  %14752 = vmatprep.subr.bf16.mxu1 %v16455_v38 }
 0x7fd   :  { %14731 = vmatpush3.bf16.msra.mxu0 %v16454_v34  ;;  %14753 = vmatpush3.bf16.msra.mxu1 %v16456_v21 }
 0x7fe   :  { %14760 = vmatprep.subr.bf16.mxu0 %v16457_v12  ;;  %14782 = vmatprep.subr.bf16.mxu1 %v16459_v48  ;;  %v16458_v12 = vld [vmem:[#allocation9 + $0x138] sm:$0xff]  }
 0x85f   :  { %v9901_v26 = vpop.f32.mrf.mxu0  ;;  %v9954_v18 = vpop.f32.mrf.mxu1 }
 0x860   :  { %v9955_v6 = vadd.f32 %v9954_v18, %v9901_v26 }
 0x861   :  { %v9903_v50 = vpop.f32.mrf.mxu0  ;;  %v9956_v46 = vpop.f32.mrf.mxu1 }
 0x862   :  { %v9957_v15 = vadd.f32 %v9956_v46, %v9903_v50 }
 0x863   :  { %v9905_v53 = vpop.f32.mrf.mxu0  ;;  %v9958_v39 = vpop.f32.mrf.mxu1 }
 0x864   :  { %v9959_v23 = vadd.f32 %v9958_v39, %v9905_v53 }
 0x865   :  { %v9907_v8 = vpop.f32.mrf.mxu0  ;;  %v9960_v11 = vpop.f32.mrf.mxu1 }
 0x866   :  { %v9961_v44 = vadd.f32 %v9960_v11, %v9907_v8  ;;  %v16460_v8 = vld [vmem:[#allocation9 + $0x1b8] sm:$0xff]   ;;  %v16461_v11 = vld [vmem:[#allocation9 + $0x170] sm:$0xff]  }
 0x867   :  { %v9911_v9 = vpop.f32.mrf.mxu0  ;;  %v9964_v49 = vpop.f32.mrf.mxu1 }
 0x868   :  { %v9965_v29 = vadd.f32 %v9964_v49, %v9911_v9 }
 0x869   :  { %v9913_v36 = vpop.f32.mrf.mxu0  ;;  %v9966_v57 = vpop.f32.mrf.mxu1 }
 0x86a   :  { %v9967_v45 = vadd.f32 %v9966_v57, %v9913_v36  ;;  %v16463_v57 = vld [vmem:[#allocation9 + $0x1f0] sm:$0xff]  }
 0x86b   :  { %v9915_v61 = vpop.f32.mrf.mxu0  ;;  %v9968_v10 = vpop.f32.mrf.mxu1 }
 0x86c   :  { %v20456_v31 = vadd.f32 %v9968_v10, %v9915_v61  ;;  %v16462_v61 = vld [vmem:[#allocation9 + $0x130] sm:$0xff]  }
 0x86d   :  { %v9917_v42 = vpop.f32.mrf.mxu0  ;;  %v9970_v33 = vpop.f32.mrf.mxu1 }
 0x86e   :  { %v9971_v30 = vadd.f32 %v9970_v33, %v9917_v42 }
 0x89f   :  { %v10007_v1 = vpop.f32.mrf.mxu0  ;;  %v10060_v24 = vpop.f32.mrf.mxu1 }
 0x8a0   :  { %v10061_v22 = vadd.f32 %v10060_v24, %v10007_v1  ;;  %v16465_v24 = vld [vmem:[#allocation9 + $0x168] sm:$0xff]  }
 0x8a1   :  { %v10009_v3 = vpop.f32.mrf.mxu0  ;;  %v10062_v17 = vpop.f32.mrf.mxu1 }
 0x8a2   :  { %v10063_v59 = vadd.f32 %v10062_v17, %v10009_v3  ;;  %v20460_v62 = vmax.f32 %v9955_v6, %v10061_v22  ;;  %v16467_v6 = vld [vmem:[#allocation9 + $0x1e8] sm:$0xff]  }
 0x8a3   :  { %v10011_v27 = vpop.f32.mrf.mxu0  ;;  %v10064_v14 = vpop.f32.mrf.mxu1 }
 0x8a4   :  { %v10065_v47 = vadd.f32 %v10064_v14, %v10011_v27  ;;  %v20462_v25 = vmax.f32 %v9957_v15, %v10063_v59  ;;  %v10131_v55 = vrot.slane %v20460_v62, 1  ;;  %v10986_v33 = vrot.slane %v20460_v62, 5  ;;  %v16464_v27 = vld [vmem:[#allocation9 + $0x1b0] sm:$0xff]   ;;  %v16466_v15 = vld [vmem:[#allocation9 + $0x128] sm:$0xff]  }
 0x8a5   :  { %v10013_v7 = vpop.f32.mrf.mxu0  ;;  %v10066_v54 = vpop.f32.mrf.mxu1  ;;  %v11167_v17 = vrot.slane %v20460_v62, 6 }
 0x8a6   :  { %v20458_v16 = vmax.f32 %v9959_v23, %v10065_v47  ;;  %v10067_v63 = vadd.f32 %v10066_v54, %v10013_v7  ;;  %v10132_v51 = vrot.slane %v20462_v25, 1  ;;  %v10444_v19 = vrot.slane %v20462_v25, 2 }
 0x8a7   :  { %v10017_v4 = vpop.f32.mrf.mxu0  ;;  %v10070_v35 = vpop.f32.mrf.mxu1  ;;  %v10625_v38 = vrot.slane %v20462_v25, 3  ;;  %v11168_v10 = vrot.slane %v20462_v25, 6  ;;  %v11349_v59 = vrot.slane %v20462_v25, 7 }
 0x8a8   :  { %v20464_v60 = vmax.f32 %v9961_v44, %v10067_v63  ;;  %v10071_v0 = vadd.f32 %v10070_v35, %v10017_v4  ;;  %v11348_v35 = vrot.slane %v20460_v62, 7 }
 0x8a9   :  { %v10019_v56 = vpop.f32.mrf.mxu0  ;;  %v10072_v32 = vpop.f32.mrf.mxu1 }
 0x8aa   :  { %v20466_v2 = vmax.f32 %v9965_v29, %v10071_v0  ;;  %v10073_v40 = vadd.f32 %v10072_v32, %v10019_v56  ;;  %v16469_v0 = vld [vmem:[#allocation9 + $0x160] sm:$0xff]  }
 0x8ab   :  { %v10021_v28 = vpop.f32.mrf.mxu0  ;;  %v10074_v13 = vpop.f32.mrf.mxu1 }
 0x8ac   :  { %v20469_v52 = vmax.f32 %v9967_v45, %v10073_v40  ;;  %v10089_v20 = vrot.slane %v20466_v2, 7  ;;  %v10135_v43 = vsel %vm21118_vm10, %v10131_v55, %v20466_v2  ;;  %v10075_v53 = vadd.f32 %v10074_v13, %v10021_v28  ;;  %v16468_v40 = vld [vmem:[#allocation9 + $0x1a8] sm:$0xff]   ;;  %vm21133_vm10 = vmmov %vm21116_vm0 }
 0x8ad   :  { %v10023_v37 = vpop.f32.mrf.mxu0  ;;  %v10076_v5 = vpop.f32.mrf.mxu1  ;;  %v10137_v50 = vpack.c.bf16 %v10135_v43, %v10135_v43  ;;  %v11171_v47 = vrot.slane %v20466_v2, 5  ;;  %v11352_v29 = vrot.slane %v20466_v2, 6  ;;  %v11710_v45 = vrot.slane %v20458_v16, 1 }
 0x8ae   :  { %v10077_v58 = vadd.f32 %v10076_v5, %v10023_v37  ;;  %v10136_v41 = vsel %vm21119_vm12, %v10132_v51, %v20469_v52  ;;  %v10090_v34 = vrot.slane %v20469_v52, 7  ;;  %v10448_v48 = vrot.slane %v20469_v52, 1  ;;  %vm21134_vm12 = vmmov %vm21116_vm0 }
 0x8af   :  { %v10138_v21 = vpack.c.bf16 %v10136_v41, %v10136_v41  ;;  %v10093_v26 = vsel %vm21120_vm9, %v20460_v62, %v10089_v20  ;;  %v10629_v18 = vrot.slane %v20469_v52, 2  ;;  %v11172_v42 = vrot.slane %v20469_v52, 5  ;;  %v16471_v20 = vld [vmem:[#allocation9 + $0x1e0] sm:$0xff]   ;;  %vm21135_vm9 = vmmov %vm21116_vm0 }
 0x8b0   :  { %v10094_v46 = vsel %vm21121_vm5, %v20462_v25, %v10090_v34  ;;  %v10452_v23 = vsel %vm21122_vm4, %v10444_v19, %v10448_v48  ;;  %v20488_v9 = vmax.f32 %v9971_v30, %v10077_v58  ;;  %v10095_v36 = vpack.c.bf16 %v10093_v26, %v10093_v26  ;;  %v16470_v58 = vld [vmem:[#allocation9 + $0x120] sm:$0xff]   ;;  %vm21136_vm5 = vmmov %vm21116_vm0 }
 0x8b1   :  { %10299 = vmatprep.mubr.bf16.mxu0 %v10138_v21  ;;  %v10096_v39 = vpack.c.bf16 %v10094_v46, %v10094_v46  ;;  %v10633_v44 = vsel %vm21123_vm1, %v10625_v38, %v10629_v18  ;;  %v10454_v49 = vpack.c.bf16 %v10452_v23, %v10452_v23  ;;  %v10990_v30 = vrot.slane %v20466_v2, 4  ;;  %v16472_v46 = vld [vmem:[#allocation9 + $0x1a0] sm:$0xff]   ;;  %v16475_v23 = vld [vmem:[#allocation9 + $0x1d8] sm:$0xff]   ;;  %vm21137_vm4 = vmmov %vm21116_vm0 }
 0x8b2   :  { %10300 = vmatmul.mubr.bf16.vlgmr.msra.gmra.mxu0 %v10137_v50  ;;  %v10635_v1 = vpack.c.bf16 %v10633_v44, %v10633_v44  ;;  %v11353_v3 = vrot.slane %v20469_v52, 6  ;;  %v20497_v22 = vmax.f32 %v20456_v31, %v10075_v53  ;;  %v20500_v14 = vsel %vm21124_vm11, %v11168_v10, %v11172_v42  ;;  %vm21138_vm1 = vmmov %vm21116_vm0 }
 0x8b3   :  { %14761 = vmatpush3.bf16.msra.mxu0 %v16458_v12  ;;  %10435 = vmatprep.mubr.bf16.mxu1 %v10096_v39  ;;  %v20505_v7 = vsel %vm21125_vm2, %v10986_v33, %v10990_v30  ;;  %v11532_v54 = vrot.slane %v20488_v9, 7  ;;  %v11711_v31 = vrot.slane %v20464_v60, 1  ;;  %v20513_v4 = vsel %vm21127_vm8, %v11167_v17, %v11171_v47  ;;  %v16473_v12 = vld [vmem:[#allocation9 + $0x158] sm:$0xff]   ;;  %v16477_v33 = vld [vmem:[#allocation9 + $0x150] sm:$0xff]   ;;  %vm21139_vm11 = vmmov %vm21116_vm0 }
 0x8b4   :  { %10615 = vmatprep.mubr.bf16.mxu0 %v10454_v49  ;;  %10436 = vmatmul.mubr.bf16.vlgmr.msra.gmra.mxu1 %v10095_v36  ;;  %v20510_v63 = vsel %vm21126_vm6, %v11349_v59, %v11353_v3  ;;  %v20527_v28 = vsel %vm21130_vm14, %v11348_v35, %v11352_v29  ;;  %v11531_v13 = vrot.slane %v20497_v22, 7  ;;  %v11888_v55 = vrot.slane %v20464_v60, 2  ;;  %v16474_v36 = vld [vmem:[#allocation9 + $0x118] sm:$0xff]   ;;  %v16479_v47 = vld [vmem:[#allocation9 + $0x1d0] sm:$0xff]   ;;  %vm21140_vm2 = vmmov %vm21116_vm0 }
 0x8b5   :  { %14783 = vmatpush3.bf16.msra.mxu1 %v16460_v8  ;;  %14762 = vmatprep.subr.bf16.mxu0 %v16461_v11  ;;  %v20519_v56 = vsel %vm21128_vm13, %v20464_v60, %v11532_v54  ;;  %v20523_v32 = vsel %vm21129_vm7, %v11711_v31, %v20488_v9  ;;  %v11887_v51 = vrot.slane %v20458_v16, 2  ;;  %v11892_v37 = vrot.slane %v20488_v9, 1  ;;  %v16476_v17 = vld [vmem:[#allocation9 + $0x198] sm:$0xff]   ;;  %vm21141_vm6 = vmmov %vm21116_vm0 }
 0x8b6   :  { %10796 = vmatprep.mubr.bf16.mxu1 %v10635_v1  ;;  %14784 = vmatprep.subr.bf16.mxu1 %v16463_v57  ;;  %v20535_v5 = vsel %vm21131_vm15, %v11710_v45, %v20497_v22  ;;  %v12069_v43 = vrot.slane %v20464_v60, 3  ;;  %v12073_v19 = vrot.slane %v20488_v9, 2  ;;  %v20541_v41 = vsel %vm21116_vm0, %v20458_v16, %v11531_v13  ;;  %vm21142_vm8 = vmmov %vm21116_vm0 }
 0x8b7   :  { %14763 = vmatpush3.bf16.msra.mxu0 %v16462_v61  ;;  %v11891_v34 = vrot.slane %v20497_v22, 1  ;;  %v12250_v38 = vrot.slane %v20464_v60, 4  ;;  %v12254_v21 = vrot.slane %v20488_v9, 3  ;;  %v20547_v48 = vsel %vm21132_vm3, %v11888_v55, %v11892_v37  ;;  %vm21143_vm13 = vmmov %vm21116_vm0  ;;  %v16482_v55 = vld [vmem:[#allocation9 + $0x108] sm:$0xff]  }
 0x8b8   :  { %14764 = vmatprep.subr.bf16.mxu0 %v16465_v24  ;;  %v20550_v26 = vsel %vm21133_vm10, %v12069_v43, %v12073_v19  ;;  %v12068_v18 = vrot.slane %v20458_v16, 3  ;;  %v12072_v50 = vrot.slane %v20497_v22, 2  ;;  %v12431_v11 = vrot.slane %v20464_v60, 5  ;;  %v16486_v43 = vld [vmem:[#allocation9 + $0x100] sm:$0xff]   ;;  %vm21144_vm7 = vmmov %vm21116_vm0 }
 0x8b9   :  { %14785 = vmatpush3.bf16.msra.mxu1 %v16464_v27  ;;  %v20555_v53 = vsel %vm21134_vm12, %v11887_v51, %v11891_v34  ;;  %v20558_v39 = vsel %vm21135_vm9, %v12250_v38, %v12254_v21  ;;  %v12435_v44 = vrot.slane %v20488_v9, 4  ;;  %v12249_v49 = vrot.slane %v20458_v16, 4  ;;  %v16485_v51 = vld [vmem:[#allocation9 + $0x140] sm:$0xff]   ;;  %v16489_v34 = vld [vmem:[#allocation9 + $0x278] sm:$0xff]   ;;  %vm21145_vm14 = vmmov %vm21116_vm0 }
 0x8ba   :  { %14786 = vmatprep.subr.bf16.mxu1 %v16467_v6  ;;  %v20561_v8 = vsel %vm21136_vm5, %v12068_v18, %v12072_v50  ;;  %v12253_v57 = vrot.slane %v20497_v22, 3  ;;  %v12612_v61 = vrot.slane %v20464_v60, 6  ;;  %v12616_v10 = vrot.slane %v20488_v9, 5  ;;  %vm21146_vm15 = vmmov %vm21116_vm0 }
 0x8bb   :  { %14765 = vmatpush3.bf16.msra.mxu0 %v16466_v15  ;;  %v12430_v42 = vrot.slane %v20458_v16, 5  ;;  %v20571_v1 = vsel %vm21137_vm4, %v12431_v11, %v12435_v44  ;;  %v12434_v24 = vrot.slane %v20497_v22, 4  ;;  %v12793_v30 = vrot.slane %v20464_v60, 7  ;;  %v16478_v60 = vld [vmem:[#allocation9 + $0x110] sm:$0xff]   ;;  %v16481_v15 = vld [vmem:[#allocation9 + $0x148] sm:$0xff]   ;;  %v16490_v44 = vld [vmem:[#allocation9 + $0x238] sm:$0xff]  }
 0x8bc   :  { %14766 = vmatprep.subr.bf16.mxu0 %v16469_v0  ;;  %v12797_v3 = vrot.slane %v20488_v9, 6  ;;  %v20577_v27 = vsel %vm21138_vm1, %v12249_v49, %v12253_v57  ;;  %v20580_v59 = vsel %vm21139_vm11, %v12612_v61, %v12616_v10  ;;  %v12611_v9 = vrot.slane %v20458_v16, 6  ;;  %v16480_v0 = vld [vmem:[#allocation9 + $0x190] sm:$0xff]   ;;  %v16492_v10 = vld [vmem:[#allocation9 + $0x2b8] sm:$0xff]   ;;  %vm21147_vm3 = vmmov %vm21116_vm0 }
 0x8bd   :  { %14787 = vmatpush3.bf16.msra.mxu1 %v16468_v40  ;;  %v20583_v6 = vsel %vm21140_vm2, %v12430_v42, %v12434_v24  ;;  %v12615_v31 = vrot.slane %v20497_v22, 5  ;;  %v12792_v35 = vrot.slane %v20458_v16, 7  ;;  %v12796_v29 = vrot.slane %v20497_v22, 6  ;;  %v16483_v40 = vld [vmem:[#allocation9 + $0x1c8] sm:$0xff]   ;;  %v16487_v22 = vld [vmem:[#allocation9 + $0x1c0] sm:$0xff]   ;;  %v16493_v57 = vld [vmem:[#allocation9 + $0x270] sm:$0xff]  }
 0x8be   :  { %14788 = vmatprep.subr.bf16.mxu1 %v16471_v20  ;;  %v20586_v54 = vsel %vm21141_vm6, %v12793_v30, %v12797_v3  ;;  %v16484_v20 = vld [vmem:[#allocation9 + $0x188] sm:$0xff]   ;;  %v10447_v16 = vrot.slane %v20466_v2, 1  ;;  %v10810_v37 = vrot.slane %v20469_v52, 3  ;;  %v10443_v19 = vrot.slane %v20460_v62, 2  ;;  %v16496_v3 = vld [vmem:[#allocation9 + $0x2b0] sm:$0xff]  }
 0x8bf   :  { %14767 = vmatpush3.bf16.msra.mxu0 %v16470_v58  ;;  %v20593_v45 = vsel %vm21142_vm8, %v12611_v9, %v12615_v31  ;;  %v20596_v13 = vsel %vm21143_vm13, %v12792_v35, %v12796_v29  ;;  %v10628_v58 = vrot.slane %v20466_v2, 2  ;;  %v10806_v38 = vrot.slane %v20462_v25, 4  ;;  %v16497_v30 = vld [vmem:[#allocation9 + $0x268] sm:$0xff]   ;;  %v16503_v31 = vld [vmem:[#allocation9 + $0x2e0] sm:$0xff]   ;;  %v16505_v35 = vld [vmem:[#allocation9 + $0x258] sm:$0xff]  }
 0x8c0   :  { %14768 = vmatprep.subr.bf16.mxu0 %v16473_v12  ;;  %v10991_v21 = vrot.slane %v20469_v52, 4  ;;  %v16488_v12 = vld [vmem:[#allocation9 + $0x180] sm:$0xff]   ;;  %v10451_v18 = vsel %vm21144_vm7, %v10443_v19, %v10447_v16  ;;  %v10624_v50 = vrot.slane %v20460_v62, 3  ;;  %v10987_v11 = vrot.slane %v20462_v25, 5  ;;  %v16494_v25 = vld [vmem:[#allocation9 + $0x230] sm:$0xff]   ;;  %v16500_v9 = vld [vmem:[#allocation9 + $0x2a8] sm:$0xff]  }
 0x8c1   :  { %14789 = vmatpush3.bf16.msra.mxu1 %v16472_v46  ;;  %v10814_v46 = vsel %vm21145_vm14, %v10806_v38, %v10810_v37  ;;  %v16504_v29 = vld [vmem:[#allocation9 + $0x2a0] sm:$0xff]   ;;  %v16510_v16 = vld [vmem:[#allocation9 + $0x210] sm:$0xff]   ;;  %v16514_v19 = vld [vmem:[#allocation9 + $0x208] sm:$0xff]   ;;  %v10809_v38 = vrot.slane %v20466_v2, 3  ;;  %v11178_v2 = vpack.c.bf16 %v20500_v14, %v20500_v14  ;;  %vm16795_vm10 = vmmov 0  }
 0x8c2   :  { %14790 = vmatprep.subr.bf16.mxu1 %v16475_v23  ;;  %v16491_v23 = vld [vmem:[#allocation9 + $0x2f8] sm:$0xff]   ;;  %v10632_v49 = vsel %vm21146_vm15, %v10624_v50, %v10628_v58  ;;  %v10995_v52 = vsel %vm21116_vm0, %v10987_v11, %v10991_v21  ;;  %v10816_v61 = vpack.c.bf16 %v10814_v46, %v10814_v46  ;;  %v16512_v37 = vld [vmem:[#allocation9 + $0x290] sm:$0xff]   ;;  %v16517_v58 = vld [vmem:[#allocation9 + $0x240] sm:$0xff]  }
 0x8c3   :  { %14769 = vmatpush3.bf16.msra.mxu0 %v16474_v36  ;;  %v10453_v36 = vpack.c.bf16 %v10451_v18, %v10451_v18  ;;  %v10634_v42 = vpack.c.bf16 %v10632_v49, %v10632_v49  ;;  %v10997_v24 = vpack.c.bf16 %v10995_v52, %v10995_v52  ;;  %v16519_v21 = vld [vmem:[#allocation9 + $0x2c0] sm:$0xff]   ;;  %v10805_v18 = vrot.slane %v20460_v62, 4  ;;  %v16521_v50 = vld [vmem:[#allocation9 + $0x378] sm:$0xff]   ;;  %v16531_v14 = vld [vmem:[#allocation9 + $0x3e8] sm:$0xff]  }
 0x8c4   :  { %14770 = vmatprep.subr.bf16.mxu0 %v16477_v33  ;;  %v16495_v33 = vld [vmem:[#allocation9 + $0x2f0] sm:$0xff]   ;;  %v16520_v46 = vld [vmem:[#allocation9 + $0x280] sm:$0xff]   ;;  %v16523_v11 = vld [vmem:[#allocation9 + $0x3f8] sm:$0xff]   ;;  %v10996_v62 = vpack.c.bf16 %v20505_v7, %v20505_v7 }
 0x8c5   :  { %14791 = vmatpush3.bf16.msra.mxu1 %v16476_v17  ;;  %v16499_v17 = vld [vmem:[#allocation9 + $0x2e8] sm:$0xff]   ;;  %v16524_v52 = vld [vmem:[#allocation9 + $0x3b8] sm:$0xff]   ;;  %v16533_v7 = vld [vmem:[#allocation9 + $0x360] sm:$0xff]  }
 0x8c6   :  { %14792 = vmatprep.subr.bf16.mxu1 %v16479_v47  ;;  %v16498_v47 = vld [vmem:[#allocation9 + $0x228] sm:$0xff]  }
 0x8c7   :  { %14771 = vmatpush3.bf16.msra.mxu0 %v16478_v60  ;;  %v16501_v60 = vld [vmem:[#allocation9 + $0x260] sm:$0xff]  }
 0x8c8   :  { %14772 = vmatprep.subr.bf16.mxu0 %v16481_v15  ;;  %v16502_v15 = vld [vmem:[#allocation9 + $0x220] sm:$0xff]  }
 0x8c9   :  { %14793 = vmatpush3.bf16.msra.mxu1 %v16480_v0  ;;  %v16507_v0 = vld [vmem:[#allocation9 + $0x2d8] sm:$0xff]  }
 0x8ca   :  { %14794 = vmatprep.subr.bf16.mxu1 %v16483_v40  ;;  %v16506_v40 = vld [vmem:[#allocation9 + $0x218] sm:$0xff]  }
 0x8cb   :  { %14773 = vmatpush3.bf16.msra.mxu0 %v16482_v55  ;;  %v16509_v55 = vld [vmem:[#allocation9 + $0x250] sm:$0xff]  }
 0x8cc   :  { %14774 = vmatprep.subr.bf16.mxu0 %v16485_v51  ;;  %v16508_v51 = vld [vmem:[#allocation9 + $0x298] sm:$0xff]  }
 0x8cd   :  { %14795 = vmatpush3.bf16.msra.mxu1 %v16484_v20  ;;  %v16511_v20 = vld [vmem:[#allocation9 + $0x2d0] sm:$0xff]  }
 0x8ce   :  { %14796 = vmatprep.subr.bf16.mxu1 %v16487_v22  ;;  %v16513_v22 = vld [vmem:[#allocation9 + $0x248] sm:$0xff]  }
 0x8cf   :  { %14775 = vmatpush3.bf16.msra.mxu0 %v16486_v43  ;;  %v16515_v43 = vld [vmem:[#allocation9 + $0x2c8] sm:$0xff]  }
 0x8d0   :  { %14804 = vmatprep.subr.bf16.mxu0 %v16489_v34  ;;  %v16516_v34 = vld [vmem:[#allocation9 + $0x288] sm:$0xff]  }
 0x8d1   :  { %14797 = vmatpush3.bf16.msra.mxu1 %v16488_v12  ;;  %v16518_v12 = vld [vmem:[#allocation9 + $0x200] sm:$0xff]  }
 0x8d2   :  { %10616 = vmatmul.mubr.bf16.vlgmr.msra.gmra.mxu0 %v10453_v36  ;;  %14826 = vmatprep.subr.bf16.mxu1 %v16491_v23  ;;  %v10813_v23 = vsel %vm21147_vm3, %v10805_v18, %v10809_v38  ;;  %v16525_v36 = vld [vmem:[#allocation9 + $0x370] sm:$0xff]   ;;  %v11358_v18 = vpack.c.bf16 %v20527_v28, %v20527_v28  ;;  %v16565_v28 = vld [vmem:[#allocation9 + $0x460] sm:$0xff]  }
 0x8d3   :  { %14805 = vmatpush3.bf16.msra.mxu0 %v16490_v44  ;;  %10977 = vmatprep.mubr.bf16.mxu0 %v10816_v61  ;;  %v16522_v44 = vld [vmem:[#allocation9 + $0x338] sm:$0xff]   ;;  %v10815_v49 = vpack.c.bf16 %v10813_v23, %v10813_v23  ;;  %v11359_v61 = vpack.c.bf16 %v20510_v63, %v20510_v63  ;;  %v16557_v38 = vld [vmem:[#allocation9 + $0x470] sm:$0xff]  }
 0x8d4   :  { %10797 = vmatmul.mubr.bf16.vlgmr.msra.gmra.mxu1 %v10634_v42  ;;  %14806 = vmatprep.subr.bf16.mxu0 %v16493_v57  ;;  %v16527_v57 = vld [vmem:[#allocation9 + $0x3f0] sm:$0xff]   ;;  %v16529_v42 = vld [vmem:[#allocation9 + $0x368] sm:$0xff]   ;;  %v16537_v63 = vld [vmem:[#allocation9 + $0x358] sm:$0xff]  }
 0x8d5   :  { %14827 = vmatpush3.bf16.msra.mxu1 %v16492_v10  ;;  %11158 = vmatprep.mubr.bf16.mxu1 %v10997_v24  ;;  %v16526_v10 = vld [vmem:[#allocation9 + $0x330] sm:$0xff]   ;;  %v16530_v24 = vld [vmem:[#allocation9 + $0x328] sm:$0xff]  }
 0x8d6   :  { %14828 = vmatprep.subr.bf16.mxu1 %v16495_v33  ;;  %v16528_v33 = vld [vmem:[#allocation9 + $0x3b0] sm:$0xff]  }
 0x8d7   :  { %14807 = vmatpush3.bf16.msra.mxu0 %v16494_v25  ;;  %v16532_v25 = vld [vmem:[#allocation9 + $0x3a8] sm:$0xff]   ;;  %v16558_v23 = vld [vmem:[#allocation9 + $0x430] sm:$0xff]  }
 0x8d8   :  { %14808 = vmatprep.subr.bf16.mxu0 %v16497_v30  ;;  %v16535_v30 = vld [vmem:[#allocation9 + $0x3e0] sm:$0xff]  }
 0x8d9   :  { %14829 = vmatpush3.bf16.msra.mxu1 %v16496_v3  ;;  %v16534_v3 = vld [vmem:[#allocation9 + $0x320] sm:$0xff]  }
 0x8da   :  { %14830 = vmatprep.subr.bf16.mxu1 %v16499_v17  ;;  %v16536_v17 = vld [vmem:[#allocation9 + $0x3a0] sm:$0xff]  }
 0x8db   :  { %14809 = vmatpush3.bf16.msra.mxu0 %v16498_v47  ;;  %v16539_v47 = vld [vmem:[#allocation9 + $0x3d8] sm:$0xff]  }
 0x8dc   :  { %14810 = vmatprep.subr.bf16.mxu0 %v16501_v60  ;;  %v16538_v60 = vld [vmem:[#allocation9 + $0x318] sm:$0xff]  }
 0x8dd   :  { %14831 = vmatpush3.bf16.msra.mxu1 %v16500_v9  ;;  %v16541_v9 = vld [vmem:[#allocation9 + $0x350] sm:$0xff]  }
 0x8de   :  { %14832 = vmatprep.subr.bf16.mxu1 %v16503_v31  ;;  %v16540_v31 = vld [vmem:[#allocation9 + $0x398] sm:$0xff]  }
 0x8df   :  { %14811 = vmatpush3.bf16.msra.mxu0 %v16502_v15  ;;  %v16543_v15 = vld [vmem:[#allocation9 + $0x3d0] sm:$0xff]  }
 0x8e0   :  { %14812 = vmatprep.subr.bf16.mxu0 %v16505_v35  ;;  %v16542_v35 = vld [vmem:[#allocation9 + $0x310] sm:$0xff]  }
 0x8e1   :  { %14833 = vmatpush3.bf16.msra.mxu1 %v16504_v29  ;;  %v16545_v29 = vld [vmem:[#allocation9 + $0x348] sm:$0xff]  }
 0x8e2   :  { %14834 = vmatprep.subr.bf16.mxu1 %v16507_v0  ;;  %v16544_v0 = vld [vmem:[#allocation9 + $0x390] sm:$0xff]  }
 0x8e3   :  { %14813 = vmatpush3.bf16.msra.mxu0 %v16506_v40  ;;  %v16547_v40 = vld [vmem:[#allocation9 + $0x3c8] sm:$0xff]  }
 0x8e4   :  { %14814 = vmatprep.subr.bf16.mxu0 %v16509_v55  ;;  %v16546_v55 = vld [vmem:[#allocation9 + $0x308] sm:$0xff]  }
 0x8e5   :  { %14835 = vmatpush3.bf16.msra.mxu1 %v16508_v51  ;;  %v16549_v51 = vld [vmem:[#allocation9 + $0x340] sm:$0xff]  }
 0x8e6   :  { %14836 = vmatprep.subr.bf16.mxu1 %v16511_v20  ;;  %v16548_v20 = vld [vmem:[#allocation9 + $0x388] sm:$0xff]  }
 0x8e7   :  { %14815 = vmatpush3.bf16.msra.mxu0 %v16510_v16  ;;  %v16551_v16 = vld [vmem:[#allocation9 + $0x3c0] sm:$0xff]  }
 0x8e8   :  { %14816 = vmatprep.subr.bf16.mxu0 %v16513_v22  ;;  %v16550_v22 = vld [vmem:[#allocation9 + $0x300] sm:$0xff]  }
 0x8e9   :  { %14837 = vmatpush3.bf16.msra.mxu1 %v16512_v37  ;;  %v16553_v37 = vld [vmem:[#allocation9 + $0x478] sm:$0xff]  }
 0x8ea   :  { %14838 = vmatprep.subr.bf16.mxu1 %v16515_v43  ;;  %v16552_v43 = vld [vmem:[#allocation9 + $0x380] sm:$0xff]  }
 0x8eb   :  { %14817 = vmatpush3.bf16.msra.mxu0 %v16514_v19  ;;  %v16555_v19 = vld [vmem:[#allocation9 + $0x4f8] sm:$0xff]  }
 0x8ec   :  { %14818 = vmatprep.subr.bf16.mxu0 %v16517_v58  ;;  %v16554_v58 = vld [vmem:[#allocation9 + $0x438] sm:$0xff]  }
 0x8ed   :  { %14839 = vmatpush3.bf16.msra.mxu1 %v16516_v34  ;;  %v11177_v34 = vpack.c.bf16 %v20513_v4, %v20513_v4  ;;  %v16561_v4 = vld [vmem:[#allocation9 + $0x468] sm:$0xff]  }
 0x8ee   :  { %14840 = vmatprep.subr.bf16.mxu1 %v16519_v21  ;;  %v11538_v21 = vpack.c.bf16 %v20519_v56, %v20519_v56  ;;  %v16563_v56 = vld [vmem:[#allocation9 + $0x4e8] sm:$0xff]  }
 0x8ef   :  { %14819 = vmatpush3.bf16.msra.mxu0 %v16518_v12  ;;  %v16556_v12 = vld [vmem:[#allocation9 + $0x4b8] sm:$0xff]  }
 0x8f0   :  { %14848 = vmatprep.subr.bf16.mxu0 %v16521_v50  ;;  %v16559_v50 = vld [vmem:[#allocation9 + $0x4f0] sm:$0xff]  }
 0x8f1   :  { %14841 = vmatpush3.bf16.msra.mxu1 %v16520_v46  ;;  %v11717_v46 = vpack.c.bf16 %v20523_v32, %v20523_v32  ;;  %v16569_v32 = vld [vmem:[#allocation9 + $0x458] sm:$0xff]  }
 0x8f2   :  { %10978 = vmatmul.mubr.bf16.vlgmr.msra.gmra.mxu0 %v10815_v49  ;;  %14870 = vmatprep.subr.bf16.mxu1 %v16523_v11  ;;  %v16560_v11 = vld [vmem:[#allocation9 + $0x4b0] sm:$0xff]   ;;  %v16564_v49 = vld [vmem:[#allocation9 + $0x4a8] sm:$0xff]  }
 0x8f3   :  { %14849 = vmatpush3.bf16.msra.mxu0 %v16522_v44  ;;  %11339 = vmatprep.mubr.bf16.mxu0 %v11178_v2  ;;  %v16562_v44 = vld [vmem:[#allocation9 + $0x428] sm:$0xff]   ;;  %v16566_v2 = vld [vmem:[#allocation9 + $0x420] sm:$0xff]  }
 0x8f4   :  { %11159 = vmatmul.mubr.bf16.vlgmr.msra.gmra.mxu1 %v10996_v62  ;;  %14850 = vmatprep.subr.bf16.mxu0 %v16525_v36  ;;  %v16567_v36 = vld [vmem:[#allocation9 + $0x4e0] sm:$0xff]   ;;  %v16571_v62 = vld [vmem:[#allocation9 + $0x4d8] sm:$0xff]  }
 0x8f5   :  { %14871 = vmatpush3.bf16.msra.mxu1 %v16524_v52  ;;  %11520 = vmatprep.mubr.bf16.mxu1 %v11359_v61  ;;  %v16568_v52 = vld [vmem:[#allocation9 + $0x4a0] sm:$0xff]   ;;  %v16573_v61 = vld [vmem:[#allocation9 + $0x450] sm:$0xff]  }
 0x8f6   :  { %14872 = vmatprep.subr.bf16.mxu1 %v16527_v57  ;;  %v16570_v57 = vld [vmem:[#allocation9 + $0x418] sm:$0xff]  }
 0x8f7   :  { %14851 = vmatpush3.bf16.msra.mxu0 %v16526_v10  ;;  %v16572_v10 = vld [vmem:[#allocation9 + $0x498] sm:$0xff]  }
 0x8f8   :  { %14852 = vmatprep.subr.bf16.mxu0 %v16529_v42  ;;  %v16575_v42 = vld [vmem:[#allocation9 + $0x4d0] sm:$0xff]  }
 0x8f9   :  { %14873 = vmatpush3.bf16.msra.mxu1 %v16528_v33  ;;  %v16574_v33 = vld [vmem:[#allocation9 + $0x410] sm:$0xff]  }
 0x8fa   :  { %14874 = vmatprep.subr.bf16.mxu1 %v16531_v14  ;;  %v16577_v14 = vld [vmem:[#allocation9 + $0x448] sm:$0xff]  }
 0x8fb   :  { %14853 = vmatpush3.bf16.msra.mxu0 %v16530_v24  ;;  %v16576_v24 = vld [vmem:[#allocation9 + $0x490] sm:$0xff]  }
 0x8fc   :  { %14854 = vmatprep.subr.bf16.mxu0 %v16533_v7  ;;  %v16579_v7 = vld [vmem:[#allocation9 + $0x4c8] sm:$0xff]  }
 0x8fd   :  { %14875 = vmatpush3.bf16.msra.mxu1 %v16532_v25  ;;  %v16578_v25 = vld [vmem:[#allocation9 + $0x408] sm:$0xff]  }
 0x8fe   :  { %14876 = vmatprep.subr.bf16.mxu1 %v16535_v30  ;;  %v16581_v30 = vld [vmem:[#allocation9 + $0x440] sm:$0xff]  }
 0x8ff   :  { %14855 = vmatpush3.bf16.msra.mxu0 %v16534_v3  ;;  %v16580_v3 = vld [vmem:[#allocation9 + $0x488] sm:$0xff]  }
 0x900   :  { %14856 = vmatprep.subr.bf16.mxu0 %v16537_v63  ;;  %v16583_v63 = vld [vmem:[#allocation9 + $0x4c0] sm:$0xff]  }
 0x901   :  { %14877 = vmatpush3.bf16.msra.mxu1 %v16536_v17  ;;  %v16582_v17 = vld [vmem:[#allocation9 + $0x400] sm:$0xff]  }
 0x902   :  { %14878 = vmatprep.subr.bf16.mxu1 %v16539_v47  ;;  %v16585_v47 = vld [vmem:[#allocation9 + $0x578] sm:$0xff]  }
 0x903   :  { %14857 = vmatpush3.bf16.msra.mxu0 %v16538_v60  ;;  %v16584_v60 = vld [vmem:[#allocation9 + $0x480] sm:$0xff]  }
 0x904   :  { %14858 = vmatprep.subr.bf16.mxu0 %v16541_v9  ;;  %v16587_v9 = vld [vmem:[#allocation9 + $0x5f8] sm:$0xff]  }
 0x905   :  { %14879 = vmatpush3.bf16.msra.mxu1 %v16540_v31  ;;  %v16586_v31 = vld [vmem:[#allocation9 + $0x538] sm:$0xff]  }
 0x906   :  { %14880 = vmatprep.subr.bf16.mxu1 %v16543_v15  ;;  %v11537_v15 = vpack.c.bf16 %v20541_v41, %v20541_v41  ;;  %v16593_v41 = vld [vmem:[#allocation9 + $0x568] sm:$0xff]  }
 0x907   :  { %14859 = vmatpush3.bf16.msra.mxu0 %v16542_v35  ;;  %v16589_v35 = vld [vmem:[#allocation9 + $0x570] sm:$0xff]  }
 0x908   :  { %14860 = vmatprep.subr.bf16.mxu0 %v16545_v29  ;;  %v11898_v29 = vpack.c.bf16 %v20547_v48, %v20547_v48  ;;  %v16595_v48 = vld [vmem:[#allocation9 + $0x5e8] sm:$0xff]  }
 0x909   :  { %14881 = vmatpush3.bf16.msra.mxu1 %v16544_v0  ;;  %v16588_v0 = vld [vmem:[#allocation9 + $0x5b8] sm:$0xff]  }
 0x90a   :  { %14882 = vmatprep.subr.bf16.mxu1 %v16547_v40  ;;  %v11716_v40 = vpack.c.bf16 %v20535_v5, %v20535_v5  ;;  %v16597_v5 = vld [vmem:[#allocation9 + $0x560] sm:$0xff]  }
 0x90b   :  { %14861 = vmatpush3.bf16.msra.mxu0 %v16546_v55  ;;  %v16591_v55 = vld [vmem:[#allocation9 + $0x5f0] sm:$0xff]  }
 0x90c   :  { %14862 = vmatprep.subr.bf16.mxu0 %v16549_v51  ;;  %v12079_v51 = vpack.c.bf16 %v20550_v26, %v20550_v26  ;;  %v16601_v26 = vld [vmem:[#allocation9 + $0x558] sm:$0xff]  }
 0x90d   :  { %14883 = vmatpush3.bf16.msra.mxu1 %v16548_v20  ;;  %v16590_v20 = vld [vmem:[#allocation9 + $0x530] sm:$0xff]  }
 0x90e   :  { %14884 = vmatprep.subr.bf16.mxu1 %v16551_v16  ;;  %v16592_v16 = vld [vmem:[#allocation9 + $0x5b0] sm:$0xff]  }
 0x90f   :  { %14863 = vmatpush3.bf16.msra.mxu0 %v16550_v22  ;;  %v16594_v22 = vld [vmem:[#allocation9 + $0x528] sm:$0xff]  }
 0x910   :  { %14892 = vmatprep.subr.bf16.mxu0 %v16553_v37  ;;  %v16596_v37 = vld [vmem:[#allocation9 + $0x5a8] sm:$0xff]  }
 0x911   :  { %14885 = vmatpush3.bf16.msra.mxu1 %v16552_v43  ;;  %v16599_v43 = vld [vmem:[#allocation9 + $0x5e0] sm:$0xff]  }
 0x912   :  { %11340 = vmatmul.mubr.bf16.vlgmr.msra.gmra.mxu0 %v11177_v34  ;;  %14914 = vmatprep.subr.bf16.mxu1 %v16555_v19  ;;  %v16598_v19 = vld [vmem:[#allocation9 + $0x520] sm:$0xff]   ;;  %v16603_v34 = vld [vmem:[#allocation9 + $0x5d8] sm:$0xff]  }
 0x913   :  { %14893 = vmatpush3.bf16.msra.mxu0 %v16554_v58  ;;  %11699 = vmatprep.mubr.bf16.mxu0 %v11538_v21  ;;  %v16600_v58 = vld [vmem:[#allocation9 + $0x5a0] sm:$0xff]   ;;  %v16605_v21 = vld [vmem:[#allocation9 + $0x550] sm:$0xff]  }
 0x914   :  { %11521 = vmatmul.mubr.bf16.vlgmr.msra.gmra.mxu1 %v11358_v18  ;;  %14894 = vmatprep.subr.bf16.mxu0 %v16557_v38  ;;  %v16602_v38 = vld [vmem:[#allocation9 + $0x518] sm:$0xff]   ;;  %v16607_v18 = vld [vmem:[#allocation9 + $0x5d0] sm:$0xff]  }
 0x915   :  { %14915 = vmatpush3.bf16.msra.mxu1 %v16556_v12  ;;  %11878 = vmatprep.mubr.bf16.mxu1 %v11717_v46  ;;  %v16604_v12 = vld [vmem:[#allocation9 + $0x598] sm:$0xff]   ;;  %v16609_v46 = vld [vmem:[#allocation9 + $0x548] sm:$0xff]  }
 0x916   :  { %14916 = vmatprep.subr.bf16.mxu1 %v16559_v50  ;;  %v16606_v50 = vld [vmem:[#allocation9 + $0x510] sm:$0xff]  }
 0x917   :  { %14895 = vmatpush3.bf16.msra.mxu0 %v16558_v23  ;;  %v16608_v23 = vld [vmem:[#allocation9 + $0x590] sm:$0xff]  }
 0x918   :  { %14896 = vmatprep.subr.bf16.mxu0 %v16561_v4  ;;  %v16611_v4 = vld [vmem:[#allocation9 + $0x5c8] sm:$0xff]  }
 0x919   :  { %14917 = vmatpush3.bf16.msra.mxu1 %v16560_v11  ;;  %v16610_v11 = vld [vmem:[#allocation9 + $0x508] sm:$0xff]  }
 0x91a   :  { %14918 = vmatprep.subr.bf16.mxu1 %v16563_v56  ;;  %v16613_v56 = vld [vmem:[#allocation9 + $0x540] sm:$0xff]  }
 0x91b   :  { %14897 = vmatpush3.bf16.msra.mxu0 %v16562_v44  ;;  %v16612_v44 = vld [vmem:[#allocation9 + $0x588] sm:$0xff]  }
 0x91c   :  { %14898 = vmatprep.subr.bf16.mxu0 %v16565_v28  ;;  %v16615_v28 = vld [vmem:[#allocation9 + $0x5c0] sm:$0xff]  }
 0x91d   :  { %14919 = vmatpush3.bf16.msra.mxu1 %v16564_v49  ;;  %v16614_v49 = vld [vmem:[#allocation9 + $0x500] sm:$0xff]  }
 0x91e   :  { %14920 = vmatprep.subr.bf16.mxu1 %v16567_v36  ;;  %v16617_v36 = vld [vmem:[#allocation9 + $0x678] sm:$0xff]  }
 0x91f   :  { %14899 = vmatpush3.bf16.msra.mxu0 %v16566_v2  ;;  %v16616_v2 = vld [vmem:[#allocation9 + $0x580] sm:$0xff]  }
 0x920   :  { %14900 = vmatprep.subr.bf16.mxu0 %v16569_v32  ;;  %v16619_v32 = vld [vmem:[#allocation9 + $0x6f8] sm:$0xff]  }
 0x921   :  { %14921 = vmatpush3.bf16.msra.mxu1 %v16568_v52  ;;  %v16618_v52 = vld [vmem:[#allocation9 + $0x638] sm:$0xff]  }
 0x922   :  { %14922 = vmatprep.subr.bf16.mxu1 %v16571_v62  ;;  %v11897_v62 = vpack.c.bf16 %v20555_v53, %v20555_v53  ;;  %v16625_v53 = vld [vmem:[#allocation9 + $0x668] sm:$0xff]  }
 0x923   :  { %14901 = vmatpush3.bf16.msra.mxu0 %v16570_v57  ;;  %v16621_v57 = vld [vmem:[#allocation9 + $0x670] sm:$0xff]  }
 0x924   :  { %14902 = vmatprep.subr.bf16.mxu0 %v16573_v61  ;;  %v12260_v61 = vpack.c.bf16 %v20558_v39, %v20558_v39  ;;  %v16627_v39 = vld [vmem:[#allocation9 + $0x6e8] sm:$0xff]  }
 0x925   :  { %14923 = vmatpush3.bf16.msra.mxu1 %v16572_v10  ;;  %v16620_v10 = vld [vmem:[#allocation9 + $0x6b8] sm:$0xff]  }
 0x926   :  { %14924 = vmatprep.subr.bf16.mxu1 %v16575_v42  ;;  %v12078_v42 = vpack.c.bf16 %v20561_v8, %v20561_v8  ;;  %v16629_v8 = vld [vmem:[#allocation9 + $0x660] sm:$0xff]  }
 0x927   :  { %14903 = vmatpush3.bf16.msra.mxu0 %v16574_v33  ;;  %v16623_v33 = vld [vmem:[#allocation9 + $0x6f0] sm:$0xff]  }
 0x928   :  { %14904 = vmatprep.subr.bf16.mxu0 %v16577_v14  ;;  %v12441_v14 = vpack.c.bf16 %v20571_v1, %v20571_v1  ;;  %v16633_v1 = vld [vmem:[#allocation9 + $0x658] sm:$0xff]  }
 0x929   :  { %14925 = vmatpush3.bf16.msra.mxu1 %v16576_v24  ;;  %v16622_v24 = vld [vmem:[#allocation9 + $0x630] sm:$0xff]  }
 0x92a   :  { %14926 = vmatprep.subr.bf16.mxu1 %v16579_v7  ;;  %v16624_v7 = vld [vmem:[#allocation9 + $0x6b0] sm:$0xff]  }
 0x92b   :  { %14905 = vmatpush3.bf16.msra.mxu0 %v16578_v25  ;;  %v16626_v25 = vld [vmem:[#allocation9 + $0x628] sm:$0xff]  }
 0x92c   :  { %14906 = vmatprep.subr.bf16.mxu0 %v16581_v30  ;;  %v16628_v30 = vld [vmem:[#allocation9 + $0x6a8] sm:$0xff]  }
 0x92d   :  { %14927 = vmatpush3.bf16.msra.mxu1 %v16580_v3  ;;  %v16631_v3 = vld [vmem:[#allocation9 + $0x6e0] sm:$0xff]  }
 0x92e   :  { %14928 = vmatprep.subr.bf16.mxu1 %v16583_v63  ;;  %v16630_v63 = vld [vmem:[#allocation9 + $0x620] sm:$0xff]  }
 0x92f   :  { %14907 = vmatpush3.bf16.msra.mxu0 %v16582_v17  ;;  %v16632_v17 = vld [vmem:[#allocation9 + $0x6a0] sm:$0xff]  }
 0x930   :  { %14936 = vmatprep.subr.bf16.mxu0 %v16585_v47  ;;  %v16635_v47 = vld [vmem:[#allocation9 + $0x6d8] sm:$0xff]  }
 0x931   :  { %14929 = vmatpush3.bf16.msra.mxu1 %v16584_v60  ;;  %v16634_v60 = vld [vmem:[#allocation9 + $0x618] sm:$0xff]  }
 0x932   :  { %11700 = vmatmul.mubr.bf16.vlgmr.msra.gmra.mxu0 %v11537_v15  ;;  %14958 = vmatprep.subr.bf16.mxu1 %v16587_v9  ;;  %v16637_v9 = vld [vmem:[#allocation9 + $0x650] sm:$0xff]  }
 0x933   :  { %14937 = vmatpush3.bf16.msra.mxu0 %v16586_v31  ;;  %12059 = vmatprep.mubr.bf16.mxu0 %v11898_v29  ;;  %v16636_v31 = vld [vmem:[#allocation9 + $0x698] sm:$0xff]   ;;  %v16639_v15 = vld [vmem:[#allocation9 + $0x6d0] sm:$0xff]   ;;  %v16641_v29 = vld [vmem:[#allocation9 + $0x648] sm:$0xff]  }
 0x934   :  { %11879 = vmatmul.mubr.bf16.vlgmr.msra.gmra.mxu1 %v11716_v40  ;;  %14938 = vmatprep.subr.bf16.mxu0 %v16589_v35  ;;  %v16638_v35 = vld [vmem:[#allocation9 + $0x610] sm:$0xff]   ;;  %v16643_v40 = vld [vmem:[#allocation9 + $0x6c8] sm:$0xff]  }
 0x935   :  { %14959 = vmatpush3.bf16.msra.mxu1 %v16588_v0  ;;  %12240 = vmatprep.mubr.bf16.mxu1 %v12079_v51  ;;  %v16640_v0 = vld [vmem:[#allocation9 + $0x690] sm:$0xff]   ;;  %v16645_v51 = vld [vmem:[#allocation9 + $0x640] sm:$0xff]  }
 0x936   :  { %14960 = vmatprep.subr.bf16.mxu1 %v16591_v55  ;;  %v16642_v55 = vld [vmem:[#allocation9 + $0x608] sm:$0xff]  }
 0x937   :  { %14939 = vmatpush3.bf16.msra.mxu0 %v16590_v20  ;;  %v16644_v20 = vld [vmem:[#allocation9 + $0x688] sm:$0xff]  }
 0x938   :  { %14940 = vmatprep.subr.bf16.mxu0 %v16593_v41  ;;  %v16647_v41 = vld [vmem:[#allocation9 + $0x6c0] sm:$0xff]  }
 0x939   :  { %14961 = vmatpush3.bf16.msra.mxu1 %v16592_v16  ;;  %v16646_v16 = vld [vmem:[#allocation9 + $0x600] sm:$0xff]  }
 0x93a   :  { %14962 = vmatprep.subr.bf16.mxu1 %v16595_v48  ;;  %v16649_v48 = vld [vmem:[#allocation9 + $0x778] sm:$0xff]  }
 0x93b   :  { %14941 = vmatpush3.bf16.msra.mxu0 %v16594_v22  ;;  %v16648_v22 = vld [vmem:[#allocation9 + $0x680] sm:$0xff]  }
 0x93c   :  { %14942 = vmatprep.subr.bf16.mxu0 %v16597_v5  ;;  %v16651_v5 = vld [vmem:[#allocation9 + $0x7f8] sm:$0xff]  }
 0x93d   :  { %14963 = vmatpush3.bf16.msra.mxu1 %v16596_v37  ;;  %v16650_v37 = vld [vmem:[#allocation9 + $0x738] sm:$0xff]  }
 0x93e   :  { %14964 = vmatprep.subr.bf16.mxu1 %v16599_v43  ;;  %v12259_v43 = vpack.c.bf16 %v20577_v27, %v20577_v27  ;;  %v16654_v27 = vld [vmem:[#allocation9 + $0x730] sm:$0xff]  }
 0x93f   :  { %14943 = vmatpush3.bf16.msra.mxu0 %v16598_v19  ;;  %v16653_v19 = vld [vmem:[#allocation9 + $0x770] sm:$0xff]  }
 0x940   :  { %14944 = vmatprep.subr.bf16.mxu0 %v16601_v26  ;;  %v12622_v26 = vpack.c.bf16 %v20580_v59, %v20580_v59 }
 0x941   :  { %14965 = vmatpush3.bf16.msra.mxu1 %v16600_v58  ;;  %v16652_v58 = vld [vmem:[#allocation9 + $0x7b8] sm:$0xff]  }
 0x942   :  { %14966 = vmatprep.subr.bf16.mxu1 %v16603_v34 }
 0x943   :  { %14945 = vmatpush3.bf16.msra.mxu0 %v16602_v38  ;;  %v12440_v38 = vpack.c.bf16 %v20583_v6, %v20583_v6  ;;  %v16659_v6 = vld [vmem:[#allocation9 + $0x7e8] sm:$0xff]  }
 0x944   :  { %14946 = vmatprep.subr.bf16.mxu0 %v16605_v21  ;;  %v16655_v21 = vld [vmem:[#allocation9 + $0x7f0] sm:$0xff]  }
 0x945   :  { %14967 = vmatpush3.bf16.msra.mxu1 %v16604_v12  ;;  %v12803_v12 = vpack.c.bf16 %v20586_v54, %v20586_v54  ;;  %v16661_v54 = vld [vmem:[#allocation9 + $0x760] sm:$0xff]  }
 0x946   :  { %14968 = vmatprep.subr.bf16.mxu1 %v16607_v18 }
 0x947   :  { %14947 = vmatpush3.bf16.msra.mxu0 %v16606_v50 }
 0x948   :  { %14948 = vmatprep.subr.bf16.mxu0 %v16609_v46  ;;  %v16657_v46 = vld [vmem:[#allocation9 + $0x768] sm:$0xff]  }
 0x949   :  { %14969 = vmatpush3.bf16.msra.mxu1 %v16608_v23  ;;  %v16656_v23 = vld [vmem:[#allocation9 + $0x7b0] sm:$0xff]  }
 0x94a   :  { %14970 = vmatprep.subr.bf16.mxu1 %v16611_v4 }
 0x94b   :  { %14949 = vmatpush3.bf16.msra.mxu0 %v16610_v11 }
 0x94c   :  { %14950 = vmatprep.subr.bf16.mxu0 %v16613_v56 }
 0x94d   :  { %14971 = vmatpush3.bf16.msra.mxu1 %v16612_v44  ;;  %v16658_v44 = vld [vmem:[#allocation9 + $0x728] sm:$0xff]  }
 0x94e   :  { %14972 = vmatprep.subr.bf16.mxu1 %v16615_v28 }
 0x94f   :  { %14951 = vmatpush3.bf16.msra.mxu0 %v16614_v49 }
 0x950   :  { %14980 = vmatprep.subr.bf16.mxu0 %v16617_v36 }
 0x951   :  { %14973 = vmatpush3.bf16.msra.mxu1 %v16616_v2  ;;  %v16660_v2 = vld [vmem:[#allocation9 + $0x7a8] sm:$0xff]  }
 0x952   :  { %12060 = vmatmul.mubr.bf16.vlgmr.msra.gmra.mxu0 %v11897_v62  ;;  %15002 = vmatprep.subr.bf16.mxu1 %v16619_v32  ;;  %v16662_v62 = vld [vmem:[#allocation9 + $0x720] sm:$0xff]  }
 0x953   :  { %14981 = vmatpush3.bf16.msra.mxu0 %v16618_v52  ;;  %12421 = vmatprep.mubr.bf16.mxu0 %v12260_v61  ;;  %v16663_v52 = vld [vmem:[#allocation9 + $0x7e0] sm:$0xff]  }
 0x954   :  { %12241 = vmatmul.mubr.bf16.vlgmr.msra.gmra.mxu1 %v12078_v42  ;;  %14982 = vmatprep.subr.bf16.mxu0 %v16621_v57  ;;  %v16665_v57 = vld [vmem:[#allocation9 + $0x758] sm:$0xff]   ;;  %v16664_v61 = vld [vmem:[#allocation9 + $0x7a0] sm:$0xff]  }
 0x955   :  { %15003 = vmatpush3.bf16.msra.mxu1 %v16620_v10  ;;  %12602 = vmatprep.mubr.bf16.mxu1 %v12441_v14  ;;  %v16667_v10 = vld [vmem:[#allocation9 + $0x7d8] sm:$0xff]  }
 0x956   :  { %15004 = vmatprep.subr.bf16.mxu1 %v16623_v33  ;;  %v16666_v42 = vld [vmem:[#allocation9 + $0x718] sm:$0xff]   ;;  %v16669_v33 = vld [vmem:[#allocation9 + $0x750] sm:$0xff]  }
 0x957   :  { %14983 = vmatpush3.bf16.msra.mxu0 %v16622_v24  ;;  %v16668_v14 = vld [vmem:[#allocation9 + $0x798] sm:$0xff]   ;;  %v16671_v24 = vld [vmem:[#allocation9 + $0x7d0] sm:$0xff]  }
 0x958   :  { %14984 = vmatprep.subr.bf16.mxu0 %v16625_v53  ;;  %v16670_v53 = vld [vmem:[#allocation9 + $0x710] sm:$0xff]  }
 0x959   :  { %15005 = vmatpush3.bf16.msra.mxu1 %v16624_v7  ;;  %v16673_v7 = vld [vmem:[#allocation9 + $0x748] sm:$0xff]  }
 0x95a   :  { %15006 = vmatprep.subr.bf16.mxu1 %v16627_v39  ;;  %v16672_v39 = vld [vmem:[#allocation9 + $0x790] sm:$0xff]  }
 0x95b   :  { %14985 = vmatpush3.bf16.msra.mxu0 %v16626_v25  ;;  %v16675_v25 = vld [vmem:[#allocation9 + $0x7c8] sm:$0xff]  }
 0x95c   :  { %14986 = vmatprep.subr.bf16.mxu0 %v16629_v8  ;;  %v16674_v8 = vld [vmem:[#allocation9 + $0x708] sm:$0xff]  }
 0x95d   :  { %15007 = vmatpush3.bf16.msra.mxu1 %v16628_v30  ;;  %v16677_v30 = vld [vmem:[#allocation9 + $0x740] sm:$0xff]  }
 0x95e   :  { %15008 = vmatprep.subr.bf16.mxu1 %v16631_v3  ;;  %v16676_v3 = vld [vmem:[#allocation9 + $0x788] sm:$0xff]  }
 0x95f   :  { %14987 = vmatpush3.bf16.msra.mxu0 %v16630_v63  ;;  %v16679_v63 = vld [vmem:[#allocation9 + $0x7c0] sm:$0xff]  }
 0x960   :  { %14988 = vmatprep.subr.bf16.mxu0 %v16633_v1  ;;  %v16678_v1 = vld [vmem:[#allocation9 + $0x700] sm:$0xff]  }
 0x961   :  { %15009 = vmatpush3.bf16.msra.mxu1 %v16632_v17  ;;  %v16680_v17 = vld [vmem:[#allocation9 + $0x780] sm:$0xff]  }
 0x962   :  { %15010 = vmatprep.subr.bf16.mxu1 %v16635_v47  ;;  %v12621_v47 = vpack.c.bf16 %v20593_v45, %v20593_v45 }
 0x963   :  { %14989 = vmatpush3.bf16.msra.mxu0 %v16634_v60 }
 0x964   :  { %14990 = vmatprep.subr.bf16.mxu0 %v16637_v9  ;;  %v12802_v9 = vpack.c.bf16 %v20596_v13, %v20596_v13 }
 0x965   :  { %15011 = vmatpush3.bf16.msra.mxu1 %v16636_v31 }
 0x966   :  { %15012 = vmatprep.subr.bf16.mxu1 %v16639_v15 }
 0x967   :  { %14991 = vmatpush3.bf16.msra.mxu0 %v16638_v35 }
 0x968   :  { %14992 = vmatprep.subr.bf16.mxu0 %v16641_v29 }
 0x969   :  { %15013 = vmatpush3.bf16.msra.mxu1 %v16640_v0 }
 0x96a   :  { %15014 = vmatprep.subr.bf16.mxu1 %v16643_v40 }
 0x96b   :  { %14993 = vmatpush3.bf16.msra.mxu0 %v16642_v55 }
 0x96c   :  { %14994 = vmatprep.subr.bf16.mxu0 %v16645_v51 }
 0x96d   :  { %15015 = vmatpush3.bf16.msra.mxu1 %v16644_v20 }
 0x96e   :  { %15016 = vmatprep.subr.bf16.mxu1 %v16647_v41 }
 0x96f   :  { %14995 = vmatpush3.bf16.msra.mxu0 %v16646_v16 }
 0x970   :  { %15024 = vmatprep.subr.bf16.mxu0 %v16649_v48 }
 0x971   :  { %15017 = vmatpush3.bf16.msra.mxu1 %v16648_v22 }
 0x972   :  { %12422 = vmatmul.mubr.bf16.vlgmr.msra.gmra.mxu0 %v12259_v43  ;;  %v14732_v34 = vpop.f32.mrf.mxu0  ;;  %15046 = vmatprep.subr.bf16.mxu1 %v16651_v5 }
 0x973   :  { %15025 = vmatpush3.bf16.msra.mxu0 %v16650_v37  ;;  %12783 = vmatprep.mubr.bf16.mxu0 %v12622_v26 }
 0x974   :  { %12603 = vmatmul.mubr.bf16.vlgmr.msra.gmra.mxu1 %v12440_v38  ;;  %v14733_v18 = vpop.f32.mrf.mxu0  ;;  %v14754_v50 = vpop.f32.mrf.mxu1  ;;  %15026 = vmatprep.subr.bf16.mxu0 %v16653_v19 }
 0x975   :  { %v14734_v59 = vadd.f32 %v14733_v18, %v14732_v34  ;;  %15047 = vmatpush3.bf16.msra.mxu1 %v16652_v58  ;;  %12964 = vmatprep.mubr.bf16.mxu1 %v12803_v12  ;;  %v16794_v12 = vmov 0.0   ;;  %v16683_v18 = vld [vmem:[%s20744_s11 + $0x28] sm:$0xff]  }
 0x976   :  { %v14735_v4 = vpop.f32.mrf.mxu0  ;;  %v14755_v11 = vpop.f32.mrf.mxu1  ;;  %15048 = vmatprep.subr.bf16.mxu1 %v16655_v21  ;;  %v16681_v21 = vld [vmem:[%s20744_s11 + $0x38] sm:$0xff]  }
 0x977   :  { %v14756_v56 = vadd.f32 %v14755_v11, %v14754_v50  ;;  %15027 = vmatpush3.bf16.msra.mxu0 %v16654_v27  ;;  %v16682_v27 = vld [vmem:[%s20744_s11 + $0x30] sm:$0xff]   ;;  %v16684_v50 = vld [vmem:[%s20744_s11 + $0x20] sm:$0xff]  }
 0x978   :  { %v14736_v28 = vpop.f32.mrf.mxu0  ;;  %v14757_v49 = vpop.f32.mrf.mxu1  ;;  %15028 = vmatprep.subr.bf16.mxu0 %v16657_v46 }
 0x979   :  { %v10438_v36 = vadd.f32 %v14756_v56, %v14734_v59  ;;  %15049 = vmatpush3.bf16.msra.mxu1 %v16656_v23  ;;  %v16685_v59 = vld [vmem:[%s20744_s11 + $0x18] sm:$0xff]  }
 0x97a   :  { %v14758_v32 = vpop.f32.mrf.mxu1  ;;  %15050 = vmatprep.subr.bf16.mxu1 %v16659_v6 }
 0x97b   :  { %15029 = vmatpush3.bf16.msra.mxu0 %v16658_v44  ;;  %v16686_v32 = vld [vmem:[%s20744_s11 + $0x10] sm:$0xff]  }
 0x97c   :  { %15030 = vmatprep.subr.bf16.mxu0 %v16661_v54 }
 0x97d   :  { %15051 = vmatpush3.bf16.msra.mxu1 %v16660_v2 }
 0x97e   :  { %15052 = vmatprep.subr.bf16.mxu1 %v16663_v52  ;;  %v16687_v52 = vld [vmem:[%s20744_s11 + $0x8] sm:$0xff]  }
 0x97f   :  { %15031 = vmatpush3.bf16.msra.mxu0 %v16662_v62  ;;  %v16689_v62 = vld [vmem:[%s20746_s13 + $0x38] sm:$0xff]  }
 0x980   :  { %15032 = vmatprep.subr.bf16.mxu0 %v16665_v57  ;;  %v16690_v57 = vld [vmem:[%s20746_s13 + $0x30] sm:$0xff]  }
 0x981   :  { %15053 = vmatpush3.bf16.msra.mxu1 %v16664_v61  ;;  %v16688_v61 = vld [vmem:[%s20744_s11] sm:$0xff]  }
 0x982   :  { %15054 = vmatprep.subr.bf16.mxu1 %v16667_v10  ;;  %v16691_v10 = vld [vmem:[%s20746_s13 + $0x28] sm:$0xff]  }
 0x983   :  { %15033 = vmatpush3.bf16.msra.mxu0 %v16666_v42  ;;  %v16692_v42 = vld [vmem:[%s20746_s13 + $0x20] sm:$0xff]  }
 0x984   :  { %15034 = vmatprep.subr.bf16.mxu0 %v16669_v33  ;;  %v16693_v33 = vld [vmem:[%s20746_s13 + $0x18] sm:$0xff]  }
 0x985   :  { %15055 = vmatpush3.bf16.msra.mxu1 %v16668_v14 }
 0x986   :  { %15056 = vmatprep.subr.bf16.mxu1 %v16671_v24  ;;  %v16694_v24 = vld [vmem:[%s20746_s13 + $0x10] sm:$0xff]  }
 0x987   :  { %15035 = vmatpush3.bf16.msra.mxu0 %v16670_v53 }
 0x988   :  { %15036 = vmatprep.subr.bf16.mxu0 %v16673_v7 }
 0x989   :  { %15057 = vmatpush3.bf16.msra.mxu1 %v16672_v39 }
 0x98a   :  { %15058 = vmatprep.subr.bf16.mxu1 %v16675_v25 }
 0x98b   :  { %15037 = vmatpush3.bf16.msra.mxu0 %v16674_v8 }
 0x98c   :  { %15038 = vmatprep.subr.bf16.mxu0 %v16677_v30 }
 0x98d   :  { %15059 = vmatpush3.bf16.msra.mxu1 %v16676_v3 }
 0x98e   :  { %15060 = vmatprep.subr.bf16.mxu1 %v16679_v63 }
 0x98f   :  { %15039 = vmatpush3.bf16.msra.mxu0 %v16678_v1 }
 0x990   :  { %15086 = vmatprep.subr.bf16.mxu0 %v16794_v12 }
 0x991   :  { %15061 = vmatpush3.bf16.msra.mxu1 %v16680_v17 }
 0x992   :  { %v14776_v60 = vpop.f32.mrf.mxu0  ;;  %12784 = vmatmul.mubr.bf16.vlgmr.msra.gmra.mxu0 %v12621_v47  ;;  %15106 = vmatprep.subr.bf16.mxu1 %v16794_v12 }
 0x993   :  { %15087 = vmatpush3.bf16.msra.mxu0 %v16681_v21  ;;  %15102 = vmatprep.mubr.msk.bf16.mxu0 %vm16795_vm10, %v16794_v12 }
 0x994   :  { %v14777_v31 = vpop.f32.mrf.mxu0  ;;  %v14798_v15 = vpop.f32.mrf.mxu1  ;;  %12965 = vmatmul.mubr.bf16.vlgmr.msra.gmra.mxu1 %v12802_v9  ;;  %15088 = vmatprep.subr.bf16.mxu0 %v16794_v12 }
 0x995   :  { %v14778_v35 = vadd.f32 %v14777_v31, %v14776_v60  ;;  %15122 = vmatprep.mubr.msk.bf16.mxu1 %vm16795_vm10, %v16794_v12  ;;  %15107 = vmatpush3.bf16.msra.mxu1 %v16689_v62 }
 0x996   :  { %v14779_v29 = vpop.f32.mrf.mxu0  ;;  %v14799_v0 = vpop.f32.mrf.mxu1  ;;  %15108 = vmatprep.subr.bf16.mxu1 %v16794_v12 }
 0x997   :  { %v10623_v40 = vadd.f32 %v14778_v35, %v10438_v36  ;;  %v14800_v55 = vadd.f32 %v14799_v0, %v14798_v15  ;;  %15089 = vmatpush3.bf16.msra.mxu0 %v16682_v27 }
 0x998   :  { %v14780_v51 = vpop.f32.mrf.mxu0  ;;  %v14801_v20 = vpop.f32.mrf.mxu1  ;;  %15090 = vmatprep.subr.bf16.mxu0 %v16794_v12 }
 0x999   :  { %v10804_v41 = vadd.f32 %v14800_v55, %v10623_v40  ;;  %15109 = vmatpush3.bf16.msra.mxu1 %v16690_v57 }
 0x99a   :  { %v14802_v16 = vpop.f32.mrf.mxu1  ;;  %15110 = vmatprep.subr.bf16.mxu1 %v16794_v12 }
 0x99b   :  { %15091 = vmatpush3.bf16.msra.mxu0 %v16683_v18 }
 0x99c   :  { %15092 = vmatprep.subr.bf16.mxu0 %v16794_v12 }
 0x99d   :  { %15111 = vmatpush3.bf16.msra.mxu1 %v16691_v10 }
 0x99e   :  { %15112 = vmatprep.subr.bf16.mxu1 %v16794_v12 }
 0x99f   :  { %15093 = vmatpush3.bf16.msra.mxu0 %v16684_v50 }
 0x9a0   :  { %15094 = vmatprep.subr.bf16.mxu0 %v16794_v12 }
 0x9a1   :  { %15113 = vmatpush3.bf16.msra.mxu1 %v16692_v42 }
 0x9a2   :  { %15114 = vmatprep.subr.bf16.mxu1 %v16794_v12 }
 0x9a3   :  { %15095 = vmatpush3.bf16.msra.mxu0 %v16685_v59 }
 0x9a4   :  { %15096 = vmatprep.subr.bf16.mxu0 %v16794_v12 }
 0x9a5   :  { %15115 = vmatpush3.bf16.msra.mxu1 %v16693_v33 }
 0x9a6   :  { %15116 = vmatprep.subr.bf16.mxu1 %v16794_v12 }
 0x9a7   :  { %15097 = vmatpush3.bf16.msra.mxu0 %v16686_v32  ;;  %v14690_v32 = vld [vmem:[%s20745_s12] ss:$0 sm:$0xff] }
 0x9a8   :  { %15098 = vmatprep.subr.bf16.mxu0 %v16794_v12 }
 0x9a9   :  { %15117 = vmatpush3.bf16.msra.mxu1 %v16694_v24 }
 0x9aa   :  { %15118 = vmatprep.subr.bf16.mxu1 %v16794_v12 }
 0x9ab   :  { %15099 = vmatpush3.bf16.msra.mxu0 %v16687_v52 }
 0x9ac   :  { %15100 = vmatprep.subr.bf16.mxu0 %v16794_v12 }
 0x9af   :  { %15101 = vmatpush3.bf16.msra.mxu0 %v16688_v61 }
 0x9b2   :  { %v14820_v48 = vpop.f32.mrf.mxu0 }
 0x9b4   :  { %v14821_v45 = vpop.f32.mrf.mxu0  ;;  %v14842_v22 = vpop.f32.mrf.mxu1 }
 0x9b5   :  { %v14822_v5 = vadd.f32 %v14821_v45, %v14820_v48 }
 0x9b6   :  { %v14823_v37 = vpop.f32.mrf.mxu0  ;;  %v14843_v43 = vpop.f32.mrf.mxu1 }
 0x9b7   :  { %v10985_v19 = vadd.f32 %v14822_v5, %v10804_v41  ;;  %v14844_v13 = vadd.f32 %v14843_v43, %v14842_v22 }
 0x9b8   :  { %v14824_v26 = vpop.f32.mrf.mxu0  ;;  %v14845_v58 = vpop.f32.mrf.mxu1 }
 0x9b9   :  { %v11166_v34 = vadd.f32 %v14844_v13, %v10985_v19 }
 0x9ba   :  { %v14846_v38 = vpop.f32.mrf.mxu1 }
 0x9d2   :  { %v14864_v46 = vpop.f32.mrf.mxu0 }
 0x9d4   :  { %v14865_v23 = vpop.f32.mrf.mxu0  ;;  %v14886_v4 = vpop.f32.mrf.mxu1 }
 0x9d5   :  { %v14866_v11 = vadd.f32 %v14865_v23, %v14864_v46 }
 0x9d6   :  { %v14867_v6 = vpop.f32.mrf.mxu0  ;;  %v14887_v56 = vpop.f32.mrf.mxu1 }
 0x9d7   :  { %v11347_v44 = vadd.f32 %v14866_v11, %v11166_v34  ;;  %v14888_v28 = vadd.f32 %v14887_v56, %v14886_v4  ;;  %v14689_v4 = vld [vmem:[%s20743_s10] ss:$0 sm:$0xff] }
 0x9d8   :  { %v14868_v49 = vpop.f32.mrf.mxu0  ;;  %v14889_v54 = vpop.f32.mrf.mxu1 }
 0x9d9   :  { %v11528_v36 = vadd.f32 %v14888_v28, %v11347_v44 }
 0x9da   :  { %v14890_v2 = vpop.f32.mrf.mxu1 }
 0x9db   :  { %v16696_v2 = vld [vmem:[%s20746_s13] sm:$0xff]  }
 0x9f2   :  { %v14908_v14 = vpop.f32.mrf.mxu0 }
 0x9f4   :  { %v14909_v53 = vpop.f32.mrf.mxu0  ;;  %v14930_v7 = vpop.f32.mrf.mxu1 }
 0x9f5   :  { %v14910_v39 = vadd.f32 %v14909_v53, %v14908_v14  ;;  %v14699_v14 = vld [vmem:[%s20747_s14] ss:$0 sm:$0xff] }
 0x9f6   :  { %v14911_v25 = vpop.f32.mrf.mxu0  ;;  %v14931_v8 = vpop.f32.mrf.mxu1 }
 0x9f7   :  { %v11707_v30 = vadd.f32 %v14910_v39, %v11528_v36  ;;  %v14932_v3 = vadd.f32 %v14931_v8, %v14930_v7  ;;  %v16695_v36 = vld [vmem:[%s20746_s13 + $0x8] sm:$0xff]  }
 0x9f8   :  { %v14912_v63 = vpop.f32.mrf.mxu0  ;;  %v14933_v1 = vpop.f32.mrf.mxu1  ;;  %15119 = vmatpush3.bf16.msra.mxu1 %v16695_v36 }
 0x9f9   :  { %v11886_v17 = vadd.f32 %v14932_v3, %v11707_v30  ;;  %15120 = vmatprep.subr.bf16.mxu1 %v16794_v12 }
 0x9fa   :  { %v14934_v47 = vpop.f32.mrf.mxu1 }
 0x9fc   :  { %15121 = vmatpush3.bf16.msra.mxu1 %v16696_v2 }
 0xa12   :  { %v14952_v60 = vpop.f32.mrf.mxu0 }
 0xa14   :  { %v14953_v9 = vpop.f32.mrf.mxu0  ;;  %v14974_v31 = vpop.f32.mrf.mxu1 }
 0xa15   :  { %v14954_v5 = vadd.f32 %v14953_v9, %v14952_v60 }
 0xa16   :  { %v14955_v15 = vpop.f32.mrf.mxu0  ;;  %v14975_v35 = vpop.f32.mrf.mxu1 }
 0xa17   :  { %v12067_v37 = vadd.f32 %v14954_v5, %v11886_v17  ;;  %v14976_v43 = vadd.f32 %v14975_v35, %v14974_v31 }
 0xa18   :  { %v14956_v29 = vpop.f32.mrf.mxu0  ;;  %v14977_v0 = vpop.f32.mrf.mxu1 }
 0xa19   :  { %v12248_v13 = vadd.f32 %v14976_v43, %v12067_v37 }
 0xa1a   :  { %v14978_v40 = vpop.f32.mrf.mxu1 }
 0xa32   :  { %v14996_v55 = vpop.f32.mrf.mxu0 }
 0xa34   :  { %v14997_v51 = vpop.f32.mrf.mxu0  ;;  %v15018_v20 = vpop.f32.mrf.mxu1 }
 0xa35   :  { %v14998_v19 = vadd.f32 %v14997_v51, %v14996_v55 }
 0xa36   :  { %v14999_v41 = vpop.f32.mrf.mxu0  ;;  %v15019_v16 = vpop.f32.mrf.mxu1 }
 0xa37   :  { %v12429_v26 = vadd.f32 %v14998_v19, %v12248_v13  ;;  %v15020_v58 = vadd.f32 %v15019_v16, %v15018_v20 }
 0xa38   :  { %v15000_v48 = vpop.f32.mrf.mxu0  ;;  %v15021_v45 = vpop.f32.mrf.mxu1 }
 0xa39   :  { %v12610_v27 = vadd.f32 %v15020_v58, %v12429_v26 }
 0xa3a   :  { %v15022_v22 = vpop.f32.mrf.mxu1 }
 0xa52   :  { %v15040_v34 = vpop.f32.mrf.mxu0 }
 0xa54   :  { %v15041_v38 = vpop.f32.mrf.mxu0  ;;  %v15062_v21 = vpop.f32.mrf.mxu1 }
 0xa55   :  { %v15042_v18 = vadd.f32 %v15041_v38, %v15040_v34 }
 0xa56   :  { %v15043_v50 = vpop.f32.mrf.mxu0  ;;  %v15063_v46 = vpop.f32.mrf.mxu1 }
 0xa57   :  { %v12791_v59 = vadd.f32 %v15042_v18, %v12610_v27  ;;  %v15064_v23 = vadd.f32 %v15063_v46, %v15062_v21 }
 0xa58   :  { %v15044_v11 = vpop.f32.mrf.mxu0  ;;  %v15065_v6 = vpop.f32.mrf.mxu1 }
 0xa59   :  { %v12972_v56 = vadd.f32 %v15064_v23, %v12791_v59 }
 0xa5a   :  { %v15066_v44 = vpop.f32.mrf.mxu1 }
 0xa5b   :  { %v12980_v28 = vadd.f32 %v14689_v4, %v12972_v56 }
 0xa5d   :  { %v12981_v49 = vmax.f32 %v12980_v28, 0.0 }
 0xa5f   :  { %v12982_v54 = vpack.c.bf16 %v12981_v49, %v12981_v49 }
 0xa61   :  { %15103 = vmatmul.mubr.bf16.vlgmr.msra.gmra.mxu0 %v12982_v54 }
 0xb21   :  { %v13088_v52 = vpop.f32.mrf.mxu0 }
 0xb22   :  { %v13089_v62 = vadd.f32 %v14690_v32, %v13088_v52 }
 0xb23   :  { %v15104_v57 = vpop.f32.mrf.mxu0 }
 0xb24   :  { %v13094_v61 = vmax.f32 %v13089_v62, 0.0 }
 0xb25   :  { %v13091_v10 = vpop.f32.mrf.mxu0 }
 0xb26   :  { %v13095_v42 = vpack.c.bf16 %v13094_v61, %v13094_v61 }
 0xb27   :  { %v15105_v33 = vpop.f32.mrf.mxu0 }
 0xb28   :  { %15123 = vmatmul.mubr.bf16.vlgmr.msra.gmra.mxu1 %v13095_v42 }
 0xbe8   :  { %v13201_v24 = vpop.f32.mrf.mxu1 }
 0xbe9   :  { %v13202_v53 = vadd.f32 %v14699_v14, %v13201_v24 }
 0xbea   :  { %v15124_v12 = vpop.f32.mrf.mxu1 }
 0xbeb   :  { %13207 = vst [vmem:[%s20748_s15] sm:$0x3] %v13202_v53 }
 0xbec   :  { %v13204_v7 = vpop.f32.mrf.mxu1 }
 0xbee   :  { %v15125_v39 = vpop.f32.mrf.mxu1 }
 0xbef   :  { %13212 = vsyncpa [#allocation5], 1 }
 0xbf0   :  { %13213 = vsyncpa [#allocation7], 1 }
 0xbf1   :  { %13214 = vsyncpa [#allocation10], 1 }

</bundles_post_ra>
